<compile_context>
chip_gen: v5e
topology: v5e:2x2
jax: 0.10.0
libtpu: 0.0.40
codegen_flags: <defaults>
</compile_context>

<pallas_src>
import jax
import jax.numpy as jnp
from jax.experimental import pallas as pl
from jax.experimental.pallas import tpu as pltpu


# ----------------------------------------------------------------------------
# Fused dense-block kernel (one grid step == one image)
# ----------------------------------------------------------------------------
def _make_dense_block_kernel(H, W, CP, C4, num_layers, c1, c2, k):
    HW = H * W
    L = num_layers
    x2_off = c1 + (L - 1) * k          # lane offset of part2 in the slab
    f0_off = x2_off + c2               # lane offset of layer-0 features

    def kernel(xin_ref, w1_ref, b1_ref, w3_ref, b3_ref, out_ref, hseg_ref, xbf_ref):
        # bf16 working copy of the lane-padded slab: feeds every 1x1 matmul and
        # receives each layer's features ("concat" = add into a still-zero slot).
        xbf_ref[...] = xin_ref[...].astype(jnp.bfloat16)

        # Zero only the top/bottom halo rows of the three dx-shifted segments.
        # The interiors are fully overwritten every layer; the left/right zero
        # borders are baked into the shifted values themselves.
        zrow = jnp.zeros((W, C4), jnp.bfloat16)
        for d in range(3):
            hseg_ref[d, 0:W, :] = zrow
            hseg_ref[d, (H + 1) * W:(H + 2) * W, :] = zrow

        # Column-in-row index of every flattened spatial position, used to zero
        # the elements that wrap across image rows in the dx shifts.
        col = jax.lax.broadcasted_iota(jnp.int32, (HW, 1), 0) % W
        first_col = col == 0
        last_col = col == (W - 1)

        for i in range(L):
            # ---- 1x1 conv + bias + ReLU6 (K = CP slab lanes, N = C4 lanes) ---
            # The zero-padded weight selects exactly this layer's input-channel
            # window out of the slab, so the matmul stays lane-dense.
            h = jnp.dot(xbf_ref[...], w1_ref[i],
                        preferred_element_type=jnp.float32)           # (HW, C4)
            hf = jnp.clip(h + b1_ref[i], 0.0, 6.0)                    # f32

            # ---- three dx-shifted copies (flat-HW shift + border mask) -------
            # hm[p] = hf[y, x-1], hp[p] = hf[y, x+1], zero at the image border.
            # (static jnp.roll == np.roll semantics; lowers to an XLU relayout)
            hm = jnp.where(first_col, 0.0, jnp.roll(hf, 1, axis=0))
            hp = jnp.where(last_col, 0.0, jnp.roll(hf, -1, axis=0))

            # Aligned, full-width bf16 stores into the segment interiors.
            hseg_ref[0, W:W + HW, :] = hm.astype(jnp.bfloat16)
            hseg_ref[1, W:W + HW, :] = hf.astype(jnp.bfloat16)
            hseg_ref[2, W:W + HW, :] = hp.astype(jnp.bfloat16)

            # ---- 3x3 conv (stride 1, pad 1): 9 aligned, value-accumulated ----
            #      matmuls; tap (dy,dx) reads segment dx at row offset dy.
            acc = None
            for t in range(9):
                dy, dx = divmod(t, 3)
                win = hseg_ref[dx, dy * W:dy * W + HW, :]              # (HW, C4) bf16
                part = jnp.dot(win, w3_ref[i * 9 + t],
                               preferred_element_type=jnp.float32)     # (HW, CP)
                acc = part if acc is None else acc + part
            f = jnp.clip(acc + b3_ref[i], 0.0, 6.0)                    # f32

            # f is non-zero only in this layer's k output lanes (its packed
            # weights/bias are zero elsewhere and clip(0)=0), and that slab slot
            # is still zero, so a full-width add realizes the channel concat.
            xbf_ref[...] = xbf_ref[...] + f.astype(jnp.bfloat16)

        # Single lane-dense writeback: part1/part2 (and lane padding) pass
        # through in exact f32 from the input slab; dense features come from
        # the bf16 working slab.
        lane = jax.lax.broadcasted_iota(jnp.int32, (1, CP), 1)
        is_feat = ((lane >= c1) & (lane < x2_off)) | \
                  ((lane >= f0_off) & (lane < f0_off + k))
        out_ref[...] = jnp.where(is_feat, xbf_ref[...].astype(jnp.float32),
                                 xin_ref[...])

    return kernel


# ----------------------------------------------------------------------------
# Wrapper: host-side packing + single pallas_call
# ----------------------------------------------------------------------------
def csp_dense_block_forward(x_nchw, params, part1_chnls, growth_rate):
    """CSP_DenseBlock forward. x_nchw: (N, C, H, W) float32 (PyTorch layout)."""
    N, C, H, W = x_nchw.shape
    L = len(params)
    k = growth_rate
    C1 = part1_chnls
    C2 = C - C1
    Ct = C + L * k                                    # final channel count
    CP = ((Ct + 127) // 128) * 128                    # lane-padded slab width
    C4 = ((4 * k + 127) // 128) * 128                 # lane width of the 3x3 path
    HW = H * W
    assert W % 16 == 0, "W must be a multiple of 16 (bf16 sublane tile)"

    # Final output slab channel layout:
    #   [ part1 | f_{L-1} | ... | f_1 | part2 | f_0 | zero padding ]
    x2_off = C1 + (L - 1) * k

    def feat_off(i):                       # where layer i's k output channels go
        return x2_off + C2 if i == 0 else C1 + (L - 1 - i) * k

    def in_off(i):                         # layer i's input channel window start
        return x2_off if i == 0 else C1 + (L - i) * k

    def in_width(i):                       # layer i's input channel width
        return C2 if i == 0 else C2 + i * k

    # NOTE (concat-via-add invariant): every feature slot [feat_off(i), +k) must
    # be disjoint from part1/part2 and from all other feature slots, and the
    # padded weight/bias lanes outside a layer's slot must be exactly zero --
    # otherwise the full-width accumulate would corrupt other channels.
    slots = sorted([(0, C1), (x2_off, C2)] + [(feat_off(i), k) for i in range(L)])
    for (a0, a1), (b0, _) in zip(slots, slots[1:]):
        assert a0 + a1 <= b0, "overlapping lane slots in the activation slab"

    # -- host-side packing (tiny; in a real network the padded weights would be
    #    pre-packed once and activations kept in this lane-padded NHWC layout). --
    x = jnp.transpose(x_nchw, (0, 2, 3, 1)).astype(jnp.float32)        # NHWC
    xinit = jnp.zeros((N, H, W, CP), jnp.float32)
    xinit = xinit.at[..., :C1].set(x[..., :C1])                        # part1
    xinit = xinit.at[..., x2_off:x2_off + C2].set(x[..., C1:])         # part2
    xinit = xinit.reshape(N, HW, CP)

    w1p, b1p, w3p, b3p = [], [], [], []
    for i, (w1, b1, w2, b2) in enumerate(params):
        s, cw, o = in_off(i), in_width(i), feat_off(i)
        w1p.append(jnp.zeros((CP, C4), jnp.float32).at[s:s + cw, :4 * k].set(w1))
        b1p.append(jnp.zeros((1, C4), jnp.float32).at[0, :4 * k].set(b1))
        w3p.append(jnp.zeros((9, C4, CP), jnp.float32)
                   .at[:, :4 * k, o:o + k].set(w2.reshape(9, 4 * k, k)))
        b3p.append(jnp.zeros((1, CP), jnp.float32).at[0, o:o + k].set(b2))
    w1p = jnp.stack(w1p).astype(jnp.bfloat16)                 # (L, CP, C4)
    b1p = jnp.stack(b1p)                                      # (L, 1, C4) f32
    w3p = jnp.concatenate(w3p, axis=0).astype(jnp.bfloat16)   # (L*9, C4, CP)
    b3p = jnp.stack(b3p)                                      # (L, 1, CP) f32

    kernel = _make_dense_block_kernel(H, W, CP, C4, L, C1, C2, k)
    out = pl.pallas_call(
        kernel,
        out_shape=jax.ShapeDtypeStruct((N, HW, CP), jnp.float32),
        grid=(N,),                                            # one image per step
        in_specs=[
            pl.BlockSpec((None, HW, CP), lambda n: (n, 0, 0)),    # initial slab
            pl.BlockSpec((L, CP, C4), lambda n: (0, 0, 0)),       # packed 1x1 W
            pl.BlockSpec((L, 1, C4), lambda n: (0, 0, 0)),        # packed 1x1 b
            pl.BlockSpec((L * 9, C4, CP), lambda n: (0, 0, 0)),   # packed 3x3 W
            pl.BlockSpec((L, 1, CP), lambda n: (0, 0, 0)),        # packed 3x3 b
        ],
        out_specs=pl.BlockSpec((None, HW, CP), lambda n: (n, 0, 0)),
        scratch_shapes=[
            pltpu.VMEM((3, (H + 2) * W, C4), jnp.bfloat16),   # 3 dx-shifted halos
            pltpu.VMEM((HW, CP), jnp.bfloat16),               # bf16 working slab
        ],
        compiler_params=pltpu.CompilerParams(
            dimension_semantics=("parallel",),                # 2 steps -> 2 TCs on v7x
        ),
    )(xinit, w1p, b1p, w3p, b3p)

    out = out.reshape(N, H, W, CP)[..., :Ct]
    # NHWC -> NCHW to match the PyTorch module interface.
    return jnp.transpose(out, (0, 3, 1, 2))


# ----------------------------------------------------------------------------
# Pure-JAX reference (same bf16-in / f32-accumulate convention as the kernel)
# ----------------------------------------------------------------------------
def reference_forward(x_nchw, params, part1_chnls):
    x = jnp.transpose(x_nchw, (0, 2, 3, 1)).astype(jnp.float32)
    part1, part2 = x[..., :part1_chnls], x[..., part1_chnls:]

    def conv1x1(z, w, b):
        y = jnp.einsum("nhwc,cd->nhwd", z.astype(jnp.bfloat16),
                       w.astype(jnp.bfloat16),
                       preferred_element_type=jnp.float32)
        return jnp.clip(y + b, 0.0, 6.0)

    def conv3x3(z, w, b):  # w: (3, 3, Cin, Cout)
        y = jax.lax.conv_general_dilated(
            z.astype(jnp.bfloat16), w.astype(jnp.bfloat16),
            window_strides=(1, 1), padding="SAME",
            dimension_numbers=("NHWC", "HWIO", "NHWC"),
            preferred_element_type=jnp.float32)
        return jnp.clip(y + b, 0.0, 6.0)

    out = part2
    for i, (w1, b1, w2, b2) in enumerate(params):
        h = conv1x1(out, w1, b1)
        f = conv3x3(h, w2, b2)
        out = jnp.concatenate([out, f], -1) if i == 0 else jnp.concatenate([f, out], -1)
    out = jnp.concatenate([part1, out], -1)
    return jnp.transpose(out, (0, 3, 1, 2))


# ----------------------------------------------------------------------------
# Deterministic parameter init (shapes from CSP_DenseBlock.__init__)
# ----------------------------------------------------------------------------
def init_params(key, part2_chnls, num_layers, k):
    params = []
    for i in range(num_layers):
        cin = part2_chnls + i * k
        key, k1, k2, k3, k4 = jax.random.split(key, 5)
        w1 = jax.random.normal(k1, (cin, 4 * k), jnp.float32) * 0.1
        b1 = jax.random.normal(k2, (4 * k,), jnp.float32) * 0.01
        w2 = jax.random.normal(k3, (3, 3, 4 * k, k), jnp.float32) * 0.05
        b2 = jax.random.normal(k4, (k,), jnp.float32) * 0.01
        params.append((w1, b1, w2, b2))
    return params


if __name__ == "__main__":
    # Module config: in_channels=4, num_layers=2, k=4, part_ratio=0.5, norm=None
    in_channels, num_layers, k, part_ratio = 4, 2, 4, 0.5
    part1_chnls = int(in_channels * part_ratio)      # 2
    part2_chnls = in_channels - part1_chnls          # 2

    key = jax.random.PRNGKey(0)
    key, xk, pk = jax.random.split(key, 3)
    x = jax.random.normal(xk, (2, in_channels, 16, 16), jnp.float32)   # NCHW
    params = init_params(pk, part2_chnls, num_layers, k)

    fwd = jax.jit(lambda xx, pp: csp_dense_block_forward(xx, pp, part1_chnls, k))
    out = jax.block_until_ready(fwd(x, params))

    expected_c = in_channels + num_layers * k        # 12
    assert out.shape == (2, expected_c, 16, 16), out.shape
    assert bool(jnp.all(jnp.isfinite(out)))

    ref = reference_forward(x, params, part1_chnls)
    err = float(jnp.max(jnp.abs(out - ref)))
    # Dense features are bf16-rounded on the single writeback (every conv input
    # is bf16 in both kernel and reference); allow for that final rounding.
    assert err < 5e-2, f"max abs error vs reference: {err}"
    # part1 and part2 are pure f32 passthroughs and must match exactly.
    assert bool(jnp.allclose(out[:, :part1_chnls], x[:, :part1_chnls], atol=1e-6))
    p2_off = part1_chnls + (num_layers - 1) * k
    assert bool(jnp.allclose(out[:, p2_off:p2_off + part2_chnls],
                             x[:, part1_chnls:], atol=1e-6))

    print("KERNEL_OK")
</pallas_src>

<mosaic_0001>
module attributes {stable_mosaic.version = 11 : i64} {
  func.func @kernel(%arg0: i32, %arg1: memref<1x256x128xf32, #tpu.memory_space<vmem>>, %arg2: memref<2x128x128xbf16, #tpu.memory_space<vmem>>, %arg3: memref<2x1x128xf32, #tpu.memory_space<vmem>>, %arg4: memref<18x128x128xbf16, #tpu.memory_space<vmem>>, %arg5: memref<2x1x128xf32, #tpu.memory_space<vmem>>, %arg6: memref<1x256x128xf32, #tpu.memory_space<vmem>>, %arg7: memref<3x288x128xbf16, #tpu.memory_space<vmem>>, %arg8: memref<256x128xbf16, #tpu.memory_space<vmem>>) attributes {dimension_semantics = [#tpu.dimension_semantics<parallel>], iteration_bounds = array<i64: 2>, scalar_prefetch = 0 : i64, scratch_operands = 2 : i64, tpu.core_type = #tpu.core_type<tc>, window_params = [{transform_indices = @transform_0, window_bounds = array<i64: 1, 256, 128>}, {pipeline_mode = #tpu.pipeline_mode<synchronous>, transform_indices = @transform_1, window_bounds = array<i64: 2, 128, 128>}, {pipeline_mode = #tpu.pipeline_mode<synchronous>, transform_indices = @transform_2, window_bounds = array<i64: 2, 1, 128>}, {pipeline_mode = #tpu.pipeline_mode<synchronous>, transform_indices = @transform_3, window_bounds = array<i64: 18, 128, 128>}, {pipeline_mode = #tpu.pipeline_mode<synchronous>, transform_indices = @transform_4, window_bounds = array<i64: 2, 1, 128>}, {transform_indices = @transform_5, window_bounds = array<i64: 1, 256, 128>}]} {
    %c0 = arith.constant 0 : index
    %c0_0 = arith.constant 0 : index
    %c0_1 = arith.constant 0 : index
    %0 = vector.load %arg1[%c0, %c0_0, %c0_1] : memref<1x256x128xf32, #tpu.memory_space<vmem>>, vector<1x256x128xf32>
    %1 = vector.shape_cast %0 : vector<1x256x128xf32> to vector<256x128xf32>
    %2 = arith.truncf %1 : vector<256x128xf32> to vector<256x128xbf16>
    %c0_2 = arith.constant 0 : index
    %c0_3 = arith.constant 0 : index
    %3 = vector.load %arg8[%c0_2, %c0_3] : memref<256x128xbf16, #tpu.memory_space<vmem>>, vector<256x128xbf16>
    tpu.vector_store %arg8[%c0_2, %c0_3], %2 {strides = array<i32>} : memref<256x128xbf16, #tpu.memory_space<vmem>>, vector<256x128xbf16>,
    %cst = arith.constant 0.000000e+00 : bf16
    %4 = vector.broadcast %cst : bf16 to vector<16x128xbf16>
    %c0_4 = arith.constant 0 : index
    %c0_5 = arith.constant 0 : index
    %c0_6 = arith.constant 0 : index
    %5 = vector.load %arg7[%c0_4, %c0_5, %c0_6] : memref<3x288x128xbf16, #tpu.memory_space<vmem>>, vector<1x16x128xbf16>
    %6 = vector.shape_cast %5 : vector<1x16x128xbf16> to vector<16x128xbf16>
    %7 = vector.shape_cast %4 : vector<16x128xbf16> to vector<1x16x128xbf16>
    tpu.vector_store %arg7[%c0_4, %c0_5, %c0_6], %7 {strides = array<i32>} : memref<3x288x128xbf16, #tpu.memory_space<vmem>>, vector<1x16x128xbf16>,
    %c0_7 = arith.constant 0 : index
    %c272 = arith.constant 272 : index
    %c0_8 = arith.constant 0 : index
    %8 = vector.load %arg7[%c0_7, %c272, %c0_8] : memref<3x288x128xbf16, #tpu.memory_space<vmem>>, vector<1x16x128xbf16>
    %9 = vector.shape_cast %8 : vector<1x16x128xbf16> to vector<16x128xbf16>
    %10 = vector.shape_cast %4 : vector<16x128xbf16> to vector<1x16x128xbf16>
    tpu.vector_store %arg7[%c0_7, %c272, %c0_8], %10 {strides = array<i32>} : memref<3x288x128xbf16, #tpu.memory_space<vmem>>, vector<1x16x128xbf16>,
    %c1 = arith.constant 1 : index
    %c0_9 = arith.constant 0 : index
    %c0_10 = arith.constant 0 : index
    %11 = vector.load %arg7[%c1, %c0_9, %c0_10] : memref<3x288x128xbf16, #tpu.memory_space<vmem>>, vector<1x16x128xbf16>
    %12 = vector.shape_cast %11 : vector<1x16x128xbf16> to vector<16x128xbf16>
    %13 = vector.shape_cast %4 : vector<16x128xbf16> to vector<1x16x128xbf16>
    tpu.vector_store %arg7[%c1, %c0_9, %c0_10], %13 {strides = array<i32>} : memref<3x288x128xbf16, #tpu.memory_space<vmem>>, vector<1x16x128xbf16>,
    %c1_11 = arith.constant 1 : index
    %c272_12 = arith.constant 272 : index
    %c0_13 = arith.constant 0 : index
    %14 = vector.load %arg7[%c1_11, %c272_12, %c0_13] : memref<3x288x128xbf16, #tpu.memory_space<vmem>>, vector<1x16x128xbf16>
    %15 = vector.shape_cast %14 : vector<1x16x128xbf16> to vector<16x128xbf16>
    %16 = vector.shape_cast %4 : vector<16x128xbf16> to vector<1x16x128xbf16>
    tpu.vector_store %arg7[%c1_11, %c272_12, %c0_13], %16 {strides = array<i32>} : memref<3x288x128xbf16, #tpu.memory_space<vmem>>, vector<1x16x128xbf16>,
    %c2 = arith.constant 2 : index
    %c0_14 = arith.constant 0 : index
    %c0_15 = arith.constant 0 : index
    %17 = vector.load %arg7[%c2, %c0_14, %c0_15] : memref<3x288x128xbf16, #tpu.memory_space<vmem>>, vector<1x16x128xbf16>
    %18 = vector.shape_cast %17 : vector<1x16x128xbf16> to vector<16x128xbf16>
    %19 = vector.shape_cast %4 : vector<16x128xbf16> to vector<1x16x128xbf16>
    tpu.vector_store %arg7[%c2, %c0_14, %c0_15], %19 {strides = array<i32>} : memref<3x288x128xbf16, #tpu.memory_space<vmem>>, vector<1x16x128xbf16>,
    %c2_16 = arith.constant 2 : index
    %c272_17 = arith.constant 272 : index
    %c0_18 = arith.constant 0 : index
    %20 = vector.load %arg7[%c2_16, %c272_17, %c0_18] : memref<3x288x128xbf16, #tpu.memory_space<vmem>>, vector<1x16x128xbf16>
    %21 = vector.shape_cast %20 : vector<1x16x128xbf16> to vector<16x128xbf16>
    %22 = vector.shape_cast %4 : vector<16x128xbf16> to vector<1x16x128xbf16>
    tpu.vector_store %arg7[%c2_16, %c272_17, %c0_18], %22 {strides = array<i32>} : memref<3x288x128xbf16, #tpu.memory_space<vmem>>, vector<1x16x128xbf16>,
    %23 = tpu.iota {dimensions = array<i32: 0>} : vector<256x1xi32>
    %c16_i32 = arith.constant 16 : i32
    %c0_i32 = arith.constant 0 : i32
    %24 = arith.cmpi eq, %c16_i32, %c0_i32 : i32
    %c1_i32 = arith.constant 1 : i32
    %25 = arith.select %24, %c1_i32, %c16_i32 : i32
    %26 = vector.broadcast %25 : i32 to vector<256x1xi32>
    %27 = arith.remsi %23, %26 : vector<256x1xi32>
    %c0_i32_19 = arith.constant 0 : i32
    %28 = vector.broadcast %c0_i32_19 : i32 to vector<256x1xi32>
    %29 = arith.cmpi ne, %27, %28 : vector<256x1xi32>
    %c0_i32_20 = arith.constant 0 : i32
    %30 = vector.broadcast %c0_i32_20 : i32 to vector<256x1xi32>
    %31 = arith.cmpi slt, %27, %30 : vector<256x1xi32>
    %c0_i32_21 = arith.constant 0 : i32
    %32 = arith.cmpi slt, %25, %c0_i32_21 : i32
    %33 = vector.broadcast %32 : i1 to vector<256x1xi1>
    %34 = vector.broadcast %33 : vector<256x1xi1> to vector<256x1xi1>
    %35 = arith.xori %31, %34 : vector<256x1xi1>
    %36 = arith.andi %35, %29 : vector<256x1xi1>
    %37 = vector.broadcast %25 : i32 to vector<256x1xi32>
    %38 = arith.addi %27, %37 : vector<256x1xi32>
    %39 = arith.select %36, %38, %27 : vector<256x1xi1>, vector<256x1xi32>
    %c0_i32_22 = arith.constant 0 : i32
    %40 = vector.broadcast %c0_i32_22 : i32 to vector<256x1xi32>
    %41 = arith.cmpi eq, %39, %40 : vector<256x1xi32>
    %c15_i32 = arith.constant 15 : i32
    %42 = vector.broadcast %c15_i32 : i32 to vector<256x1xi32>
    %43 = arith.cmpi eq, %39, %42 : vector<256x1xi32>
    %c0_23 = arith.constant 0 : index
    %c0_24 = arith.constant 0 : index
    %44 = vector.load %arg8[%c0_23, %c0_24] : memref<256x128xbf16, #tpu.memory_space<vmem>>, vector<256x128xbf16>
    %c0_25 = arith.constant 0 : index
    %c0_26 = arith.constant 0 : index
    %c0_27 = arith.constant 0 : index
    %45 = vector.load %arg2[%c0_25, %c0_26, %c0_27] : memref<2x128x128xbf16, #tpu.memory_space<vmem>>, vector<1x128x128xbf16>
    %46 = vector.shape_cast %45 : vector<1x128x128xbf16> to vector<128x128xbf16>
    %cst_28 = arith.constant dense<0.000000e+00> : vector<256x128xf32>
    %47 = tpu.matmul %44, %46, %cst_28 {dimension_numbers = #tpu.dot_dimension_numbers<[1], [0], [0], [1], [0, 0, 1, 1], [], []>} : vector<256x128xbf16>, vector<128x128xbf16>, vector<256x128xf32> -> vector<256x128xf32>
    %c0_29 = arith.constant 0 : index
    %c0_30 = arith.constant 0 : index
    %c0_31 = arith.constant 0 : index
    %48 = vector.load %arg3[%c0_29, %c0_30, %c0_31] : memref<2x1x128xf32, #tpu.memory_space<vmem>>, vector<1x1x128xf32>
    %49 = vector.shape_cast %48 : vector<1x1x128xf32> to vector<1x128xf32>
    %50 = vector.broadcast %49 : vector<1x128xf32> to vector<256x128xf32>
    %51 = arith.addf %47, %50 : vector<256x128xf32>
    %cst_32 = arith.constant 0.000000e+00 : f32
    %cst_33 = arith.constant 6.000000e+00 : f32
    %52 = vector.broadcast %cst_32 : f32 to vector<256x128xf32>
    %53 = arith.maximumf %52, %51 : vector<256x128xf32>
    %54 = vector.broadcast %cst_33 : f32 to vector<256x128xf32>
    %55 = arith.minimumf %54, %53 : vector<256x128xf32>
    %56 = vector.extract_strided_slice %55 {offsets = [255, 0], sizes = [1, 128], strides = [1, 1]} : vector<256x128xf32> to vector<1x128xf32>
    %57 = vector.extract_strided_slice %55 {offsets = [0, 0], sizes = [255, 128], strides = [1, 1]} : vector<256x128xf32> to vector<255x128xf32>
    %58 = tpu.concatenate %56, %57 in 0 : vector<1x128xf32>, vector<255x128xf32> -> vector<256x128xf32>
    %cst_34 = arith.constant 0.000000e+00 : f32
    %59 = vector.shape_cast %41 : vector<256x1xi1> to vector<256x1xi1>
    %60 = vector.broadcast %59 : vector<256x1xi1> to vector<256x128xi1>
    %61 = vector.broadcast %cst_34 : f32 to vector<256x128xf32>
    %62 = arith.select %60, %61, %58 : vector<256x128xi1>, vector<256x128xf32>
    %63 = vector.extract_strided_slice %55 {offsets = [1, 0], sizes = [255, 128], strides = [1, 1]} : vector<256x128xf32> to vector<255x128xf32>
    %64 = vector.extract_strided_slice %55 {offsets = [0, 0], sizes = [1, 128], strides = [1, 1]} : vector<256x128xf32> to vector<1x128xf32>
    %65 = tpu.concatenate %63, %64 in 0 : vector<255x128xf32>, vector<1x128xf32> -> vector<256x128xf32>
    %cst_35 = arith.constant 0.000000e+00 : f32
    %66 = vector.shape_cast %43 : vector<256x1xi1> to vector<256x1xi1>
    %67 = vector.broadcast %66 : vector<256x1xi1> to vector<256x128xi1>
    %68 = vector.broadcast %cst_35 : f32 to vector<256x128xf32>
    %69 = arith.select %67, %68, %65 : vector<256x128xi1>, vector<256x128xf32>
    %70 = arith.truncf %62 : vector<256x128xf32> to vector<256x128xbf16>
    %c0_36 = arith.constant 0 : index
    %c16 = arith.constant 16 : index
    %c0_37 = arith.constant 0 : index
    %71 = vector.load %arg7[%c0_36, %c16, %c0_37] : memref<3x288x128xbf16, #tpu.memory_space<vmem>>, vector<1x256x128xbf16>
    %72 = vector.shape_cast %71 : vector<1x256x128xbf16> to vector<256x128xbf16>
    %73 = vector.shape_cast %70 : vector<256x128xbf16> to vector<1x256x128xbf16>
    tpu.vector_store %arg7[%c0_36, %c16, %c0_37], %73 {strides = array<i32>} : memref<3x288x128xbf16, #tpu.memory_space<vmem>>, vector<1x256x128xbf16>,
    %74 = arith.truncf %55 : vector<256x128xf32> to vector<256x128xbf16>
    %c1_38 = arith.constant 1 : index
    %c16_39 = arith.constant 16 : index
    %c0_40 = arith.constant 0 : index
    %75 = vector.load %arg7[%c1_38, %c16_39, %c0_40] : memref<3x288x128xbf16, #tpu.memory_space<vmem>>, vector<1x256x128xbf16>
    %76 = vector.shape_cast %75 : vector<1x256x128xbf16> to vector<256x128xbf16>
    %77 = vector.shape_cast %74 : vector<256x128xbf16> to vector<1x256x128xbf16>
    tpu.vector_store %arg7[%c1_38, %c16_39, %c0_40], %77 {strides = array<i32>} : memref<3x288x128xbf16, #tpu.memory_space<vmem>>, vector<1x256x128xbf16>,
    %78 = arith.truncf %69 : vector<256x128xf32> to vector<256x128xbf16>
    %c2_41 = arith.constant 2 : index
    %c16_42 = arith.constant 16 : index
    %c0_43 = arith.constant 0 : index
    %79 = vector.load %arg7[%c2_41, %c16_42, %c0_43] : memref<3x288x128xbf16, #tpu.memory_space<vmem>>, vector<1x256x128xbf16>
    %80 = vector.shape_cast %79 : vector<1x256x128xbf16> to vector<256x128xbf16>
    %81 = vector.shape_cast %78 : vector<256x128xbf16> to vector<1x256x128xbf16>
    tpu.vector_store %arg7[%c2_41, %c16_42, %c0_43], %81 {strides = array<i32>} : memref<3x288x128xbf16, #tpu.memory_space<vmem>>, vector<1x256x128xbf16>,
    %c0_44 = arith.constant 0 : index
    %c0_45 = arith.constant 0 : index
    %c0_46 = arith.constant 0 : index
    %82 = vector.load %arg7[%c0_44, %c0_45, %c0_46] : memref<3x288x128xbf16, #tpu.memory_space<vmem>>, vector<1x256x128xbf16>
    %83 = vector.shape_cast %82 : vector<1x256x128xbf16> to vector<256x128xbf16>
    %c0_47 = arith.constant 0 : index
    %c0_48 = arith.constant 0 : index
    %c0_49 = arith.constant 0 : index
    %84 = vector.load %arg4[%c0_47, %c0_48, %c0_49] : memref<18x128x128xbf16, #tpu.memory_space<vmem>>, vector<1x128x128xbf16>
    %85 = vector.shape_cast %84 : vector<1x128x128xbf16> to vector<128x128xbf16>
    %cst_50 = arith.constant dense<0.000000e+00> : vector<256x128xf32>
    %86 = tpu.matmul %83, %85, %cst_50 {dimension_numbers = #tpu.dot_dimension_numbers<[1], [0], [0], [1], [0, 0, 1, 1], [], []>} : vector<256x128xbf16>, vector<128x128xbf16>, vector<256x128xf32> -> vector<256x128xf32>
    %c1_51 = arith.constant 1 : index
    %c0_52 = arith.constant 0 : index
    %c0_53 = arith.constant 0 : index
    %87 = vector.load %arg7[%c1_51, %c0_52, %c0_53] : memref<3x288x128xbf16, #tpu.memory_space<vmem>>, vector<1x256x128xbf16>
    %88 = vector.shape_cast %87 : vector<1x256x128xbf16> to vector<256x128xbf16>
    %c1_54 = arith.constant 1 : index
    %c0_55 = arith.constant 0 : index
    %c0_56 = arith.constant 0 : index
    %89 = vector.load %arg4[%c1_54, %c0_55, %c0_56] : memref<18x128x128xbf16, #tpu.memory_space<vmem>>, vector<1x128x128xbf16>
    %90 = vector.shape_cast %89 : vector<1x128x128xbf16> to vector<128x128xbf16>
    %cst_57 = arith.constant dense<0.000000e+00> : vector<256x128xf32>
    %91 = tpu.matmul %88, %90, %cst_57 {dimension_numbers = #tpu.dot_dimension_numbers<[1], [0], [0], [1], [0, 0, 1, 1], [], []>} : vector<256x128xbf16>, vector<128x128xbf16>, vector<256x128xf32> -> vector<256x128xf32>
    %92 = arith.addf %86, %91 : vector<256x128xf32>
    %c2_58 = arith.constant 2 : index
    %c0_59 = arith.constant 0 : index
    %c0_60 = arith.constant 0 : index
    %93 = vector.load %arg7[%c2_58, %c0_59, %c0_60] : memref<3x288x128xbf16, #tpu.memory_space<vmem>>, vector<1x256x128xbf16>
    %94 = vector.shape_cast %93 : vector<1x256x128xbf16> to vector<256x128xbf16>
    %c2_61 = arith.constant 2 : index
    %c0_62 = arith.constant 0 : index
    %c0_63 = arith.constant 0 : index
    %95 = vector.load %arg4[%c2_61, %c0_62, %c0_63] : memref<18x128x128xbf16, #tpu.memory_space<vmem>>, vector<1x128x128xbf16>
    %96 = vector.shape_cast %95 : vector<1x128x128xbf16> to vector<128x128xbf16>
    %cst_64 = arith.constant dense<0.000000e+00> : vector<256x128xf32>
    %97 = tpu.matmul %94, %96, %cst_64 {dimension_numbers = #tpu.dot_dimension_numbers<[1], [0], [0], [1], [0, 0, 1, 1], [], []>} : vector<256x128xbf16>, vector<128x128xbf16>, vector<256x128xf32> -> vector<256x128xf32>
    %98 = arith.addf %92, %97 : vector<256x128xf32>
    %c0_65 = arith.constant 0 : index
    %c16_66 = arith.constant 16 : index
    %c0_67 = arith.constant 0 : index
    %99 = vector.load %arg7[%c0_65, %c16_66, %c0_67] : memref<3x288x128xbf16, #tpu.memory_space<vmem>>, vector<1x256x128xbf16>
    %100 = vector.shape_cast %99 : vector<1x256x128xbf16> to vector<256x128xbf16>
    %c3 = arith.constant 3 : index
    %c0_68 = arith.constant 0 : index
    %c0_69 = arith.constant 0 : index
    %101 = vector.load %arg4[%c3, %c0_68, %c0_69] : memref<18x128x128xbf16, #tpu.memory_space<vmem>>, vector<1x128x128xbf16>
    %102 = vector.shape_cast %101 : vector<1x128x128xbf16> to vector<128x128xbf16>
    %cst_70 = arith.constant dense<0.000000e+00> : vector<256x128xf32>
    %103 = tpu.matmul %100, %102, %cst_70 {dimension_numbers = #tpu.dot_dimension_numbers<[1], [0], [0], [1], [0, 0, 1, 1], [], []>} : vector<256x128xbf16>, vector<128x128xbf16>, vector<256x128xf32> -> vector<256x128xf32>
    %104 = arith.addf %98, %103 : vector<256x128xf32>
    %c1_71 = arith.constant 1 : index
    %c16_72 = arith.constant 16 : index
    %c0_73 = arith.constant 0 : index
    %105 = vector.load %arg7[%c1_71, %c16_72, %c0_73] : memref<3x288x128xbf16, #tpu.memory_space<vmem>>, vector<1x256x128xbf16>
    %106 = vector.shape_cast %105 : vector<1x256x128xbf16> to vector<256x128xbf16>
    %c4 = arith.constant 4 : index
    %c0_74 = arith.constant 0 : index
    %c0_75 = arith.constant 0 : index
    %107 = vector.load %arg4[%c4, %c0_74, %c0_75] : memref<18x128x128xbf16, #tpu.memory_space<vmem>>, vector<1x128x128xbf16>
    %108 = vector.shape_cast %107 : vector<1x128x128xbf16> to vector<128x128xbf16>
    %cst_76 = arith.constant dense<0.000000e+00> : vector<256x128xf32>
    %109 = tpu.matmul %106, %108, %cst_76 {dimension_numbers = #tpu.dot_dimension_numbers<[1], [0], [0], [1], [0, 0, 1, 1], [], []>} : vector<256x128xbf16>, vector<128x128xbf16>, vector<256x128xf32> -> vector<256x128xf32>
    %110 = arith.addf %104, %109 : vector<256x128xf32>
    %c2_77 = arith.constant 2 : index
    %c16_78 = arith.constant 16 : index
    %c0_79 = arith.constant 0 : index
    %111 = vector.load %arg7[%c2_77, %c16_78, %c0_79] : memref<3x288x128xbf16, #tpu.memory_space<vmem>>, vector<1x256x128xbf16>
    %112 = vector.shape_cast %111 : vector<1x256x128xbf16> to vector<256x128xbf16>
    %c5 = arith.constant 5 : index
    %c0_80 = arith.constant 0 : index
    %c0_81 = arith.constant 0 : index
    %113 = vector.load %arg4[%c5, %c0_80, %c0_81] : memref<18x128x128xbf16, #tpu.memory_space<vmem>>, vector<1x128x128xbf16>
    %114 = vector.shape_cast %113 : vector<1x128x128xbf16> to vector<128x128xbf16>
    %cst_82 = arith.constant dense<0.000000e+00> : vector<256x128xf32>
    %115 = tpu.matmul %112, %114, %cst_82 {dimension_numbers = #tpu.dot_dimension_numbers<[1], [0], [0], [1], [0, 0, 1, 1], [], []>} : vector<256x128xbf16>, vector<128x128xbf16>, vector<256x128xf32> -> vector<256x128xf32>
    %116 = arith.addf %110, %115 : vector<256x128xf32>
    %c0_83 = arith.constant 0 : index
    %c32 = arith.constant 32 : index
    %c0_84 = arith.constant 0 : index
    %117 = vector.load %arg7[%c0_83, %c32, %c0_84] : memref<3x288x128xbf16, #tpu.memory_space<vmem>>, vector<1x256x128xbf16>
    %118 = vector.shape_cast %117 : vector<1x256x128xbf16> to vector<256x128xbf16>
    %c6 = arith.constant 6 : index
    %c0_85 = arith.constant 0 : index
    %c0_86 = arith.constant 0 : index
    %119 = vector.load %arg4[%c6, %c0_85, %c0_86] : memref<18x128x128xbf16, #tpu.memory_space<vmem>>, vector<1x128x128xbf16>
    %120 = vector.shape_cast %119 : vector<1x128x128xbf16> to vector<128x128xbf16>
    %cst_87 = arith.constant dense<0.000000e+00> : vector<256x128xf32>
    %121 = tpu.matmul %118, %120, %cst_87 {dimension_numbers = #tpu.dot_dimension_numbers<[1], [0], [0], [1], [0, 0, 1, 1], [], []>} : vector<256x128xbf16>, vector<128x128xbf16>, vector<256x128xf32> -> vector<256x128xf32>
    %122 = arith.addf %116, %121 : vector<256x128xf32>
    %c1_88 = arith.constant 1 : index
    %c32_89 = arith.constant 32 : index
    %c0_90 = arith.constant 0 : index
    %123 = vector.load %arg7[%c1_88, %c32_89, %c0_90] : memref<3x288x128xbf16, #tpu.memory_space<vmem>>, vector<1x256x128xbf16>
    %124 = vector.shape_cast %123 : vector<1x256x128xbf16> to vector<256x128xbf16>
    %c7 = arith.constant 7 : index
    %c0_91 = arith.constant 0 : index
    %c0_92 = arith.constant 0 : index
    %125 = vector.load %arg4[%c7, %c0_91, %c0_92] : memref<18x128x128xbf16, #tpu.memory_space<vmem>>, vector<1x128x128xbf16>
    %126 = vector.shape_cast %125 : vector<1x128x128xbf16> to vector<128x128xbf16>
    %cst_93 = arith.constant dense<0.000000e+00> : vector<256x128xf32>
    %127 = tpu.matmul %124, %126, %cst_93 {dimension_numbers = #tpu.dot_dimension_numbers<[1], [0], [0], [1], [0, 0, 1, 1], [], []>} : vector<256x128xbf16>, vector<128x128xbf16>, vector<256x128xf32> -> vector<256x128xf32>
    %128 = arith.addf %122, %127 : vector<256x128xf32>
    %c2_94 = arith.constant 2 : index
    %c32_95 = arith.constant 32 : index
    %c0_96 = arith.constant 0 : index
    %129 = vector.load %arg7[%c2_94, %c32_95, %c0_96] : memref<3x288x128xbf16, #tpu.memory_space<vmem>>, vector<1x256x128xbf16>
    %130 = vector.shape_cast %129 : vector<1x256x128xbf16> to vector<256x128xbf16>
    %c8 = arith.constant 8 : index
    %c0_97 = arith.constant 0 : index
    %c0_98 = arith.constant 0 : index
    %131 = vector.load %arg4[%c8, %c0_97, %c0_98] : memref<18x128x128xbf16, #tpu.memory_space<vmem>>, vector<1x128x128xbf16>
    %132 = vector.shape_cast %131 : vector<1x128x128xbf16> to vector<128x128xbf16>
    %cst_99 = arith.constant dense<0.000000e+00> : vector<256x128xf32>
    %133 = tpu.matmul %130, %132, %cst_99 {dimension_numbers = #tpu.dot_dimension_numbers<[1], [0], [0], [1], [0, 0, 1, 1], [], []>} : vector<256x128xbf16>, vector<128x128xbf16>, vector<256x128xf32> -> vector<256x128xf32>
    %134 = arith.addf %128, %133 : vector<256x128xf32>
    %c0_100 = arith.constant 0 : index
    %c0_101 = arith.constant 0 : index
    %c0_102 = arith.constant 0 : index
    %135 = vector.load %arg5[%c0_100, %c0_101, %c0_102] : memref<2x1x128xf32, #tpu.memory_space<vmem>>, vector<1x1x128xf32>
    %136 = vector.shape_cast %135 : vector<1x1x128xf32> to vector<1x128xf32>
    %137 = vector.broadcast %136 : vector<1x128xf32> to vector<256x128xf32>
    %138 = arith.addf %134, %137 : vector<256x128xf32>
    %cst_103 = arith.constant 0.000000e+00 : f32
    %cst_104 = arith.constant 6.000000e+00 : f32
    %139 = vector.broadcast %cst_103 : f32 to vector<256x128xf32>
    %140 = arith.maximumf %139, %138 : vector<256x128xf32>
    %141 = vector.broadcast %cst_104 : f32 to vector<256x128xf32>
    %142 = arith.minimumf %141, %140 : vector<256x128xf32>
    %c0_105 = arith.constant 0 : index
    %c0_106 = arith.constant 0 : index
    %143 = vector.load %arg8[%c0_105, %c0_106] : memref<256x128xbf16, #tpu.memory_space<vmem>>, vector<256x128xbf16>
    %144 = arith.truncf %142 : vector<256x128xf32> to vector<256x128xbf16>
    %145 = arith.addf %143, %144 : vector<256x128xbf16>
    %c0_107 = arith.constant 0 : index
    %c0_108 = arith.constant 0 : index
    %146 = vector.load %arg8[%c0_107, %c0_108] : memref<256x128xbf16, #tpu.memory_space<vmem>>, vector<256x128xbf16>
    tpu.vector_store %arg8[%c0_107, %c0_108], %145 {strides = array<i32>} : memref<256x128xbf16, #tpu.memory_space<vmem>>, vector<256x128xbf16>,
    %c0_109 = arith.constant 0 : index
    %c0_110 = arith.constant 0 : index
    %147 = vector.load %arg8[%c0_109, %c0_110] : memref<256x128xbf16, #tpu.memory_space<vmem>>, vector<256x128xbf16>
    %c1_111 = arith.constant 1 : index
    %c0_112 = arith.constant 0 : index
    %c0_113 = arith.constant 0 : index
    %148 = vector.load %arg2[%c1_111, %c0_112, %c0_113] : memref<2x128x128xbf16, #tpu.memory_space<vmem>>, vector<1x128x128xbf16>
    %149 = vector.shape_cast %148 : vector<1x128x128xbf16> to vector<128x128xbf16>
    %cst_114 = arith.constant dense<0.000000e+00> : vector<256x128xf32>
    %150 = tpu.matmul %147, %149, %cst_114 {dimension_numbers = #tpu.dot_dimension_numbers<[1], [0], [0], [1], [0, 0, 1, 1], [], []>} : vector<256x128xbf16>, vector<128x128xbf16>, vector<256x128xf32> -> vector<256x128xf32>
    %c1_115 = arith.constant 1 : index
    %c0_116 = arith.constant 0 : index
    %c0_117 = arith.constant 0 : index
    %151 = vector.load %arg3[%c1_115, %c0_116, %c0_117] : memref<2x1x128xf32, #tpu.memory_space<vmem>>, vector<1x1x128xf32>
    %152 = vector.shape_cast %151 : vector<1x1x128xf32> to vector<1x128xf32>
    %153 = vector.broadcast %152 : vector<1x128xf32> to vector<256x128xf32>
    %154 = arith.addf %150, %153 : vector<256x128xf32>
    %cst_118 = arith.constant 0.000000e+00 : f32
    %cst_119 = arith.constant 6.000000e+00 : f32
    %155 = vector.broadcast %cst_118 : f32 to vector<256x128xf32>
    %156 = arith.maximumf %155, %154 : vector<256x128xf32>
    %157 = vector.broadcast %cst_119 : f32 to vector<256x128xf32>
    %158 = arith.minimumf %157, %156 : vector<256x128xf32>
    %159 = vector.extract_strided_slice %158 {offsets = [255, 0], sizes = [1, 128], strides = [1, 1]} : vector<256x128xf32> to vector<1x128xf32>
    %160 = vector.extract_strided_slice %158 {offsets = [0, 0], sizes = [255, 128], strides = [1, 1]} : vector<256x128xf32> to vector<255x128xf32>
    %161 = tpu.concatenate %159, %160 in 0 : vector<1x128xf32>, vector<255x128xf32> -> vector<256x128xf32>
    %cst_120 = arith.constant 0.000000e+00 : f32
    %162 = vector.shape_cast %41 : vector<256x1xi1> to vector<256x1xi1>
    %163 = vector.broadcast %162 : vector<256x1xi1> to vector<256x128xi1>
    %164 = vector.broadcast %cst_120 : f32 to vector<256x128xf32>
    %165 = arith.select %163, %164, %161 : vector<256x128xi1>, vector<256x128xf32>
    %166 = vector.extract_strided_slice %158 {offsets = [1, 0], sizes = [255, 128], strides = [1, 1]} : vector<256x128xf32> to vector<255x128xf32>
    %167 = vector.extract_strided_slice %158 {offsets = [0, 0], sizes = [1, 128], strides = [1, 1]} : vector<256x128xf32> to vector<1x128xf32>
    %168 = tpu.concatenate %166, %167 in 0 : vector<255x128xf32>, vector<1x128xf32> -> vector<256x128xf32>
    %cst_121 = arith.constant 0.000000e+00 : f32
    %169 = vector.shape_cast %43 : vector<256x1xi1> to vector<256x1xi1>
    %170 = vector.broadcast %169 : vector<256x1xi1> to vector<256x128xi1>
    %171 = vector.broadcast %cst_121 : f32 to vector<256x128xf32>
    %172 = arith.select %170, %171, %168 : vector<256x128xi1>, vector<256x128xf32>
    %173 = arith.truncf %165 : vector<256x128xf32> to vector<256x128xbf16>
    %c0_122 = arith.constant 0 : index
    %c16_123 = arith.constant 16 : index
    %c0_124 = arith.constant 0 : index
    %174 = vector.load %arg7[%c0_122, %c16_123, %c0_124] : memref<3x288x128xbf16, #tpu.memory_space<vmem>>, vector<1x256x128xbf16>
    %175 = vector.shape_cast %174 : vector<1x256x128xbf16> to vector<256x128xbf16>
    %176 = vector.shape_cast %173 : vector<256x128xbf16> to vector<1x256x128xbf16>
    tpu.vector_store %arg7[%c0_122, %c16_123, %c0_124], %176 {strides = array<i32>} : memref<3x288x128xbf16, #tpu.memory_space<vmem>>, vector<1x256x128xbf16>,
    %177 = arith.truncf %158 : vector<256x128xf32> to vector<256x128xbf16>
    %c1_125 = arith.constant 1 : index
    %c16_126 = arith.constant 16 : index
    %c0_127 = arith.constant 0 : index
    %178 = vector.load %arg7[%c1_125, %c16_126, %c0_127] : memref<3x288x128xbf16, #tpu.memory_space<vmem>>, vector<1x256x128xbf16>
    %179 = vector.shape_cast %178 : vector<1x256x128xbf16> to vector<256x128xbf16>
    %180 = vector.shape_cast %177 : vector<256x128xbf16> to vector<1x256x128xbf16>
    tpu.vector_store %arg7[%c1_125, %c16_126, %c0_127], %180 {strides = array<i32>} : memref<3x288x128xbf16, #tpu.memory_space<vmem>>, vector<1x256x128xbf16>,
    %181 = arith.truncf %172 : vector<256x128xf32> to vector<256x128xbf16>
    %c2_128 = arith.constant 2 : index
    %c16_129 = arith.constant 16 : index
    %c0_130 = arith.constant 0 : index
    %182 = vector.load %arg7[%c2_128, %c16_129, %c0_130] : memref<3x288x128xbf16, #tpu.memory_space<vmem>>, vector<1x256x128xbf16>
    %183 = vector.shape_cast %182 : vector<1x256x128xbf16> to vector<256x128xbf16>
    %184 = vector.shape_cast %181 : vector<256x128xbf16> to vector<1x256x128xbf16>
    tpu.vector_store %arg7[%c2_128, %c16_129, %c0_130], %184 {strides = array<i32>} : memref<3x288x128xbf16, #tpu.memory_space<vmem>>, vector<1x256x128xbf16>,
    %c0_131 = arith.constant 0 : index
    %c0_132 = arith.constant 0 : index
    %c0_133 = arith.constant 0 : index
    %185 = vector.load %arg7[%c0_131, %c0_132, %c0_133] : memref<3x288x128xbf16, #tpu.memory_space<vmem>>, vector<1x256x128xbf16>
    %186 = vector.shape_cast %185 : vector<1x256x128xbf16> to vector<256x128xbf16>
    %c9 = arith.constant 9 : index
    %c0_134 = arith.constant 0 : index
    %c0_135 = arith.constant 0 : index
    %187 = vector.load %arg4[%c9, %c0_134, %c0_135] : memref<18x128x128xbf16, #tpu.memory_space<vmem>>, vector<1x128x128xbf16>
    %188 = vector.shape_cast %187 : vector<1x128x128xbf16> to vector<128x128xbf16>
    %cst_136 = arith.constant dense<0.000000e+00> : vector<256x128xf32>
    %189 = tpu.matmul %186, %188, %cst_136 {dimension_numbers = #tpu.dot_dimension_numbers<[1], [0], [0], [1], [0, 0, 1, 1], [], []>} : vector<256x128xbf16>, vector<128x128xbf16>, vector<256x128xf32> -> vector<256x128xf32>
    %c1_137 = arith.constant 1 : index
    %c0_138 = arith.constant 0 : index
    %c0_139 = arith.constant 0 : index
    %190 = vector.load %arg7[%c1_137, %c0_138, %c0_139] : memref<3x288x128xbf16, #tpu.memory_space<vmem>>, vector<1x256x128xbf16>
    %191 = vector.shape_cast %190 : vector<1x256x128xbf16> to vector<256x128xbf16>
    %c10 = arith.constant 10 : index
    %c0_140 = arith.constant 0 : index
    %c0_141 = arith.constant 0 : index
    %192 = vector.load %arg4[%c10, %c0_140, %c0_141] : memref<18x128x128xbf16, #tpu.memory_space<vmem>>, vector<1x128x128xbf16>
    %193 = vector.shape_cast %192 : vector<1x128x128xbf16> to vector<128x128xbf16>
    %cst_142 = arith.constant dense<0.000000e+00> : vector<256x128xf32>
    %194 = tpu.matmul %191, %193, %cst_142 {dimension_numbers = #tpu.dot_dimension_numbers<[1], [0], [0], [1], [0, 0, 1, 1], [], []>} : vector<256x128xbf16>, vector<128x128xbf16>, vector<256x128xf32> -> vector<256x128xf32>
    %195 = arith.addf %189, %194 : vector<256x128xf32>
    %c2_143 = arith.constant 2 : index
    %c0_144 = arith.constant 0 : index
    %c0_145 = arith.constant 0 : index
    %196 = vector.load %arg7[%c2_143, %c0_144, %c0_145] : memref<3x288x128xbf16, #tpu.memory_space<vmem>>, vector<1x256x128xbf16>
    %197 = vector.shape_cast %196 : vector<1x256x128xbf16> to vector<256x128xbf16>
    %c11 = arith.constant 11 : index
    %c0_146 = arith.constant 0 : index
    %c0_147 = arith.constant 0 : index
    %198 = vector.load %arg4[%c11, %c0_146, %c0_147] : memref<18x128x128xbf16, #tpu.memory_space<vmem>>, vector<1x128x128xbf16>
    %199 = vector.shape_cast %198 : vector<1x128x128xbf16> to vector<128x128xbf16>
    %cst_148 = arith.constant dense<0.000000e+00> : vector<256x128xf32>
    %200 = tpu.matmul %197, %199, %cst_148 {dimension_numbers = #tpu.dot_dimension_numbers<[1], [0], [0], [1], [0, 0, 1, 1], [], []>} : vector<256x128xbf16>, vector<128x128xbf16>, vector<256x128xf32> -> vector<256x128xf32>
    %201 = arith.addf %195, %200 : vector<256x128xf32>
    %c0_149 = arith.constant 0 : index
    %c16_150 = arith.constant 16 : index
    %c0_151 = arith.constant 0 : index
    %202 = vector.load %arg7[%c0_149, %c16_150, %c0_151] : memref<3x288x128xbf16, #tpu.memory_space<vmem>>, vector<1x256x128xbf16>
    %203 = vector.shape_cast %202 : vector<1x256x128xbf16> to vector<256x128xbf16>
    %c12 = arith.constant 12 : index
    %c0_152 = arith.constant 0 : index
    %c0_153 = arith.constant 0 : index
    %204 = vector.load %arg4[%c12, %c0_152, %c0_153] : memref<18x128x128xbf16, #tpu.memory_space<vmem>>, vector<1x128x128xbf16>
    %205 = vector.shape_cast %204 : vector<1x128x128xbf16> to vector<128x128xbf16>
    %cst_154 = arith.constant dense<0.000000e+00> : vector<256x128xf32>
    %206 = tpu.matmul %203, %205, %cst_154 {dimension_numbers = #tpu.dot_dimension_numbers<[1], [0], [0], [1], [0, 0, 1, 1], [], []>} : vector<256x128xbf16>, vector<128x128xbf16>, vector<256x128xf32> -> vector<256x128xf32>
    %207 = arith.addf %201, %206 : vector<256x128xf32>
    %c1_155 = arith.constant 1 : index
    %c16_156 = arith.constant 16 : index
    %c0_157 = arith.constant 0 : index
    %208 = vector.load %arg7[%c1_155, %c16_156, %c0_157] : memref<3x288x128xbf16, #tpu.memory_space<vmem>>, vector<1x256x128xbf16>
    %209 = vector.shape_cast %208 : vector<1x256x128xbf16> to vector<256x128xbf16>
    %c13 = arith.constant 13 : index
    %c0_158 = arith.constant 0 : index
    %c0_159 = arith.constant 0 : index
    %210 = vector.load %arg4[%c13, %c0_158, %c0_159] : memref<18x128x128xbf16, #tpu.memory_space<vmem>>, vector<1x128x128xbf16>
    %211 = vector.shape_cast %210 : vector<1x128x128xbf16> to vector<128x128xbf16>
    %cst_160 = arith.constant dense<0.000000e+00> : vector<256x128xf32>
    %212 = tpu.matmul %209, %211, %cst_160 {dimension_numbers = #tpu.dot_dimension_numbers<[1], [0], [0], [1], [0, 0, 1, 1], [], []>} : vector<256x128xbf16>, vector<128x128xbf16>, vector<256x128xf32> -> vector<256x128xf32>
    %213 = arith.addf %207, %212 : vector<256x128xf32>
    %c2_161 = arith.constant 2 : index
    %c16_162 = arith.constant 16 : index
    %c0_163 = arith.constant 0 : index
    %214 = vector.load %arg7[%c2_161, %c16_162, %c0_163] : memref<3x288x128xbf16, #tpu.memory_space<vmem>>, vector<1x256x128xbf16>
    %215 = vector.shape_cast %214 : vector<1x256x128xbf16> to vector<256x128xbf16>
    %c14 = arith.constant 14 : index
    %c0_164 = arith.constant 0 : index
    %c0_165 = arith.constant 0 : index
    %216 = vector.load %arg4[%c14, %c0_164, %c0_165] : memref<18x128x128xbf16, #tpu.memory_space<vmem>>, vector<1x128x128xbf16>
    %217 = vector.shape_cast %216 : vector<1x128x128xbf16> to vector<128x128xbf16>
    %cst_166 = arith.constant dense<0.000000e+00> : vector<256x128xf32>
    %218 = tpu.matmul %215, %217, %cst_166 {dimension_numbers = #tpu.dot_dimension_numbers<[1], [0], [0], [1], [0, 0, 1, 1], [], []>} : vector<256x128xbf16>, vector<128x128xbf16>, vector<256x128xf32> -> vector<256x128xf32>
    %219 = arith.addf %213, %218 : vector<256x128xf32>
    %c0_167 = arith.constant 0 : index
    %c32_168 = arith.constant 32 : index
    %c0_169 = arith.constant 0 : index
    %220 = vector.load %arg7[%c0_167, %c32_168, %c0_169] : memref<3x288x128xbf16, #tpu.memory_space<vmem>>, vector<1x256x128xbf16>
    %221 = vector.shape_cast %220 : vector<1x256x128xbf16> to vector<256x128xbf16>
    %c15 = arith.constant 15 : index
    %c0_170 = arith.constant 0 : index
    %c0_171 = arith.constant 0 : index
    %222 = vector.load %arg4[%c15, %c0_170, %c0_171] : memref<18x128x128xbf16, #tpu.memory_space<vmem>>, vector<1x128x128xbf16>
    %223 = vector.shape_cast %222 : vector<1x128x128xbf16> to vector<128x128xbf16>
    %cst_172 = arith.constant dense<0.000000e+00> : vector<256x128xf32>
    %224 = tpu.matmul %221, %223, %cst_172 {dimension_numbers = #tpu.dot_dimension_numbers<[1], [0], [0], [1], [0, 0, 1, 1], [], []>} : vector<256x128xbf16>, vector<128x128xbf16>, vector<256x128xf32> -> vector<256x128xf32>
    %225 = arith.addf %219, %224 : vector<256x128xf32>
    %c1_173 = arith.constant 1 : index
    %c32_174 = arith.constant 32 : index
    %c0_175 = arith.constant 0 : index
    %226 = vector.load %arg7[%c1_173, %c32_174, %c0_175] : memref<3x288x128xbf16, #tpu.memory_space<vmem>>, vector<1x256x128xbf16>
    %227 = vector.shape_cast %226 : vector<1x256x128xbf16> to vector<256x128xbf16>
    %c16_176 = arith.constant 16 : index
    %c0_177 = arith.constant 0 : index
    %c0_178 = arith.constant 0 : index
    %228 = vector.load %arg4[%c16_176, %c0_177, %c0_178] : memref<18x128x128xbf16, #tpu.memory_space<vmem>>, vector<1x128x128xbf16>
    %229 = vector.shape_cast %228 : vector<1x128x128xbf16> to vector<128x128xbf16>
    %cst_179 = arith.constant dense<0.000000e+00> : vector<256x128xf32>
    %230 = tpu.matmul %227, %229, %cst_179 {dimension_numbers = #tpu.dot_dimension_numbers<[1], [0], [0], [1], [0, 0, 1, 1], [], []>} : vector<256x128xbf16>, vector<128x128xbf16>, vector<256x128xf32> -> vector<256x128xf32>
    %231 = arith.addf %225, %230 : vector<256x128xf32>
    %c2_180 = arith.constant 2 : index
    %c32_181 = arith.constant 32 : index
    %c0_182 = arith.constant 0 : index
    %232 = vector.load %arg7[%c2_180, %c32_181, %c0_182] : memref<3x288x128xbf16, #tpu.memory_space<vmem>>, vector<1x256x128xbf16>
    %233 = vector.shape_cast %232 : vector<1x256x128xbf16> to vector<256x128xbf16>
    %c17 = arith.constant 17 : index
    %c0_183 = arith.constant 0 : index
    %c0_184 = arith.constant 0 : index
    %234 = vector.load %arg4[%c17, %c0_183, %c0_184] : memref<18x128x128xbf16, #tpu.memory_space<vmem>>, vector<1x128x128xbf16>
    %235 = vector.shape_cast %234 : vector<1x128x128xbf16> to vector<128x128xbf16>
    %cst_185 = arith.constant dense<0.000000e+00> : vector<256x128xf32>
    %236 = tpu.matmul %233, %235, %cst_185 {dimension_numbers = #tpu.dot_dimension_numbers<[1], [0], [0], [1], [0, 0, 1, 1], [], []>} : vector<256x128xbf16>, vector<128x128xbf16>, vector<256x128xf32> -> vector<256x128xf32>
    %237 = arith.addf %231, %236 : vector<256x128xf32>
    %c1_186 = arith.constant 1 : index
    %c0_187 = arith.constant 0 : index
    %c0_188 = arith.constant 0 : index
    %238 = vector.load %arg5[%c1_186, %c0_187, %c0_188] : memref<2x1x128xf32, #tpu.memory_space<vmem>>, vector<1x1x128xf32>
    %239 = vector.shape_cast %238 : vector<1x1x128xf32> to vector<1x128xf32>
    %240 = vector.broadcast %239 : vector<1x128xf32> to vector<256x128xf32>
    %241 = arith.addf %237, %240 : vector<256x128xf32>
    %cst_189 = arith.constant 0.000000e+00 : f32
    %cst_190 = arith.constant 6.000000e+00 : f32
    %242 = vector.broadcast %cst_189 : f32 to vector<256x128xf32>
    %243 = arith.maximumf %242, %241 : vector<256x128xf32>
    %244 = vector.broadcast %cst_190 : f32 to vector<256x128xf32>
    %245 = arith.minimumf %244, %243 : vector<256x128xf32>
    %c0_191 = arith.constant 0 : index
    %c0_192 = arith.constant 0 : index
    %246 = vector.load %arg8[%c0_191, %c0_192] : memref<256x128xbf16, #tpu.memory_space<vmem>>, vector<256x128xbf16>
    %247 = arith.truncf %245 : vector<256x128xf32> to vector<256x128xbf16>
    %248 = arith.addf %246, %247 : vector<256x128xbf16>
    %c0_193 = arith.constant 0 : index
    %c0_194 = arith.constant 0 : index
    %249 = vector.load %arg8[%c0_193, %c0_194] : memref<256x128xbf16, #tpu.memory_space<vmem>>, vector<256x128xbf16>
    tpu.vector_store %arg8[%c0_193, %c0_194], %248 {strides = array<i32>} : memref<256x128xbf16, #tpu.memory_space<vmem>>, vector<256x128xbf16>,
    %250 = tpu.iota {dimensions = array<i32: 1>} : vector<1x128xi32>
    %c2_i32 = arith.constant 2 : i32
    %251 = vector.broadcast %c2_i32 : i32 to vector<1x128xi32>
    %252 = arith.cmpi sge, %250, %251 : vector<1x128xi32>
    %c6_i32 = arith.constant 6 : i32
    %253 = vector.broadcast %c6_i32 : i32 to vector<1x128xi32>
    %254 = arith.cmpi slt, %250, %253 : vector<1x128xi32>
    %255 = arith.andi %252, %254 : vector<1x128xi1>
    %c8_i32 = arith.constant 8 : i32
    %256 = vector.broadcast %c8_i32 : i32 to vector<1x128xi32>
    %257 = arith.cmpi sge, %250, %256 : vector<1x128xi32>
    %c12_i32 = arith.constant 12 : i32
    %258 = vector.broadcast %c12_i32 : i32 to vector<1x128xi32>
    %259 = arith.cmpi slt, %250, %258 : vector<1x128xi32>
    %260 = arith.andi %257, %259 : vector<1x128xi1>
    %261 = arith.ori %255, %260 : vector<1x128xi1>
    %c0_195 = arith.constant 0 : index
    %c0_196 = arith.constant 0 : index
    %262 = vector.load %arg8[%c0_195, %c0_196] : memref<256x128xbf16, #tpu.memory_space<vmem>>, vector<256x128xbf16>
    %263 = arith.extf %262 : vector<256x128xbf16> to vector<256x128xf32>
    %c0_197 = arith.constant 0 : index
    %c0_198 = arith.constant 0 : index
    %c0_199 = arith.constant 0 : index
    %264 = vector.load %arg1[%c0_197, %c0_198, %c0_199] : memref<1x256x128xf32, #tpu.memory_space<vmem>>, vector<1x256x128xf32>
    %265 = vector.shape_cast %264 : vector<1x256x128xf32> to vector<256x128xf32>
    %266 = vector.shape_cast %261 : vector<1x128xi1> to vector<1x128xi1>
    %267 = vector.broadcast %266 : vector<1x128xi1> to vector<256x128xi1>
    %268 = arith.select %267, %263, %265 : vector<256x128xi1>, vector<256x128xf32>
    %c0_200 = arith.constant 0 : index
    %c0_201 = arith.constant 0 : index
    %c0_202 = arith.constant 0 : index
    %269 = vector.load %arg6[%c0_200, %c0_201, %c0_202] : memref<1x256x128xf32, #tpu.memory_space<vmem>>, vector<1x256x128xf32>
    %270 = vector.shape_cast %269 : vector<1x256x128xf32> to vector<256x128xf32>
    %271 = vector.shape_cast %268 : vector<256x128xf32> to vector<1x256x128xf32>
    tpu.vector_store %arg6[%c0_200, %c0_201, %c0_202], %271 {strides = array<i32>} : memref<1x256x128xf32, #tpu.memory_space<vmem>>, vector<1x256x128xf32>,
    return
  }
  func.func @transform_0(%arg0: i32) -> (i32, i32, i32) {
    %c0_i32 = arith.constant 0 : i32
    %c0_i32_0 = arith.constant 0 : i32
    %c0_i32_1 = arith.constant 0 : i32
    return %arg0, %c0_i32, %c0_i32_0 : i32, i32, i32
  }
  func.func @transform_1(%arg0: i32) -> (i32, i32, i32) {
    %c0_i32 = arith.constant 0 : i32
    %c0_i32_0 = arith.constant 0 : i32
    %c0_i32_1 = arith.constant 0 : i32
    %c0_i32_2 = arith.constant 0 : i32
    return %c0_i32, %c0_i32_0, %c0_i32_1 : i32, i32, i32
  }
  func.func @transform_2(%arg0: i32) -> (i32, i32, i32) {
    %c0_i32 = arith.constant 0 : i32
    %c0_i32_0 = arith.constant 0 : i32
    %c0_i32_1 = arith.constant 0 : i32
    %c0_i32_2 = arith.constant 0 : i32
    return %c0_i32, %c0_i32_0, %c0_i32_1 : i32, i32, i32
  }
  func.func @transform_3(%arg0: i32) -> (i32, i32, i32) {
    %c0_i32 = arith.constant 0 : i32
    %c0_i32_0 = arith.constant 0 : i32
    %c0_i32_1 = arith.constant 0 : i32
    %c0_i32_2 = arith.constant 0 : i32
    return %c0_i32, %c0_i32_0, %c0_i32_1 : i32, i32, i32
  }
  func.func @transform_4(%arg0: i32) -> (i32, i32, i32) {
    %c0_i32 = arith.constant 0 : i32
    %c0_i32_0 = arith.constant 0 : i32
    %c0_i32_1 = arith.constant 0 : i32
    %c0_i32_2 = arith.constant 0 : i32
    return %c0_i32, %c0_i32_0, %c0_i32_1 : i32, i32, i32
  }
  func.func @transform_5(%arg0: i32) -> (i32, i32, i32) {
    %c0_i32 = arith.constant 0 : i32
    %c0_i32_0 = arith.constant 0 : i32
    %c0_i32_1 = arith.constant 0 : i32
    return %arg0, %c0_i32, %c0_i32_0 : i32, i32, i32
  }
}

</mosaic_0001>

<bundles_post_ra>
// kernel: _lambda_.1
= control target key start
LH: loop header
LB: loop body
LE: loop exit
PB: predicated region body
PF: predicated region fallthrough
CT: control target
= control target key end

     0   :  { %s12866_s18 = smov 0   ;;  %s14871_s0 = inlined_call_operand.vmem [shape: f32[2,256,128], index: 0, kind: input, shape index: {}]   ;;  %s14872_s1 = inlined_call_operand.vmem [shape: bf16[2,128,128], index: 1, kind: input, shape index: {}]   ;;  %s14873_s2 = inlined_call_operand.vmem [shape: f32[2,1,128], index: 2, kind: input, shape index: {}]   ;;  %s14874_s3 = inlined_call_operand.vmem [shape: bf16[18,128,128], index: 3, kind: input, shape index: {}]   ;;  %s14875_s4 = inlined_call_operand.vmem [shape: f32[2,1,128], index: 4, kind: input, shape index: {}]   ;;  %s14876_s5 = inlined_call_operand.vmem [shape: f32[2,256,128], index: 5, kind: output, shape index: {}]  }
   0x1 LB: > { %s9009_s19 = sadd.s32 4294967295, %s12833_s18   ;;  %p9013_p0 = scmp.ge.s32.totalorder %s12833_s18, 1  ;;  %s12833_s18 = sphi %s12866_s18, %s15_s18  }
   0x2   : > { %p187_p1 = scmp.lt.s32.totalorder %s12833_s18, 3 }
   0x4   : > { %p188_p2 = pnand %p9013_p0, %p187_p1 }
   0x6   : > { %191 = sbr.rel (%p188_p2) target bundleno = 1993 (0x7c9), region = 40 }
   0xb   : > { %v11255_v0 = vld [vmem:[%s14872_s1 + $0x38] sm:$0xff]  ;;  %p215_p3 = scmp.lt.s32.totalorder %s9009_s19, 1  ;;  %v11254_v1 = vld [vmem:[%s14872_s1 + $0x30] sm:$0xff]  ;;  %v11253_v2 = vld [vmem:[%s14872_s1 + $0x28] sm:$0xff]  ;;  %v12835_v53 = vmov 0   ;;  %vm14877_vm0 = vcmask 1040384  }
   0xc   : > { %1013 = vmatpush.bf16.msra.mxu0 %v11255_v0  ;;  %v11252_v9 = vld [vmem:[%s14872_s1 + $0x20] sm:$0xff]  ;;  %v11251_v10 = vld [vmem:[%s14872_s1 + $0x18] sm:$0xff]  ;;  %v11250_v13 = vld [vmem:[%s14872_s1 + $0x10] sm:$0xff]  ;;  %327 = vst [vmem:[#allocation2 + $0x90] sm:$0xf] %v12835_v53  ;;  %vm14880_vm1 = vcmask 1046528  }
   0xd   : > { %s15228_s19 = smov (!%p215_p3, %s9009_s19), 1  ;;  %v11249_v15 = vld [vmem:[%s14872_s1 + $0x8] sm:$0xff]  ;;  %v11248_v16 = vld [vmem:[%s14872_s1] sm:$0xff]  ;;  %v11303_v34 = vld [vmem:[%s14874_s3 + $0x78] sm:$0xff]  ;;  %328 = vst [vmem:[#allocation2 + $0x94] sm:$0xf] %v12835_v53 }
   0xe   : > { %s11230_s24 = sshll.u32 %s15228_s19, 8  ;;  %2019 = vmatpush.bf16.msra.mxu1 %v11303_v34  ;;  %v11302_v37 = vld [vmem:[%s14874_s3 + $0x70] sm:$0xff]  ;;  %v11301_v40 = vld [vmem:[%s14874_s3 + $0x68] sm:$0xff]  ;;  %v11300_v41 = vld [vmem:[%s14874_s3 + $0x60] sm:$0xff]  ;;  %322 = vst [vmem:[#allocation2] sm:$0xf] %v12835_v53 }
   0xf   : > { %s12891_s29 = scalar_lea.vmem %s14871_s0, %s11230_s24  ;;  %v11327_v42 = vld [vmem:[%s14874_s3 + $0xb8] sm:$0xff]  ;;  %v11326_v43 = vld [vmem:[%s14874_s3 + $0xb0] sm:$0xff]  ;;  %v11325_v49 = vld [vmem:[%s14874_s3 + $0xa8] sm:$0xff]  ;;  %323 = vst [vmem:[#allocation2 + $0x4] sm:$0xf] %v12835_v53  ;;  %v14935_v34 = vmov 0  ;;  %s14643_s22 = scalar_lea.vmem %s14876_s5, %s11230_s24 }
  0x10   : > { %1014 = vmatpush.bf16.msra.mxu0 %v11254_v1  ;;  %v226_v3 = vld [vmem:[%s12891_s29] sm:$0xff]  ;;  %v227_v4 = vld [vmem:[%s12891_s29 + $0x8] sm:$0xff]  ;;  %v228_v5 = vld [vmem:[%s12891_s29 + $0x10] sm:$0xff]  ;;  %2534 = vmatpush.bf16.msra.mxu3 %v11327_v42  ;;  %324 = vst [vmem:[#allocation2 + $0x88] sm:$0xf] %v12835_v53 }
  0x11   : > { %v11715_v6 = vpack.c.bf16 %v227_v4, %v226_v3  ;;  %v229_v7 = vld [vmem:[%s12891_s29 + $0x18] sm:$0xff]  ;;  %v230_v11 = vld [vmem:[%s12891_s29 + $0x20] sm:$0xff]  ;;  %v231_v12 = vld [vmem:[%s12891_s29 + $0x28] sm:$0xff]  ;;  %325 = vst [vmem:[#allocation2 + $0x8c] sm:$0xf] %v12835_v53 }
  0x12   : > { %v11720_v8 = vpack.c.bf16 %v229_v7, %v228_v5  ;;  %v11725_v14 = vpack.c.bf16 %v231_v12, %v230_v11  ;;  %v232_v18 = vld [vmem:[%s12891_s29 + $0x30] sm:$0xff]  ;;  %v233_v19 = vld [vmem:[%s12891_s29 + $0x38] sm:$0xff]  ;;  %v234_v22 = vld [vmem:[%s12891_s29 + $0x40] sm:$0xff]  ;;  %2020 = vmatpush.bf16.msra.mxu1 %v11302_v37  ;;  %329 = vst [vmem:[#allocation2 + $0x118] sm:$0xf] %v12835_v53 }
  0x13   : > { %11716 = vst [vmem:[#allocation3 + $0x30] sm:$0xff] %v11715_v6   ;;  %v11730_v20 = vpack.c.bf16 %v233_v19, %v232_v18  ;;  %v235_v23 = vld [vmem:[%s12891_s29 + $0x48] sm:$0xff]  ;;  %v236_v26 = vld [vmem:[%s12891_s29 + $0x50] sm:$0xff]  ;;  %v237_v27 = vld [vmem:[%s12891_s29 + $0x58] sm:$0xff] }
  0x14   : > { %1015 = vmatpush.bf16.msra.mxu0 %v11253_v2  ;;  %12624 = vst [vmem:[#allocation3] sm:$0xff] %v11720_v8   ;;  %v11735_v24 = vpack.c.bf16 %v235_v23, %v234_v22  ;;  %v11740_v28 = vpack.c.bf16 %v237_v27, %v236_v26  ;;  %v238_v30 = vld [vmem:[%s12891_s29 + $0x60] sm:$0xff]  ;;  %v239_v31 = vld [vmem:[%s12891_s29 + $0x68] sm:$0xff]  ;;  %v240_v35 = vld [vmem:[%s12891_s29 + $0x70] sm:$0xff]  ;;  %2535 = vmatpush.bf16.msra.mxu3 %v11326_v43 }
  0x15   : > { %12625 = vst [vmem:[#allocation3 + $0x58] sm:$0xff] %v11725_v14   ;;  %v11745_v32 = vpack.c.bf16 %v239_v31, %v238_v30  ;;  %v241_v36 = vld [vmem:[%s12891_s29 + $0x78] sm:$0xff]  ;;  %v242_v45 = vld [vmem:[%s12891_s29 + $0x80] sm:$0xff]  ;;  %v243_v46 = vld [vmem:[%s12891_s29 + $0x88] sm:$0xff] }
  0x16   : > { %12626 = vst [vmem:[#allocation3 + $0x18] sm:$0xff] %v11730_v20   ;;  %v11750_v38 = vpack.c.bf16 %v241_v36, %v240_v35  ;;  %2021 = vmatpush.bf16.msra.mxu1 %v11301_v40  ;;  %v11299_v44 = vld [vmem:[%s14874_s3 + $0x58] sm:$0xff]  ;;  %v11755_v47 = vpack.c.bf16 %v243_v46, %v242_v45  ;;  %v11298_v48 = vld [vmem:[%s14874_s3 + $0x50] sm:$0xff]  ;;  %v11297_v51 = vld [vmem:[%s14874_s3 + $0x48] sm:$0xff] }
  0x17   : > { %12627 = vst [vmem:[#allocation3 + $0x50] sm:$0xff] %v11735_v24   ;;  %v11324_v52 = vld [vmem:[%s14874_s3 + $0xa0] sm:$0xff]  ;;  %v11323_v55 = vld [vmem:[%s14874_s3 + $0x98] sm:$0xff]  ;;  %v244_v56 = vld [vmem:[%s12891_s29 + $0x90] sm:$0xff] }
  0x18   : > { %1016 = vmatpush.bf16.msra.mxu0 %v11252_v9  ;;  %12628 = vst [vmem:[#allocation3 + $0x68] sm:$0xff] %v11740_v28   ;;  %2536 = vmatpush.bf16.msra.mxu3 %v11325_v49  ;;  %v11296_v54 = vld [vmem:[%s14874_s3 + $0x40] sm:$0xff]  ;;  %v245_v57 = vld [vmem:[%s12891_s29 + $0x98] sm:$0xff]  ;;  %v11280_v58 = vld [vmem:[#allocation2 + $0x90] sm:$0xff]  ;;  %v14890_v9 = vlaneseq }
  0x19   : > { %12629 = vst [vmem:[#allocation3 + $0x8] sm:$0xff] %v11745_v32   ;;  %v11322_v59 = vld [vmem:[%s14874_s3 + $0x90] sm:$0xff]  ;;  %v11760_v60 = vpack.c.bf16 %v245_v57, %v244_v56  ;;  %v11321_v61 = vld [vmem:[%s14874_s3 + $0x88] sm:$0xff]  ;;  %v11320_v63 = vld [vmem:[%s14874_s3 + $0x80] sm:$0xff] }
  0x1a   : > { %v11232_v17 = vld [vmem:[#allocation3 + $0x30] sm:$0xff]  ;;  %12630 = vst [vmem:[#allocation3 + $0x48] sm:$0xff] %v11750_v38   ;;  %2022 = vmatpush.bf16.msra.mxu1 %v11300_v41  ;;  %v247_v2 = vld [vmem:[%s12891_s29 + $0xa8] sm:$0xff]  ;;  %v249_v11 = vld [vmem:[%s12891_s29 + $0xb8] sm:$0xff] }
  0x1b   : > { %v11233_v21 = vld [vmem:[#allocation3] sm:$0xff]  ;;  %12631 = vst [vmem:[#allocation3 + $0x40] sm:$0xff] %v11755_v47   ;;  %v246_v1 = vld [vmem:[%s12891_s29 + $0xa0] sm:$0xff]  ;;  %v251_v37 = vld [vmem:[%s12891_s29 + $0xc8] sm:$0xff] }
  0x1c   : > { %1017 = vmatpush.bf16.msra.mxu0 %v11251_v10  ;;  %v11234_v25 = vld [vmem:[#allocation3 + $0x58] sm:$0xff]  ;;  %2537 = vmatpush.bf16.msra.mxu3 %v11324_v52  ;;  %330 = vst [vmem:[#allocation2 + $0x11c] sm:$0xf] %v12835_v53  ;;  %v11765_v3 = vpack.c.bf16 %v247_v2, %v246_v1  ;;  %v12981_v4 = vld [vmem:[%s14873_s2] ss:$0 sm:$0xff]  ;;  %v248_v10 = vld [vmem:[%s12891_s29 + $0xb0] sm:$0xff] }
  0x1d   : > { %v11235_v29 = vld [vmem:[#allocation3 + $0x18] sm:$0xff]  ;;  %332 = vst [vmem:[#allocation2 + $0x120] sm:$0xf] %v12835_v53  ;;  %v11278_v30 = vld [vmem:[%s14874_s3 + $0x30] sm:$0xff]  ;;  %v250_v36 = vld [vmem:[%s12891_s29 + $0xc0] sm:$0xff] }
  0x1e   : > { %v11236_v33 = vld [vmem:[#allocation3 + $0x50] sm:$0xff]  ;;  %2023 = vmatpush.bf16.msra.mxu1 %v11299_v44  ;;  %333 = vst [vmem:[#allocation2 + $0x124] sm:$0xf] %v12835_v53  ;;  %v11277_v41 = vld [vmem:[%s14874_s3 + $0x28] sm:$0xff]  ;;  %v11775_v42 = vpack.c.bf16 %v251_v37, %v250_v36 }
  0x1f   : > { %v11237_v39 = vld [vmem:[#allocation3 + $0x68] sm:$0xff]  ;;  %334 = vst [vmem:[#allocation2 + $0x1a8] sm:$0xf] %v12835_v53 }
  0x20   : > { %1018 = vmatpush.bf16.msra.mxu0 %v11250_v13  ;;  %v11238_v50 = vld [vmem:[#allocation3 + $0x8] sm:$0xff]  ;;  %2538 = vmatpush.bf16.msra.mxu3 %v11323_v55  ;;  %335 = vst [vmem:[#allocation2 + $0x1ac] sm:$0xf] %v12835_v53  ;;  %v11770_v13 = vpack.c.bf16 %v249_v11, %v248_v10  ;;  %v14938_v53 = vmov 0  ;;  %v14941_v10 = vmov 0 }
  0x21   : > { %12632 = vst [vmem:[#allocation3 + $0x20] sm:$0xff] %v11760_v60   ;;  %v11239_v62 = vld [vmem:[#allocation3 + $0x48] sm:$0xff] }
  0x22   : > { %2024 = vmatpush.bf16.msra.mxu1 %v11298_v48  ;;  %12633 = vst [vmem:[#allocation3 + $0x10] sm:$0xff] %v11765_v3   ;;  %v11240_v5 = vld [vmem:[#allocation3 + $0x40] sm:$0xff]  ;;  %v11275_v60 = vld [vmem:[%s14874_s3 + $0x18] sm:$0xff] }
  0x23   : > { %12634 = vst [vmem:[#allocation3 + $0x38] sm:$0xff] %v11770_v13   ;;  %v253_v13 = vld [vmem:[%s12891_s29 + $0xd8] sm:$0xff] }
  0x24   : > { %1019 = vmatpush.bf16.msra.mxu0 %v11249_v15  ;;  %2539 = vmatpush.bf16.msra.mxu3 %v11322_v59  ;;  %12635 = vst [vmem:[#allocation3 + $0x60] sm:$0xff] %v11775_v42  }
  0x25   : > { %v11304_v0 = vld [vmem:[#allocation2 + $0x120] sm:$0xff] }
  0x26   : > { %2025 = vmatpush.bf16.msra.mxu1 %v11297_v51  ;;  %v11276_v51 = vld [vmem:[%s14874_s3 + $0x20] sm:$0xff] }
  0x28   : > { %1020 = vmatpush.bf16.msra.mxu0 %v11248_v16  ;;  %2540 = vmatpush.bf16.msra.mxu3 %v11321_v61  ;;  %v11241_v23 = vld [vmem:[#allocation3 + $0x20] sm:$0xff] }
  0x2a   : > { %2026 = vmatpush.bf16.msra.mxu1 %v11296_v54 }
  0x2b   : > { %1021 = vmatmul.bf16.vlgmr.msra.gmra.mxu0 %v11232_v17  ;;  %v12990_v17 = vshrl.u32 %v14890_v9, 7 }
  0x2c   : > { %2541 = vmatpush.bf16.msra.mxu3 %v11320_v63 }
  0x2d   : > { %2027 = vmatmul.bf16.vlgmr.msra.gmra.mxu1 %v11280_v58  ;;  %v338_v22 = vadd.s32 8, %v12990_v17  ;;  %v340_v57 = vadd.s32 24, %v12990_v17  ;;  %v11242_v58 = vld [vmem:[#allocation3 + $0x10] sm:$0xff]  ;;  %v342_v37 = vadd.s32 40, %v12990_v17 }
  0x2f   : > { %2542 = vmatmul.bf16.vlgmr.msra.gmra.mxu3 %v11304_v0  ;;  %v380_v28 = vand.u32 15, %v338_v22  ;;  %v394_v1 = vand.u32 15, %v340_v57 }
  0x31   : > { %vm13010_vm2 = vcmp.eq.s32.totalorder %v380_v28, 15  ;;  %vm13050_vm4 = vcmp.eq.s32.totalorder %v394_v1, 15 }
  0x32   : > { %v14936_v34 = vsel %vm13010_vm2, 4294967295, %v14935_v34  ;;  %v14942_v10 = vsel %vm13050_vm4, 4294967295, %v14941_v10 }
  0x33   : > { %14937 = vst [vmem:[#allocation4_spill] sm:$0xff] %v14936_v34 }
  0x34   : > { %14943 = vst [vmem:[#allocation6_spill] sm:$0xff] %v14942_v10 }
  0x3b   : > { %1026 = vmatmul.bf16.gmra.mxu0 %v11233_v21 }
  0x4b   : > { %1031 = vmatmul.bf16.gmra.mxu0 %v11234_v25  ;;  %v11279_v25 = vld [vmem:[%s14874_s3 + $0x38] sm:$0xff] }
  0x4c   : > { %2252 = vmatpush.bf16.msra.mxu2 %v11279_v25 }
  0x50   : > { %2253 = vmatpush.bf16.msra.mxu2 %v11278_v30  ;;  %v11272_v30 = vld [vmem:[%s14874_s3] sm:$0xff] }
  0x54   : > { %2254 = vmatpush.bf16.msra.mxu2 %v11277_v41 }
  0x58   : > { %2255 = vmatpush.bf16.msra.mxu2 %v11276_v51  ;;  %v343_v51 = vadd.s32 48, %v12990_v17 }
  0x5b   : > { %1036 = vmatmul.bf16.gmra.mxu0 %v11235_v29 }
  0x5c   : > { %2256 = vmatpush.bf16.msra.mxu2 %v11275_v60 }
  0x6b   : > { %1041 = vmatmul.bf16.gmra.mxu0 %v11236_v33  ;;  %v339_v33 = vadd.s32 16, %v12990_v17 }
  0x6d   : > { %v387_v46 = vand.u32 15, %v339_v33 }
  0x6f   : > { %vm13032_vm3 = vcmp.eq.s32.totalorder %v387_v46, 0  ;;  %v408_v46 = vand.u32 15, %v342_v37 }
  0x70   : > { %v14939_v53 = vsel %vm13032_vm3, 4294967295, %v14938_v53 }
  0x71   : > { %14940 = vst [vmem:[#allocation5_spill] sm:$0xff] %v14939_v53  ;;  %vm13078_vm6 = vcmp.eq.s32.totalorder %v408_v46, 15 }
  0x7b   : > { %1046 = vmatmul.bf16.gmra.mxu0 %v11237_v39 }
  0x8b   : > { %1051 = vmatmul.bf16.gmra.mxu0 %v11238_v50 }
  0x9b   : > { %1056 = vmatmul.bf16.gmra.mxu0 %v11239_v62 }
  0xa8   : > { %v1022_v6 = vpop.f32.mrf.mxu0 }
  0xa9   : > { %v1023_v7 = vadd.f32 %v12981_v4, %v1022_v6 }
  0xab   : > { %1061 = vmatmul.bf16.gmra.mxu0 %v11240_v5  ;;  %v1102_v8 = vmax.f32 %v1023_v7, 0.0  ;;  %v11274_v5 = vld [vmem:[%s14874_s3 + $0x10] sm:$0xff] }
  0xac   : > { %2257 = vmatpush.bf16.msra.mxu2 %v11274_v5 }
  0xad   : > { %v12987_v15 = vmin.f32 %v1102_v8, 6.0  ;;  %v341_v8 = vadd.s32 32, %v12990_v17 }
  0xaf   : > { %v14892_v19 = vrot.slane %v12987_v15, 7  ;;  %v14891_v38 = vrot.slane %v12987_v15, 1 }
  0xb0   : > { %v1024_v12 = vpop.f32.mrf.mxu0 }
  0xb1   : > { %v1025_v14 = vadd.f32 %v12981_v4, %v1024_v12  ;;  %v252_v12 = vld [vmem:[%s12891_s29 + $0xd0] sm:$0xff] }
  0xb3   : > { %v1103_v16 = vmax.f32 %v1025_v14, 0.0 }
  0xb5   : > { %v1135_v18 = vmin.f32 %v1103_v16, 6.0 }
  0xb7   : > { %v1202_v20 = vrot.slane %v1135_v18, 7  ;;  %v11875_v21 = vpack.c.bf16 %v1135_v18, %v12987_v15  ;;  %v1394_v32 = vrot.slane %v1135_v18, 1  ;;  %v11273_v18 = vld [vmem:[%s14874_s3 + $0x8] sm:$0xff] }
  0xb8   : > { %v1027_v24 = vpop.f32.mrf.mxu0  ;;  %2258 = vmatpush.bf16.msra.mxu2 %v11273_v18 }
  0xb9   : > { %v13001_v26 = vsel %vm14877_vm0, %v14892_v19, %v1202_v20  ;;  %12655 = vst [vmem:[#allocation2 + $0x98] sm:$0xff] %v11875_v21   ;;  %v1028_v27 = vadd.f32 %v12981_v4, %v1027_v24  ;;  %v1395_v45 = vsel %vm14880_vm1, %v14891_v38, %v1394_v32  ;;  %v401_v24 = vand.u32 15, %v341_v8 }
  0xbb   : > { %v1104_v29 = vmax.f32 %v1028_v27, 0.0  ;;  %1066 = vmatmul.bf16.gmra.mxu0 %v11241_v23  ;;  %vm13067_vm5 = vcmp.eq.s32.totalorder %v401_v24, 0 }
  0xbc   : > { %2259 = vmatpush.bf16.msra.mxu2 %v11272_v30  ;;  %v345_v30 = vadd.s32 64, %v12990_v17 }
  0xbd   : > { %v13007_v31 = vmin.f32 %v1104_v29, 6.0 }
  0xbf   : > { %v1396_v35 = vrot.slane %v13007_v31, 1  ;;  %v1204_v47 = vrot.slane %v13007_v31, 7 }
  0xc0   : > { %v1029_v39 = vpop.f32.mrf.mxu0  ;;  %v11281_v40 = vld [vmem:[#allocation2 + $0x98] sm:$0xff] }
  0xc1   : > { %v1397_v43 = vsel %vm14880_vm1, %v1394_v32, %v1396_v35  ;;  %v1030_v44 = vadd.f32 %v12981_v4, %v1029_v39  ;;  %2032 = vmatmul.bf16.gmra.mxu1 %v11281_v40  ;;  %v1205_v54 = vsel %vm14877_vm0, %v1202_v20, %v1204_v47  ;;  %v11780_v20 = vpack.c.bf16 %v253_v13, %v252_v12  ;;  %v11243_v39 = vld [vmem:[#allocation3 + $0x38] sm:$0xff]  ;;  %v11256_v40 = vld [vmem:[#allocation2] sm:$0xff]  ;;  %v11244_v13 = vld [vmem:[#allocation3 + $0x60] sm:$0xff] }
  0xc2   : > { %v1555_v48 = vsel %vm13010_vm2, 0.0, %v1397_v43  ;;  %v1362_v61 = vsel %vm13032_vm3, 0.0, %v1205_v54  ;;  %v14944_v32 = vmov 0  ;;  %2260 = vmatmul.bf16.vlgmr.msra.gmra.mxu2 %v11256_v40 }
  0xc3   : > { %v11955_v49 = vpack.c.bf16 %v1555_v48, %v1395_v45  ;;  %v1105_v50 = vmax.f32 %v1030_v44, 0.0  ;;  %12636 = vst [vmem:[#allocation3 + $0x70] sm:$0xff] %v11780_v20   ;;  %v14945_v32 = vsel %vm13067_vm5, 4294967295, %v14944_v32 }
  0xc4   : > { %14946 = vst [vmem:[#allocation7_spill] sm:$0xff] %v14945_v32 }
  0xc5   : > { %12671 = vst [vmem:[#allocation2 + $0x128] sm:$0xff] %v11955_v49   ;;  %v1137_v52 = vmin.f32 %v1105_v50, 6.0 }
  0xc7   : > { %v1206_v55 = vrot.slane %v1137_v52, 7  ;;  %v11880_v56 = vpack.c.bf16 %v1137_v52, %v13007_v31  ;;  %v1398_v7 = vrot.slane %v1137_v52, 1  ;;  %v14947_v52 = vmov 0 }
  0xc8   : > { %v1032_v59 = vpop.f32.mrf.mxu0  ;;  %v14948_v52 = vsel %vm13078_vm6, 4294967295, %v14947_v52 }
  0xc9   : > { %v1207_v62 = vsel %vm14877_vm0, %v1204_v47, %v1206_v55  ;;  %12656 = vst [vmem:[#allocation2 + $0xa0] sm:$0xff] %v11880_v56   ;;  %v1033_v63 = vadd.f32 %v12981_v4, %v1032_v59  ;;  %v1399_v23 = vsel %vm14880_vm1, %v1396_v35, %v1398_v7  ;;  %v255_v56 = vld [vmem:[%s12891_s29 + $0xe8] sm:$0xff] }
  0xca   : > { %v11800_v0 = vpack.c.bf16 %v1207_v62, %v1362_v61  ;;  %14949 = vst [vmem:[#allocation8_spill] sm:$0xff] %v14948_v52 }
  0xcb   : > { %v1106_v2 = vmax.f32 %v1033_v63, 0.0  ;;  %1071 = vmatmul.bf16.gmra.mxu0 %v11242_v58  ;;  %v415_v63 = vand.u32 15, %v343_v51 }
  0xcc   : > { %12640 = vst [vmem:[#allocation2 + $0x10] sm:$0xff] %v11800_v0   ;;  %v11305_v3 = vld [vmem:[#allocation2 + $0x128] sm:$0xff] }
  0xcd   : > { %v1138_v6 = vmin.f32 %v1106_v2, 6.0  ;;  %2547 = vmatmul.bf16.gmra.mxu3 %v11305_v3  ;;  %vm13089_vm7 = vcmp.eq.s32.totalorder %v415_v63, 0 }
  0xcf   : > { %v1400_v11 = vrot.slane %v1138_v6, 1  ;;  %v1208_v25 = vrot.slane %v1138_v6, 7 }
  0xd0   : > { %v1034_v14 = vpop.f32.mrf.mxu0  ;;  %v11282_v16 = vld [vmem:[#allocation2 + $0xa0] sm:$0xff] }
  0xd1   : > { %v1401_v21 = vsel %vm14880_vm1, %v1398_v7, %v1400_v11  ;;  %v1035_v22 = vadd.f32 %v12981_v4, %v1034_v14  ;;  %2037 = vmatmul.bf16.gmra.mxu1 %v11282_v16  ;;  %v1209_v33 = vsel %vm14877_vm0, %v1206_v55, %v1208_v25  ;;  %v254_v55 = vld [vmem:[%s12891_s29 + $0xe0] sm:$0xff] }
  0xd2   : > { %v1557_v27 = vsel %vm13050_vm4, 0.0, %v1401_v21  ;;  %v1364_v42 = vsel %vm13067_vm5, 0.0, %v1209_v33  ;;  %v11785_v59 = vpack.c.bf16 %v255_v56, %v254_v55 }
  0xd3   : > { %v11960_v28 = vpack.c.bf16 %v1557_v27, %v1399_v23  ;;  %v1107_v29 = vmax.f32 %v1035_v22, 0.0  ;;  %v11375_v27 = vld [vmem:[%s14874_s3 + $0x138] sm:$0xff] }
  0xd4   : > { %12637 = vst [vmem:[#allocation3 + $0x78] sm:$0xff] %v11785_v59   ;;  %3162 = vmatpush.bf16.msrb.mxu1 %v11375_v27 }
  0xd5   : > { %12672 = vst [vmem:[#allocation2 + $0x130] sm:$0xff] %v11960_v28   ;;  %v1139_v31 = vmin.f32 %v1107_v29, 6.0 }
  0xd7   : > { %v1210_v35 = vrot.slane %v1139_v31, 7  ;;  %v11885_v36 = vpack.c.bf16 %v1139_v31, %v1138_v6  ;;  %v1402_v50 = vrot.slane %v1139_v31, 1  ;;  %v14950_v6 = vmov 0 }
  0xd8   : > { %v1037_v41 = vpop.f32.mrf.mxu0  ;;  %v14951_v6 = vsel %vm13089_vm7, 4294967295, %v14950_v6  ;;  %v14953_v31 = vmov 0 }
  0xd9   : > { %v1211_v43 = vsel %vm14877_vm0, %v1208_v25, %v1210_v35  ;;  %12657 = vst [vmem:[#allocation2 + $0xa8] sm:$0xff] %v11885_v36   ;;  %v1038_v44 = vadd.f32 %v12981_v4, %v1037_v41  ;;  %v1403_v62 = vsel %vm14880_vm1, %v1400_v11, %v1402_v50  ;;  %v344_v11 = vadd.s32 56, %v12990_v17  ;;  %v11351_v25 = vld [vmem:[%s14874_s3 + $0xf8] sm:$0xff] }
  0xda   : > { %v11805_v45 = vpack.c.bf16 %v1211_v43, %v1364_v42  ;;  %14952 = vst [vmem:[#allocation9_spill] sm:$0xff] %v14951_v6  ;;  %2848 = vmatpush.bf16.msrb.mxu0 %v11351_v25  ;;  %v257_v36 = vld [vmem:[%s12891_s29 + $0xf8] sm:$0xff]  ;;  %v14962_v25 = vmov 0 }
  0xdb   : > { %v1108_v47 = vmax.f32 %v1038_v44, 0.0  ;;  %1076 = vmatmul.bf16.gmra.mxu0 %v11243_v39  ;;  %v422_v22 = vand.u32 15, %v344_v11  ;;  %v429_v44 = vand.u32 15, %v345_v30  ;;  %v348_v30 = vadd.s32 88, %v12990_v17 }
  0xdc   : > { %12641 = vst [vmem:[#allocation2 + $0x18] sm:$0xff] %v11805_v45   ;;  %v11306_v48 = vld [vmem:[#allocation2 + $0x130] sm:$0xff] }
  0xdd   : > { %v1140_v49 = vmin.f32 %v1108_v47, 6.0  ;;  %2552 = vmatmul.bf16.gmra.mxu3 %v11306_v48  ;;  %vm13106_vm8 = vcmp.eq.s32.totalorder %v422_v22, 15  ;;  %vm13117_vm9 = vcmp.eq.s32.totalorder %v429_v44, 0  ;;  %v11350_v44 = vld [vmem:[%s14874_s3 + $0xf0] sm:$0xff] }
  0xde   : > { %v14954_v31 = vsel %vm13106_vm8, 4294967295, %v14953_v31  ;;  %2849 = vmatpush.bf16.msrb.mxu0 %v11350_v44 }
  0xdf   : > { %v1404_v54 = vrot.slane %v1140_v49, 1  ;;  %v1212_v0 = vrot.slane %v1140_v49, 7  ;;  %14955 = vst [vmem:[#allocation10_spill] sm:$0xff] %v14954_v31 }
  0xe0   : > { %v1039_v57 = vpop.f32.mrf.mxu0  ;;  %v11283_v58 = vld [vmem:[#allocation2 + $0xa8] sm:$0xff] }
  0xe1   : > { %v1405_v60 = vsel %vm14880_vm1, %v1402_v50, %v1404_v54  ;;  %v1040_v61 = vadd.f32 %v12981_v4, %v1039_v57  ;;  %2042 = vmatmul.bf16.gmra.mxu1 %v11283_v58  ;;  %v1213_v7 = vsel %vm14877_vm0, %v1210_v35, %v1212_v0  ;;  %v256_v35 = vld [vmem:[%s12891_s29 + $0xf0] sm:$0xff]  ;;  %v14956_v50 = vmov 0  ;;  %v11245_v57 = vld [vmem:[#allocation3 + $0x70] sm:$0xff] }
  0xe2   : > { %v1559_v1 = vsel %vm13078_vm6, 0.0, %v1405_v60  ;;  %v1366_v16 = vsel %vm13089_vm7, 0.0, %v1213_v7  ;;  %v11790_v40 = vpack.c.bf16 %v257_v36, %v256_v35  ;;  %v14957_v50 = vsel %vm13117_vm9, 4294967295, %v14956_v50 }
  0xe3   : > { %v11965_v2 = vpack.c.bf16 %v1559_v1, %v1403_v62  ;;  %v1109_v3 = vmax.f32 %v1040_v61, 0.0  ;;  %14958 = vst [vmem:[#allocation11_spill] sm:$0xff] %v14957_v50  ;;  %v14959_v7 = vmov 0 }
  0xe4   : > { %12638 = vst [vmem:[#allocation3 + $0x28] sm:$0xff] %v11790_v40  }
  0xe5   : > { %12673 = vst [vmem:[#allocation2 + $0x138] sm:$0xff] %v11965_v2   ;;  %v1141_v5 = vmin.f32 %v1109_v3, 6.0 }
  0xe7   : > { %v1214_v8 = vrot.slane %v1141_v5, 7  ;;  %v11890_v12 = vpack.c.bf16 %v1141_v5, %v1140_v49  ;;  %v1406_v29 = vrot.slane %v1141_v5, 1  ;;  %v347_v5 = vadd.s32 80, %v12990_v17 }
  0xe8   : > { %v1042_v14 = vpop.f32.mrf.mxu0 }
  0xe9   : > { %v1215_v18 = vsel %vm14877_vm0, %v1212_v0, %v1214_v8  ;;  %12658 = vst [vmem:[#allocation2 + $0xb0] sm:$0xff] %v11890_v12   ;;  %v1043_v20 = vadd.f32 %v12981_v4, %v1042_v14  ;;  %v1407_v43 = vsel %vm14880_vm1, %v1404_v54, %v1406_v29  ;;  %v346_v54 = vadd.s32 72, %v12990_v17 }
  0xea   : > { %v11810_v21 = vpack.c.bf16 %v1215_v18, %v1366_v16  ;;  %v443_v18 = vand.u32 15, %v347_v5 }
  0xeb   : > { %v1110_v23 = vmax.f32 %v1043_v20, 0.0  ;;  %1081 = vmatmul.bf16.gmra.mxu0 %v11244_v13  ;;  %v436_v63 = vand.u32 15, %v346_v54 }
  0xec   : > { %12642 = vst [vmem:[#allocation2 + $0x20] sm:$0xff] %v11810_v21   ;;  %v11307_v24 = vld [vmem:[#allocation2 + $0x138] sm:$0xff]  ;;  %vm13137_vm11 = vcmp.eq.s32.totalorder %v443_v18, 0 }
  0xed   : > { %v1142_v28 = vmin.f32 %v1110_v23, 6.0  ;;  %2557 = vmatmul.bf16.gmra.mxu3 %v11307_v24  ;;  %vm13128_vm10 = vcmp.eq.s32.totalorder %v436_v63, 15  ;;  %v14963_v25 = vsel %vm13137_vm11, 4294967295, %v14962_v25 }
  0xee   : > { %v14960_v7 = vsel %vm13128_vm10, 4294967295, %v14959_v7  ;;  %14964 = vst [vmem:[#allocation13_spill] sm:$0xff] %v14963_v25 }
  0xef   : > { %v1408_v33 = vrot.slane %v1142_v28, 1  ;;  %v1216_v45 = vrot.slane %v1142_v28, 7  ;;  %14961 = vst [vmem:[#allocation12_spill] sm:$0xff] %v14960_v7 }
  0xf0   : > { %v1044_v37 = vpop.f32.mrf.mxu0  ;;  %v11284_v39 = vld [vmem:[#allocation2 + $0xb0] sm:$0xff] }
  0xf1   : > { %v1409_v41 = vsel %vm14880_vm1, %v1406_v29, %v1408_v33  ;;  %v1045_v42 = vadd.f32 %v12981_v4, %v1044_v37  ;;  %2047 = vmatmul.bf16.gmra.mxu1 %v11284_v39  ;;  %v1217_v51 = vsel %vm14877_vm0, %v1214_v8, %v1216_v45 }
  0xf2   : > { %v1561_v46 = vsel %vm13106_vm8, 0.0, %v1409_v41  ;;  %v1368_v59 = vsel %vm13117_vm9, 0.0, %v1217_v51  ;;  %v450_v41 = vand.u32 15, %v348_v30 }
  0xf3   : > { %v11970_v47 = vpack.c.bf16 %v1561_v46, %v1407_v43  ;;  %v1111_v48 = vmax.f32 %v1045_v42, 0.0 }
  0xf4   : > { %vm13154_vm12 = vcmp.eq.s32.totalorder %v450_v41, 15 }
  0xf5   : > { %12674 = vst [vmem:[#allocation2 + $0x140] sm:$0xff] %v11970_v47   ;;  %v1143_v49 = vmin.f32 %v1111_v48, 6.0  ;;  %v349_v48 = vadd.s32 96, %v12990_v17 }
  0xf7   : > { %v1218_v55 = vrot.slane %v1143_v49, 7  ;;  %v11895_v56 = vpack.c.bf16 %v1143_v49, %v1142_v28  ;;  %v1410_v3 = vrot.slane %v1143_v49, 1  ;;  %v14965_v49 = vmov 0 }
  0xf8   : > { %v1047_v58 = vpop.f32.mrf.mxu0  ;;  %v14966_v49 = vsel %vm13154_vm12, 4294967295, %v14965_v49 }
  0xf9   : > { %v1219_v60 = vsel %vm14877_vm0, %v1216_v45, %v1218_v55  ;;  %12659 = vst [vmem:[#allocation2 + $0xb8] sm:$0xff] %v11895_v56   ;;  %v1048_v61 = vadd.f32 %v12981_v4, %v1047_v58  ;;  %v1411_v16 = vsel %vm14880_vm1, %v1408_v33, %v1410_v3  ;;  %v11246_v33 = vld [vmem:[#allocation3 + $0x78] sm:$0xff]  ;;  %v11374_v45 = vld [vmem:[%s14874_s3 + $0x130] sm:$0xff] }
  0xfa   : > { %v11815_v62 = vpack.c.bf16 %v1219_v60, %v1368_v59  ;;  %14967 = vst [vmem:[#allocation14_spill] sm:$0xff] %v14966_v49  ;;  %3163 = vmatpush.bf16.msrb.mxu1 %v11374_v45  ;;  %v457_v59 = vand.u32 15, %v349_v48  ;;  %v14974_v45 = vmov 0 }
  0xfb   : > { %v1112_v0 = vmax.f32 %v1048_v61, 0.0  ;;  %1086 = vmatmul.bf16.gmra.mxu0 %v11245_v57 }
  0xfc   : > { %12643 = vst [vmem:[#allocation2 + $0x28] sm:$0xff] %v11815_v62   ;;  %v11308_v1 = vld [vmem:[#allocation2 + $0x140] sm:$0xff]  ;;  %vm13163_vm13 = vcmp.eq.s32.totalorder %v457_v59, 0 }
  0xfd   : > { %v1144_v2 = vmin.f32 %v1112_v0, 6.0  ;;  %2562 = vmatmul.bf16.gmra.mxu3 %v11308_v1  ;;  %v14968_v1 = vmov 0 }
  0xfe   : > { %v14969_v1 = vsel %vm13163_vm13, 4294967295, %v14968_v1 }
  0xff   : > { %v1412_v8 = vrot.slane %v1144_v2, 1  ;;  %v1220_v20 = vrot.slane %v1144_v2, 7  ;;  %14970 = vst [vmem:[#allocation15_spill] sm:$0xff] %v14969_v1 }
 0x100   : > { %v1049_v12 = vpop.f32.mrf.mxu0  ;;  %v11285_v11 = vld [vmem:[#allocation2 + $0xb8] sm:$0xff] }
 0x101   : > { %v1413_v13 = vsel %vm14880_vm1, %v1410_v3, %v1412_v8  ;;  %v1050_v14 = vadd.f32 %v12981_v4, %v1049_v12  ;;  %2052 = vmatmul.bf16.gmra.mxu1 %v11285_v11  ;;  %v1221_v27 = vsel %vm14877_vm0, %v1218_v55, %v1220_v20  ;;  %v11247_v12 = vld [vmem:[#allocation3 + $0x28] sm:$0xff] }
 0x102   : > { %v1563_v21 = vsel %vm13128_vm10, 0.0, %v1413_v13  ;;  %v1370_v36 = vsel %vm13137_vm11, 0.0, %v1221_v27  ;;  %v351_v27 = vadd.s32 112, %v12990_v17 }
 0x103   : > { %v11975_v22 = vpack.c.bf16 %v1563_v21, %v1411_v16  ;;  %v1113_v23 = vmax.f32 %v1050_v14, 0.0 }
 0x105   : > { %12675 = vst [vmem:[#allocation2 + $0x148] sm:$0xff] %v11975_v22   ;;  %v1145_v24 = vmin.f32 %v1113_v23, 6.0 }
 0x107   : > { %v1222_v28 = vrot.slane %v1145_v24, 7  ;;  %v11900_v29 = vpack.c.bf16 %v1145_v24, %v1144_v2  ;;  %v1414_v47 = vrot.slane %v1145_v24, 1 }
 0x108   : > { %v1052_v35 = vpop.f32.mrf.mxu0 }
 0x109   : > { %v1223_v37 = vsel %vm14877_vm0, %v1220_v20, %v1222_v28  ;;  %12660 = vst [vmem:[#allocation2 + $0xc0] sm:$0xff] %v11900_v29   ;;  %v1053_v39 = vadd.f32 %v12981_v4, %v1052_v35  ;;  %v1415_v58 = vsel %vm14880_vm1, %v1412_v8, %v1414_v47  ;;  %v350_v8 = vadd.s32 104, %v12990_v17 }
 0x10a   : > { %v11820_v40 = vpack.c.bf16 %v1223_v37, %v1370_v36 }
 0x10b   : > { %v1114_v42 = vmax.f32 %v1053_v39, 0.0  ;;  %1091 = vmatmul.bf16.gmra.mxu0 %v11246_v33  ;;  %v464_v20 = vand.u32 15, %v350_v8  ;;  %v471_v39 = vand.u32 15, %v351_v27  ;;  %v14977_v8 = vmov 0 }
 0x10c   : > { %12644 = vst [vmem:[#allocation2 + $0x30] sm:$0xff] %v11820_v40   ;;  %v11309_v43 = vld [vmem:[#allocation2 + $0x148] sm:$0xff] }
 0x10d   : > { %v1146_v46 = vmin.f32 %v1114_v42, 6.0  ;;  %2567 = vmatmul.bf16.gmra.mxu3 %v11309_v43  ;;  %vm13174_vm14 = vcmp.eq.s32.totalorder %v464_v20, 15  ;;  %vm13183_vm15 = vcmp.eq.s32.totalorder %v471_v39, 0 }
 0x10e   : > { %v14975_v45 = vsel %vm13183_vm15, 4294967295, %v14974_v45 }
 0x10f   : > { %v1416_v51 = vrot.slane %v1146_v46, 1  ;;  %v1224_v60 = vrot.slane %v1146_v46, 7  ;;  %14976 = vst [vmem:[#allocation17_spill] sm:$0xff] %v14975_v45 }
 0x110   : > { %v1054_v55 = vpop.f32.mrf.mxu0  ;;  %v11286_v56 = vld [vmem:[#allocation2 + $0xc0] sm:$0xff] }
 0x111   : > { %v1417_v54 = vsel %vm14880_vm1, %v1414_v47, %v1416_v51  ;;  %v1055_v57 = vadd.f32 %v12981_v4, %v1054_v55  ;;  %2057 = vmatmul.bf16.gmra.mxu1 %v11286_v56  ;;  %v1225_v2 = vsel %vm14877_vm0, %v1222_v28, %v1224_v60  ;;  %v14971_v28 = vmov 0 }
 0x112   : > { %v1565_v61 = vsel %vm13154_vm12, 0.0, %v1417_v54  ;;  %v1372_v13 = vsel %vm13163_vm13, 0.0, %v1225_v2  ;;  %v14972_v28 = vsel %vm13174_vm14, 4294967295, %v14971_v28  ;;  %vm14993_vm13 = vcmask 1040384  }
 0x113   : > { %v11980_v62 = vpack.c.bf16 %v1565_v61, %v1415_v58  ;;  %v1115_v63 = vmax.f32 %v1055_v57, 0.0  ;;  %14973 = vst [vmem:[#allocation16_spill] sm:$0xff] %v14972_v28  ;;  %v13193_v61 = vpop.f32.mrf.mxu1  ;;  %vm15061_vm12 = vcmask 1046528   ;;  %v11404_v28 = vld [vmem:[#allocation2 + $0x30] sm:$0xff] }
 0x114   : > { %vm15063_vm11 = vmmov %vm15061_vm12  ;;  %v11333_v49 = vld [vmem:[#allocation2 + $0x30] sm:$0xff] }
 0x115   : > { %12676 = vst [vmem:[#allocation2 + $0x150] sm:$0xff] %v11980_v62   ;;  %v1147_v0 = vmin.f32 %v1115_v63, 6.0  ;;  %v11349_v63 = vld [vmem:[%s14874_s3 + $0xe8] sm:$0xff] }
 0x116   : > { %2850 = vmatpush.bf16.msrb.mxu0 %v11349_v63 }
 0x117   : > { %v1226_v3 = vrot.slane %v1147_v0, 7  ;;  %v11905_v5 = vpack.c.bf16 %v1147_v0, %v1146_v46  ;;  %v1418_v24 = vrot.slane %v1147_v0, 1  ;;  %v11373_v0 = vld [vmem:[%s14874_s3 + $0x128] sm:$0xff] }
 0x118   : > { %v1057_v11 = vpop.f32.mrf.mxu0  ;;  %3164 = vmatpush.bf16.msrb.mxu1 %v11373_v0 }
 0x119   : > { %v1227_v14 = vsel %vm14877_vm0, %v1224_v60, %v1226_v3  ;;  %12661 = vst [vmem:[#allocation2 + $0xc8] sm:$0xff] %v11905_v5   ;;  %v1058_v16 = vadd.f32 %v12981_v4, %v1057_v11  ;;  %v1419_v37 = vsel %vm14880_vm1, %v1416_v51, %v1418_v24  ;;  %v352_v51 = vadd.s32 120, %v12990_v17 }
 0x11a   : > { %v11825_v18 = vpack.c.bf16 %v1227_v14, %v1372_v13  ;;  %v353_v5 = vadd.s32 128, %v12990_v17 }
 0x11b   : > { %v1116_v21 = vmax.f32 %v1058_v16, 0.0  ;;  %1096 = vmatmul.bf16.gmra.mxu0 %v11247_v12  ;;  %v478_v59 = vand.u32 15, %v352_v51 }
 0x11c   : > { %12645 = vst [vmem:[#allocation2 + $0x38] sm:$0xff] %v11825_v18   ;;  %v11310_v22 = vld [vmem:[#allocation2 + $0x150] sm:$0xff]  ;;  %v485_v20 = vand.u32 15, %v353_v5 }
 0x11d   : > { %v1148_v23 = vmin.f32 %v1116_v21, 6.0  ;;  %2572 = vmatmul.bf16.gmra.mxu3 %v11310_v22 }
 0x11f   : > { %v1420_v29 = vrot.slane %v1148_v23, 1  ;;  %v1228_v40 = vrot.slane %v1148_v23, 7 }
 0x120   : > { %v1059_v30 = vpop.f32.mrf.mxu0  ;;  %v11287_v33 = vld [vmem:[#allocation2 + $0xc8] sm:$0xff] }
 0x121   : > { %v1421_v35 = vsel %vm14880_vm1, %v1418_v24, %v1420_v29  ;;  %v1060_v36 = vadd.f32 %v12981_v4, %v1059_v30  ;;  %2062 = vmatmul.bf16.gmra.mxu1 %v11287_v33  ;;  %v1229_v46 = vsel %vm14877_vm0, %v1226_v3, %v1228_v40  ;;  %v13211_v30 = vpop.f32.mrf.mxu1  ;;  %v14980_v33 = vmov 0 }
 0x122   : > { %v1567_v41 = vsel %vm13174_vm14, 0.0, %v1421_v35  ;;  %v1374_v56 = vsel %vm13183_vm15, 0.0, %v1229_v46  ;;  %vm13213_vm15 = vcmp.eq.s32.totalorder %v485_v20, 0  ;;  %vm14983_vm14 = vcmask 1040384  }
 0x123   : > { %v11985_v42 = vpack.c.bf16 %v1567_v41, %v1419_v37  ;;  %v1117_v43 = vmax.f32 %v1060_v36, 0.0  ;;  %v14981_v33 = vsel %vm13213_vm15, 4294967295, %v14980_v33  ;;  %v354_v37 = vadd.s32 136, %v12990_v17  ;;  %v11405_v25 = vld [vmem:[#allocation2 + $0x38] sm:$0xff] }
 0x124   : > { %14982 = vst [vmem:[#allocation19_spill] sm:$0xff] %v14981_v33  ;;  %v11334_v50 = vld [vmem:[#allocation2 + $0x38] sm:$0xff] }
 0x125   : > { %12677 = vst [vmem:[#allocation2 + $0x158] sm:$0xff] %v11985_v42   ;;  %v1149_v44 = vmin.f32 %v1117_v43, 6.0 }
 0x127   : > { %v1230_v47 = vrot.slane %v1149_v44, 7  ;;  %v11910_v48 = vpack.c.bf16 %v1149_v44, %v1148_v23  ;;  %v1422_v3 = vrot.slane %v1149_v44, 1  ;;  %v492_v44 = vand.u32 15, %v354_v37 }
 0x128   : > { %v1062_v55 = vpop.f32.mrf.mxu0 }
 0x129   : > { %v1231_v54 = vsel %vm14877_vm0, %v1228_v40, %v1230_v47  ;;  %12662 = vst [vmem:[#allocation2 + $0xd0] sm:$0xff] %v11910_v48   ;;  %v1063_v57 = vadd.f32 %v12981_v4, %v1062_v55  ;;  %vm13202_vm0 = vcmp.eq.s32.totalorder %v478_v59, 15  ;;  %v1423_v18 = vsel %vm14880_vm1, %v1420_v29, %v1422_v3 }
 0x12a   : > { %v11830_v58 = vpack.c.bf16 %v1231_v54, %v1374_v56  ;;  %v14978_v8 = vsel %vm13202_vm0, 4294967295, %v14977_v8  ;;  %v355_v56 = vadd.s32 144, %v12990_v17  ;;  %v14985_v54 = vmov 0 }
 0x12b   : > { %v1118_v60 = vmax.f32 %v1063_v57, 0.0  ;;  %14979 = vst [vmem:[#allocation18_spill] sm:$0xff] %v14978_v8 }
 0x12c   : > { %12646 = vst [vmem:[#allocation2 + $0x40] sm:$0xff] %v11830_v58   ;;  %v11311_v62 = vld [vmem:[#allocation2 + $0x158] sm:$0xff] }
 0x12d   : > { %v1150_v2 = vmin.f32 %v1118_v60, 6.0  ;;  %2577 = vmatmul.bf16.gmra.mxu3 %v11311_v62 }
 0x12f   : > { %v1424_v12 = vrot.slane %v1150_v2, 1  ;;  %v1232_v21 = vrot.slane %v1150_v2, 7 }
 0x130   : > { %v1064_v11 = vpop.f32.mrf.mxu0  ;;  %v11288_v13 = vld [vmem:[#allocation2 + $0xd0] sm:$0xff] }
 0x131   : > { %v1425_v14 = vsel %vm14880_vm1, %v1422_v3, %v1424_v12  ;;  %v1065_v16 = vadd.f32 %v12981_v4, %v1064_v11  ;;  %2067 = vmatmul.bf16.gmra.mxu1 %v11288_v13  ;;  %v1233_v35 = vsel %vm14983_vm14, %v1230_v47, %v1232_v21  ;;  %vm14984_vm1 = vmmov %vm14983_vm14  ;;  %v13223_v47 = vpop.f32.mrf.mxu3  ;;  %vm13226_vm14 = vcmp.eq.s32.totalorder %v492_v44, 15 }
 0x132   : > { %v1569_v22 = vsel %vm13202_vm0, 0.0, %v1425_v14  ;;  %v1376_v40 = vsel %vm13213_vm15, 0.0, %v1233_v35  ;;  %v14986_v54 = vsel %vm13226_vm14, 4294967295, %v14985_v54 }
 0x133   : > { %v11990_v23 = vpack.c.bf16 %v1569_v22, %v1423_v18  ;;  %v1119_v24 = vmax.f32 %v1065_v16, 0.0  ;;  %14987 = vst [vmem:[#allocation20_spill] sm:$0xff] %v14986_v54  ;;  %v14990_v16 = vmov 0  ;;  %v11406_v52 = vld [vmem:[#allocation2 + $0x40] sm:$0xff] }
 0x134   : > { %v11335_v32 = vld [vmem:[#allocation2 + $0x40] sm:$0xff] }
 0x135   : > { %12678 = vst [vmem:[#allocation2 + $0x160] sm:$0xff] %v11990_v23   ;;  %v1151_v27 = vmin.f32 %v1119_v24, 6.0 }
 0x137   : > { %v1234_v36 = vrot.slane %v1151_v27, 7  ;;  %v11915_v29 = vpack.c.bf16 %v1151_v27, %v1150_v2  ;;  %v1426_v55 = vrot.slane %v1151_v27, 1  ;;  %v499_v2 = vand.u32 15, %v355_v56 }
 0x138   : > { %v1067_v39 = vpop.f32.mrf.mxu0 }
 0x139   : > { %v1235_v41 = vsel %vm14984_vm1, %v1232_v21, %v1234_v36  ;;  %12663 = vst [vmem:[#allocation2 + $0xd8] sm:$0xff] %v11915_v29   ;;  %v1068_v42 = vadd.f32 %v12981_v4, %v1067_v39  ;;  %vm14988_vm1 = vcmask 1046528   ;;  %vm13237_vm0 = vcmp.eq.s32.totalorder %v499_v2, 0  ;;  %v13245_v23 = vpop.f32.mrf.mxu3 }
 0x13a   : > { %v11835_v43 = vpack.c.bf16 %v1235_v41, %v1376_v40  ;;  %vm14989_vm15 = vmmov %vm14988_vm1  ;;  %v14991_v16 = vsel %vm13237_vm0, 4294967295, %v14990_v16  ;;  %v11348_v41 = vld [vmem:[%s14874_s3 + $0xe0] sm:$0xff] }
 0x13b   : > { %v1120_v46 = vmax.f32 %v1068_v42, 0.0  ;;  %v1427_v0 = vsel %vm14989_vm15, %v1424_v12, %v1426_v55  ;;  %14992 = vst [vmem:[#allocation21_spill] sm:$0xff] %v14991_v16  ;;  %v356_v12 = vadd.s32 152, %v12990_v17  ;;  %vm14994_vm15 = vmmov %vm14993_vm13  ;;  %v11372_v42 = vld [vmem:[%s14874_s3 + $0x120] sm:$0xff]  ;;  %2851 = vmatpush.bf16.msrb.mxu0 %v11348_v41 }
 0x13c   : > { %12647 = vst [vmem:[#allocation2 + $0x48] sm:$0xff] %v11835_v43   ;;  %v11312_v48 = vld [vmem:[#allocation2 + $0x160] sm:$0xff]  ;;  %3165 = vmatpush.bf16.msrb.mxu1 %v11372_v42 }
 0x13d   : > { %v1152_v51 = vmin.f32 %v1120_v46, 6.0  ;;  %2582 = vmatmul.bf16.gmra.mxu3 %v11312_v48  ;;  %v506_v39 = vand.u32 15, %v356_v12  ;;  %v357_v46 = vadd.s32 160, %v12990_v17  ;;  %v14995_v48 = vmov 0 }
 0x13e   : > { %v13230_v58 = vpop.f32.mrf.mxu1 }
 0x13f   : > { %v1428_v57 = vrot.slane %v1152_v51, 1  ;;  %v1236_v3 = vrot.slane %v1152_v51, 7  ;;  %v513_v2 = vand.u32 15, %v357_v46 }
 0x140   : > { %v1069_v59 = vpop.f32.mrf.mxu0  ;;  %v11289_v60 = vld [vmem:[#allocation2 + $0xd8] sm:$0xff] }
 0x141   : > { %v1429_v62 = vsel %vm14988_vm1, %v1426_v55, %v1428_v57  ;;  %v1070_v63 = vadd.f32 %v12981_v4, %v1069_v59  ;;  %2072 = vmatmul.bf16.gmra.mxu1 %v11289_v60  ;;  %v1237_v18 = vsel %vm14993_vm13, %v1234_v36, %v1236_v3  ;;  %vm13258_vm13 = vcmp.eq.s32.totalorder %v506_v39, 15 }
 0x142   : > { %v1571_v5 = vsel %vm13226_vm14, 0.0, %v1429_v62  ;;  %v1378_v27 = vsel %vm13237_vm0, 0.0, %v1237_v18  ;;  %v14996_v48 = vsel %vm13258_vm13, 4294967295, %v14995_v48  ;;  %vm13271_vm0 = vcmp.eq.s32.totalorder %v513_v2, 0 }
 0x143   : > { %v11995_v11 = vpack.c.bf16 %v1571_v5, %v1427_v0  ;;  %v1121_v13 = vmax.f32 %v1070_v63, 0.0  ;;  %14997 = vst [vmem:[#allocation22_spill] sm:$0xff] %v14996_v48  ;;  %v14999_v18 = vmov 0 }
 0x144   : > { %v15000_v18 = vsel %vm13271_vm0, 4294967295, %v14999_v18 }
 0x145   : > { %12679 = vst [vmem:[#allocation2 + $0x168] sm:$0xff] %v11995_v11   ;;  %v1153_v14 = vmin.f32 %v1121_v13, 6.0 }
 0x146   : > { %v13243_v22 = vpop.f32.mrf.mxu1  ;;  %15001 = vst [vmem:[#allocation23_spill] sm:$0xff] %v15000_v18 }
 0x147   : > { %v1238_v20 = vrot.slane %v1153_v14, 7  ;;  %v11920_v21 = vpack.c.bf16 %v1153_v14, %v1152_v51  ;;  %v1430_v44 = vrot.slane %v1153_v14, 1 }
 0x148   : > { %v1072_v24 = vpop.f32.mrf.mxu0 }
 0x149   : > { %v1239_v35 = vsel %vm14994_vm15, %v1236_v3, %v1238_v20  ;;  %12664 = vst [vmem:[#allocation2 + $0xe0] sm:$0xff] %v11920_v21   ;;  %v1073_v29 = vadd.f32 %v12981_v4, %v1072_v24  ;;  %vm14998_vm15 = vmmov %vm14988_vm1 }
 0x14a   : > { %v11840_v37 = vpack.c.bf16 %v1239_v35, %v1378_v27  ;;  %v1431_v0 = vsel %vm14998_vm15, %v1428_v57, %v1430_v44  ;;  %v358_v57 = vadd.s32 168, %v12990_v17 }
 0x14b   : > { %v1122_v36 = vmax.f32 %v1073_v29, 0.0 }
 0x14c   : > { %12648 = vst [vmem:[#allocation2 + $0x50] sm:$0xff] %v11840_v37   ;;  %v11313_v40 = vld [vmem:[#allocation2 + $0x168] sm:$0xff]  ;;  %v520_v41 = vand.u32 15, %v358_v57 }
 0x14d   : > { %v1154_v43 = vmin.f32 %v1122_v36, 6.0  ;;  %2587 = vmatmul.bf16.gmra.mxu3 %v11313_v40 }
 0x14e   : > { %v13262_v55 = vpop.f32.mrf.mxu1 }
 0x14f   : > { %v1432_v51 = vrot.slane %v1154_v43, 1  ;;  %v1240_v3 = vrot.slane %v1154_v43, 7 }
 0x150   : > { %v1074_v56 = vpop.f32.mrf.mxu0  ;;  %v11290_v59 = vld [vmem:[#allocation2 + $0xe0] sm:$0xff]  ;;  %v13266_v63 = vpop.f32.mrf.mxu3 }
 0x151   : > { %v1433_v60 = vsel %vm14988_vm1, %v1430_v44, %v1432_v51  ;;  %v1075_v62 = vadd.f32 %v12981_v4, %v1074_v56  ;;  %2077 = vmatmul.bf16.gmra.mxu1 %v11290_v59  ;;  %vm15002_vm1 = vcmask 1040384   ;;  %v359_v56 = vadd.s32 176, %v12990_v17 }
 0x152   : > { %v1573_v5 = vsel %vm13258_vm13, 0.0, %v1433_v60  ;;  %v1241_v21 = vsel %vm15002_vm1, %v1238_v20, %v1240_v3  ;;  %vm15003_vm15 = vmmov %vm15002_vm1  ;;  %vm13286_vm1 = vcmp.eq.s32.totalorder %v520_v41, 15  ;;  %v15004_v59 = vmov 0 }
 0x153   : > { %v12000_v11 = vpack.c.bf16 %v1573_v5, %v1431_v0  ;;  %v1123_v13 = vmax.f32 %v1075_v62, 0.0  ;;  %v1380_v29 = vsel %vm13271_vm0, 0.0, %v1241_v21  ;;  %v15005_v59 = vsel %vm13286_vm1, 4294967295, %v15004_v59 }
 0x154   : > { %15006 = vst [vmem:[#allocation24_spill] sm:$0xff] %v15005_v59  ;;  %v15009_v41 = vmov 0 }
 0x155   : > { %12680 = vst [vmem:[#allocation2 + $0x170] sm:$0xff] %v12000_v11   ;;  %v1155_v14 = vmin.f32 %v1123_v13, 6.0 }
 0x156   : > { %v13277_v27 = vpop.f32.mrf.mxu1 }
 0x157   : > { %v1242_v12 = vrot.slane %v1155_v14, 7  ;;  %v11925_v24 = vpack.c.bf16 %v1155_v14, %v1154_v43  ;;  %v2261_v43 = vpop.f32.mrf.mxu2  ;;  %v1434_v46 = vrot.slane %v1155_v14, 1  ;;  %v527_v14 = vand.u32 15, %v359_v56 }
 0x158   : > { %v1077_v35 = vpop.f32.mrf.mxu0  ;;  %v13283_v36 = vpop.f32.mrf.mxu3 }
 0x159   : > { %v1243_v37 = vsel %vm15003_vm15, %v1240_v3, %v1242_v12  ;;  %12665 = vst [vmem:[#allocation2 + $0xe8] sm:$0xff] %v11925_v24   ;;  %v1078_v39 = vadd.f32 %v12981_v4, %v1077_v35  ;;  %vm15007_vm15 = vcmask 1046528  }
 0x15a   : > { %v11845_v40 = vpack.c.bf16 %v1243_v37, %v1380_v29  ;;  %vm15008_vm0 = vmmov %vm15007_vm15 }
 0x15b   : > { %v1124_v20 = vmax.f32 %v1078_v39, 0.0  ;;  %v1435_v13 = vsel %vm15008_vm0, %v1432_v51, %v1434_v46  ;;  %v2262_v39 = vadd.f32 %v2261_v43, %v13193_v61  ;;  %vm15012_vm0 = vcmask 1040384  }
 0x15c   : > { %12649 = vst [vmem:[#allocation2 + $0x58] sm:$0xff] %v11845_v40   ;;  %v11314_v42 = vld [vmem:[#allocation2 + $0x170] sm:$0xff] }
 0x15d   : > { %v1156_v44 = vmin.f32 %v1124_v20, 6.0  ;;  %2592 = vmatmul.bf16.gmra.mxu3 %v11314_v42 }
 0x15e   : > { %v13290_v62 = vpop.f32.mrf.mxu1 }
 0x15f   : > { %v1436_v60 = vrot.slane %v1156_v44, 1  ;;  %v1244_v21 = vrot.slane %v1156_v44, 7  ;;  %v2263_v29 = vpop.f32.mrf.mxu2 }
 0x160   : > { %v1079_v0 = vpop.f32.mrf.mxu0  ;;  %v11291_v2 = vld [vmem:[#allocation2 + $0xe8] sm:$0xff]  ;;  %v13294_v11 = vpop.f32.mrf.mxu3  ;;  %v2264_v40 = vadd.f32 %v2263_v29, %v13211_v30 }
 0x161   : > { %v1437_v3 = vsel %vm15007_vm15, %v1434_v46, %v1436_v60  ;;  %v1080_v5 = vadd.f32 %v12981_v4, %v1079_v0  ;;  %2082 = vmatmul.bf16.gmra.mxu1 %v11291_v2  ;;  %vm13301_vm15 = vcmp.eq.s32.totalorder %v527_v14, 0  ;;  %v1245_v51 = vsel %vm15012_vm0, %v1242_v12, %v1244_v21 }
 0x162   : > { %v1575_v24 = vsel %vm13286_vm1, 0.0, %v1437_v3  ;;  %v15010_v41 = vsel %vm13301_vm15, 4294967295, %v15009_v41  ;;  %v360_v46 = vadd.s32 184, %v12990_v17  ;;  %v13310_v2 = vadd.f32 %v13223_v47, %v2262_v39  ;;  %vm15013_vm1 = vmmov %vm15012_vm0  ;;  %v11347_v47 = vld [vmem:[%s14874_s3 + $0xd8] sm:$0xff] }
 0x163   : > { %v12005_v57 = vpack.c.bf16 %v1575_v24, %v1435_v13  ;;  %v1125_v35 = vmax.f32 %v1080_v5, 0.0  ;;  %15011 = vst [vmem:[#allocation25_spill] sm:$0xff] %v15010_v41  ;;  %v13313_v61 = vadd.f32 %v13245_v23, %v2264_v40  ;;  %v1382_v30 = vsel %vm13301_vm15, 0.0, %v1245_v51  ;;  %v11371_v23 = vld [vmem:[%s14874_s3 + $0x118] sm:$0xff]  ;;  %2852 = vmatpush.bf16.msrb.mxu0 %v11347_v47 }
 0x164   : > { %v534_v5 = vand.u32 15, %v360_v46  ;;  %3166 = vmatpush.bf16.msrb.mxu1 %v11371_v23  ;;  %vm15017_vm0 = vcmask 1046528  }
 0x165   : > { %12681 = vst [vmem:[#allocation2 + $0x178] sm:$0xff] %v12005_v57   ;;  %v1157_v37 = vmin.f32 %v1125_v35, 6.0  ;;  %v361_v57 = vadd.s32 192, %v12990_v17  ;;  %v15014_v35 = vmov 0  ;;  %vm15018_vm15 = vmmov %vm15017_vm0 }
 0x166   : > { %v13307_v56 = vpop.f32.mrf.mxu1 }
 0x167   : > { %v1246_v20 = vrot.slane %v1157_v37, 7  ;;  %v11930_v42 = vpack.c.bf16 %v1157_v37, %v1156_v44 }
 0x168   : > { %v1082_v0 = vpop.f32.mrf.mxu0  ;;  %v13319_v44 = vpop.f32.mrf.mxu3 }
 0x169   : > { %v1247_v43 = vsel %vm15013_vm1, %v1244_v21, %v1246_v20  ;;  %12666 = vst [vmem:[#allocation2 + $0xf0] sm:$0xff] %v11930_v42   ;;  %v1083_v12 = vadd.f32 %v12981_v4, %v1082_v0  ;;  %v1438_v21 = vrot.slane %v1157_v37, 1  ;;  %vm13328_vm1 = vcmp.eq.s32.totalorder %v534_v5, 15 }
 0x16a   : > { %v11850_v3 = vpack.c.bf16 %v1247_v43, %v1382_v30  ;;  %v15015_v35 = vsel %vm13328_vm1, 4294967295, %v15014_v35  ;;  %v541_v30 = vand.u32 15, %v361_v57 }
 0x16b   : > { %v1126_v13 = vmax.f32 %v1083_v12, 0.0  ;;  %15016 = vst [vmem:[#allocation26_spill] sm:$0xff] %v15015_v35  ;;  %v1439_v37 = vsel %vm15018_vm15, %v1436_v60, %v1438_v21  ;;  %v362_v60 = vadd.s32 200, %v12990_v17 }
 0x16c   : > { %12650 = vst [vmem:[#allocation2 + $0x60] sm:$0xff] %v11850_v3   ;;  %v11315_v14 = vld [vmem:[#allocation2 + $0x178] sm:$0xff]  ;;  %vm13341_vm13 = vcmp.eq.s32.totalorder %v541_v30, 0 }
 0x16d   : > { %v1158_v24 = vmin.f32 %v1126_v13, 6.0  ;;  %2597 = vmatmul.bf16.gmra.mxu3 %v11315_v14  ;;  %v15019_v14 = vmov 0 }
 0x16e   : > { %v13332_v39 = vpop.f32.mrf.mxu1  ;;  %v15020_v14 = vsel %vm13341_vm13, 4294967295, %v15019_v14 }
 0x16f   : > { %v1440_v29 = vrot.slane %v1158_v24, 1  ;;  %v1248_v43 = vrot.slane %v1158_v24, 7  ;;  %15021 = vst [vmem:[#allocation27_spill] sm:$0xff] %v15020_v14 }
 0x170   : > { %v1084_v40 = vpop.f32.mrf.mxu0  ;;  %v11292_v51 = vld [vmem:[#allocation2 + $0xf0] sm:$0xff]  ;;  %v13336_v0 = vpop.f32.mrf.mxu3 }
 0x171   : > { %v1441_v42 = vsel %vm15017_vm0, %v1438_v21, %v1440_v29  ;;  %v1085_v46 = vadd.f32 %v12981_v4, %v1084_v40  ;;  %2087 = vmatmul.bf16.gmra.mxu1 %v11292_v51  ;;  %vm15022_vm0 = vcmask 1040384  }
 0x172   : > { %v1577_v12 = vsel %vm13328_vm1, 0.0, %v1441_v42  ;;  %v1249_v4 = vsel %vm15022_vm0, %v1246_v20, %v1248_v43  ;;  %vm15023_vm15 = vmmov %vm15022_vm0  ;;  %v13355_v42 = vld [vmem:[%s14873_s2] ss:$0 sm:$0xff] }
 0x173   : > { %v12010_v3 = vpack.c.bf16 %v1577_v12, %v1439_v37  ;;  %v1127_v5 = vmax.f32 %v1085_v46, 0.0  ;;  %v1384_v40 = vsel %vm13341_vm13, 0.0, %v1249_v4  ;;  %v548_v37 = vand.u32 15, %v362_v60  ;;  %v11423_v4 = vld [vmem:[%s14874_s3 + $0x1b8] sm:$0xff] }
 0x174   : > { %3790 = vmatpush.bf16.msrb.mxu3 %v11423_v4  ;;  %v11422_v4 = vld [vmem:[%s14874_s3 + $0x1b0] sm:$0xff] }
 0x175   : > { %12682 = vst [vmem:[#allocation2 + $0x180] sm:$0xff] %v12010_v3   ;;  %v1159_v13 = vmin.f32 %v1127_v5, 6.0  ;;  %vm13366_vm0 = vcmp.eq.s32.totalorder %v548_v37, 15 }
 0x176   : > { %v13347_v21 = vpop.f32.mrf.mxu1 }
 0x177   : > { %v1250_v47 = vrot.slane %v1159_v13, 7  ;;  %v11935_v23 = vpack.c.bf16 %v1159_v13, %v1158_v24  ;;  %v1442_v5 = vrot.slane %v1159_v13, 1 }
 0x178   : > { %v1087_v57 = vpop.f32.mrf.mxu0  ;;  %v13358_v46 = vpop.f32.mrf.mxu3  ;;  %3791 = vmatpush.bf16.msrb.mxu3 %v11422_v4 }
 0x179   : > { %v1251_v51 = vsel %vm15023_vm15, %v1248_v43, %v1250_v47  ;;  %12667 = vst [vmem:[#allocation2 + $0xf8] sm:$0xff] %v11935_v23   ;;  %v1088_v20 = vadd.f32 %v13355_v42, %v1087_v57  ;;  %v363_v43 = vadd.s32 208, %v12990_v17  ;;  %v15024_v23 = vmov 0 }
 0x17a   : > { %v11855_v24 = vpack.c.bf16 %v1251_v51, %v1384_v40  ;;  %v15025_v23 = vsel %vm13366_vm0, 4294967295, %v15024_v23  ;;  %vm15027_vm15 = vcmask 1046528  }
 0x17b   : > { %v1128_v30 = vmax.f32 %v1088_v20, 0.0  ;;  %15026 = vst [vmem:[#allocation28_spill] sm:$0xff] %v15025_v23  ;;  %vm15028_vm13 = vmmov %vm15027_vm15  ;;  %v11346_v23 = vld [vmem:[%s14874_s3 + $0xd0] sm:$0xff] }
 0x17c   : > { %12651 = vst [vmem:[#allocation2 + $0x68] sm:$0xff] %v11855_v24   ;;  %v11316_v12 = vld [vmem:[#allocation2 + $0x180] sm:$0xff]  ;;  %v1443_v37 = vsel %vm15028_vm13, %v1440_v29, %v1442_v5  ;;  %vm15032_vm13 = vcmask 1040384   ;;  %2853 = vmatpush.bf16.msrb.mxu0 %v11346_v23 }
 0x17d   : > { %v13360_v3 = vmin.f32 %v1128_v30, 6.0  ;;  %2602 = vmatmul.bf16.gmra.mxu3 %v11316_v12  ;;  %v555_v30 = vand.u32 15, %v363_v43  ;;  %v11421_v43 = vld [vmem:[%s14874_s3 + $0x1a8] sm:$0xff]  ;;  %v11368_v23 = vld [vmem:[%s14874_s3 + $0x100] sm:$0xff] }
 0x17e   : > { %v13371_v60 = vpop.f32.mrf.mxu1  ;;  %3792 = vmatpush.bf16.msrb.mxu3 %v11421_v43 }
 0x17f   : > { %v14893_v57 = vrot.slane %v13360_v3, 1  ;;  %v1252_v12 = vrot.slane %v13360_v3, 7  ;;  %v15037_v35 = vrot.slane %v13360_v3, 1 }
 0x180   : > { %v1089_v40 = vpop.f32.mrf.mxu0  ;;  %v11293_v51 = vld [vmem:[#allocation2 + $0xf8] sm:$0xff]  ;;  %v13377_v24 = vpop.f32.mrf.mxu3 }
 0x181   : > { %v1445_v13 = vsel %vm15027_vm15, %v1442_v5, %v14893_v57  ;;  %v1090_v20 = vadd.f32 %v13355_v42, %v1089_v40  ;;  %2092 = vmatmul.bf16.gmra.mxu1 %v11293_v51  ;;  %vm13388_vm15 = vcmp.eq.s32.totalorder %v555_v30, 0  ;;  %v15029_v57 = vmov 0  ;;  %v11370_v5 = vld [vmem:[%s14874_s3 + $0x110] sm:$0xff] }
 0x182   : > { %v1579_v9 = vsel %vm13366_vm0, 0.0, %v1445_v13  ;;  %v15030_v57 = vsel %vm13388_vm15, 4294967295, %v15029_v57  ;;  %v1253_v29 = vsel %vm15032_vm13, %v1250_v47, %v1252_v12  ;;  %3167 = vmatpush.bf16.msrb.mxu1 %v11370_v5  ;;  %v11369_v5 = vld [vmem:[%s14874_s3 + $0x108] sm:$0xff] }
 0x183   : > { %v12015_v38 = vpack.c.bf16 %v1579_v9, %v1443_v37  ;;  %v1129_v19 = vmax.f32 %v1090_v20, 0.0  ;;  %15031 = vst [vmem:[#allocation29_spill] sm:$0xff] %v15030_v57  ;;  %v1386_v47 = vsel %vm13388_vm15, 0.0, %v1253_v29  ;;  %v11420_v29 = vld [vmem:[%s14874_s3 + $0x1a0] sm:$0xff]  ;;  %v11399_v57 = vld [vmem:[%s14874_s3 + $0x178] sm:$0xff]  ;;  %vm15036_vm15 = vcmask 1046528  }
 0x184   : > { %3793 = vmatpush.bf16.msrb.mxu3 %v11420_v29  ;;  %3476 = vmatpush.bf16.msrb.mxu2 %v11399_v57  ;;  %vm15038_vm0 = vmmov %vm15036_vm15  ;;  %v11344_v57 = vld [vmem:[%s14874_s3 + $0xc0] sm:$0xff] }
 0x185   : > { %12683 = vst [vmem:[#allocation2 + $0x188] sm:$0xff] %v12015_v38   ;;  %v13386_v40 = vmin.f32 %v1129_v19, 6.0  ;;  %v364_v38 = vadd.s32 216, %v12990_v17 }
 0x186   : > { %v13403_v51 = vpop.f32.mrf.mxu1  ;;  %3168 = vmatpush.bf16.msrb.mxu1 %v11369_v5  ;;  %v11419_v5 = vld [vmem:[%s14874_s3 + $0x198] sm:$0xff] }
 0x187   : > { %v1254_v9 = vrot.slane %v13386_v40, 7  ;;  %v11940_v19 = vpack.c.bf16 %v13386_v40, %v13360_v3  ;;  %v562_v43 = vand.u32 15, %v364_v38  ;;  %v11345_v38 = vld [vmem:[%s14874_s3 + $0xc8] sm:$0xff]  ;;  %v15039_v3 = vmov 0 }
 0x188   : > { %v1092_v13 = vpop.f32.mrf.mxu0  ;;  %v13409_v30 = vpop.f32.mrf.mxu3  ;;  %2854 = vmatpush.bf16.msrb.mxu0 %v11345_v38  ;;  %3794 = vmatpush.bf16.msrb.mxu3 %v11419_v5  ;;  %v11418_v38 = vld [vmem:[%s14874_s3 + $0x190] sm:$0xff] }
 0x189   : > { %v1255_v20 = vsel %vm15032_vm13, %v1252_v12, %v1254_v9  ;;  %12668 = vst [vmem:[#allocation2 + $0x100] sm:$0xff] %v11940_v19   ;;  %v1093_v37 = vadd.f32 %v13355_v42, %v1092_v13  ;;  %vm13433_vm13 = vcmp.eq.s32.totalorder %v562_v43, 15 }
 0x18a   : > { %v11860_v4 = vpack.c.bf16 %v1255_v20, %v1386_v47  ;;  %v1446_v47 = vrot.slane %v13386_v40, 1  ;;  %v365_v20 = vadd.s32 224, %v12990_v17  ;;  %3169 = vmatpush.bf16.msrb.mxu1 %v11368_v23 }
 0x18b   : > { %v1130_v12 = vmax.f32 %v1093_v37, 0.0  ;;  %v15033_v37 = vmov 0 }
 0x18c   : > { %12652 = vst [vmem:[#allocation2 + $0x70] sm:$0xff] %v11860_v4   ;;  %v11317_v19 = vld [vmem:[#allocation2 + $0x188] sm:$0xff]  ;;  %v15034_v37 = vsel %vm13433_vm13, 4294967295, %v15033_v37  ;;  %v1447_v41 = vsel %vm15038_vm0, %v15037_v35, %v1446_v47  ;;  %v569_v59 = vand.u32 15, %v365_v20  ;;  %2855 = vmatpush.bf16.msrb.mxu0 %v11344_v57  ;;  %3795 = vmatpush.bf16.msrb.mxu3 %v11418_v38  ;;  %v11416_v57 = vld [vmem:[%s14874_s3 + $0x180] sm:$0xff] }
 0x18d   : > { %v13420_v13 = vmin.f32 %v1130_v12, 6.0  ;;  %2607 = vmatmul.bf16.gmra.mxu3 %v11317_v19  ;;  %15035 = vst [vmem:[#allocation30_spill] sm:$0xff] %v15034_v37  ;;  %v11417_v20 = vld [vmem:[%s14874_s3 + $0x188] sm:$0xff] }
 0x18e   : > { %v13438_v4 = vpop.f32.mrf.mxu1  ;;  %vm13459_vm0 = vcmp.eq.s32.totalorder %v569_v59, 0 }
 0x18f   : > { %v1448_v40 = vrot.slane %v13420_v13, 1  ;;  %v1256_v18 = vrot.slane %v13420_v13, 7  ;;  %v15040_v3 = vsel %vm13459_vm0, 4294967295, %v15039_v3 }
 0x190   : > { %v1094_v29 = vpop.f32.mrf.mxu0  ;;  %v11294_v12 = vld [vmem:[#allocation2 + $0x100] sm:$0xff]  ;;  %v13445_v43 = vpop.f32.mrf.mxu3  ;;  %15041 = vst [vmem:[#allocation31_spill] sm:$0xff] %v15040_v3  ;;  %3796 = vmatpush.bf16.msrb.mxu3 %v11417_v20  ;;  %v367_v3 = vadd.s32 240, %v12990_v17 }
 0x191   : > { %v1449_v19 = vsel %vm15036_vm15, %v1446_v47, %v1448_v40  ;;  %v1095_v14 = vadd.f32 %v13355_v42, %v1094_v29  ;;  %2097 = vmatmul.bf16.gmra.mxu1 %v11294_v12  ;;  %vm15042_vm15 = vcmask 1040384  }
 0x192   : > { %v1581_v48 = vsel %vm13433_vm13, 0.0, %v1449_v19  ;;  %v1257_v47 = vsel %vm15042_vm15, %v1254_v9, %v1256_v18  ;;  %vm15043_vm13 = vmmov %vm15042_vm15  ;;  %vm15047_vm15 = vcmask 1046528  }
 0x193   : > { %v12020_v23 = vpack.c.bf16 %v1581_v48, %v1447_v41  ;;  %v1131_v5 = vmax.f32 %v1095_v14, 0.0  ;;  %v366_v48 = vadd.s32 232, %v12990_v17  ;;  %v1388_v59 = vsel %vm13459_vm0, 0.0, %v1257_v47  ;;  %vm15048_vm0 = vmmov %vm15047_vm15 }
 0x194   : > { %3797 = vmatpush.bf16.msrb.mxu3 %v11416_v57  ;;  %v373_v57 = vand.u32 15, %v12990_v17 }
 0x195   : > { %12684 = vst [vmem:[#allocation2 + $0x190] sm:$0xff] %v12020_v23   ;;  %v1163_v35 = vmin.f32 %v1131_v5, 6.0  ;;  %v576_v23 = vand.u32 15, %v366_v48 }
 0x196   : > { %v13469_v41 = vpop.f32.mrf.mxu1 }
 0x197   : > { %v1258_v29 = vrot.slane %v1163_v35, 7  ;;  %v11945_v12 = vpack.c.bf16 %v1163_v35, %v13420_v13 }
 0x198   : > { %v1097_v14 = vpop.f32.mrf.mxu0  ;;  %v13478_v13 = vpop.f32.mrf.mxu3 }
 0x199   : > { %v1259_v19 = vsel %vm15043_vm13, %v1256_v18, %v1258_v29  ;;  %12669 = vst [vmem:[#allocation2 + $0x108] sm:$0xff] %v11945_v12   ;;  %v1098_v9 = vadd.f32 %v13355_v42, %v1097_v14  ;;  %v1450_v18 = vrot.slane %v1163_v35, 1  ;;  %vm13481_vm13 = vcmp.eq.s32.totalorder %v576_v23, 15 }
 0x19a   : > { %v11865_v38 = vpack.c.bf16 %v1259_v19, %v1388_v59  ;;  %v15044_v12 = vmov 0  ;;  %v368_v14 = vadd.s32 248, %v12990_v17  ;;  %v11398_v17 = vld [vmem:[%s14874_s3 + $0x170] sm:$0xff] }
 0x19b   : > { %v1132_v5 = vmax.f32 %v1098_v9, 0.0  ;;  %v15045_v12 = vsel %vm13481_vm13, 4294967295, %v15044_v12  ;;  %v583_v9 = vand.u32 15, %v367_v3  ;;  %v1451_v35 = vsel %vm15048_vm0, %v1448_v40, %v1450_v18  ;;  %3477 = vmatpush.bf16.msrb.mxu2 %v11398_v17  ;;  %v11352_v17 = vld [vmem:[#allocation2 + $0x98] sm:$0xff] }
 0x19c   : > { %12653 = vst [vmem:[#allocation2 + $0x78] sm:$0xff] %v11865_v38   ;;  %v11318_v37 = vld [vmem:[#allocation2 + $0x190] sm:$0xff]  ;;  %v590_v54 = vand.u32 15, %v368_v14  ;;  %v15049_v3 = vmov 0  ;;  %vm13501_vm0 = vcmp.eq.s32.totalorder %v373_v57, 0  ;;  %v15053_v40 = vmov 0 }
 0x19d   : > { %v1164_v47 = vmin.f32 %v1132_v5, 6.0  ;;  %2612 = vmatmul.bf16.gmra.mxu3 %v11318_v37  ;;  %15046 = vst [vmem:[#allocation32_spill] sm:$0xff] %v15045_v12  ;;  %vm13496_vm1 = vcmp.eq.s32.totalorder %v583_v9, 0  ;;  %v15054_v40 = vsel %vm13501_vm0, 4294967295, %v15053_v40  ;;  %v15059_v9 = vrot.slane %v12987_v15, 7 }
 0x19e   : > { %v13486_v59 = vpop.f32.mrf.mxu1  ;;  %v15050_v3 = vsel %vm13496_vm1, 4294967295, %v15049_v3  ;;  %15055 = vst [vmem:[#allocation34_spill] sm:$0xff] %v15054_v40 }
 0x19f   : > { %v1452_v20 = vrot.slane %v1164_v47, 1  ;;  %v1260_v38 = vrot.slane %v1164_v47, 7  ;;  %15051 = vst [vmem:[#allocation33_spill] sm:$0xff] %v15050_v3  ;;  %v11332_v3 = vld [vmem:[#allocation2 + $0x28] sm:$0xff] }
 0x1a0   : > { %v1099_v19 = vpop.f32.mrf.mxu0  ;;  %v11295_v48 = vld [vmem:[#allocation2 + $0x108] sm:$0xff]  ;;  %v13494_v8 = vpop.f32.mrf.mxu3 }
 0x1a1   : > { %v1453_v16 = vsel %vm15047_vm15, %v1450_v18, %v1452_v20  ;;  %v1100_v5 = vadd.f32 %v13355_v42, %v1099_v19  ;;  %2102 = vmatmul.bf16.gmra.mxu1 %v11295_v48  ;;  %vm15052_vm15 = vcmask 1040384  }
 0x1a2   : > { %v1583_v37 = vsel %vm13481_vm13, 0.0, %v1453_v16  ;;  %v1261_v45 = vsel %vm15052_vm15, %v1258_v29, %v1260_v38  ;;  %vm13508_vm13 = vcmp.eq.s32.totalorder %v590_v54, 15  ;;  %v15056_v16 = vmov 0  ;;  %vm15060_vm14 = vmmov %vm15052_vm15 }
 0x1a3   : > { %v12025_v23 = vpack.c.bf16 %v1583_v37, %v1451_v35  ;;  %v1133_v33 = vmax.f32 %v1100_v5, 0.0  ;;  %v15057_v16 = vsel %vm13508_vm13, 4294967295, %v15056_v16  ;;  %v15062_v35 = vrot.slane %v12987_v15, 1 }
 0x1a4   : > { %15058 = vst [vmem:[#allocation35_spill] sm:$0xff] %v15057_v16  ;;  %v11403_v16 = vld [vmem:[#allocation2 + $0x28] sm:$0xff] }
 0x1a5   : > { %12685 = vst [vmem:[#allocation2 + $0x198] sm:$0xff] %v12025_v23   ;;  %v1165_v42 = vmin.f32 %v1133_v33, 6.0  ;;  %v1390_v33 = vsel %vm13496_vm1, 0.0, %v1261_v45 }
 0x1a6   : > { %v13512_v48 = vpop.f32.mrf.mxu1 }
 0x1a7   : > { %v1167_v18 = vrot.slane %v1165_v42, 7  ;;  %v1454_v14 = vrot.slane %v1165_v42, 1  ;;  %v11950_v19 = vpack.c.bf16 %v1165_v42, %v1164_v47 }
 0x1a9   : > { %v1262_v29 = vsel %vm15052_vm15, %v1260_v38, %v1167_v18  ;;  %v1295_v5 = vsel %vm15060_vm14, %v1167_v18, %v15059_v9  ;;  %v1455_v54 = vsel %vm15061_vm12, %v1452_v20, %v1454_v14  ;;  %v1489_v37 = vsel %vm15063_vm11, %v1454_v14, %v15062_v35  ;;  %12670 = vst [vmem:[#allocation2 + $0x110] sm:$0xff] %v11950_v19   ;;  %v13529_v20 = vpop.f32.mrf.mxu3  ;;  %v11353_v9 = vld [vmem:[#allocation2 + $0xa0] sm:$0xff]  ;;  %v11329_v35 = vld [vmem:[#allocation2 + $0x10] sm:$0xff]  ;;  %vm15084_vm11 = vmmov %vm15060_vm14 }
 0x1aa   : > { %v1360_v47 = vsel %vm13501_vm0, 0.0, %v1295_v5  ;;  %v1585_v45 = vsel %vm13508_vm13, 0.0, %v1489_v37  ;;  %v11870_v57 = vpack.c.bf16 %v1262_v29, %v1390_v33  ;;  %v11397_v37 = vld [vmem:[%s14874_s3 + $0x168] sm:$0xff]  ;;  %vm15085_vm14 = vmmov %vm15061_vm12 }
 0x1ab   : > { %v11795_v38 = vpack.c.bf16 %v13001_v26, %v1360_v47  ;;  %v12030_v23 = vpack.c.bf16 %v1585_v45, %v1455_v54  ;;  %v11400_v26 = vld [vmem:[#allocation2 + $0x10] sm:$0xff]  ;;  %3478 = vmatpush.bf16.msrb.mxu2 %v11397_v37  ;;  %v11447_v37 = vld [vmem:[%s14874_s3 + $0x1f8] sm:$0xff]  ;;  %vm15087_vm15 = vmmov %vm15084_vm11 }
 0x1ac   : > { %12654 = vst [vmem:[#allocation2 + $0x80] sm:$0xff] %v11870_v57   ;;  %v11319_v42 = vld [vmem:[#allocation2 + $0x198] sm:$0xff]  ;;  %v11258_v54 = vld [vmem:[#allocation2 + $0x10] sm:$0xff]  ;;  %4104 = vmatpush.bf16.msra.mxu0 %v11447_v37 }
 0x1ad   : > { %12639 = vst [vmem:[#allocation2 + $0x8] sm:$0xff] %v11795_v38   ;;  %2617 = vmatmul.bf16.gmra.mxu3 %v11319_v42  ;;  %v11401_v57 = vld [vmem:[#allocation2 + $0x18] sm:$0xff] }
 0x1ae   : > { %12686 = vst [vmem:[#allocation2 + $0x1a0] sm:$0xff] %v12030_v23   ;;  %v13531_v15 = vpop.f32.mrf.mxu1  ;;  %v11354_v23 = vld [vmem:[#allocation2 + $0xa8] sm:$0xff]  ;;  %v11259_v42 = vld [vmem:[#allocation2 + $0x18] sm:$0xff] }
 0x1af   : > { %v11356_v37 = vld [vmem:[#allocation2 + $0xb8] sm:$0xff] }
 0x1b1   : > { %3170 = vmatmul.bf16.vlgmr.msrb.gmra.mxu1 %v11352_v17  ;;  %v13535_v33 = vpop.f32.mrf.mxu3  ;;  %v11330_v17 = vld [vmem:[#allocation2 + $0x18] sm:$0xff] }
 0x1b4   : > { %v11257_v18 = vld [vmem:[#allocation2 + $0x8] sm:$0xff] }
 0x1b5   : > { %v11328_v14 = vld [vmem:[#allocation2 + $0x8] sm:$0xff]  ;;  %2265 = vmatmul.bf16.gmra.mxu2 %v11257_v18 }
 0x1b6   : > { %2856 = vmatmul.bf16.vlgmr.msrb.gmra.mxu0 %v11328_v14  ;;  %v13533_v19 = vpop.f32.mrf.mxu1 }
 0x1b9   : > { %v13539_v5 = vpop.f32.mrf.mxu3 }
 0x1bd   : > { %3798 = vmatmul.bf16.vlgmr.msrb.gmra.mxu3 %v11400_v26  ;;  %v11402_v26 = vld [vmem:[#allocation2 + $0x20] sm:$0xff] }
 0x1be   : > { %v13537_v29 = vpop.f32.mrf.mxu1 }
 0x1c1   : > { %3175 = vmatmul.bf16.gmra.mxu1 %v11353_v9  ;;  %v13546_v45 = vpop.f32.mrf.mxu3 }
 0x1c5   : > { %2270 = vmatmul.bf16.gmra.mxu2 %v11258_v54 }
 0x1c6   : > { %2861 = vmatmul.bf16.gmra.mxu0 %v11329_v35  ;;  %v13544_v47 = vpop.f32.mrf.mxu1  ;;  %v11355_v35 = vld [vmem:[#allocation2 + $0xb0] sm:$0xff] }
 0x1c9   : > { %v13550_v18 = vpop.f32.mrf.mxu3 }
 0x1cd   : > { %3803 = vmatmul.bf16.gmra.mxu3 %v11401_v57  ;;  %v11260_v57 = vld [vmem:[#allocation2 + $0x20] sm:$0xff] }
 0x1ce   : > { %v13548_v38 = vpop.f32.mrf.mxu1 }
 0x1d1   : > { %3180 = vmatmul.bf16.gmra.mxu1 %v11354_v23  ;;  %v13556_v54 = vpop.f32.mrf.mxu3  ;;  %v11331_v23 = vld [vmem:[#allocation2 + $0x20] sm:$0xff] }
 0x1d5   : > { %2275 = vmatmul.bf16.gmra.mxu2 %v11259_v42  ;;  %v11396_v42 = vld [vmem:[%s14874_s3 + $0x160] sm:$0xff] }
 0x1d6   : > { %2866 = vmatmul.bf16.gmra.mxu0 %v11330_v17  ;;  %v13552_v14 = vpop.f32.mrf.mxu1  ;;  %v11471_v17 = vld [vmem:[%s14874_s3 + $0x238] sm:$0xff]  ;;  %3479 = vmatpush.bf16.msrb.mxu2 %v11396_v42 }
 0x1d7   : > { %4418 = vmatpush.bf16.msra.mxu1 %v11471_v17  ;;  %v11357_v17 = vld [vmem:[#allocation2 + $0xc0] sm:$0xff] }
 0x1dd   : > { %3808 = vmatmul.bf16.gmra.mxu3 %v11402_v26 }
 0x1de   : > { %v13554_v9 = vpop.f32.mrf.mxu1 }
 0x1e1   : > { %3185 = vmatmul.bf16.gmra.mxu1 %v11355_v35  ;;  %v13569_v35 = vpop.f32.mrf.mxu3 }
 0x1e5   : > { %2280 = vmatmul.bf16.gmra.mxu2 %v11260_v57 }
 0x1e6   : > { %2871 = vmatmul.bf16.gmra.mxu0 %v11331_v23  ;;  %v13567_v26 = vpop.f32.mrf.mxu1  ;;  %v11261_v23 = vld [vmem:[#allocation2 + $0x28] sm:$0xff] }
 0x1e9   : > { %v13573_v57 = vpop.f32.mrf.mxu3 }
 0x1ed   : > { %3813 = vmatmul.bf16.gmra.mxu3 %v11403_v16  ;;  %v11446_v16 = vld [vmem:[%s14874_s3 + $0x1f0] sm:$0xff] }
 0x1ee   : > { %v13571_v40 = vpop.f32.mrf.mxu1  ;;  %4105 = vmatpush.bf16.msra.mxu0 %v11446_v16  ;;  %v11358_v16 = vld [vmem:[#allocation2 + $0xc8] sm:$0xff] }
 0x1f1   : > { %3190 = vmatmul.bf16.gmra.mxu1 %v11356_v37  ;;  %v13577_v1 = vpop.f32.mrf.mxu3  ;;  %v11262_v37 = vld [vmem:[#allocation2 + $0x30] sm:$0xff] }
 0x1f5   : > { %2285 = vmatmul.bf16.gmra.mxu2 %v11261_v23 }
 0x1f6   : > { %2876 = vmatmul.bf16.gmra.mxu0 %v11332_v3  ;;  %v13575_v12 = vpop.f32.mrf.mxu1  ;;  %v11395_v3 = vld [vmem:[%s14874_s3 + $0x158] sm:$0xff] }
 0x1f7   : > { %3480 = vmatpush.bf16.msrb.mxu2 %v11395_v3 }
 0x1fd   : > { %3818 = vmatmul.bf16.gmra.mxu3 %v11404_v28  ;;  %v11470_v28 = vld [vmem:[%s14874_s3 + $0x230] sm:$0xff] }
 0x1fe   : > { %v13579_v42 = vpop.f32.mrf.mxu1  ;;  %4419 = vmatpush.bf16.msra.mxu1 %v11470_v28  ;;  %v11359_v28 = vld [vmem:[#allocation2 + $0xd0] sm:$0xff] }
 0x1ff   : > { %15064 = vst [vmem:[#allocation36_spill] sm:$0xff] %v13579_v42  ;;  %v11408_v42 = vld [vmem:[#allocation2 + $0x50] sm:$0xff] }
 0x201   : > { %3195 = vmatmul.bf16.gmra.mxu1 %v11357_v17  ;;  %v13592_v17 = vpop.f32.mrf.mxu3 }
 0x205   : > { %2290 = vmatmul.bf16.gmra.mxu2 %v11262_v37  ;;  %v11263_v37 = vld [vmem:[#allocation2 + $0x38] sm:$0xff] }
 0x206   : > { %2881 = vmatmul.bf16.gmra.mxu0 %v11333_v49  ;;  %v13590_v23 = vpop.f32.mrf.mxu1 }
 0x207   : > { %15065 = vst [vmem:[#allocation37_spill] sm:$0xff] %v13590_v23 }
 0x209   : > { %v13596_v49 = vpop.f32.mrf.mxu3 }
 0x20d   : > { %3823 = vmatmul.bf16.gmra.mxu3 %v11405_v25  ;;  %v11264_v25 = vld [vmem:[#allocation2 + $0x40] sm:$0xff] }
 0x20e   : > { %v13594_v7 = vpop.f32.mrf.mxu1 }
 0x20f   : > { %15066 = vst [vmem:[#allocation38_spill] sm:$0xff] %v13594_v7  ;;  %v11336_v7 = vld [vmem:[#allocation2 + $0x48] sm:$0xff] }
 0x211   : > { %3200 = vmatmul.bf16.gmra.mxu1 %v11358_v16  ;;  %v13600_v6 = vpop.f32.mrf.mxu3  ;;  %v11445_v16 = vld [vmem:[%s14874_s3 + $0x1e8] sm:$0xff] }
 0x212   : > { %4106 = vmatpush.bf16.msra.mxu0 %v11445_v16 }
 0x215   : > { %2295 = vmatmul.bf16.gmra.mxu2 %v11263_v37 }
 0x216   : > { %2886 = vmatmul.bf16.gmra.mxu0 %v11334_v50  ;;  %v13598_v31 = vpop.f32.mrf.mxu1  ;;  %v11394_v50 = vld [vmem:[%s14874_s3 + $0x150] sm:$0xff] }
 0x217   : > { %15067 = vst [vmem:[#allocation39_spill] sm:$0xff] %v13598_v31  ;;  %3481 = vmatpush.bf16.msrb.mxu2 %v11394_v50  ;;  %v11265_v31 = vld [vmem:[#allocation2 + $0x48] sm:$0xff] }
 0x219   : > { %v13607_v10 = vpop.f32.mrf.mxu3 }
 0x21a   : > { %15069 = vst [vmem:[#allocation41_spill] sm:$0xff] %v13607_v10 }
 0x21d   : > { %3828 = vmatmul.bf16.gmra.mxu3 %v11406_v52  ;;  %v11469_v52 = vld [vmem:[%s14874_s3 + $0x228] sm:$0xff] }
 0x21e   : > { %v13602_v3 = vpop.f32.mrf.mxu1  ;;  %4420 = vmatpush.bf16.msra.mxu1 %v11469_v52 }
 0x21f   : > { %15068 = vst [vmem:[#allocation40_spill] sm:$0xff] %v13602_v3 }
 0x221   : > { %3205 = vmatmul.bf16.gmra.mxu1 %v11359_v28  ;;  %v11407_v28 = vld [vmem:[#allocation2 + $0x48] sm:$0xff]  ;;  %v13617_v34 = vpop.f32.mrf.mxu3 }
 0x222   : > { %15071 = vst [vmem:[#allocation43_spill] sm:$0xff] %v13617_v34 }
 0x225   : > { %2300 = vmatmul.bf16.gmra.mxu2 %v11264_v25  ;;  %v11360_v25 = vld [vmem:[#allocation2 + $0xd8] sm:$0xff] }
 0x226   : > { %2891 = vmatmul.bf16.gmra.mxu0 %v11335_v32  ;;  %v13615_v37 = vpop.f32.mrf.mxu1 }
 0x227   : > { %15070 = vst [vmem:[#allocation42_spill] sm:$0xff] %v13615_v37 }
 0x229   : > { %v13622_v50 = vpop.f32.mrf.mxu3 }
 0x22a   : > { %15073 = vst [vmem:[#allocation45_spill] sm:$0xff] %v13622_v50  ;;  %v11337_v50 = vld [vmem:[#allocation2 + $0x50] sm:$0xff] }
 0x22d   : > { %3833 = vmatmul.bf16.gmra.mxu3 %v11407_v28 }
 0x22e   : > { %v3171_v53 = vpop.f32.mrf.mxu1 }
 0x231   : > { %3210 = vmatmul.bf16.gmra.mxu1 %v11360_v25 }
 0x233   : > { %v2857_v32 = vpop.f32.mrf.mxu0 }
 0x234   : > { %v2937_v3 = vadd.f32 %v2857_v32, %v13310_v2  ;;  %v11361_v32 = vld [vmem:[#allocation2 + $0xe0] sm:$0xff] }
 0x235   : > { %2305 = vmatmul.bf16.gmra.mxu2 %v11265_v31 }
 0x236   : > { %2896 = vmatmul.bf16.gmra.mxu0 %v11336_v7  ;;  %v13620_v23 = vadd.f32 %v3171_v53, %v2937_v3  ;;  %v3173_v37 = vpop.f32.mrf.mxu1  ;;  %v13629_v7 = vpop.f32.mrf.mxu3 }
 0x238   : > { %15072 = vst [vmem:[#allocation44_spill] sm:$0xff] %v13620_v23  ;;  %v2266_v16 = vpop.f32.mrf.mxu2  ;;  %v11266_v23 = vld [vmem:[#allocation2 + $0x50] sm:$0xff] }
 0x239   : > { %v2267_v34 = vadd.f32 %v2266_v16, %v13230_v58 }
 0x23b   : > { %v2859_v52 = vpop.f32.mrf.mxu0  ;;  %v2625_v53 = vadd.f32 %v13266_v63, %v2267_v34  ;;  %v11468_v34 = vld [vmem:[%s14874_s3 + $0x220] sm:$0xff] }
 0x23c   : > { %v2938_v28 = vadd.f32 %v2859_v52, %v13313_v61  ;;  %v11444_v61 = vld [vmem:[%s14874_s3 + $0x1e0] sm:$0xff]  ;;  %4421 = vmatpush.bf16.msra.mxu1 %v11468_v34  ;;  %v11267_v34 = vld [vmem:[#allocation2 + $0x58] sm:$0xff] }
 0x23d   : > { %3838 = vmatmul.bf16.gmra.mxu3 %v11408_v42  ;;  %v11393_v42 = vld [vmem:[%s14874_s3 + $0x148] sm:$0xff]  ;;  %4107 = vmatpush.bf16.msra.mxu0 %v11444_v61 }
 0x23e   : > { %v13626_v25 = vadd.f32 %v3173_v37, %v2938_v28  ;;  %v3176_v2 = vpop.f32.mrf.mxu1  ;;  %3482 = vmatpush.bf16.msrb.mxu2 %v11393_v42 }
 0x240   : > { %v2268_v10 = vpop.f32.mrf.mxu2 }
 0x241   : > { %3215 = vmatmul.bf16.gmra.mxu1 %v11361_v32  ;;  %v2269_v58 = vadd.f32 %v2268_v10, %v13243_v22 }
 0x243   : > { %v2862_v31 = vpop.f32.mrf.mxu0  ;;  %v2626_v52 = vadd.f32 %v13283_v36, %v2269_v58  ;;  %v11338_v36 = vld [vmem:[#allocation2 + $0x58] sm:$0xff] }
 0x244   : > { %v2939_v3 = vadd.f32 %v2862_v31, %v2625_v53 }
 0x245   : > { %2310 = vmatmul.bf16.gmra.mxu2 %v11266_v23  ;;  %v11409_v23 = vld [vmem:[#allocation2 + $0x58] sm:$0xff] }
 0x246   : > { %2901 = vmatmul.bf16.gmra.mxu0 %v11337_v50  ;;  %v13641_v63 = vadd.f32 %v3176_v2, %v2939_v3  ;;  %v3178_v37 = vpop.f32.mrf.mxu1  ;;  %v13644_v50 = vpop.f32.mrf.mxu3  ;;  %v11362_v2 = vld [vmem:[#allocation2 + $0xe8] sm:$0xff] }
 0x248   : > { %v2271_v16 = vpop.f32.mrf.mxu2 }
 0x249   : > { %v2272_v28 = vadd.f32 %v2271_v16, %v13262_v55 }
 0x24b   : > { %v2864_v10 = vpop.f32.mrf.mxu0  ;;  %v2627_v3 = vadd.f32 %v13294_v11, %v2272_v28 }
 0x24c   : > { %v2940_v22 = vadd.f32 %v2864_v10, %v2626_v52 }
 0x24d   : > { %3843 = vmatmul.bf16.gmra.mxu3 %v11409_v23 }
 0x24e   : > { %v13647_v32 = vadd.f32 %v3178_v37, %v2940_v22  ;;  %v3181_v53 = vpop.f32.mrf.mxu1  ;;  %v13653_v16 = vpop.f32.mrf.mxu3 }
 0x250   : > { %v2273_v31 = vpop.f32.mrf.mxu2 }
 0x251   : > { %3220 = vmatmul.bf16.gmra.mxu1 %v11362_v2  ;;  %v2274_v58 = vadd.f32 %v2273_v31, %v13277_v27  ;;  %v11410_v2 = vld [vmem:[#allocation2 + $0x60] sm:$0xff]  ;;  %v11363_v27 = vld [vmem:[#allocation2 + $0xf0] sm:$0xff] }
 0x253   : > { %v2867_v61 = vpop.f32.mrf.mxu0  ;;  %v2628_v10 = vadd.f32 %v13319_v44, %v2274_v58  ;;  %v11339_v44 = vld [vmem:[#allocation2 + $0x60] sm:$0xff]  ;;  %v11443_v58 = vld [vmem:[%s14874_s3 + $0x1d8] sm:$0xff] }
 0x254   : > { %v2941_v42 = vadd.f32 %v2867_v61, %v2627_v3  ;;  %4108 = vmatpush.bf16.msra.mxu0 %v11443_v58 }
 0x255   : > { %2315 = vmatmul.bf16.gmra.mxu2 %v11267_v34 }
 0x256   : > { %2906 = vmatmul.bf16.gmra.mxu0 %v11338_v36  ;;  %v13651_v52 = vadd.f32 %v3181_v53, %v2941_v42  ;;  %v3183_v55 = vpop.f32.mrf.mxu1  ;;  %v13659_v61 = vpop.f32.mrf.mxu3  ;;  %v11268_v36 = vld [vmem:[#allocation2 + $0x60] sm:$0xff] }
 0x258   : > { %v2276_v37 = vpop.f32.mrf.mxu2 }
 0x259   : > { %v2277_v11 = vadd.f32 %v2276_v37, %v13290_v62 }
 0x25b   : > { %v2869_v22 = vpop.f32.mrf.mxu0  ;;  %v2629_v53 = vadd.f32 %v13336_v0, %v2277_v11  ;;  %v11467_v0 = vld [vmem:[%s14874_s3 + $0x218] sm:$0xff] }
 0x25c   : > { %v2942_v23 = vadd.f32 %v2869_v22, %v2628_v10  ;;  %4422 = vmatpush.bf16.msra.mxu1 %v11467_v0 }
 0x25d   : > { %3848 = vmatmul.bf16.gmra.mxu3 %v11410_v2 }
 0x25e   : > { %v13657_v28 = vadd.f32 %v3183_v55, %v2942_v23  ;;  %v3186_v3 = vpop.f32.mrf.mxu1  ;;  %v11392_v55 = vld [vmem:[%s14874_s3 + $0x140] sm:$0xff]  ;;  %v13675_v2 = vpop.f32.mrf.mxu3 }
 0x25f   : > { %3483 = vmatpush.bf16.msrb.mxu2 %v11392_v55  ;;  %v11269_v55 = vld [vmem:[#allocation2 + $0x68] sm:$0xff] }
 0x260   : > { %v2278_v31 = vpop.f32.mrf.mxu2 }
 0x261   : > { %3225 = vmatmul.bf16.gmra.mxu1 %v11363_v27  ;;  %v2279_v62 = vadd.f32 %v2278_v31, %v13307_v56  ;;  %v11411_v27 = vld [vmem:[#allocation2 + $0x68] sm:$0xff] }
 0x263   : > { %v2872_v42 = vpop.f32.mrf.mxu0  ;;  %v2630_v23 = vadd.f32 %v13358_v46, %v2279_v62  ;;  %v11340_v46 = vld [vmem:[#allocation2 + $0x68] sm:$0xff] }
 0x264   : > { %v2943_v34 = vadd.f32 %v2872_v42, %v2629_v53 }
 0x265   : > { %2320 = vmatmul.bf16.gmra.mxu2 %v11268_v36 }
 0x266   : > { %2911 = vmatmul.bf16.gmra.mxu0 %v11339_v44  ;;  %v13672_v37 = vadd.f32 %v3186_v3, %v2943_v34  ;;  %v3188_v10 = vpop.f32.mrf.mxu1  ;;  %v11364_v3 = vld [vmem:[#allocation2 + $0xf8] sm:$0xff]  ;;  %v13681_v62 = vpop.f32.mrf.mxu3 }
 0x268   : > { %v2281_v22 = vpop.f32.mrf.mxu2 }
 0x269   : > { %v2282_v31 = vadd.f32 %v2281_v22, %v13332_v39 }
 0x26b   : > { %v2874_v56 = vpop.f32.mrf.mxu0  ;;  %v2631_v36 = vadd.f32 %v13377_v24, %v2282_v31 }
 0x26c   : > { %v2944_v11 = vadd.f32 %v2874_v56, %v2630_v23 }
 0x26d   : > { %3853 = vmatmul.bf16.gmra.mxu3 %v11411_v27  ;;  %v11412_v27 = vld [vmem:[#allocation2 + $0x70] sm:$0xff] }
 0x26e   : > { %v13678_v53 = vadd.f32 %v3188_v10, %v2944_v11  ;;  %v3191_v42 = vpop.f32.mrf.mxu1 }
 0x270   : > { %v2283_v34 = vpop.f32.mrf.mxu2 }
 0x271   : > { %3230 = vmatmul.bf16.gmra.mxu1 %v11364_v3  ;;  %v2284_v0 = vadd.f32 %v2283_v34, %v13347_v21  ;;  %v11365_v21 = vld [vmem:[#allocation2 + $0x100] sm:$0xff] }
 0x273   : > { %v2877_v44 = vpop.f32.mrf.mxu0  ;;  %v2632_v23 = vadd.f32 %v13409_v30, %v2284_v0  ;;  %v11341_v30 = vld [vmem:[#allocation2 + $0x70] sm:$0xff] }
 0x274   : > { %v2945_v58 = vadd.f32 %v2877_v44, %v2631_v36  ;;  %v13690_v36 = vpop.f32.mrf.mxu3  ;;  %v11466_v0 = vld [vmem:[%s14874_s3 + $0x210] sm:$0xff] }
 0x275   : > { %2325 = vmatmul.bf16.gmra.mxu2 %v11269_v55  ;;  %v11270_v55 = vld [vmem:[#allocation2 + $0x70] sm:$0xff]  ;;  %4423 = vmatpush.bf16.msra.mxu1 %v11466_v0 }
 0x276   : > { %2916 = vmatmul.bf16.gmra.mxu0 %v11340_v46  ;;  %v13684_v39 = vadd.f32 %v3191_v42, %v2945_v58  ;;  %v3193_v10 = vpop.f32.mrf.mxu1  ;;  %v11442_v46 = vld [vmem:[%s14874_s3 + $0x1d0] sm:$0xff] }
 0x277   : > { %4109 = vmatpush.bf16.msra.mxu0 %v11442_v46 }
 0x278   : > { %v2286_v22 = vpop.f32.mrf.mxu2 }
 0x279   : > { %v2287_v24 = vadd.f32 %v2286_v22, %v13371_v60 }
 0x27b   : > { %v2879_v56 = vpop.f32.mrf.mxu0  ;;  %v2633_v42 = vadd.f32 %v13445_v43, %v2287_v24  ;;  %v11495_v43 = vld [vmem:[%s14872_s1 + $0x78] sm:$0xff] }
 0x27c   : > { %v2946_v11 = vadd.f32 %v2879_v56, %v2632_v23  ;;  %5061 = vmatpush.bf16.msra.mxu2 %v11495_v43  ;;  %v13705_v56 = vpop.f32.mrf.mxu3  ;;  %v11271_v43 = vld [vmem:[#allocation2 + $0x78] sm:$0xff] }
 0x27d   : > { %3858 = vmatmul.bf16.gmra.mxu3 %v11412_v27 }
 0x27e   : > { %v13688_v31 = vadd.f32 %v3193_v10, %v2946_v11  ;;  %v3196_v3 = vpop.f32.mrf.mxu1  ;;  %v11465_v11 = vld [vmem:[%s14874_s3 + $0x208] sm:$0xff] }
 0x27f   : > { %4424 = vmatpush.bf16.msra.mxu1 %v11465_v11 }
 0x280   : > { %v2288_v34 = vpop.f32.mrf.mxu2 }
 0x281   : > { %3235 = vmatmul.bf16.gmra.mxu1 %v11365_v21  ;;  %v2289_v60 = vadd.f32 %v2288_v34, %v13403_v51  ;;  %v11413_v21 = vld [vmem:[#allocation2 + $0x78] sm:$0xff]  ;;  %v11441_v34 = vld [vmem:[%s14874_s3 + $0x1c8] sm:$0xff] }
 0x282   : > { %4110 = vmatpush.bf16.msra.mxu0 %v11441_v34 }
 0x283   : > { %v2882_v44 = vpop.f32.mrf.mxu0  ;;  %v2634_v51 = vadd.f32 %v13478_v13, %v2289_v60 }
 0x284   : > { %v2947_v58 = vadd.f32 %v2882_v44, %v2633_v42  ;;  %v11464_v42 = vld [vmem:[%s14874_s3 + $0x200] sm:$0xff]  ;;  %v13724_v60 = vpop.f32.mrf.mxu3 }
 0x285   : > { %2330 = vmatmul.bf16.gmra.mxu2 %v11270_v55  ;;  %4425 = vmatpush.bf16.msra.mxu1 %v11464_v42 }
 0x286   : > { %2921 = vmatmul.bf16.gmra.mxu0 %v11341_v30  ;;  %v13703_v10 = vadd.f32 %v3196_v3, %v2947_v58  ;;  %v3198_v22 = vpop.f32.mrf.mxu1  ;;  %v11366_v58 = vld [vmem:[#allocation2 + $0x108] sm:$0xff] }
 0x288   : > { %v2291_v23 = vpop.f32.mrf.mxu2 }
 0x289   : > { %v2292_v3 = vadd.f32 %v2291_v23, %v13438_v4  ;;  %v11440_v4 = vld [vmem:[%s14874_s3 + $0x1c0] sm:$0xff]  ;;  %v11342_v23 = vld [vmem:[#allocation2 + $0x78] sm:$0xff] }
 0x28a   : > { %4111 = vmatpush.bf16.msra.mxu0 %v11440_v4 }
 0x28b   : > { %v2884_v27 = vpop.f32.mrf.mxu0  ;;  %v2635_v30 = vadd.f32 %v13494_v8, %v2292_v3  ;;  %v11414_v3 = vld [vmem:[#allocation2 + $0x80] sm:$0xff] }
 0x28c   : > { %v2948_v24 = vadd.f32 %v2884_v27, %v2634_v51  ;;  %v13730_v34 = vpop.f32.mrf.mxu3 }
 0x28d   : > { %3863 = vmatmul.bf16.gmra.mxu3 %v11413_v21 }
 0x28e   : > { %v13718_v13 = vadd.f32 %v3198_v22, %v2948_v24  ;;  %v3201_v44 = vpop.f32.mrf.mxu1 }
 0x290   : > { %v2293_v55 = vpop.f32.mrf.mxu2 }
 0x291   : > { %3240 = vmatmul.bf16.gmra.mxu1 %v11366_v58  ;;  %v2294_v22 = vadd.f32 %v2293_v55, %v13469_v41  ;;  %v11367_v41 = vld [vmem:[#allocation2 + $0x110] sm:$0xff] }
 0x293   : > { %v2887_v46 = vpop.f32.mrf.mxu0  ;;  %v2636_v8 = vadd.f32 %v13529_v20, %v2294_v22  ;;  %v11376_v20 = vld [vmem:[#allocation2 + $0x128] sm:$0xff] }
 0x294   : > { %v2949_v0 = vadd.f32 %v2887_v46, %v2635_v30 }
 0x295   : > { %2335 = vmatmul.bf16.gmra.mxu2 %v11271_v43 }
 0x296   : > { %2926 = vmatmul.bf16.gmra.mxu0 %v11342_v23  ;;  %v13727_v51 = vadd.f32 %v3201_v44, %v2949_v0  ;;  %v3203_v11 = vpop.f32.mrf.mxu1  ;;  %v11343_v0 = vld [vmem:[#allocation2 + $0x80] sm:$0xff] }
 0x298   : > { %v2296_v27 = vpop.f32.mrf.mxu2 }
 0x299   : > { %v2297_v42 = vadd.f32 %v2296_v27, %v13486_v59  ;;  %v11494_v59 = vld [vmem:[%s14872_s1 + $0x70] sm:$0xff] }
 0x29a   : > { %5062 = vmatpush.bf16.msra.mxu2 %v11494_v59 }
 0x29b   : > { %v2889_v24 = vpop.f32.mrf.mxu0  ;;  %v2637_v44 = vadd.f32 %v13535_v33, %v2297_v42 }
 0x29c   : > { %v2950_v21 = vadd.f32 %v2889_v24, %v2636_v8 }
 0x29d   : > { %3868 = vmatmul.bf16.gmra.mxu3 %v11414_v3  ;;  %v11448_v3 = vld [vmem:[#allocation2 + $0x130] sm:$0xff] }
 0x29e   : > { %v13733_v58 = vadd.f32 %v3203_v11, %v2950_v21  ;;  %v3206_v30 = vpop.f32.mrf.mxu1 }
 0x2a0   : > { %v2298_v55 = vpop.f32.mrf.mxu2 }
 0x2a1   : > { %3245 = vmatmul.bf16.gmra.mxu1 %v11367_v41  ;;  %v2299_v43 = vadd.f32 %v2298_v55, %v13512_v48 }
 0x2a3   : > { %v2892_v4 = vpop.f32.mrf.mxu0  ;;  %v2638_v27 = vadd.f32 %v13539_v5, %v2299_v43 }
 0x2a4   : > { %v2951_v46 = vadd.f32 %v2892_v4, %v2637_v44  ;;  %v11377_v44 = vld [vmem:[#allocation2 + $0x130] sm:$0xff]  ;;  %v11424_v4 = vld [vmem:[#allocation2 + $0xa0] sm:$0xff] }
 0x2a5   : > { %3484 = vmatmul.bf16.vlgmr.msrb.gmra.mxu2 %v11376_v20 }
 0x2a6   : > { %2931 = vmatmul.bf16.gmra.mxu0 %v11343_v0  ;;  %v13740_v23 = vadd.f32 %v3206_v30, %v2951_v46  ;;  %v3208_v22 = vpop.f32.mrf.mxu1 }
 0x2a8   : > { %v2301_v11 = vpop.f32.mrf.mxu2 }
 0x2a9   : > { %v2302_v24 = vadd.f32 %v2301_v11, %v13531_v15 }
 0x2ab   : > { %v2894_v33 = vpop.f32.mrf.mxu0  ;;  %v2639_v41 = vadd.f32 %v13546_v45, %v2302_v24 }
 0x2ac   : > { %v2952_v8 = vadd.f32 %v2894_v33, %v2638_v27  ;;  %v11449_v27 = vld [vmem:[#allocation2 + $0x138] sm:$0xff] }
 0x2ae   : > { %v13744_v21 = vadd.f32 %v3208_v22, %v2952_v8  ;;  %v3211_v48 = vpop.f32.mrf.mxu1 }
 0x2b0   : > { %v2303_v42 = vpop.f32.mrf.mxu2 }
 0x2b1   : > { %4426 = vmatmul.bf16.vlgmr.msra.gmra.mxu1 %v11448_v3  ;;  %v2304_v46 = vadd.f32 %v2303_v42, %v13533_v19  ;;  %v11425_v3 = vld [vmem:[#allocation2 + $0xa8] sm:$0xff] }
 0x2b3   : > { %v2897_v55 = vpop.f32.mrf.mxu0  ;;  %v2640_v20 = vadd.f32 %v13550_v18, %v2304_v46 }
 0x2b4   : > { %v2953_v30 = vadd.f32 %v2897_v55, %v2639_v41 }
 0x2b5   : > { %3489 = vmatmul.bf16.gmra.mxu2 %v11377_v44 }
 0x2b6   : > { %4112 = vmatmul.bf16.vlgmr.msra.gmra.mxu0 %v11424_v4  ;;  %v13748_v5 = vadd.f32 %v3211_v48, %v2953_v30  ;;  %v3213_v0 = vpop.f32.mrf.mxu1  ;;  %v11378_v48 = vld [vmem:[#allocation2 + $0x138] sm:$0xff] }
 0x2b8   : > { %v2306_v15 = vpop.f32.mrf.mxu2 }
 0x2b9   : > { %v2307_v22 = vadd.f32 %v2306_v15, %v13537_v29  ;;  %v11493_v29 = vld [vmem:[%s14872_s1 + $0x68] sm:$0xff] }
 0x2ba   : > { %5063 = vmatpush.bf16.msra.mxu2 %v11493_v29 }
 0x2bb   : > { %v2899_v43 = vpop.f32.mrf.mxu0  ;;  %v2641_v19 = vadd.f32 %v13556_v54, %v2307_v22  ;;  %v11379_v22 = vld [vmem:[#allocation2 + $0x140] sm:$0xff] }
 0x2bc   : > { %v2954_v59 = vadd.f32 %v2899_v43, %v2640_v20 }
 0x2be   : > { %v13752_v11 = vadd.f32 %v3213_v0, %v2954_v59  ;;  %v3216_v45 = vpop.f32.mrf.mxu1  ;;  %v11450_v0 = vld [vmem:[#allocation2 + $0x140] sm:$0xff] }
 0x2c0   : > { %v2308_v33 = vpop.f32.mrf.mxu2 }
 0x2c1   : > { %4431 = vmatmul.bf16.gmra.mxu1 %v11449_v27  ;;  %v2309_v42 = vadd.f32 %v2308_v33, %v13544_v47 }
 0x2c3   : > { %v2902_v8 = vpop.f32.mrf.mxu0  ;;  %v2642_v30 = vadd.f32 %v13569_v35, %v2309_v42  ;;  %v11451_v42 = vld [vmem:[#allocation2 + $0x148] sm:$0xff] }
 0x2c4   : > { %v2955_v24 = vadd.f32 %v2902_v8, %v2641_v19 }
 0x2c5   : > { %3494 = vmatmul.bf16.gmra.mxu2 %v11378_v48 }
 0x2c6   : > { %4117 = vmatmul.bf16.gmra.mxu0 %v11425_v3  ;;  %v13759_v18 = vadd.f32 %v3216_v45, %v2955_v24  ;;  %v3218_v41 = vpop.f32.mrf.mxu1  ;;  %v11426_v45 = vld [vmem:[#allocation2 + $0xb0] sm:$0xff] }
 0x2c8   : > { %v2311_v55 = vpop.f32.mrf.mxu2 }
 0x2c9   : > { %v2312_v4 = vadd.f32 %v2311_v55, %v13548_v38 }
 0x2cb   : > { %v2904_v54 = vpop.f32.mrf.mxu0  ;;  %v2643_v20 = vadd.f32 %v13573_v57, %v2312_v4 }
 0x2cc   : > { %v2956_v44 = vadd.f32 %v2904_v54, %v2642_v30  ;;  %v11380_v30 = vld [vmem:[#allocation2 + $0x148] sm:$0xff]  ;;  %v11427_v54 = vld [vmem:[#allocation2 + $0xb8] sm:$0xff] }
 0x2ce   : > { %v13763_v46 = vadd.f32 %v3218_v41, %v2956_v44  ;;  %v3221_v47 = vpop.f32.mrf.mxu1 }
 0x2d0   : > { %v2313_v15 = vpop.f32.mrf.mxu2 }
 0x2d1   : > { %4436 = vmatmul.bf16.gmra.mxu1 %v11450_v0  ;;  %v2314_v27 = vadd.f32 %v2313_v15, %v13552_v14 }
 0x2d3   : > { %v2907_v43 = vpop.f32.mrf.mxu0  ;;  %v2644_v19 = vadd.f32 %v13577_v1, %v2314_v27  ;;  %v11492_v1 = vld [vmem:[%s14872_s1 + $0x60] sm:$0xff] }
 0x2d4   : > { %v2957_v59 = vadd.f32 %v2907_v43, %v2643_v20  ;;  %5064 = vmatpush.bf16.msra.mxu2 %v11492_v1 }
 0x2d5   : > { %3499 = vmatmul.bf16.gmra.mxu2 %v11379_v22 }
 0x2d6   : > { %4122 = vmatmul.bf16.gmra.mxu0 %v11426_v45  ;;  %v13767_v35 = vadd.f32 %v3221_v47, %v2957_v59  ;;  %v3223_v33 = vpop.f32.mrf.mxu1  ;;  %v11452_v59 = vld [vmem:[#allocation2 + $0x150] sm:$0xff] }
 0x2d8   : > { %v2316_v38 = vpop.f32.mrf.mxu2 }
 0x2d9   : > { %v2317_v48 = vadd.f32 %v2316_v38, %v13554_v9  ;;  %v11381_v38 = vld [vmem:[#allocation2 + $0x150] sm:$0xff] }
 0x2db   : > { %v2909_v8 = vpop.f32.mrf.mxu0  ;;  %v2645_v14 = vadd.f32 %v13592_v17, %v2317_v48  ;;  %v15074_v48 = vld [vmem:[#allocation41_spill] sm:$0xff] }
 0x2dc   : > { %v2958_v24 = vadd.f32 %v2909_v8, %v2644_v19  ;;  %v11428_v19 = vld [vmem:[#allocation2 + $0xc0] sm:$0xff] }
 0x2de   : > { %v13771_v3 = vadd.f32 %v3223_v33, %v2958_v24  ;;  %v3226_v57 = vpop.f32.mrf.mxu1 }
 0x2e0   : > { %v2318_v29 = vpop.f32.mrf.mxu2 }
 0x2e1   : > { %4441 = vmatmul.bf16.gmra.mxu1 %v11451_v42  ;;  %v2319_v44 = vadd.f32 %v2318_v29, %v13567_v26 }
 0x2e3   : > { %v2912_v41 = vpop.f32.mrf.mxu0  ;;  %v2646_v0 = vadd.f32 %v13596_v49, %v2319_v44  ;;  %v15076_v44 = vld [vmem:[#allocation43_spill] sm:$0xff] }
 0x2e4   : > { %v2959_v55 = vadd.f32 %v2912_v41, %v2645_v14  ;;  %v15075_v14 = vld [vmem:[#allocation36_spill] sm:$0xff] }
 0x2e5   : > { %3504 = vmatmul.bf16.gmra.mxu2 %v11380_v30  ;;  %v11453_v30 = vld [vmem:[#allocation2 + $0x158] sm:$0xff] }
 0x2e6   : > { %4127 = vmatmul.bf16.gmra.mxu0 %v11427_v54  ;;  %v13778_v9 = vadd.f32 %v3226_v57, %v2959_v55  ;;  %v3228_v4 = vpop.f32.mrf.mxu1 }
 0x2e8   : > { %v2321_v47 = vpop.f32.mrf.mxu2 }
 0x2e9   : > { %v2322_v20 = vadd.f32 %v2321_v47, %v13571_v40  ;;  %v11382_v47 = vld [vmem:[#allocation2 + $0x158] sm:$0xff] }
 0x2eb   : > { %v2914_v17 = vpop.f32.mrf.mxu0  ;;  %v2647_v45 = vadd.f32 %v13600_v6, %v2322_v20  ;;  %v11491_v20 = vld [vmem:[%s14872_s1 + $0x58] sm:$0xff] }
 0x2ec   : > { %v2960_v15 = vadd.f32 %v2914_v17, %v2646_v0  ;;  %v11429_v0 = vld [vmem:[#allocation2 + $0xc8] sm:$0xff]  ;;  %v15077_v17 = vld [vmem:[#allocation37_spill] sm:$0xff]  ;;  %5065 = vmatpush.bf16.msra.mxu2 %v11491_v20 }
 0x2ee   : > { %v13782_v43 = vadd.f32 %v3228_v4, %v2960_v15  ;;  %v3231_v26 = vpop.f32.mrf.mxu1 }
 0x2f0   : > { %v2323_v22 = vpop.f32.mrf.mxu2 }
 0x2f1   : > { %4446 = vmatmul.bf16.gmra.mxu1 %v11452_v59  ;;  %v2324_v8 = vadd.f32 %v2323_v22, %v13575_v12 }
 0x2f3   : > { %v2917_v27 = vpop.f32.mrf.mxu0  ;;  %v2648_v57 = vadd.f32 %v15074_v48, %v2324_v8  ;;  %v11454_v48 = vld [vmem:[#allocation2 + $0x160] sm:$0xff] }
 0x2f4   : > { %v2961_v33 = vadd.f32 %v2917_v27, %v2647_v45  ;;  %v15078_v45 = vld [vmem:[#allocation45_spill] sm:$0xff] }
 0x2f5   : > { %3509 = vmatmul.bf16.gmra.mxu2 %v11381_v38 }
 0x2f6   : > { %4132 = vmatmul.bf16.gmra.mxu0 %v11428_v19  ;;  %v13786_v49 = vadd.f32 %v3231_v26, %v2961_v33  ;;  %v3233_v24 = vpop.f32.mrf.mxu1  ;;  %v15079_v19 = vld [vmem:[#allocation38_spill] sm:$0xff] }
 0x2f8   : > { %v2326_v40 = vpop.f32.mrf.mxu2 }
 0x2f9   : > { %v2327_v41 = vadd.f32 %v2326_v40, %v15075_v14 }
 0x2fb   : > { %v2919_v42 = vpop.f32.mrf.mxu0  ;;  %v2649_v12 = vadd.f32 %v15076_v44, %v2327_v41  ;;  %v11383_v41 = vld [vmem:[#allocation2 + $0x160] sm:$0xff] }
 0x2fc   : > { %v2962_v29 = vadd.f32 %v2919_v42, %v2648_v57 }
 0x2fe   : > { %v13790_v55 = vadd.f32 %v3233_v24, %v2962_v29  ;;  %v3236_v6 = vpop.f32.mrf.mxu1 }
 0x300   : > { %v2328_v54 = vpop.f32.mrf.mxu2 }
 0x301   : > { %4451 = vmatmul.bf16.gmra.mxu1 %v11453_v30  ;;  %v2329_v15 = vadd.f32 %v2328_v54, %v15077_v17  ;;  %v15080_v30 = vld [vmem:[#allocation39_spill] sm:$0xff]  ;;  %v15081_v17 = vld [vmem:[#allocation40_spill] sm:$0xff] }
 0x303   : > { %v2922_v1 = vpop.f32.mrf.mxu0  ;;  %v2650_v27 = vadd.f32 %v15078_v45, %v2329_v15 }
 0x304   : > { %v2963_v4 = vadd.f32 %v2922_v1, %v2649_v12 }
 0x305   : > { %3514 = vmatmul.bf16.gmra.mxu2 %v11382_v47 }
 0x306   : > { %4137 = vmatmul.bf16.gmra.mxu0 %v11429_v0  ;;  %v13797_v26 = vadd.f32 %v3236_v6, %v2963_v4  ;;  %v3238_v59 = vpop.f32.mrf.mxu1  ;;  %v11430_v6 = vld [vmem:[#allocation2 + $0xd0] sm:$0xff] }
 0x308   : > { %v2331_v22 = vpop.f32.mrf.mxu2 }
 0x309   : > { %v2332_v8 = vadd.f32 %v2331_v22, %v15079_v19  ;;  %v11384_v19 = vld [vmem:[#allocation2 + $0x168] sm:$0xff] }
 0x30b   : > { %v2924_v33 = vpop.f32.mrf.mxu0  ;;  %v2651_v42 = vadd.f32 %v13629_v7, %v2332_v8  ;;  %v15082_v8 = vld [vmem:[#allocation42_spill] sm:$0xff] }
 0x30c   : > { %v2964_v38 = vadd.f32 %v2924_v33, %v2650_v27  ;;  %v11543_v27 = vld [vmem:[%s14874_s3 + $0x2b8] sm:$0xff] }
 0x30d   : > { %5938 = vmatpush.bf16.msra.mxu3 %v11543_v27 }
 0x30e   : > { %v13801_v24 = vadd.f32 %v3238_v59, %v2964_v38  ;;  %v3241_v40 = vpop.f32.mrf.mxu1  ;;  %v11455_v59 = vld [vmem:[#allocation2 + $0x168] sm:$0xff] }
 0x310   : > { %v2333_v57 = vpop.f32.mrf.mxu2 }
 0x311   : > { %4456 = vmatmul.bf16.gmra.mxu1 %v11454_v48  ;;  %v2334_v54 = vadd.f32 %v2333_v57, %v15080_v30 }
 0x313   : > { %v2927_v29 = vpop.f32.mrf.mxu0  ;;  %v2652_v4 = vadd.f32 %v13644_v50, %v2334_v54  ;;  %v11431_v50 = vld [vmem:[#allocation2 + $0xd8] sm:$0xff]  ;;  %v13822_v54 = vpop.f32.mrf.mxu3 }
 0x314   : > { %v2965_v14 = vadd.f32 %v2927_v29, %v2651_v42 }
 0x315   : > { %3519 = vmatmul.bf16.gmra.mxu2 %v11383_v41  ;;  %v15083_v41 = vld [vmem:[#allocation44_spill] sm:$0xff] }
 0x316   : > { %4142 = vmatmul.bf16.gmra.mxu0 %v11430_v6  ;;  %v13805_v44 = vadd.f32 %v3241_v40, %v2965_v14  ;;  %v3243_v12 = vpop.f32.mrf.mxu1 }
 0x318   : > { %v2336_v1 = vpop.f32.mrf.mxu2 }
 0x319   : > { %v2337_v15 = vadd.f32 %v2336_v1, %v15081_v17  ;;  %v11456_v1 = vld [vmem:[#allocation2 + $0x170] sm:$0xff] }
 0x31b   : > { %v2929_v47 = vpop.f32.mrf.mxu0  ;;  %v2653_v45 = vadd.f32 %v13653_v16, %v2337_v15  ;;  %v13831_v15 = vld [vmem:[%s14875_s4] ss:$0 sm:$0xff] }
 0x31c   : > { %v2966_v0 = vadd.f32 %v2929_v47, %v2652_v4 }
 0x31e   : > { %v13809_v20 = vadd.f32 %v3243_v12, %v2966_v0  ;;  %v3246_v7 = vpop.f32.mrf.mxu1  ;;  %v11490_v0 = vld [vmem:[%s14872_s1 + $0x50] sm:$0xff] }
 0x31f   : > { %5066 = vmatpush.bf16.msra.mxu2 %v11490_v0 }
 0x320   : > { %v2338_v22 = vpop.f32.mrf.mxu2 }
 0x321   : > { %4461 = vmatmul.bf16.gmra.mxu1 %v11455_v59  ;;  %v2339_v40 = vadd.f32 %v2338_v22, %v15082_v8  ;;  %v11432_v59 = vld [vmem:[#allocation2 + $0xe0] sm:$0xff] }
 0x323   : > { %v2932_v33 = vpop.f32.mrf.mxu0  ;;  %v2654_v29 = vadd.f32 %v13659_v61, %v2339_v40 }
 0x324   : > { %v2967_v38 = vadd.f32 %v2932_v33, %v2653_v45  ;;  %v13835_v33 = vpop.f32.mrf.mxu3 }
 0x325   : > { %3524 = vmatmul.bf16.gmra.mxu2 %v11384_v19 }
 0x326   : > { %4147 = vmatmul.bf16.gmra.mxu0 %v11431_v50  ;;  %v13816_v48 = vadd.f32 %v3246_v7, %v2967_v38  ;;  %v3248_v57 = vpop.f32.mrf.mxu1  ;;  %v11385_v7 = vld [vmem:[#allocation2 + $0x170] sm:$0xff] }
 0x328   : > { %v3485_v42 = vpop.f32.mrf.mxu2 }
 0x329   : > { %v3565_v6 = vadd.f32 %v3485_v42, %v15083_v41 }
 0x32b   : > { %v2934_v16 = vpop.f32.mrf.mxu0  ;;  %v3879_v47 = vadd.f32 %v13675_v2, %v3565_v6  ;;  %v12033_v6 = vld [vmem:[#allocation3 + $0x30] sm:$0xff]  }
 0x32c   : > { %v2968_v14 = vadd.f32 %v2934_v16, %v2654_v29 }
 0x32e   : > { %v13820_v30 = vadd.f32 %v3248_v57, %v2968_v14  ;;  %v4427_v12 = vpop.f32.mrf.mxu1  ;;  %v11457_v14 = vld [vmem:[#allocation2 + $0x178] sm:$0xff] }
 0x330   : > { %v3487_v4 = vpop.f32.mrf.mxu2 }
 0x331   : > { %4466 = vmatmul.bf16.gmra.mxu1 %v11456_v1  ;;  %v3566_v22 = vadd.f32 %v3487_v4, %v13626_v25 }
 0x333   : > { %v4113_v17 = vpop.f32.mrf.mxu0  ;;  %v3880_v50 = vadd.f32 %v13681_v62, %v3566_v22  ;;  %v11542_v62 = vld [vmem:[%s14874_s3 + $0x2b0] sm:$0xff]  ;;  %v12035_v22 = vunpack.c.h.bf16 %v12033_v6 }
 0x334   : > { %v4193_v61 = vadd.f32 %v4113_v17, %v3879_v47  ;;  %v13844_v47 = vpop.f32.mrf.mxu3  ;;  %5939 = vmatpush.bf16.msra.mxu3 %v11542_v62  ;;  %v11458_v62 = vld [vmem:[#allocation2 + $0x180] sm:$0xff] }
 0x335   : > { %3529 = vmatmul.bf16.gmra.mxu2 %v11385_v7  ;;  %v11433_v7 = vld [vmem:[#allocation2 + $0xe8] sm:$0xff] }
 0x336   : > { %v4507_v45 = vadd.f32 %v4427_v12, %v4193_v61  ;;  %4152 = vmatmul.bf16.gmra.mxu0 %v11432_v59  ;;  %v4429_v2 = vpop.f32.mrf.mxu1  ;;  %v11386_v61 = vld [vmem:[#allocation2 + $0x178] sm:$0xff]  ;;  %v12034_v59 = vunpack.c.l.bf16 %v12033_v6 }
 0x338   : > { %v4543_v27 = vadd.f32 %v13831_v15, %v4507_v45  ;;  %v3490_v38 = vpop.f32.mrf.mxu2 }
 0x339   : > { %v3567_v42 = vadd.f32 %v3490_v38, %v13641_v63 }
 0x33a   : > { %v4575_v19 = vmax.f32 %v4543_v27, 0.0 }
 0x33b   : > { %v4115_v8 = vpop.f32.mrf.mxu0  ;;  %v3881_v4 = vadd.f32 %v13690_v36, %v3567_v42 }
 0x33c   : > { %v4194_v40 = vadd.f32 %v4115_v8, %v3880_v50  ;;  %v4607_v57 = vmin.f32 %v4575_v19, 6.0 }
 0x33e   : > { %v4508_v29 = vadd.f32 %v4429_v2, %v4194_v40  ;;  %v4432_v16 = vpop.f32.mrf.mxu1  ;;  %v4671_v12 = vpack.c.bf16 %v4607_v57, %v4607_v57 }
 0x340   : > { %v4544_v25 = vadd.f32 %v13831_v15, %v4508_v29  ;;  %v3492_v41 = vpop.f32.mrf.mxu2  ;;  %v4735_v45 = vunpack.c.l.bf16 %v4671_v12  ;;  %v13849_v12 = vpop.f32.mrf.mxu3 }
 0x341   : > { %4471 = vmatmul.bf16.gmra.mxu1 %v11457_v14  ;;  %v3568_v27 = vadd.f32 %v3492_v41, %v13647_v32 }
 0x342   : > { %v4576_v1 = vmax.f32 %v4544_v25, 0.0  ;;  %v4767_v40 = vadd.f32 %v12034_v59, %v4735_v45 }
 0x343   : > { %v4118_v0 = vpop.f32.mrf.mxu0  ;;  %v3882_v29 = vadd.f32 %v13705_v56, %v3568_v27 }
 0x344   : > { %v4608_v63 = vmin.f32 %v4576_v1, 6.0  ;;  %v4195_v17 = vadd.f32 %v4118_v0, %v3881_v4 }
 0x345   : > { %3534 = vmatmul.bf16.gmra.mxu2 %v11386_v61 }
 0x346   : > { %v4672_v2 = vpack.c.bf16 %v4608_v63, %v4608_v63  ;;  %v4509_v38 = vadd.f32 %v4432_v16, %v4195_v17  ;;  %4157 = vmatmul.bf16.gmra.mxu0 %v11433_v7  ;;  %v4434_v36 = vpop.f32.mrf.mxu1  ;;  %v12687_v63 = vld [vmem:[#allocation3] sm:$0xff]   ;;  %v11489_v7 = vld [vmem:[%s14872_s1 + $0x48] sm:$0xff] }
 0x347   : > { %5067 = vmatpush.bf16.msra.mxu2 %v11489_v7  ;;  %v12038_v27 = vunpack.c.l.bf16 %v12687_v63  ;;  %v12688_v7 = vld [vmem:[#allocation3 + $0x58] sm:$0xff]  }
 0x348   : > { %v4736_v19 = vunpack.c.l.bf16 %v4672_v2  ;;  %v4545_v50 = vadd.f32 %v13831_v15, %v4509_v38  ;;  %v3495_v8 = vpop.f32.mrf.mxu2  ;;  %v11434_v2 = vld [vmem:[#allocation2 + $0xf0] sm:$0xff]  ;;  %v12039_v38 = vunpack.c.h.bf16 %v12687_v63 }
 0x349   : > { %v3569_v16 = vadd.f32 %v3495_v8, %v13651_v52  ;;  %v11387_v52 = vld [vmem:[#allocation2 + $0x180] sm:$0xff] }
 0x34a   : > { %v4768_v57 = vadd.f32 %v12035_v22, %v4736_v19  ;;  %v4577_v42 = vmax.f32 %v4545_v50, 0.0 }
 0x34b   : > { %v4120_v25 = vpop.f32.mrf.mxu0  ;;  %v3883_v56 = vadd.f32 %v13724_v60, %v3569_v16  ;;  %v13858_v60 = vpop.f32.mrf.mxu3 }
 0x34c   : > { %v12099_v14 = vpack.c.bf16 %v4768_v57, %v4767_v40  ;;  %v4196_v6 = vadd.f32 %v4120_v25, %v3882_v29  ;;  %v4609_v32 = vmin.f32 %v4577_v42, 6.0 }
 0x34e   : > { %12100 = vst [vmem:[#allocation3 + $0x30] sm:$0xff] %v12099_v14   ;;  %v4510_v41 = vadd.f32 %v4434_v36, %v4196_v6  ;;  %v4437_v1 = vpop.f32.mrf.mxu1  ;;  %v4673_v17 = vpack.c.bf16 %v4609_v32, %v4609_v32 }
 0x350   : > { %v4546_v4 = vadd.f32 %v13831_v15, %v4510_v41  ;;  %v3497_v0 = vpop.f32.mrf.mxu2  ;;  %v4737_v36 = vunpack.c.l.bf16 %v4673_v17  ;;  %v11459_v17 = vld [vmem:[#allocation2 + $0x188] sm:$0xff] }
 0x351   : > { %4476 = vmatmul.bf16.gmra.mxu1 %v11458_v62  ;;  %v3570_v50 = vadd.f32 %v3497_v0, %v13657_v28 }
 0x352   : > { %v4578_v61 = vmax.f32 %v4546_v4, 0.0  ;;  %v4769_v25 = vadd.f32 %v12038_v27, %v4737_v36  ;;  %v11388_v27 = vld [vmem:[#allocation2 + $0x188] sm:$0xff]  ;;  %v12042_v36 = vunpack.c.l.bf16 %v12688_v7 }
 0x353   : > { %v4123_v59 = vpop.f32.mrf.mxu0  ;;  %v3884_v32 = vadd.f32 %v13730_v34, %v3570_v50 }
 0x354   : > { %v4610_v22 = vmin.f32 %v4578_v61, 6.0  ;;  %v4197_v45 = vadd.f32 %v4123_v59, %v3883_v56  ;;  %v13864_v61 = vpop.f32.mrf.mxu3 }
 0x355   : > { %3539 = vmatmul.bf16.gmra.mxu2 %v11387_v52 }
 0x356   : > { %v4674_v19 = vpack.c.bf16 %v4610_v22, %v4610_v22  ;;  %v4511_v8 = vadd.f32 %v4437_v1, %v4197_v45  ;;  %4162 = vmatmul.bf16.gmra.mxu0 %v11434_v2  ;;  %v4439_v40 = vpop.f32.mrf.mxu1  ;;  %v11541_v45 = vld [vmem:[%s14874_s3 + $0x2a8] sm:$0xff] }
 0x357   : > { %5940 = vmatpush.bf16.msra.mxu3 %v11541_v45  ;;  %v11488_v45 = vld [vmem:[%s14872_s1 + $0x40] sm:$0xff] }
 0x358   : > { %v4738_v57 = vunpack.c.l.bf16 %v4674_v19  ;;  %v4547_v42 = vadd.f32 %v13831_v15, %v4511_v8  ;;  %v3500_v29 = vpop.f32.mrf.mxu2  ;;  %v12043_v19 = vunpack.c.h.bf16 %v12688_v7  ;;  %5068 = vmatpush.bf16.msra.mxu2 %v11488_v45 }
 0x359   : > { %v3571_v1 = vadd.f32 %v3500_v29, %v13672_v37 }
 0x35a   : > { %v4770_v14 = vadd.f32 %v12039_v38, %v4738_v57  ;;  %v4579_v6 = vmax.f32 %v4547_v42, 0.0  ;;  %v11435_v38 = vld [vmem:[#allocation2 + $0xf8] sm:$0xff] }
 0x35b   : > { %v4125_v16 = vpop.f32.mrf.mxu0  ;;  %v3885_v34 = vadd.f32 %v13822_v54, %v3571_v1 }
 0x35c   : > { %v12104_v41 = vpack.c.bf16 %v4770_v14, %v4769_v25  ;;  %v4198_v4 = vadd.f32 %v4125_v16, %v3884_v32  ;;  %v4611_v28 = vmin.f32 %v4579_v6, 6.0 }
 0x35e   : > { %12702 = vst [vmem:[#allocation3] sm:$0xff] %v12104_v41   ;;  %v4512_v62 = vadd.f32 %v4439_v40, %v4198_v4  ;;  %v4442_v0 = vpop.f32.mrf.mxu1  ;;  %v4675_v59 = vpack.c.bf16 %v4611_v28, %v4611_v28  ;;  %v13873_v41 = vpop.f32.mrf.mxu3 }
 0x360   : > { %v4548_v63 = vadd.f32 %v13831_v15, %v4512_v62  ;;  %v3502_v56 = vpop.f32.mrf.mxu2  ;;  %v4739_v50 = vunpack.c.l.bf16 %v4675_v59  ;;  %v12689_v59 = vld [vmem:[#allocation3 + $0x18] sm:$0xff]  }
 0x361   : > { %4481 = vmatmul.bf16.gmra.mxu1 %v11459_v17  ;;  %v3572_v40 = vadd.f32 %v3502_v56, %v13678_v53  ;;  %v11460_v56 = vld [vmem:[#allocation2 + $0x190] sm:$0xff] }
 0x362   : > { %v4580_v22 = vmax.f32 %v4548_v63, 0.0  ;;  %v4771_v14 = vadd.f32 %v12042_v36, %v4739_v50  ;;  %v12046_v36 = vunpack.c.l.bf16 %v12689_v59 }
 0x363   : > { %v4128_v52 = vpop.f32.mrf.mxu0  ;;  %v3886_v16 = vadd.f32 %v13835_v33, %v3572_v40 }
 0x364   : > { %v4612_v37 = vmin.f32 %v4580_v22, 6.0  ;;  %v4199_v2 = vadd.f32 %v4128_v52, %v3885_v34 }
 0x365   : > { %3544 = vmatmul.bf16.gmra.mxu2 %v11388_v27  ;;  %v11436_v27 = vld [vmem:[#allocation2 + $0x100] sm:$0xff] }
 0x366   : > { %v4676_v8 = vpack.c.bf16 %v4612_v37, %v4612_v37  ;;  %v4513_v57 = vadd.f32 %v4442_v0, %v4199_v2  ;;  %4167 = vmatmul.bf16.gmra.mxu0 %v11435_v38  ;;  %v4444_v54 = vpop.f32.mrf.mxu1  ;;  %v13881_v38 = vpop.f32.mrf.mxu3 }
 0x368   : > { %v4740_v42 = vunpack.c.l.bf16 %v4676_v8  ;;  %v4549_v29 = vadd.f32 %v13831_v15, %v4513_v57  ;;  %v3505_v25 = vpop.f32.mrf.mxu2 }
 0x369   : > { %v3573_v62 = vadd.f32 %v3505_v25, %v13684_v39  ;;  %v11389_v39 = vld [vmem:[#allocation2 + $0x190] sm:$0xff] }
 0x36a   : > { %v4772_v6 = vadd.f32 %v12043_v19, %v4740_v42  ;;  %v4581_v32 = vmax.f32 %v4549_v29, 0.0  ;;  %v12047_v19 = vunpack.c.h.bf16 %v12689_v59  ;;  %v12690_v59 = vld [vmem:[#allocation3 + $0x50] sm:$0xff]  }
 0x36b   : > { %v4130_v4 = vpop.f32.mrf.mxu0  ;;  %v3887_v33 = vadd.f32 %v13844_v47, %v3573_v62 }
 0x36c   : > { %v12109_v28 = vpack.c.bf16 %v4772_v6, %v4771_v14  ;;  %v4200_v1 = vadd.f32 %v4130_v4, %v3886_v16  ;;  %v4613_v53 = vmin.f32 %v4581_v32, 6.0 }
 0x36e   : > { %12703 = vst [vmem:[#allocation3 + $0x58] sm:$0xff] %v12109_v28   ;;  %v4514_v0 = vadd.f32 %v4444_v54, %v4200_v1  ;;  %v4447_v63 = vpop.f32.mrf.mxu1  ;;  %v4677_v22 = vpack.c.bf16 %v4613_v53, %v4613_v53  ;;  %v11415_v54 = vld [vmem:[#allocation2 + $0x88] sm:$0xff] }
 0x36f   : > { %3873 = vmatmul.bf16.gmra.mxu3 %v11415_v54 }
 0x370   : > { %v4550_v17 = vadd.f32 %v13831_v15, %v4514_v0  ;;  %v3507_v7 = vpop.f32.mrf.mxu2  ;;  %v4741_v50 = vunpack.c.l.bf16 %v4677_v22  ;;  %v13887_v0 = vpop.f32.mrf.mxu3 }
 0x371   : > { %4486 = vmatmul.bf16.gmra.mxu1 %v11460_v56  ;;  %v3574_v40 = vadd.f32 %v3507_v7, %v13688_v31  ;;  %v11461_v56 = vld [vmem:[#allocation2 + $0x198] sm:$0xff] }
 0x372   : > { %v4582_v34 = vmax.f32 %v4550_v17, 0.0  ;;  %v4773_v14 = vadd.f32 %v12046_v36, %v4741_v50 }
 0x373   : > { %v4133_v52 = vpop.f32.mrf.mxu0  ;;  %v3888_v16 = vadd.f32 %v13849_v12, %v3574_v40 }
 0x374   : > { %v4614_v37 = vmin.f32 %v4582_v34, 6.0  ;;  %v4201_v2 = vadd.f32 %v4133_v52, %v3887_v33  ;;  %v11540_v33 = vld [vmem:[%s14874_s3 + $0x2a0] sm:$0xff] }
 0x375   : > { %3549 = vmatmul.bf16.gmra.mxu2 %v11389_v39  ;;  %5941 = vmatpush.bf16.msra.mxu3 %v11540_v33  ;;  %v12050_v39 = vunpack.c.l.bf16 %v12690_v59  ;;  %v11438_v33 = vld [vmem:[#allocation2 + $0x110] sm:$0xff] }
 0x376   : > { %v4678_v8 = vpack.c.bf16 %v4614_v37, %v4614_v37  ;;  %v4515_v57 = vadd.f32 %v4447_v63, %v4201_v2  ;;  %4172 = vmatmul.bf16.gmra.mxu0 %v11436_v27  ;;  %v4449_v47 = vpop.f32.mrf.mxu1  ;;  %v11390_v37 = vld [vmem:[#allocation2 + $0x198] sm:$0xff]  ;;  %v11437_v2 = vld [vmem:[#allocation2 + $0x108] sm:$0xff]  ;;  %v12051_v27 = vunpack.c.h.bf16 %v12690_v59 }
 0x378   : > { %v4742_v42 = vunpack.c.l.bf16 %v4678_v8  ;;  %v4551_v29 = vadd.f32 %v13831_v15, %v4515_v57  ;;  %v3510_v25 = vpop.f32.mrf.mxu2 }
 0x379   : > { %v3575_v53 = vadd.f32 %v3510_v25, %v13703_v10 }
 0x37a   : > { %v4774_v6 = vadd.f32 %v12047_v19, %v4742_v42  ;;  %v4583_v32 = vmax.f32 %v4551_v29, 0.0 }
 0x37b   : > { %v4135_v4 = vpop.f32.mrf.mxu0  ;;  %v3889_v12 = vadd.f32 %v13858_v60, %v3575_v53  ;;  %v11462_v53 = vld [vmem:[#allocation2 + $0x1a0] sm:$0xff] }
 0x37c   : > { %v12114_v28 = vpack.c.bf16 %v4774_v6, %v4773_v14  ;;  %v4202_v1 = vadd.f32 %v4135_v4, %v3888_v16  ;;  %v4615_v31 = vmin.f32 %v4583_v32, 6.0 }
 0x37e   : > { %12704 = vst [vmem:[#allocation3 + $0x18] sm:$0xff] %v12114_v28   ;;  %v4516_v62 = vadd.f32 %v4449_v47, %v4202_v1  ;;  %v4452_v63 = vpop.f32.mrf.mxu1  ;;  %v4679_v22 = vpack.c.bf16 %v4615_v31, %v4615_v31  ;;  %v13896_v47 = vpop.f32.mrf.mxu3 }
 0x380   : > { %v4552_v17 = vadd.f32 %v13831_v15, %v4516_v62  ;;  %v3512_v7 = vpop.f32.mrf.mxu2  ;;  %v4743_v36 = vunpack.c.l.bf16 %v4679_v22 }
 0x381   : > { %4491 = vmatmul.bf16.gmra.mxu1 %v11461_v56  ;;  %v3576_v50 = vadd.f32 %v3512_v7, %v13718_v13 }
 0x382   : > { %v4584_v34 = vmax.f32 %v4552_v17, 0.0  ;;  %v4775_v42 = vadd.f32 %v12050_v39, %v4743_v36 }
 0x383   : > { %v4138_v45 = vpop.f32.mrf.mxu0  ;;  %v3890_v14 = vadd.f32 %v13864_v61, %v3576_v50 }
 0x384   : > { %v4616_v10 = vmin.f32 %v4584_v34, 6.0  ;;  %v4203_v52 = vadd.f32 %v4138_v45, %v3889_v12  ;;  %v11391_v12 = vld [vmem:[#allocation2 + $0x1a0] sm:$0xff] }
 0x385   : > { %3554 = vmatmul.bf16.gmra.mxu2 %v11390_v37 }
 0x386   : > { %v4680_v19 = vpack.c.bf16 %v4616_v10, %v4616_v10  ;;  %v4517_v8 = vadd.f32 %v4452_v63, %v4203_v52  ;;  %4177 = vmatmul.bf16.gmra.mxu0 %v11437_v2  ;;  %v4454_v60 = vpop.f32.mrf.mxu1  ;;  %v12691_v63 = vld [vmem:[#allocation3 + $0x68] sm:$0xff]   ;;  %v13902_v61 = vpop.f32.mrf.mxu3 }
 0x387   : > { %v12055_v45 = vunpack.c.h.bf16 %v12691_v63 }
 0x388   : > { %v4744_v40 = vunpack.c.l.bf16 %v4680_v19  ;;  %v4553_v57 = vadd.f32 %v13831_v15, %v4517_v8  ;;  %v3515_v54 = vpop.f32.mrf.mxu2 }
 0x389   : > { %v3577_v4 = vadd.f32 %v3515_v54, %v13727_v51  ;;  %v12054_v51 = vunpack.c.l.bf16 %v12691_v63  ;;  %v11472_v63 = vld [vmem:[#allocation3 + $0x30] sm:$0xff] }
 0x38a   : > { %v4776_v29 = vadd.f32 %v12051_v27, %v4744_v40  ;;  %v4585_v25 = vmax.f32 %v4553_v57, 0.0 }
 0x38b   : > { %v4140_v6 = vpop.f32.mrf.mxu0  ;;  %v3891_v7 = vadd.f32 %v13873_v41, %v3577_v4 }
 0x38c   : > { %v12119_v32 = vpack.c.bf16 %v4776_v29, %v4775_v42  ;;  %v4204_v16 = vadd.f32 %v4140_v6, %v3890_v14  ;;  %v4617_v13 = vmin.f32 %v4585_v25, 6.0  ;;  %v11463_v14 = vld [vmem:[#allocation2 + $0x1a8] sm:$0xff] }
 0x38e   : > { %12705 = vst [vmem:[#allocation3 + $0x50] sm:$0xff] %v12119_v32   ;;  %v4518_v28 = vadd.f32 %v4454_v60, %v4204_v16  ;;  %v4457_v1 = vpop.f32.mrf.mxu1  ;;  %v4681_v17 = vpack.c.bf16 %v4617_v13, %v4617_v13  ;;  %v13907_v42 = vpop.f32.mrf.mxu3  ;;  %v12692_v13 = vld [vmem:[#allocation3 + $0x8] sm:$0xff]  }
 0x390   : > { %v4554_v31 = vadd.f32 %v13831_v15, %v4518_v28  ;;  %v3517_v62 = vpop.f32.mrf.mxu2  ;;  %v4745_v10 = vunpack.c.l.bf16 %v4681_v17  ;;  %v12058_v17 = vunpack.c.l.bf16 %v12692_v13 }
 0x391   : > { %4496 = vmatmul.bf16.gmra.mxu1 %v11462_v53  ;;  %v3578_v37 = vadd.f32 %v3517_v62, %v13733_v58 }
 0x392   : > { %v4586_v56 = vmax.f32 %v4554_v31, 0.0  ;;  %v4777_v19 = vadd.f32 %v12054_v51, %v4745_v10  ;;  %v11539_v31 = vld [vmem:[%s14874_s3 + $0x298] sm:$0xff] }
 0x393   : > { %v4143_v59 = vpop.f32.mrf.mxu0  ;;  %v3892_v60 = vadd.f32 %v13881_v38, %v3578_v37  ;;  %5942 = vmatpush.bf16.msra.mxu3 %v11539_v31 }
 0x394   : > { %v4618_v22 = vmin.f32 %v4586_v56, 6.0  ;;  %v4205_v34 = vadd.f32 %v4143_v59, %v3891_v7  ;;  %v12059_v56 = vunpack.c.h.bf16 %v12692_v13 }
 0x395   : > { %3559 = vmatmul.bf16.gmra.mxu2 %v11391_v12 }
 0x396   : > { %v4682_v52 = vpack.c.bf16 %v4618_v22, %v4618_v22  ;;  %v4519_v2 = vadd.f32 %v4457_v1, %v4205_v34  ;;  %4182 = vmatmul.bf16.gmra.mxu0 %v11438_v33  ;;  %v4459_v39 = vpop.f32.mrf.mxu1  ;;  %v11439_v1 = vld [vmem:[#allocation2 + $0x118] sm:$0xff] }
 0x398   : > { %v4746_v27 = vunpack.c.l.bf16 %v4682_v52  ;;  %v4555_v41 = vadd.f32 %v13831_v15, %v4519_v2  ;;  %v3520_v36 = vpop.f32.mrf.mxu2 }
 0x399   : > { %v3579_v29 = vadd.f32 %v3520_v36, %v13740_v23 }
 0x39a   : > { %v4778_v50 = vadd.f32 %v12055_v45, %v4746_v27  ;;  %v4587_v8 = vmax.f32 %v4555_v41, 0.0 }
 0x39b   : > { %v4145_v40 = vpop.f32.mrf.mxu0  ;;  %v3893_v38 = vadd.f32 %v13887_v0, %v3579_v29  ;;  %v3844_v0 = vpop.f32.mrf.mxu3 }
 0x39c   : > { %v12124_v57 = vpack.c.bf16 %v4778_v50, %v4777_v19  ;;  %v4206_v54 = vadd.f32 %v4145_v40, %v3892_v60  ;;  %v4619_v58 = vmin.f32 %v4587_v8, 6.0 }
 0x39e   : > { %12706 = vst [vmem:[#allocation3 + $0x68] sm:$0xff] %v12124_v57   ;;  %v4520_v25 = vadd.f32 %v4459_v39, %v4206_v54  ;;  %v4462_v6 = vpop.f32.mrf.mxu1  ;;  %v4683_v4 = vpack.c.bf16 %v4619_v58, %v4619_v58  ;;  %v12693_v57 = vld [vmem:[#allocation3 + $0x48] sm:$0xff]  }
 0x3a0   : > { %v4556_v32 = vadd.f32 %v13831_v15, %v4520_v25  ;;  %v3522_v16 = vpop.f32.mrf.mxu2  ;;  %v4747_v7 = vunpack.c.l.bf16 %v4683_v4 }
 0x3a1   : > { %4501 = vmatmul.bf16.gmra.mxu1 %v11463_v14  ;;  %v3580_v22 = vadd.f32 %v3522_v16, %v13744_v21  ;;  %v12063_v16 = vunpack.c.h.bf16 %v12693_v57 }
 0x3a2   : > { %v4588_v28 = vmax.f32 %v4556_v32, 0.0  ;;  %v4779_v10 = vadd.f32 %v12058_v17, %v4747_v7  ;;  %v12062_v32 = vunpack.c.l.bf16 %v12693_v57 }
 0x3a3   : > { %v4148_v53 = vpop.f32.mrf.mxu0  ;;  %v3894_v2 = vadd.f32 %v13896_v47, %v3580_v22  ;;  %v3846_v60 = vpop.f32.mrf.mxu3 }
 0x3a4   : > { %v4620_v62 = vmin.f32 %v4588_v28, 6.0  ;;  %v4207_v23 = vadd.f32 %v4148_v53, %v3893_v38 }
 0x3a5   : > { %5069 = vmatmul.bf16.vlgmr.msra.gmra.mxu2 %v11472_v63 }
 0x3a6   : > { %v4684_v59 = vpack.c.bf16 %v4620_v62, %v4620_v62  ;;  %v4521_v34 = vadd.f32 %v4462_v6, %v4207_v23  ;;  %4187 = vmatmul.bf16.gmra.mxu0 %v11439_v1  ;;  %v4464_v12 = vpop.f32.mrf.mxu1  ;;  %v11473_v6 = vld [vmem:[#allocation3] sm:$0xff] }
 0x3a8   : > { %v4748_v33 = vunpack.c.l.bf16 %v4684_v59  ;;  %v4557_v51 = vadd.f32 %v13831_v15, %v4521_v34  ;;  %v3525_v45 = vpop.f32.mrf.mxu2 }
 0x3a9   : > { %v3581_v21 = vadd.f32 %v3525_v45, %v13748_v5  ;;  %v12694_v45 = vld [vmem:[#allocation3 + $0x40] sm:$0xff]  }
 0x3aa   : > { %v4780_v52 = vadd.f32 %v12059_v56, %v4748_v33  ;;  %v4589_v37 = vmax.f32 %v4557_v51, 0.0 }
 0x3ab   : > { %v4150_v39 = vpop.f32.mrf.mxu0  ;;  %v3895_v29 = vadd.f32 %v13902_v61, %v3581_v21  ;;  %v3849_v17 = vpop.f32.mrf.mxu3  ;;  %v12067_v21 = vunpack.c.h.bf16 %v12694_v45 }
 0x3ac   : > { %v12129_v27 = vpack.c.bf16 %v4780_v52, %v4779_v10  ;;  %v4208_v41 = vadd.f32 %v4150_v39, %v3894_v2  ;;  %v4621_v36 = vmin.f32 %v4589_v37, 6.0 }
 0x3ae   : > { %12707 = vst [vmem:[#allocation3 + $0x8] sm:$0xff] %v12129_v27   ;;  %v4522_v19 = vadd.f32 %v4464_v12, %v4208_v41  ;;  %v4467_v50 = vpop.f32.mrf.mxu1  ;;  %v4685_v54 = vpack.c.bf16 %v4621_v36, %v4621_v36  ;;  %v11474_v41 = vld [vmem:[#allocation3 + $0x58] sm:$0xff] }
 0x3b0   : > { %v4558_v8 = vadd.f32 %v13831_v15, %v4522_v19  ;;  %v3527_v40 = vpop.f32.mrf.mxu2  ;;  %v4749_v13 = vunpack.c.l.bf16 %v4685_v54 }
 0x3b1   : > { %v3582_v5 = vadd.f32 %v3527_v40, %v13752_v11 }
 0x3b2   : > { %v4590_v58 = vmax.f32 %v4558_v8, 0.0  ;;  %v4781_v62 = vadd.f32 %v12062_v32, %v4749_v13 }
 0x3b3   : > { %v4153_v25 = vpop.f32.mrf.mxu0  ;;  %v3896_v63 = vadd.f32 %v13907_v42, %v3582_v5  ;;  %v11538_v42 = vld [vmem:[%s14874_s3 + $0x290] sm:$0xff]  ;;  %v3851_v36 = vpop.f32.mrf.mxu3 }
 0x3b4   : > { %v4622_v47 = vmin.f32 %v4590_v58, 6.0  ;;  %v4209_v14 = vadd.f32 %v4153_v25, %v3895_v29  ;;  %5943 = vmatpush.bf16.msra.mxu3 %v11538_v42 }
 0x3b5   : > { %5074 = vmatmul.bf16.gmra.mxu2 %v11473_v6 }
 0x3b6   : > { %v4686_v4 = vpack.c.bf16 %v4622_v47, %v4622_v47  ;;  %v4523_v28 = vadd.f32 %v4467_v50, %v4209_v14  ;;  %v4469_v38 = vpop.f32.mrf.mxu1 }
 0x3b8   : > { %v4750_v1 = vunpack.c.l.bf16 %v4686_v4  ;;  %v4559_v31 = vadd.f32 %v13831_v15, %v4523_v28  ;;  %v3530_v53 = vpop.f32.mrf.mxu2 }
 0x3b9   : > { %v3583_v11 = vadd.f32 %v3530_v53, %v13759_v18  ;;  %v12066_v18 = vunpack.c.l.bf16 %v12694_v45 }
 0x3ba   : > { %v4782_v23 = vadd.f32 %v12063_v16, %v4750_v1  ;;  %v4591_v61 = vmax.f32 %v4559_v31, 0.0  ;;  %v12695_v31 = vld [vmem:[#allocation3 + $0x20] sm:$0xff]  }
 0x3bb   : > { %v4155_v56 = vpop.f32.mrf.mxu0  ;;  %v3897_v37 = vadd.f32 %v3844_v0, %v3583_v11 }
 0x3bc   : > { %v12134_v7 = vpack.c.bf16 %v4782_v23, %v4781_v62  ;;  %v4210_v59 = vadd.f32 %v4155_v56, %v3896_v63  ;;  %v4623_v22 = vmin.f32 %v4591_v61, 6.0  ;;  %v11475_v56 = vld [vmem:[#allocation3 + $0x18] sm:$0xff] }
 0x3be   : > { %12708 = vst [vmem:[#allocation3 + $0x48] sm:$0xff] %v12134_v7   ;;  %v4524_v34 = vadd.f32 %v4469_v38, %v4210_v59  ;;  %v4472_v12 = vpop.f32.mrf.mxu1  ;;  %v4687_v10 = vpack.c.bf16 %v4623_v22, %v4623_v22  ;;  %v12070_v7 = vunpack.c.l.bf16 %v12695_v31  ;;  %v12071_v59 = vunpack.c.h.bf16 %v12695_v31 }
 0x3c0   : > { %v4560_v33 = vadd.f32 %v13831_v15, %v4524_v34  ;;  %v3532_v51 = vpop.f32.mrf.mxu2  ;;  %v4751_v19 = vunpack.c.l.bf16 %v4687_v10 }
 0x3c1   : > { %v3584_v8 = vadd.f32 %v3532_v51, %v13763_v46  ;;  %v3854_v46 = vpop.f32.mrf.mxu3 }
 0x3c2   : > { %v4592_v52 = vmax.f32 %v4560_v33, 0.0  ;;  %v4783_v29 = vadd.f32 %v12066_v18, %v4751_v19 }
 0x3c3   : > { %v4158_v2 = vpop.f32.mrf.mxu0  ;;  %v3898_v14 = vadd.f32 %v3846_v60, %v3584_v8  ;;  %v12696_v8 = vld [vmem:[#allocation3 + $0x10] sm:$0xff]  }
 0x3c4   : > { %v4624_v39 = vmin.f32 %v4592_v52, 6.0  ;;  %v4211_v27 = vadd.f32 %v4158_v2, %v3897_v37 }
 0x3c5   : > { %5079 = vmatmul.bf16.gmra.mxu2 %v11474_v41 }
 0x3c6   : > { %v4688_v50 = vpack.c.bf16 %v4624_v39, %v4624_v39  ;;  %v4525_v40 = vadd.f32 %v4472_v12, %v4211_v27  ;;  %v4474_v57 = vpop.f32.mrf.mxu1 }
 0x3c8   : > { %v4752_v0 = vunpack.c.l.bf16 %v4688_v50  ;;  %v4561_v54 = vadd.f32 %v13831_v15, %v4525_v40  ;;  %v3535_v58 = vpop.f32.mrf.mxu2 }
 0x3c9   : > { %v3585_v4 = vadd.f32 %v3535_v58, %v13767_v35  ;;  %v3856_v45 = vpop.f32.mrf.mxu3 }
 0x3ca   : > { %v4784_v25 = vadd.f32 %v12067_v21, %v4752_v0  ;;  %v4593_v47 = vmax.f32 %v4561_v54, 0.0 }
 0x3cb   : > { %v4160_v6 = vpop.f32.mrf.mxu0  ;;  %v3899_v23 = vadd.f32 %v3849_v17, %v3585_v4 }
 0x3cc   : > { %v12139_v32 = vpack.c.bf16 %v4784_v25, %v4783_v29  ;;  %v4212_v16 = vadd.f32 %v4160_v6, %v3898_v14  ;;  %v4625_v13 = vmin.f32 %v4593_v47, 6.0  ;;  %v11476_v47 = vld [vmem:[#allocation3 + $0x50] sm:$0xff]  ;;  %v12075_v14 = vunpack.c.h.bf16 %v12696_v8 }
 0x3ce   : > { %12709 = vst [vmem:[#allocation3 + $0x40] sm:$0xff] %v12139_v32   ;;  %v4526_v5 = vadd.f32 %v4474_v57, %v4212_v16  ;;  %v4477_v28 = vpop.f32.mrf.mxu1  ;;  %v4689_v53 = vpack.c.bf16 %v4625_v13, %v4625_v13 }
 0x3d0   : > { %v4562_v38 = vadd.f32 %v13831_v15, %v4526_v5  ;;  %v3537_v1 = vpop.f32.mrf.mxu2  ;;  %v4753_v22 = vunpack.c.l.bf16 %v4689_v53 }
 0x3d1   : > { %v3586_v35 = vadd.f32 %v3537_v1, %v13771_v3  ;;  %v3859_v54 = vpop.f32.mrf.mxu3 }
 0x3d2   : > { %v4594_v62 = vmax.f32 %v4562_v38, 0.0  ;;  %v4785_v52 = vadd.f32 %v12070_v7, %v4753_v22 }
 0x3d3   : > { %v4163_v61 = vpop.f32.mrf.mxu0  ;;  %v3900_v42 = vadd.f32 %v3851_v36, %v3586_v35  ;;  %v11537_v36 = vld [vmem:[%s14874_s3 + $0x288] sm:$0xff] }
 0x3d4   : > { %v4626_v63 = vmin.f32 %v4594_v62, 6.0  ;;  %v4213_v60 = vadd.f32 %v4163_v61, %v3899_v23  ;;  %5944 = vmatpush.bf16.msra.mxu3 %v11537_v36 }
 0x3d5   : > { %5084 = vmatmul.bf16.gmra.mxu2 %v11475_v56 }
 0x3d6   : > { %v4690_v11 = vpack.c.bf16 %v4626_v63, %v4626_v63  ;;  %v4527_v34 = vadd.f32 %v4477_v28, %v4213_v60  ;;  %v4479_v12 = vpop.f32.mrf.mxu1 }
 0x3d8   : > { %v4754_v33 = vunpack.c.l.bf16 %v4690_v11  ;;  %v4563_v51 = vadd.f32 %v13831_v15, %v4527_v34  ;;  %v3540_v10 = vpop.f32.mrf.mxu2  ;;  %v12697_v11 = vld [vmem:[#allocation3 + $0x38] sm:$0xff]  }
 0x3d9   : > { %v3587_v18 = vadd.f32 %v3540_v10, %v13778_v9  ;;  %v12074_v9 = vunpack.c.l.bf16 %v12696_v8  ;;  %v3861_v63 = vpop.f32.mrf.mxu3  ;;  %v11477_v10 = vld [vmem:[#allocation3 + $0x68] sm:$0xff] }
 0x3da   : > { %v4786_v17 = vadd.f32 %v12071_v59, %v4754_v33  ;;  %v4595_v37 = vmax.f32 %v4563_v51, 0.0 }
 0x3db   : > { %v4165_v2 = vpop.f32.mrf.mxu0  ;;  %v3901_v0 = vadd.f32 %v3854_v46, %v3587_v18 }
 0x3dc   : > { %v12144_v39 = vpack.c.bf16 %v4786_v17, %v4785_v52  ;;  %v4214_v27 = vadd.f32 %v4165_v2, %v3900_v42  ;;  %v4627_v41 = vmin.f32 %v4595_v37, 6.0  ;;  %v12078_v52 = vunpack.c.l.bf16 %v12697_v11 }
 0x3dd   : > { %v12079_v17 = vunpack.c.h.bf16 %v12697_v11  ;;  %v13982_v11 = vld [vmem:[%s14875_s4] ss:$0 sm:$0xff] }
 0x3de   : > { %12710 = vst [vmem:[#allocation3 + $0x20] sm:$0xff] %v12144_v39   ;;  %v4528_v3 = vadd.f32 %v4479_v12, %v4214_v27  ;;  %v4482_v21 = vpop.f32.mrf.mxu1  ;;  %v4691_v40 = vpack.c.bf16 %v4627_v41, %v4627_v41  ;;  %v11519_v41 = vld [vmem:[%s14874_s3 + $0x278] sm:$0xff] }
 0x3df   : > { %6171 = vmatpush.bf16.msrb.mxu0 %v11519_v41 }
 0x3e0   : > { %v4564_v19 = vadd.f32 %v13831_v15, %v4528_v3  ;;  %v3542_v50 = vpop.f32.mrf.mxu2  ;;  %v4755_v6 = vunpack.c.l.bf16 %v4691_v40 }
 0x3e1   : > { %v3588_v16 = vadd.f32 %v3542_v50, %v13782_v43  ;;  %v3864_v39 = vpop.f32.mrf.mxu3 }
 0x3e2   : > { %v4596_v57 = vmax.f32 %v4564_v19, 0.0  ;;  %v4787_v38 = vadd.f32 %v12074_v9, %v4755_v6  ;;  %v11567_v19 = vld [vmem:[%s14874_s3 + $0x2f8] sm:$0xff] }
 0x3e3   : > { %v4168_v58 = vpop.f32.mrf.mxu0  ;;  %v3902_v53 = vadd.f32 %v3856_v45, %v3588_v16  ;;  %6453 = vmatpush.bf16.msrb.mxu1 %v11567_v19 }
 0x3e4   : > { %v4628_v29 = vmin.f32 %v4596_v57, 6.0  ;;  %v4215_v25 = vadd.f32 %v4168_v58, %v3901_v0  ;;  %v11518_v0 = vld [vmem:[%s14874_s3 + $0x270] sm:$0xff] }
 0x3e5   : > { %5089 = vmatmul.bf16.gmra.mxu2 %v11476_v47  ;;  %6172 = vmatpush.bf16.msrb.mxu0 %v11518_v0  ;;  %v11566_v58 = vld [vmem:[%s14874_s3 + $0x2f0] sm:$0xff]  ;;  %v11512_v0 = vld [vmem:[%s14874_s3 + $0x240] sm:$0xff] }
 0x3e6   : > { %v4692_v32 = vpack.c.bf16 %v4628_v29, %v4628_v29  ;;  %v4529_v13 = vadd.f32 %v4482_v21, %v4215_v25  ;;  %v4484_v4 = vpop.f32.mrf.mxu1 }
 0x3e7   : > { %6454 = vmatpush.bf16.msrb.mxu1 %v11566_v58  ;;  %v11479_v58 = vld [vmem:[#allocation3 + $0x48] sm:$0xff] }
 0x3e8   : > { %v4756_v5 = vunpack.c.l.bf16 %v4692_v32  ;;  %v4565_v46 = vadd.f32 %v13831_v15, %v4529_v13  ;;  %v3545_v28 = vpop.f32.mrf.mxu2  ;;  %v11565_v13 = vld [vmem:[%s14874_s3 + $0x2e8] sm:$0xff] }
 0x3e9   : > { %v3589_v56 = vadd.f32 %v3545_v28, %v13786_v49  ;;  %v3866_v32 = vpop.f32.mrf.mxu3  ;;  %v11536_v28 = vld [vmem:[%s14874_s3 + $0x280] sm:$0xff] }
 0x3ea   : > { %v4788_v1 = vadd.f32 %v12075_v14, %v4756_v5  ;;  %v4597_v31 = vmax.f32 %v4565_v46, 0.0  ;;  %v11517_v14 = vld [vmem:[%s14874_s3 + $0x268] sm:$0xff]  ;;  %5945 = vmatpush.bf16.msra.mxu3 %v11536_v28 }
 0x3eb   : > { %v4170_v62 = vpop.f32.mrf.mxu0  ;;  %v3903_v12 = vadd.f32 %v3859_v54, %v3589_v56  ;;  %6173 = vmatpush.bf16.msrb.mxu0 %v11517_v14  ;;  %6455 = vmatpush.bf16.msrb.mxu1 %v11565_v13  ;;  %v11496_v13 = vld [vmem:[#allocation2] sm:$0xff] }
 0x3ec   : > { %v12149_v23 = vpack.c.bf16 %v4788_v1, %v4787_v38  ;;  %v4216_v61 = vadd.f32 %v4170_v62, %v3902_v53  ;;  %v4629_v60 = vmin.f32 %v4597_v31, 6.0  ;;  %v11478_v53 = vld [vmem:[#allocation3 + $0x8] sm:$0xff] }
 0x3ee   : > { %12711 = vst [vmem:[#allocation3 + $0x10] sm:$0xff] %v12149_v23   ;;  %v4530_v43 = vadd.f32 %v4484_v4, %v4216_v61  ;;  %v4487_v7 = vpop.f32.mrf.mxu1  ;;  %v4693_v35 = vpack.c.bf16 %v4629_v60, %v4629_v60  ;;  %v12698_v4 = vld [vmem:[#allocation3 + $0x60] sm:$0xff]   ;;  %v11564_v61 = vld [vmem:[%s14874_s3 + $0x2e0] sm:$0xff] }
 0x3ef   : > { %v12082_v62 = vunpack.c.l.bf16 %v12698_v4  ;;  %v12083_v23 = vunpack.c.h.bf16 %v12698_v4  ;;  %6456 = vmatpush.bf16.msrb.mxu1 %v11564_v61 }
 0x3f0   : > { %v4566_v59 = vadd.f32 %v13831_v15, %v4530_v43  ;;  %v3547_v22 = vpop.f32.mrf.mxu2  ;;  %v4757_v37 = vunpack.c.l.bf16 %v4693_v35 }
 0x3f1   : > { %v3590_v2 = vadd.f32 %v3547_v22, %v13790_v55 }
 0x3f2   : > { %v4598_v34 = vmax.f32 %v4566_v59, 0.0  ;;  %v4789_v50 = vadd.f32 %v12078_v52, %v4757_v37  ;;  %v11515_v59 = vld [vmem:[%s14874_s3 + $0x258] sm:$0xff] }
 0x3f3   : > { %v4173_v33 = vpop.f32.mrf.mxu0  ;;  %v3904_v40 = vadd.f32 %v3861_v63, %v3590_v2  ;;  %v11562_v2 = vld [vmem:[%s14874_s3 + $0x2d0] sm:$0xff] }
 0x3f4   : > { %v4630_v51 = vmin.f32 %v4598_v34, 6.0  ;;  %v4217_v45 = vadd.f32 %v4173_v33, %v3903_v12 }
 0x3f5   : > { %5094 = vmatmul.bf16.gmra.mxu2 %v11477_v10  ;;  %v3869_v10 = vpop.f32.mrf.mxu3 }
 0x3f6   : > { %v4694_v42 = vpack.c.bf16 %v4630_v51, %v4630_v51  ;;  %v4531_v49 = vadd.f32 %v4487_v7, %v4217_v45  ;;  %v4489_v27 = vpop.f32.mrf.mxu1 }
 0x3f8   : > { %v4758_v18 = vunpack.c.l.bf16 %v4694_v42  ;;  %v4567_v3 = vadd.f32 %v13831_v15, %v4531_v49  ;;  %v3550_v21 = vpop.f32.mrf.mxu2 }
 0x3f9   : > { %v3591_v25 = vadd.f32 %v3550_v21, %v13797_v26  ;;  %v11520_v21 = vld [vmem:[#allocation2 + $0x90] sm:$0xff] }
 0x3fa   : > { %v4790_v8 = vadd.f32 %v12079_v17, %v4758_v18  ;;  %v4599_v55 = vmax.f32 %v4567_v3, 0.0  ;;  %v11514_v17 = vld [vmem:[%s14874_s3 + $0x250] sm:$0xff]  ;;  %v11513_v18 = vld [vmem:[%s14874_s3 + $0x248] sm:$0xff]  ;;  %5946 = vmatmul.bf16.vlgmr.msra.gmra.mxu3 %v11520_v21 }
 0x3fb   : > { %v4175_v57 = vpop.f32.mrf.mxu0  ;;  %v3905_v26 = vadd.f32 %v3864_v39, %v3591_v25 }
 0x3fc   : > { %v12154_v36 = vpack.c.bf16 %v4790_v8, %v4789_v50  ;;  %v4218_v54 = vadd.f32 %v4175_v57, %v3904_v40  ;;  %v4631_v29 = vmin.f32 %v4599_v55, 6.0  ;;  %v11561_v50 = vld [vmem:[%s14874_s3 + $0x2c8] sm:$0xff]  ;;  %v12699_v8 = vld [vmem:[#allocation3 + $0x70] sm:$0xff]  }
 0x3fd   : > { %v12086_v25 = vunpack.c.l.bf16 %v12699_v8 }
 0x3fe   : > { %12712 = vst [vmem:[#allocation3 + $0x38] sm:$0xff] %v12154_v36   ;;  %v4532_v47 = vadd.f32 %v4489_v27, %v4218_v54  ;;  %v4492_v9 = vpop.f32.mrf.mxu1  ;;  %v4695_v5 = vpack.c.bf16 %v4631_v29, %v4631_v29  ;;  %v3871_v29 = vpop.f32.mrf.mxu3 }
 0x400   : > { %v4568_v6 = vadd.f32 %v13831_v15, %v4532_v47  ;;  %v3552_v16 = vpop.f32.mrf.mxu2  ;;  %v11516_v15 = vld [vmem:[%s14874_s3 + $0x260] sm:$0xff]  ;;  %v4759_v63 = vunpack.c.l.bf16 %v4695_v5  ;;  %v12087_v47 = vunpack.c.h.bf16 %v12699_v8 }
 0x401   : > { %6174 = vmatpush.bf16.msrb.mxu0 %v11516_v15  ;;  %v3592_v56 = vadd.f32 %v3552_v16, %v13801_v24  ;;  %v11563_v24 = vld [vmem:[%s14874_s3 + $0x2d8] sm:$0xff] }
 0x402   : > { %v4600_v46 = vmax.f32 %v4568_v6, 0.0  ;;  %v4791_v12 = vadd.f32 %v12082_v62, %v4759_v63  ;;  %6457 = vmatpush.bf16.msrb.mxu1 %v11563_v24 }
 0x403   : > { %v4178_v38 = vpop.f32.mrf.mxu0  ;;  %v3906_v45 = vadd.f32 %v3866_v32, %v3592_v56  ;;  %v11591_v56 = vld [vmem:[%s14874_s3 + $0x338] sm:$0xff] }
 0x404   : > { %v4632_v1 = vmin.f32 %v4600_v46, 6.0  ;;  %v4219_v31 = vadd.f32 %v4178_v38, %v3905_v26  ;;  %v11544_v46 = vld [vmem:[#allocation2 + $0x120] sm:$0xff]  ;;  %6767 = vmatpush.bf16.msrb.mxu2 %v11591_v56 }
 0x405   : > { %5099 = vmatmul.bf16.gmra.mxu2 %v11478_v53  ;;  %6175 = vmatpush.bf16.msrb.mxu0 %v11515_v59 }
 0x406   : > { %v4696_v60 = vpack.c.bf16 %v4632_v1, %v4632_v1  ;;  %v4533_v43 = vadd.f32 %v4492_v9, %v4219_v31  ;;  %v4494_v7 = vpop.f32.mrf.mxu1  ;;  %6458 = vmatpush.bf16.msrb.mxu1 %v11562_v2  ;;  %v11560_v9 = vld [vmem:[%s14874_s3 + $0x2c0] sm:$0xff]  ;;  %v11615_v2 = vld [vmem:[%s14874_s3 + $0x378] sm:$0xff] }
 0x407   : > { %7081 = vmatpush.bf16.msrb.mxu3 %v11615_v2 }
 0x408   : > { %v4760_v22 = vunpack.c.l.bf16 %v4696_v60  ;;  %v4569_v35 = vadd.f32 %v13982_v11, %v4533_v43  ;;  %v3555_v34 = vpop.f32.mrf.mxu2 }
 0x409   : > { %6176 = vmatpush.bf16.msrb.mxu0 %v11514_v17  ;;  %v3593_v39 = vadd.f32 %v3555_v34, %v13805_v44 }
 0x40a   : > { %v4792_v33 = vadd.f32 %v12083_v23, %v4760_v22  ;;  %v4601_v51 = vmax.f32 %v4569_v35, 0.0  ;;  %6459 = vmatpush.bf16.msrb.mxu1 %v11561_v50  ;;  %v12700_v22 = vld [vmem:[#allocation3 + $0x78] sm:$0xff]  }
 0x40b   : > { %v4180_v52 = vpop.f32.mrf.mxu0  ;;  %v3907_v44 = vadd.f32 %v3869_v10, %v3593_v39  ;;  %v12090_v10 = vunpack.c.l.bf16 %v12700_v22 }
 0x40c   : > { %v12159_v37 = vpack.c.bf16 %v4792_v33, %v4791_v12  ;;  %v4220_v42 = vadd.f32 %v4180_v52, %v3906_v45  ;;  %v4633_v49 = vmin.f32 %v4601_v51, 6.0  ;;  %v11480_v45 = vld [vmem:[#allocation3 + $0x40] sm:$0xff] }
 0x40d   : > { %6177 = vmatpush.bf16.msrb.mxu0 %v11513_v18 }
 0x40e   : > { %12713 = vst [vmem:[#allocation3 + $0x60] sm:$0xff] %v12159_v37   ;;  %v4534_v27 = vadd.f32 %v4494_v7, %v4220_v42  ;;  %v4497_v41 = vpop.f32.mrf.mxu1  ;;  %v4697_v55 = vpack.c.bf16 %v4633_v49, %v4633_v49  ;;  %6460 = vmatpush.bf16.msrb.mxu1 %v11560_v9 }
 0x410   : > { %v4570_v3 = vadd.f32 %v13982_v11, %v4534_v27  ;;  %v3557_v19 = vpop.f32.mrf.mxu2  ;;  %v4761_v14 = vunpack.c.l.bf16 %v4697_v55 }
 0x411   : > { %6178 = vmatpush.bf16.msrb.mxu0 %v11512_v0  ;;  %v3594_v32 = vadd.f32 %v3557_v19, %v13809_v20  ;;  %6461 = vmatmul.bf16.vlgmr.msrb.gmra.mxu1 %v11544_v46  ;;  %v3874_v20 = vpop.f32.mrf.mxu3 }
 0x412   : > { %v4602_v40 = vmax.f32 %v4570_v3, 0.0  ;;  %v4793_v38 = vadd.f32 %v12086_v25, %v4761_v14 }
 0x413   : > { %v4183_v57 = vpop.f32.mrf.mxu0  ;;  %v3908_v31 = vadd.f32 %v3871_v29, %v3594_v32  ;;  %v12701_v29 = vld [vmem:[#allocation3 + $0x28] sm:$0xff]  }
 0x414   : > { %v4634_v36 = vmin.f32 %v4602_v40, 6.0  ;;  %v4221_v54 = vadd.f32 %v4183_v57, %v3907_v44  ;;  %6179 = vmatmul.bf16.vlgmr.msrb.gmra.mxu0 %v11496_v13  ;;  %v12094_v13 = vunpack.c.l.bf16 %v12701_v29 }
 0x415   : > { %5104 = vmatmul.bf16.gmra.mxu2 %v11479_v58 }
 0x416   : > { %v4698_v6 = vpack.c.bf16 %v4634_v36, %v4634_v36  ;;  %v4535_v16 = vadd.f32 %v4497_v41, %v4221_v54  ;;  %v4499_v26 = vpop.f32.mrf.mxu1  ;;  %v14023_v41 = vld [vmem:[%s14873_s2 + $0x1] ss:$0 sm:$0xff] }
 0x418   : > { %v4762_v4 = vunpack.c.l.bf16 %v4698_v6  ;;  %v4571_v5 = vadd.f32 %v13982_v11, %v4535_v16  ;;  %v3560_v28 = vpop.f32.mrf.mxu2  ;;  %v11481_v16 = vld [vmem:[#allocation3 + $0x20] sm:$0xff] }
 0x419   : > { %v3595_v63 = vadd.f32 %v3560_v28, %v13816_v48  ;;  %v12091_v48 = vunpack.c.h.bf16 %v12700_v22  ;;  %v3876_v49 = vpop.f32.mrf.mxu3 }
 0x41a   : > { %v4794_v15 = vadd.f32 %v12087_v47, %v4762_v4  ;;  %v4603_v1 = vmax.f32 %v4571_v5, 0.0  ;;  %v12095_v5 = vunpack.c.h.bf16 %v12701_v29 }
 0x41b   : > { %v4185_v53 = vpop.f32.mrf.mxu0  ;;  %v3909_v34 = vadd.f32 %v3874_v20, %v3595_v63  ;;  %v11590_v63 = vld [vmem:[%s14874_s3 + $0x330] sm:$0xff] }
 0x41c   : > { %v12164_v62 = vpack.c.bf16 %v4794_v15, %v4793_v38  ;;  %v4222_v23 = vadd.f32 %v4185_v53, %v3908_v31  ;;  %v4635_v61 = vmin.f32 %v4603_v1, 6.0  ;;  %6768 = vmatpush.bf16.msrb.mxu2 %v11590_v63 }
 0x41e   : > { %12714 = vst [vmem:[#allocation3 + $0x70] sm:$0xff] %v12164_v62   ;;  %v4536_v60 = vadd.f32 %v4499_v26, %v4222_v23  ;;  %v4502_v59 = vpop.f32.mrf.mxu1  ;;  %v4699_v35 = vpack.c.bf16 %v4635_v61, %v4635_v61 }
 0x420   : > { %v4572_v43 = vadd.f32 %v13982_v11, %v4536_v60  ;;  %v3562_v7 = vpop.f32.mrf.mxu2  ;;  %v4763_v52 = vunpack.c.l.bf16 %v4699_v35 }
 0x421   : > { %v3596_v37 = vadd.f32 %v3562_v7, %v13820_v30 }
 0x422   : > { %v4604_v24 = vmax.f32 %v4572_v43, 0.0  ;;  %v4795_v3 = vadd.f32 %v12090_v10, %v4763_v52 }
 0x423   : > { %v4188_v12 = vpop.f32.mrf.mxu0  ;;  %v3910_v30 = vadd.f32 %v3876_v49, %v3596_v37 }
 0x424   : > { %v4636_v33 = vmin.f32 %v4604_v24, 6.0  ;;  %v4223_v51 = vadd.f32 %v4188_v12, %v3909_v34 }
 0x425   : > { %5109 = vmatmul.bf16.gmra.mxu2 %v11480_v45 }
 0x426   : > { %v4700_v17 = vpack.c.bf16 %v4636_v33, %v4636_v33  ;;  %v4537_v42 = vadd.f32 %v4502_v59, %v4223_v51  ;;  %v4504_v8 = vpop.f32.mrf.mxu1 }
 0x428   : > { %v4764_v39 = vunpack.c.l.bf16 %v4700_v17  ;;  %v4573_v27 = vadd.f32 %v13982_v11, %v4537_v42  ;;  %v5070_v18 = vpop.f32.mrf.mxu2  ;;  %v11614_v17 = vld [vmem:[%s14874_s3 + $0x370] sm:$0xff] }
 0x429   : > { %v5071_v40 = vadd.f32 %v14023_v41, %v5070_v18  ;;  %7082 = vmatpush.bf16.msrb.mxu3 %v11614_v17 }
 0x42a   : > { %v4796_v21 = vadd.f32 %v12091_v48, %v4764_v39  ;;  %v4605_v19 = vmax.f32 %v4573_v27, 0.0  ;;  %v11482_v48 = vld [vmem:[#allocation3 + $0x10] sm:$0xff] }
 0x42b   : > { %v4190_v50 = vpop.f32.mrf.mxu0  ;;  %v5150_v36 = vmax.f32 %v5071_v40, 0.0 }
 0x42c   : > { %v12169_v55 = vpack.c.bf16 %v4796_v21, %v4795_v3  ;;  %v4224_v44 = vadd.f32 %v4190_v50, %v3910_v30  ;;  %v4637_v57 = vmin.f32 %v4605_v19, 6.0 }
 0x42d   : > { %v14028_v14 = vmin.f32 %v5150_v36, 6.0 }
 0x42e   : > { %12715 = vst [vmem:[#allocation3 + $0x78] sm:$0xff] %v12169_v55   ;;  %v4538_v0 = vadd.f32 %v4504_v8, %v4224_v44  ;;  %v4701_v25 = vpack.c.bf16 %v4637_v57, %v4637_v57 }
 0x42f   : > { %v5248_v28 = vrot.slane %v14028_v14, 7  ;;  %v5375_v7 = vrot.slane %v14028_v14, 1 }
 0x430   : > { %v4574_v54 = vadd.f32 %v13982_v11, %v4538_v0  ;;  %v5072_v58 = vpop.f32.mrf.mxu2  ;;  %v4765_v4 = vunpack.c.l.bf16 %v4701_v25 }
 0x431   : > { %v5073_v9 = vadd.f32 %v14023_v41, %v5072_v58 }
 0x432   : > { %v4606_v47 = vmax.f32 %v4574_v54, 0.0  ;;  %v4797_v31 = vadd.f32 %v12094_v13, %v4765_v4 }
 0x433   : > { %v5151_v32 = vmax.f32 %v5073_v9, 0.0  ;;  %v11483_v9 = vld [vmem:[#allocation3 + $0x38] sm:$0xff] }
 0x434   : > { %v4638_v6 = vmin.f32 %v4606_v47, 6.0 }
 0x435   : > { %v5183_v26 = vmin.f32 %v5151_v32, 6.0  ;;  %5114 = vmatmul.bf16.gmra.mxu2 %v11481_v16 }
 0x436   : > { %v4702_v46 = vpack.c.bf16 %v4638_v6, %v4638_v6 }
 0x437   : > { %v5249_v38 = vrot.slane %v5183_v26, 7  ;;  %v12259_v15 = vpack.c.bf16 %v5183_v26, %v14028_v14  ;;  %v5376_v56 = vrot.slane %v5183_v26, 1 }
 0x438   : > { %v4766_v11 = vunpack.c.l.bf16 %v4702_v46  ;;  %v5075_v1 = vpop.f32.mrf.mxu2 }
 0x439   : > { %v14035_v62 = vsel %vm15084_vm11, %v5248_v28, %v5249_v38  ;;  %12733 = vst [vmem:[#allocation2 + $0x98] sm:$0xff] %v12259_v15   ;;  %v5076_v23 = vadd.f32 %v14023_v41, %v5075_v1  ;;  %v5377_v24 = vsel %vm15085_vm14, %v5375_v7, %v5376_v56 }
 0x43a   : > { %v4798_v53 = vadd.f32 %v12095_v5, %v4766_v11 }
 0x43b   : > { %v5152_v61 = vmax.f32 %v5076_v23, 0.0 }
 0x43c   : > { %v12174_v20 = vpack.c.bf16 %v4798_v53, %v4797_v31  ;;  %v11589_v31 = vld [vmem:[%s14874_s3 + $0x328] sm:$0xff] }
 0x43d   : > { %v5184_v60 = vmin.f32 %v5152_v61, 6.0  ;;  %6769 = vmatpush.bf16.msrb.mxu2 %v11589_v31 }
 0x43e   : > { %12716 = vst [vmem:[#allocation3 + $0x28] sm:$0xff] %v12174_v20  }
 0x43f   : > { %v5378_v43 = vrot.slane %v5184_v60, 1  ;;  %v5251_v12 = vrot.slane %v5184_v60, 7 }
 0x440   : > { %v5077_v59 = vpop.f32.mrf.mxu2  ;;  %v11521_v22 = vld [vmem:[#allocation2 + $0x98] sm:$0xff] }
 0x441   : > { %v5379_v35 = vsel %vm15061_vm12, %v5376_v56, %v5378_v43  ;;  %v5078_v34 = vadd.f32 %v14023_v41, %v5077_v59  ;;  %5951 = vmatmul.bf16.gmra.mxu3 %v11521_v22  ;;  %v5252_v37 = vsel %vm15087_vm15, %v5249_v38, %v5251_v12 }
 0x442   : > { %v5473_v51 = vsel %vm13010_vm2, 0.0, %v5379_v35  ;;  %v5345_v27 = vsel %vm13032_vm3, 0.0, %v5252_v37  ;;  %vm15089_vm2 = vmmov %vm15084_vm11 }
 0x443   : > { %v12339_v45 = vpack.c.bf16 %v5473_v51, %v5377_v24  ;;  %v5153_v10 = vmax.f32 %v5078_v34, 0.0  ;;  %vm15090_vm11 = vmmov %vm15061_vm12  ;;  %v11613_v51 = vld [vmem:[%s14874_s3 + $0x368] sm:$0xff] }
 0x444   : > { %vm15091_vm3 = vmmov %vm15090_vm11  ;;  %7083 = vmatpush.bf16.msrb.mxu3 %v11613_v51  ;;  %v15112_v51 = vld [vmem:[#allocation13_spill] sm:$0xff] }
 0x445   : > { %12749 = vst [vmem:[#allocation2 + $0x128] sm:$0xff] %v12339_v45   ;;  %v5185_v52 = vmin.f32 %v5153_v10, 6.0  ;;  %5119 = vmatmul.bf16.gmra.mxu2 %v11482_v48  ;;  %vm15093_vm12 = vmmov %vm15089_vm2 }
 0x446   : > { %vm15095_vm14 = vmmov %vm15089_vm2 }
 0x447   : > { %v5253_v42 = vrot.slane %v5185_v52, 7  ;;  %v12264_v2 = vpack.c.bf16 %v5185_v52, %v5184_v60  ;;  %v5380_v8 = vrot.slane %v5185_v52, 1  ;;  %vm15099_vm15 = vmmov %vm15089_vm2 }
 0x448   : > { %v5080_v49 = vpop.f32.mrf.mxu2 }
 0x449   : > { %v5254_v18 = vsel %vm15089_vm2, %v5251_v12, %v5253_v42  ;;  %12734 = vst [vmem:[#allocation2 + $0xa0] sm:$0xff] %v12264_v2   ;;  %v5081_v3 = vadd.f32 %v14023_v41, %v5080_v49  ;;  %v5381_v36 = vsel %vm15091_vm3, %v5378_v43, %v5380_v8  ;;  %v11484_v12 = vld [vmem:[#allocation3 + $0x60] sm:$0xff] }
 0x44a   : > { %v12184_v21 = vpack.c.bf16 %v5254_v18, %v5345_v27 }
 0x44b   : > { %v5154_v30 = vmax.f32 %v5081_v3, 0.0 }
 0x44c   : > { %12718 = vst [vmem:[#allocation2 + $0x10] sm:$0xff] %v12184_v21   ;;  %v11545_v19 = vld [vmem:[#allocation2 + $0x128] sm:$0xff] }
 0x44d   : > { %v5186_v50 = vmin.f32 %v5154_v30, 6.0  ;;  %6466 = vmatmul.bf16.gmra.mxu1 %v11545_v19 }
 0x44f   : > { %v5382_v55 = vrot.slane %v5186_v50, 1  ;;  %v5255_v54 = vrot.slane %v5186_v50, 7 }
 0x450   : > { %v5082_v40 = vpop.f32.mrf.mxu2  ;;  %v11522_v44 = vld [vmem:[#allocation2 + $0xa0] sm:$0xff] }
 0x451   : > { %v5383_v57 = vsel %vm15090_vm11, %v5380_v8, %v5382_v55  ;;  %v5083_v0 = vadd.f32 %v14023_v41, %v5082_v40  ;;  %5956 = vmatmul.bf16.gmra.mxu3 %v11522_v44  ;;  %v5256_v32 = vsel %vm15093_vm12, %v5253_v42, %v5255_v54 }
 0x452   : > { %v5475_v29 = vsel %vm13050_vm4, 0.0, %v5383_v57  ;;  %v5347_v46 = vsel %vm13067_vm5, 0.0, %v5256_v32  ;;  %vm15096_vm4 = vmmov %vm15091_vm3 }
 0x453   : > { %v12344_v25 = vpack.c.bf16 %v5475_v29, %v5381_v36  ;;  %v5155_v47 = vmax.f32 %v5083_v0, 0.0  ;;  %vm15097_vm5 = vmmov %vm15091_vm3 }
 0x455   : > { %12750 = vst [vmem:[#allocation2 + $0x130] sm:$0xff] %v12344_v25   ;;  %v5187_v6 = vmin.f32 %v5155_v47, 6.0  ;;  %5124 = vmatmul.bf16.gmra.mxu2 %v11483_v9 }
 0x457   : > { %v5257_v16 = vrot.slane %v5187_v6, 7  ;;  %v12269_v13 = vpack.c.bf16 %v5187_v6, %v5186_v50  ;;  %v5384_v23 = vrot.slane %v5187_v6, 1 }
 0x458   : > { %v5085_v4 = vpop.f32.mrf.mxu2 }
 0x459   : > { %v5258_v26 = vsel %vm15095_vm14, %v5255_v54, %v5257_v16  ;;  %12735 = vst [vmem:[#allocation2 + $0xa8] sm:$0xff] %v12269_v13   ;;  %v5086_v11 = vadd.f32 %v14023_v41, %v5085_v4  ;;  %v5385_v43 = vsel %vm15097_vm5, %v5382_v55, %v5384_v23  ;;  %v11485_v54 = vld [vmem:[#allocation3 + $0x70] sm:$0xff]  ;;  %vm15113_vm14 = vnez %v15112_v51 }
 0x45a   : > { %v12189_v38 = vpack.c.bf16 %v5258_v26, %v5347_v46  ;;  %v11588_v26 = vld [vmem:[%s14874_s3 + $0x320] sm:$0xff] }
 0x45b   : > { %v5156_v15 = vmax.f32 %v5086_v11, 0.0  ;;  %6770 = vmatpush.bf16.msrb.mxu2 %v11588_v26 }
 0x45c   : > { %12719 = vst [vmem:[#allocation2 + $0x18] sm:$0xff] %v12189_v38   ;;  %v11546_v1 = vld [vmem:[#allocation2 + $0x130] sm:$0xff] }
 0x45d   : > { %v5188_v53 = vmin.f32 %v5156_v15, 6.0  ;;  %6471 = vmatmul.bf16.gmra.mxu1 %v11546_v1 }
 0x45f   : > { %v5386_v20 = vrot.slane %v5188_v53, 1  ;;  %v5259_v59 = vrot.slane %v5188_v53, 7 }
 0x460   : > { %v5087_v61 = vpop.f32.mrf.mxu2  ;;  %v11523_v63 = vld [vmem:[#allocation2 + $0xa8] sm:$0xff] }
 0x461   : > { %v5387_v60 = vsel %vm15096_vm4, %v5384_v23, %v5386_v20  ;;  %v5088_v56 = vadd.f32 %v14023_v41, %v5087_v61  ;;  %5961 = vmatmul.bf16.gmra.mxu3 %v11523_v63  ;;  %v5260_v45 = vsel %vm15099_vm15, %v5257_v16, %v5259_v59  ;;  %v15125_v63 = vld [vmem:[#allocation16_spill] sm:$0xff] }
 0x462   : > { %v5477_v35 = vsel %vm13078_vm6, 0.0, %v5387_v60  ;;  %v5349_v37 = vsel %vm13089_vm7, 0.0, %v5260_v45  ;;  %vm15101_vm6 = vmmov %vm15089_vm2 }
 0x463   : > { %v12349_v34 = vpack.c.bf16 %v5477_v35, %v5385_v43  ;;  %v5157_v24 = vmax.f32 %v5088_v56, 0.0  ;;  %vm15102_vm2 = vmmov %vm15091_vm3  ;;  %v11612_v35 = vld [vmem:[%s14874_s3 + $0x360] sm:$0xff] }
 0x464   : > { %vm15103_vm7 = vmmov %vm15102_vm2  ;;  %7084 = vmatpush.bf16.msrb.mxu3 %v11612_v35 }
 0x465   : > { %12751 = vst [vmem:[#allocation2 + $0x138] sm:$0xff] %v12349_v34   ;;  %v5189_v33 = vmin.f32 %v5157_v24, 6.0  ;;  %5129 = vmatmul.bf16.gmra.mxu2 %v11484_v12  ;;  %vm15105_vm11 = vmmov %vm15101_vm6 }
 0x466   : > { %vm15107_vm3 = vmmov %vm15101_vm6 }
 0x467   : > { %v5261_v10 = vrot.slane %v5189_v33, 7  ;;  %v12274_v48 = vpack.c.bf16 %v5189_v33, %v5188_v53  ;;  %v5388_v3 = vrot.slane %v5189_v33, 1  ;;  %vm15111_vm12 = vmmov %vm15107_vm3 }
 0x468   : > { %v5090_v52 = vpop.f32.mrf.mxu2  ;;  %vm15115_vm4 = vmmov %vm15102_vm2 }
 0x469   : > { %v5262_v42 = vsel %vm15101_vm6, %v5259_v59, %v5261_v10  ;;  %12736 = vst [vmem:[#allocation2 + $0xb0] sm:$0xff] %v12274_v48   ;;  %v5091_v2 = vadd.f32 %v14023_v41, %v5090_v52  ;;  %v5389_v55 = vsel %vm15103_vm7, %v5386_v20, %v5388_v3  ;;  %v11486_v59 = vld [vmem:[#allocation3 + $0x78] sm:$0xff]  ;;  %vm15116_vm5 = vmmov %vm15102_vm2 }
 0x46a   : > { %v12194_v49 = vpack.c.bf16 %v5262_v42, %v5349_v37  ;;  %vm15119_vm6 = vmmov %vm15107_vm3 }
 0x46b   : > { %v5158_v39 = vmax.f32 %v5091_v2, 0.0  ;;  %vm15122_vm7 = vmmov %vm15107_vm3 }
 0x46c   : > { %12720 = vst [vmem:[#allocation2 + $0x20] sm:$0xff] %v12194_v49   ;;  %v11547_v27 = vld [vmem:[#allocation2 + $0x138] sm:$0xff] }
 0x46d   : > { %v5190_v18 = vmin.f32 %v5158_v39, 6.0  ;;  %6476 = vmatmul.bf16.gmra.mxu1 %v11547_v27 }
 0x46f   : > { %v5390_v21 = vrot.slane %v5190_v18, 1  ;;  %v5263_v40 = vrot.slane %v5190_v18, 7 }
 0x470   : > { %v5092_v30 = vpop.f32.mrf.mxu2  ;;  %v11524_v19 = vld [vmem:[#allocation2 + $0xb0] sm:$0xff] }
 0x471   : > { %v5391_v50 = vsel %vm15102_vm2, %v5388_v3, %v5390_v21  ;;  %v5093_v8 = vadd.f32 %v14023_v41, %v5092_v30  ;;  %5966 = vmatmul.bf16.gmra.mxu3 %v11524_v19  ;;  %v5264_v29 = vsel %vm15105_vm11, %v5261_v10, %v5263_v40  ;;  %v15117_v19 = vld [vmem:[#allocation14_spill] sm:$0xff]  ;;  %vm15123_vm11 = vmmov %vm15115_vm4 }
 0x472   : > { %v5479_v57 = vsel %vm13106_vm8, 0.0, %v5391_v50  ;;  %v5351_v32 = vsel %vm13117_vm9, 0.0, %v5264_v29  ;;  %vm15108_vm8 = vmmov %vm15102_vm2  ;;  %vm15118_vm15 = vnez %v15117_v19 }
 0x473   : > { %v12354_v0 = vpack.c.bf16 %v5479_v57, %v5389_v55  ;;  %v5159_v36 = vmax.f32 %v5093_v8, 0.0  ;;  %vm15109_vm9 = vmmov %vm15102_vm2 }
 0x475   : > { %12752 = vst [vmem:[#allocation2 + $0x140] sm:$0xff] %v12354_v0   ;;  %v5191_v58 = vmin.f32 %v5159_v36, 6.0  ;;  %5134 = vmatmul.bf16.gmra.mxu2 %v11485_v54 }
 0x477   : > { %v5265_v25 = vrot.slane %v5191_v58, 7  ;;  %v12279_v47 = vpack.c.bf16 %v5191_v58, %v5190_v18  ;;  %v5392_v38 = vrot.slane %v5191_v58, 1  ;;  %v15120_v58 = vld [vmem:[#allocation15_spill] sm:$0xff] }
 0x478   : > { %v5095_v9 = vpop.f32.mrf.mxu2  ;;  %vm15121_vm2 = vnez %v15120_v58 }
 0x479   : > { %v5266_v16 = vsel %vm15107_vm3, %v5263_v40, %v5265_v25  ;;  %12737 = vst [vmem:[#allocation2 + $0xb8] sm:$0xff] %v12279_v47   ;;  %v5096_v13 = vadd.f32 %v14023_v41, %v5095_v9  ;;  %v5393_v20 = vsel %vm15109_vm9, %v5390_v21, %v5392_v38  ;;  %v11487_v40 = vld [vmem:[#allocation3 + $0x28] sm:$0xff]  ;;  %vm15127_vm9 = vmmov %vm15119_vm6 }
 0x47a   : > { %v12199_v4 = vpack.c.bf16 %v5266_v16, %v5351_v32 }
 0x47b   : > { %v5160_v5 = vmax.f32 %v5096_v13, 0.0 }
 0x47c   : > { %12721 = vst [vmem:[#allocation2 + $0x28] sm:$0xff] %v12199_v4   ;;  %v11548_v46 = vld [vmem:[#allocation2 + $0x140] sm:$0xff] }
 0x47d   : > { %v5192_v11 = vmin.f32 %v5160_v5, 6.0  ;;  %6481 = vmatmul.bf16.gmra.mxu1 %v11548_v46  ;;  %v5947_v32 = vpop.f32.mrf.mxu3  ;;  %v11587_v5 = vld [vmem:[%s14874_s3 + $0x318] sm:$0xff] }
 0x47e   : > { %6771 = vmatpush.bf16.msrb.mxu2 %v11587_v5 }
 0x47f   : > { %v5394_v15 = vrot.slane %v5192_v11, 1  ;;  %v5267_v61 = vrot.slane %v5192_v11, 7 }
 0x480   : > { %v5097_v1 = vpop.f32.mrf.mxu2  ;;  %v11525_v31 = vld [vmem:[#allocation2 + $0xb8] sm:$0xff] }
 0x481   : > { %v5395_v53 = vsel %vm15108_vm8, %v5392_v38, %v5394_v15  ;;  %v5098_v23 = vadd.f32 %v14023_v41, %v5097_v1  ;;  %5971 = vmatmul.bf16.gmra.mxu3 %v11525_v31  ;;  %v5268_v34 = vsel %vm15111_vm12, %v5265_v25, %v5267_v61  ;;  %vm15126_vm8 = vnez %v15125_v63 }
 0x482   : > { %v5481_v60 = vsel %vm13128_vm10, 0.0, %v5395_v53  ;;  %v5353_v45 = vsel %vm15113_vm14, 0.0, %v5268_v34  ;;  %vm15114_vm10 = vmmov %vm15107_vm3 }
 0x483   : > { %v12359_v56 = vpack.c.bf16 %v5481_v60, %v5393_v20  ;;  %v5161_v43 = vmax.f32 %v5098_v23, 0.0  ;;  %vm15124_vm3 = vmmov %vm15115_vm4 }
 0x484   : > { %vm15130_vm14 = vmmov %vm15119_vm6 }
 0x485   : > { %12753 = vst [vmem:[#allocation2 + $0x148] sm:$0xff] %v12359_v56   ;;  %v5193_v22 = vmin.f32 %v5161_v43, 6.0  ;;  %5139 = vmatmul.bf16.gmra.mxu2 %v11486_v59 }
 0x487   : > { %v5269_v24 = vrot.slane %v5193_v22, 7  ;;  %v12284_v12 = vpack.c.bf16 %v5193_v22, %v5192_v11  ;;  %v5396_v2 = vrot.slane %v5193_v22, 1  ;;  %v11611_v22 = vld [vmem:[%s14874_s3 + $0x358] sm:$0xff] }
 0x488   : > { %v5100_v33 = vpop.f32.mrf.mxu2  ;;  %7085 = vmatpush.bf16.msrb.mxu3 %v11611_v22 }
 0x489   : > { %v5270_v10 = vsel %vm15114_vm10, %v5267_v61, %v5269_v24  ;;  %12738 = vst [vmem:[#allocation2 + $0xc0] sm:$0xff] %v12284_v12   ;;  %v5101_v48 = vadd.f32 %v14023_v41, %v5100_v33  ;;  %v5397_v21 = vsel %vm15116_vm5, %v5394_v15, %v5396_v2  ;;  %v15128_v33 = vld [vmem:[#allocation17_spill] sm:$0xff]  ;;  %vm15131_vm10 = vmmov %vm15124_vm3 }
 0x48a   : > { %v12204_v52 = vpack.c.bf16 %v5270_v10, %v5353_v45  ;;  %vm15129_vm12 = vnez %v15128_v33 }
 0x48b   : > { %v5162_v17 = vmax.f32 %v5101_v48, 0.0 }
 0x48c   : > { %12722 = vst [vmem:[#allocation2 + $0x30] sm:$0xff] %v12204_v52   ;;  %v11549_v37 = vld [vmem:[#allocation2 + $0x148] sm:$0xff] }
 0x48d   : > { %v5194_v42 = vmin.f32 %v5162_v17, 6.0  ;;  %6486 = vmatmul.bf16.gmra.mxu1 %v11549_v37 }
 0x48e   : > { %v6462_v26 = vpop.f32.mrf.mxu1 }
 0x48f   : > { %v5398_v49 = vrot.slane %v5194_v42, 1  ;;  %v5271_v30 = vrot.slane %v5194_v42, 7 }
 0x490   : > { %v5102_v39 = vpop.f32.mrf.mxu2  ;;  %v11526_v27 = vld [vmem:[#allocation2 + $0xc0] sm:$0xff] }
 0x491   : > { %v5399_v18 = vsel %vm15115_vm4, %v5396_v2, %v5398_v49  ;;  %v5103_v3 = vadd.f32 %v14023_v41, %v5102_v39  ;;  %5976 = vmatmul.bf16.gmra.mxu3 %v11526_v27  ;;  %v5272_v57 = vsel %vm15119_vm6, %v5269_v24, %v5271_v30  ;;  %v6180_v16 = vpop.f32.mrf.mxu0  ;;  %vm15132_vm4 = vmmov %vm15124_vm3 }
 0x492   : > { %v5483_v50 = vsel %vm15118_vm15, 0.0, %v5399_v18  ;;  %v5355_v29 = vsel %vm15121_vm2, 0.0, %v5272_v57  ;;  %v6181_v4 = vadd.f32 %v6180_v16, %v5947_v32  ;;  %vm15135_vm15 = vmmov %vm15119_vm6  ;;  %v14150_v16 = vpop.f32.mrf.mxu3 }
 0x493   : > { %v12364_v8 = vpack.c.bf16 %v5483_v50, %v5397_v21  ;;  %v5163_v55 = vmax.f32 %v5103_v3, 0.0  ;;  %vm15138_vm2 = vmmov %vm15122_vm7 }
 0x494   : > { %v14122_v38 = vadd.f32 %v6462_v26, %v6181_v4 }
 0x495   : > { %12754 = vst [vmem:[#allocation2 + $0x150] sm:$0xff] %v12364_v8   ;;  %v5195_v44 = vmin.f32 %v5163_v55, 6.0  ;;  %5144 = vmatmul.bf16.gmra.mxu2 %v11487_v40 }
 0x497   : > { %v5273_v0 = vrot.slane %v5195_v44, 7  ;;  %v12289_v36 = vpack.c.bf16 %v5195_v44, %v5194_v42  ;;  %v5400_v11 = vrot.slane %v5195_v44, 1 }
 0x498   : > { %v5105_v54 = vpop.f32.mrf.mxu2 }
 0x499   : > { %v5274_v25 = vsel %vm15122_vm7, %v5271_v30, %v5273_v0  ;;  %12739 = vst [vmem:[#allocation2 + $0xc8] sm:$0xff] %v12289_v36   ;;  %v5106_v47 = vadd.f32 %v14023_v41, %v5105_v54  ;;  %v5401_v20 = vsel %vm15124_vm3, %v5398_v49, %v5400_v11  ;;  %v15133_v30 = vld [vmem:[#allocation18_spill] sm:$0xff]  ;;  %v15136_v36 = vld [vmem:[#allocation19_spill] sm:$0xff]  ;;  %vm15139_vm7 = vmmov %vm15124_vm3 }
 0x49a   : > { %v12209_v9 = vpack.c.bf16 %v5274_v25, %v5355_v29  ;;  %vm15134_vm5 = vnez %v15133_v30  ;;  %vm15137_vm6 = vnez %v15136_v36 }
 0x49b   : > { %v5164_v6 = vmax.f32 %v5106_v47, 0.0 }
 0x49c   : > { %12723 = vst [vmem:[#allocation2 + $0x38] sm:$0xff] %v12209_v9   ;;  %v11550_v13 = vld [vmem:[#allocation2 + $0x150] sm:$0xff] }
 0x49d   : > { %v5196_v46 = vmin.f32 %v5164_v6, 6.0  ;;  %6491 = vmatmul.bf16.gmra.mxu1 %v11550_v13  ;;  %v11586_v6 = vld [vmem:[%s14874_s3 + $0x310] sm:$0xff] }
 0x49e   : > { %6772 = vmatpush.bf16.msrb.mxu2 %v11586_v6 }
 0x49f   : > { %v5402_v15 = vrot.slane %v5196_v46, 1  ;;  %v5275_v61 = vrot.slane %v5196_v46, 7 }
 0x4a0   : > { %v5107_v1 = vpop.f32.mrf.mxu2  ;;  %v11527_v31 = vld [vmem:[#allocation2 + $0xc8] sm:$0xff] }
 0x4a1   : > { %v5403_v53 = vsel %vm15123_vm11, %v5400_v11, %v5402_v15  ;;  %v5108_v23 = vadd.f32 %v14023_v41, %v5107_v1  ;;  %5981 = vmatmul.bf16.gmra.mxu3 %v11527_v31  ;;  %v5276_v35 = vsel %vm15127_vm9, %v5273_v0, %v5275_v61  ;;  %vm15140_vm11 = vmmov %vm15124_vm3  ;;  %v15141_v31 = vld [vmem:[#allocation20_spill] sm:$0xff] }
 0x4a2   : > { %v5485_v60 = vsel %vm15126_vm8, 0.0, %v5403_v53  ;;  %v5357_v51 = vsel %vm15129_vm12, 0.0, %v5276_v35  ;;  %vm15142_vm3 = vnez %v15141_v31  ;;  %vm15143_vm8 = vmmov %vm15138_vm2 }
 0x4a3   : > { %v12369_v56 = vpack.c.bf16 %v5485_v60, %v5401_v20  ;;  %v5165_v43 = vmax.f32 %v5108_v23, 0.0  ;;  %v14157_v20 = vpop.f32.mrf.mxu1  ;;  %vm15146_vm12 = vmmov %vm15138_vm2 }
 0x4a5   : > { %12755 = vst [vmem:[#allocation2 + $0x158] sm:$0xff] %v12369_v56   ;;  %v5197_v59 = vmin.f32 %v5165_v43, 6.0  ;;  %v11610_v56 = vld [vmem:[%s14874_s3 + $0x350] sm:$0xff] }
 0x4a6   : > { %7086 = vmatpush.bf16.msrb.mxu3 %v11610_v56 }
 0x4a7   : > { %v5277_v34 = vrot.slane %v5197_v59, 7  ;;  %v12294_v24 = vpack.c.bf16 %v5197_v59, %v5196_v46  ;;  %v5404_v42 = vrot.slane %v5197_v59, 1 }
 0x4a8   : > { %v5110_v12 = vpop.f32.mrf.mxu2 }
 0x4a9   : > { %v5278_v45 = vsel %vm15130_vm14, %v5275_v61, %v5277_v34  ;;  %12740 = vst [vmem:[#allocation2 + $0xd0] sm:$0xff] %v12294_v24   ;;  %v5111_v10 = vadd.f32 %v14023_v41, %v5110_v12  ;;  %v5405_v3 = vsel %vm15132_vm4, %v5402_v15, %v5404_v42  ;;  %vm15147_vm14 = vmmov %vm15132_vm4 }
 0x4aa   : > { %v12214_v48 = vpack.c.bf16 %v5278_v45, %v5357_v51 }
 0x4ab   : > { %v5166_v52 = vmax.f32 %v5111_v10, 0.0 }
 0x4ac   : > { %12724 = vst [vmem:[#allocation2 + $0x40] sm:$0xff] %v12214_v48   ;;  %v11551_v17 = vld [vmem:[#allocation2 + $0x158] sm:$0xff] }
 0x4ad   : > { %v5198_v37 = vmin.f32 %v5166_v52, 6.0  ;;  %6496 = vmatmul.bf16.gmra.mxu1 %v11551_v17 }
 0x4af   : > { %v5406_v2 = vrot.slane %v5198_v37, 1  ;;  %v5279_v21 = vrot.slane %v5198_v37, 7 }
 0x4b0   : > { %v5112_v49 = vpop.f32.mrf.mxu2  ;;  %v11528_v39 = vld [vmem:[#allocation2 + $0xd0] sm:$0xff] }
 0x4b1   : > { %v5407_v27 = vsel %vm15131_vm10, %v5404_v42, %v5406_v2  ;;  %v5113_v18 = vadd.f32 %v14023_v41, %v5112_v49  ;;  %5986 = vmatmul.bf16.gmra.mxu3 %v11528_v39  ;;  %v5280_v40 = vsel %vm15135_vm15, %v5277_v34, %v5279_v21  ;;  %v15144_v34 = vld [vmem:[#allocation21_spill] sm:$0xff]  ;;  %vm15148_vm10 = vmmov %vm15132_vm4 }
 0x4b2   : > { %v5487_v19 = vsel %vm15134_vm5, 0.0, %v5407_v27  ;;  %v5359_v54 = vsel %vm15137_vm6, 0.0, %v5280_v40  ;;  %vm15145_vm9 = vnez %v15144_v34  ;;  %vm15151_vm5 = vmmov %vm15138_vm2  ;;  %v11609_v34 = vld [vmem:[%s14874_s3 + $0x348] sm:$0xff] }
 0x4b3   : > { %v12374_v50 = vpack.c.bf16 %v5487_v19, %v5405_v3  ;;  %v5167_v8 = vmax.f32 %v5113_v18, 0.0  ;;  %vm15154_vm6 = vmmov %vm15138_vm2  ;;  %7087 = vmatpush.bf16.msrb.mxu3 %v11609_v34 }
 0x4b5   : > { %12756 = vst [vmem:[#allocation2 + $0x160] sm:$0xff] %v12374_v50   ;;  %v5199_v55 = vmin.f32 %v5167_v8, 6.0 }
 0x4b7   : > { %v5281_v44 = vrot.slane %v5199_v55, 7  ;;  %v12299_v57 = vpack.c.bf16 %v5199_v55, %v5198_v37  ;;  %v5408_v13 = vrot.slane %v5199_v55, 1 }
 0x4b8   : > { %v5115_v0 = vpop.f32.mrf.mxu2 }
 0x4b9   : > { %v5282_v58 = vsel %vm15138_vm2, %v5279_v21, %v5281_v44  ;;  %12741 = vst [vmem:[#allocation2 + $0xd8] sm:$0xff] %v12299_v57   ;;  %v5116_v29 = vadd.f32 %v14023_v41, %v5115_v0  ;;  %v5409_v15 = vsel %vm15140_vm11, %v5406_v2, %v5408_v13  ;;  %v15149_v21 = vld [vmem:[#allocation22_spill] sm:$0xff]  ;;  %vm15155_vm2 = vmmov %vm15139_vm7 }
 0x4ba   : > { %v12219_v25 = vpack.c.bf16 %v5282_v58, %v5359_v54  ;;  %vm15150_vm4 = vnez %v15149_v21  ;;  %v15152_v54 = vld [vmem:[#allocation23_spill] sm:$0xff] }
 0x4bb   : > { %v5168_v47 = vmax.f32 %v5116_v29, 0.0  ;;  %vm15153_vm15 = vnez %v15152_v54 }
 0x4bc   : > { %12725 = vst [vmem:[#allocation2 + $0x48] sm:$0xff] %v12219_v25   ;;  %v11552_v9 = vld [vmem:[#allocation2 + $0x160] sm:$0xff] }
 0x4bd   : > { %v5200_v32 = vmin.f32 %v5168_v47, 6.0  ;;  %6501 = vmatmul.bf16.gmra.mxu1 %v11552_v9 }
 0x4bf   : > { %v5410_v4 = vrot.slane %v5200_v32, 1  ;;  %v5283_v1 = vrot.slane %v5200_v32, 7 }
 0x4c0   : > { %v5117_v5 = vpop.f32.mrf.mxu2  ;;  %v11529_v46 = vld [vmem:[#allocation2 + $0xd8] sm:$0xff] }
 0x4c1   : > { %v5411_v26 = vsel %vm15139_vm7, %v5408_v13, %v5410_v4  ;;  %v5118_v11 = vadd.f32 %v14023_v41, %v5117_v5  ;;  %5991 = vmatmul.bf16.gmra.mxu3 %v11529_v46  ;;  %v5284_v43 = vsel %vm15143_vm8, %v5281_v44, %v5283_v1  ;;  %v11585_v13 = vld [vmem:[%s14874_s3 + $0x308] sm:$0xff]  ;;  %vm15156_vm7 = vmmov %vm15155_vm2 }
 0x4c2   : > { %v5489_v53 = vsel %vm15142_vm3, 0.0, %v5411_v26  ;;  %v5361_v24 = vsel %vm15145_vm9, 0.0, %v5284_v43  ;;  %6773 = vmatpush.bf16.msrb.mxu2 %v11585_v13  ;;  %vm15159_vm3 = vmmov %vm15151_vm5 }
 0x4c3   : > { %v12379_v23 = vpack.c.bf16 %v5489_v53, %v5409_v15  ;;  %v5169_v61 = vmax.f32 %v5118_v11, 0.0  ;;  %vm15162_vm9 = vmmov %vm15159_vm3 }
 0x4c4   : > { %v14159_v60 = vpop.f32.mrf.mxu3 }
 0x4c5   : > { %12757 = vst [vmem:[#allocation2 + $0x168] sm:$0xff] %v12379_v23   ;;  %v5201_v63 = vmin.f32 %v5169_v61, 6.0  ;;  %v15157_v61 = vld [vmem:[#allocation24_spill] sm:$0xff] }
 0x4c6   : > { %vm15158_vm11 = vnez %v15157_v61  ;;  %v11584_v61 = vld [vmem:[%s14874_s3 + $0x300] sm:$0xff] }
 0x4c7   : > { %v5285_v59 = vrot.slane %v5201_v63, 7  ;;  %v12304_v22 = vpack.c.bf16 %v5201_v63, %v5200_v32  ;;  %v5412_v37 = vrot.slane %v5201_v63, 1  ;;  %6774 = vmatpush.bf16.msrb.mxu2 %v11584_v61 }
 0x4c8   : > { %v5120_v35 = vpop.f32.mrf.mxu2 }
 0x4c9   : > { %v5286_v12 = vsel %vm15146_vm12, %v5283_v1, %v5285_v59  ;;  %12742 = vst [vmem:[#allocation2 + $0xe0] sm:$0xff] %v12304_v22   ;;  %v5121_v33 = vadd.f32 %v14023_v41, %v5120_v35  ;;  %v5413_v18 = vsel %vm15148_vm10, %v5410_v4, %v5412_v37  ;;  %vm15163_vm12 = vmmov %vm15155_vm2 }
 0x4ca   : > { %v12224_v51 = vpack.c.bf16 %v5286_v12, %v5361_v24  ;;  %v14169_v10 = vpop.f32.mrf.mxu1 }
 0x4cb   : > { %v5170_v45 = vmax.f32 %v5121_v33, 0.0 }
 0x4cc   : > { %12726 = vst [vmem:[#allocation2 + $0x50] sm:$0xff] %v12224_v51   ;;  %v11553_v48 = vld [vmem:[#allocation2 + $0x168] sm:$0xff]  ;;  %v14171_v17 = vpop.f32.mrf.mxu3 }
 0x4cd   : > { %v5202_v52 = vmin.f32 %v5170_v45, 6.0  ;;  %6506 = vmatmul.bf16.gmra.mxu1 %v11553_v48  ;;  %v15160_v45 = vld [vmem:[#allocation25_spill] sm:$0xff] }
 0x4ce   : > { %vm15161_vm8 = vnez %v15160_v45 }
 0x4cf   : > { %v5414_v42 = vrot.slane %v5202_v52, 1  ;;  %v5287_v3 = vrot.slane %v5202_v52, 7 }
 0x4d0   : > { %v5122_v2 = vpop.f32.mrf.mxu2  ;;  %v11530_v49 = vld [vmem:[#allocation2 + $0xe0] sm:$0xff] }
 0x4d1   : > { %v5415_v39 = vsel %vm15147_vm14, %v5412_v37, %v5414_v42  ;;  %v5123_v27 = vadd.f32 %v14023_v41, %v5122_v2  ;;  %5996 = vmatmul.bf16.gmra.mxu3 %v11530_v49  ;;  %v5288_v44 = vsel %vm15151_vm5, %v5285_v59, %v5287_v3  ;;  %vm15164_vm14 = vmmov %vm15155_vm2 }
 0x4d2   : > { %v5491_v30 = vsel %vm15150_vm4, 0.0, %v5415_v39  ;;  %v14178_v8 = vpop.f32.mrf.mxu1  ;;  %v5363_v58 = vsel %vm15153_vm15, 0.0, %v5288_v44  ;;  %vm15167_vm4 = vmmov %vm15159_vm3 }
 0x4d3   : > { %v12384_v19 = vpack.c.bf16 %v5491_v30, %v5413_v18  ;;  %v5171_v50 = vmax.f32 %v5123_v27, 0.0  ;;  %vm15170_vm15 = vmmov %vm15159_vm3 }
 0x4d4   : > { %v14180_v40 = vpop.f32.mrf.mxu3 }
 0x4d5   : > { %12758 = vst [vmem:[#allocation2 + $0x170] sm:$0xff] %v12384_v19   ;;  %v5203_v55 = vmin.f32 %v5171_v50, 6.0 }
 0x4d7   : > { %v5289_v57 = vrot.slane %v5203_v55, 7  ;;  %v12309_v0 = vpack.c.bf16 %v5203_v55, %v5202_v52  ;;  %v5416_v46 = vrot.slane %v5203_v55, 1 }
 0x4d8   : > { %v5125_v36 = vpop.f32.mrf.mxu2 }
 0x4d9   : > { %v5290_v29 = vsel %vm15154_vm6, %v5287_v3, %v5289_v57  ;;  %12743 = vst [vmem:[#allocation2 + $0xe8] sm:$0xff] %v12309_v0   ;;  %v5126_v25 = vadd.f32 %v14023_v41, %v5125_v36  ;;  %v5417_v53 = vsel %vm15156_vm7, %v5414_v42, %v5416_v46  ;;  %v15165_v0 = vld [vmem:[#allocation26_spill] sm:$0xff]  ;;  %vm15171_vm6 = vmmov %vm15155_vm2 }
 0x4da   : > { %v12229_v47 = vpack.c.bf16 %v5290_v29, %v5363_v58  ;;  %v14187_v6 = vpop.f32.mrf.mxu1  ;;  %vm15166_vm10 = vnez %v15165_v0  ;;  %v15175_v0 = vld [vmem:[#allocation29_spill] sm:$0xff] }
 0x4db   : > { %v5172_v9 = vmax.f32 %v5126_v25, 0.0 }
 0x4dc   : > { %12727 = vst [vmem:[#allocation2 + $0x58] sm:$0xff] %v12229_v47   ;;  %v11554_v32 = vld [vmem:[#allocation2 + $0x170] sm:$0xff]  ;;  %v14192_v5 = vpop.f32.mrf.mxu3 }
 0x4dd   : > { %v5204_v4 = vmin.f32 %v5172_v9, 6.0  ;;  %6511 = vmatmul.bf16.gmra.mxu1 %v11554_v32 }
 0x4df   : > { %v5418_v26 = vrot.slane %v5204_v4, 1  ;;  %v5291_v23 = vrot.slane %v5204_v4, 7 }
 0x4e0   : > { %v5127_v11 = vpop.f32.mrf.mxu2  ;;  %v11531_v15 = vld [vmem:[#allocation2 + $0xe8] sm:$0xff] }
 0x4e1   : > { %v5419_v1 = vsel %vm15155_vm2, %v5416_v46, %v5418_v26  ;;  %v5128_v31 = vadd.f32 %v14023_v41, %v5127_v11  ;;  %6001 = vmatmul.bf16.gmra.mxu3 %v11531_v15  ;;  %v5292_v24 = vsel %vm15159_vm3, %v5289_v57, %v5291_v23  ;;  %v15168_v46 = vld [vmem:[#allocation27_spill] sm:$0xff] }
 0x4e2   : > { %v5493_v63 = vsel %vm15158_vm11, 0.0, %v5419_v1  ;;  %v14199_v59 = vpop.f32.mrf.mxu1  ;;  %v5365_v48 = vsel %vm15161_vm8, 0.0, %v5292_v24  ;;  %vm15169_vm5 = vnez %v15168_v46  ;;  %vm15174_vm11 = vmmov %vm15159_vm3  ;;  %vm15176_vm3 = vnez %v15175_v0 }
 0x4e3   : > { %v12389_v56 = vpack.c.bf16 %v5493_v63, %v5417_v53  ;;  %v5173_v43 = vmax.f32 %v5128_v31, 0.0  ;;  %vm15177_vm8 = vmmov %vm15167_vm4 }
 0x4e4   : > { %v14201_v35 = vpop.f32.mrf.mxu3 }
 0x4e5   : > { %12759 = vst [vmem:[#allocation2 + $0x178] sm:$0xff] %v12389_v56   ;;  %v5205_v22 = vmin.f32 %v5173_v43, 6.0 }
 0x4e7   : > { %v5293_v12 = vrot.slane %v5205_v22, 7  ;;  %v12314_v33 = vpack.c.bf16 %v5205_v22, %v5204_v4  ;;  %v5420_v3 = vrot.slane %v5205_v22, 1  ;;  %v11663_v22 = vld [vmem:[%s14874_s3 + $0x3f8] sm:$0xff] }
 0x4e8   : > { %v5130_v51 = vpop.f32.mrf.mxu2  ;;  %7709 = vmatpush.bf16.msra.mxu1 %v11663_v22 }
 0x4e9   : > { %v5294_v52 = vsel %vm15162_vm9, %v5291_v23, %v5293_v12  ;;  %12744 = vst [vmem:[#allocation2 + $0xf0] sm:$0xff] %v12314_v33   ;;  %v5131_v37 = vadd.f32 %v14023_v41, %v5130_v51  ;;  %v5421_v44 = vsel %vm15164_vm14, %v5418_v26, %v5420_v3  ;;  %vm15178_vm9 = vmmov %vm15155_vm2 }
 0x4ea   : > { %v12234_v42 = vpack.c.bf16 %v5294_v52, %v5365_v48  ;;  %v14211_v49 = vpop.f32.mrf.mxu1  ;;  %v15172_v52 = vld [vmem:[#allocation28_spill] sm:$0xff] }
 0x4eb   : > { %v5174_v2 = vmax.f32 %v5131_v37, 0.0  ;;  %vm15173_vm7 = vnez %v15172_v52 }
 0x4ec   : > { %12728 = vst [vmem:[#allocation2 + $0x60] sm:$0xff] %v12234_v42   ;;  %v11555_v39 = vld [vmem:[#allocation2 + $0x178] sm:$0xff]  ;;  %v14213_v18 = vpop.f32.mrf.mxu3  ;;  %v11662_v42 = vld [vmem:[%s14874_s3 + $0x3f0] sm:$0xff] }
 0x4ed   : > { %v5206_v27 = vmin.f32 %v5174_v2, 6.0  ;;  %6516 = vmatmul.bf16.gmra.mxu1 %v11555_v39 }
 0x4ee   : > { %7710 = vmatpush.bf16.msra.mxu1 %v11662_v42  ;;  %v11639_v42 = vld [vmem:[%s14874_s3 + $0x3b8] sm:$0xff] }
 0x4ef   : > { %v5422_v21 = vrot.slane %v5206_v27, 1  ;;  %v5295_v57 = vrot.slane %v5206_v27, 7  ;;  %7395 = vmatpush.bf16.msra.mxu0 %v11639_v42 }
 0x4f0   : > { %v5132_v30 = vpop.f32.mrf.mxu2  ;;  %v11532_v19 = vld [vmem:[#allocation2 + $0xf0] sm:$0xff] }
 0x4f1   : > { %v5423_v50 = vsel %vm15163_vm12, %v5420_v3, %v5422_v21  ;;  %v5133_v55 = vadd.f32 %v14023_v41, %v5132_v30  ;;  %6006 = vmatmul.bf16.gmra.mxu3 %v11532_v19  ;;  %v5296_v9 = vsel %vm15167_vm4, %v5293_v12, %v5295_v57  ;;  %vm15179_vm12 = vmmov %vm15155_vm2 }
 0x4f2   : > { %v5495_v36 = vsel %vm15166_vm10, 0.0, %v5423_v50  ;;  %v14220_v29 = vpop.f32.mrf.mxu1  ;;  %v5367_v26 = vsel %vm15169_vm5, 0.0, %v5296_v9  ;;  %v11661_v50 = vld [vmem:[%s14874_s3 + $0x3e8] sm:$0xff]  ;;  %v11660_v9 = vld [vmem:[%s14874_s3 + $0x3e0] sm:$0xff]  ;;  %vm15182_vm10 = vmmov %vm15167_vm4 }
 0x4f3   : > { %v12394_v54 = vpack.c.bf16 %v5495_v36, %v5421_v44  ;;  %v5175_v58 = vmax.f32 %v5133_v55, 0.0  ;;  %7711 = vmatpush.bf16.msra.mxu1 %v11661_v50  ;;  %vm15185_vm5 = vmmov %vm15177_vm8 }
 0x4f4   : > { %v14222_v47 = vpop.f32.mrf.mxu3 }
 0x4f5   : > { %12760 = vst [vmem:[#allocation2 + $0x180] sm:$0xff] %v12394_v54   ;;  %v5207_v25 = vmin.f32 %v5175_v58, 6.0 }
 0x4f7   : > { %v5297_v32 = vrot.slane %v5207_v25, 7  ;;  %v12319_v13 = vpack.c.bf16 %v5207_v25, %v5206_v27  ;;  %v5424_v43 = vrot.slane %v5207_v25, 1  ;;  %7712 = vmatpush.bf16.msra.mxu1 %v11660_v9 }
 0x4f8   : > { %v5135_v4 = vpop.f32.mrf.mxu2 }
 0x4f9   : > { %v5298_v11 = vsel %vm15170_vm15, %v5295_v57, %v5297_v32  ;;  %12745 = vst [vmem:[#allocation2 + $0xf8] sm:$0xff] %v12319_v13   ;;  %v5136_v15 = vadd.f32 %v14023_v41, %v5135_v4  ;;  %v5425_v45 = vsel %vm15155_vm2, %v5422_v21, %v5424_v43  ;;  %v11608_v21 = vld [vmem:[%s14874_s3 + $0x340] sm:$0xff]  ;;  %vm15186_vm15 = vmmov %vm15155_vm2 }
 0x4fa   : > { %v12239_v1 = vpack.c.bf16 %v5298_v11, %v5367_v26  ;;  %v14229_v53 = vpop.f32.mrf.mxu1  ;;  %7088 = vmatpush.bf16.msrb.mxu3 %v11608_v21  ;;  %v11659_v11 = vld [vmem:[%s14874_s3 + $0x3d8] sm:$0xff] }
 0x4fb   : > { %v5176_v31 = vmax.f32 %v5136_v15, 0.0  ;;  %7713 = vmatpush.bf16.msra.mxu1 %v11659_v11 }
 0x4fc   : > { %12729 = vst [vmem:[#allocation2 + $0x68] sm:$0xff] %v12239_v1   ;;  %v11556_v23 = vld [vmem:[#allocation2 + $0x180] sm:$0xff]  ;;  %v14234_v56 = vpop.f32.mrf.mxu3 }
 0x4fd   : > { %v5208_v63 = vmin.f32 %v5176_v31, 6.0  ;;  %6521 = vmatmul.bf16.gmra.mxu1 %v11556_v23 }
 0x4ff   : > { %v5426_v34 = vrot.slane %v5208_v63, 1  ;;  %v5299_v48 = vrot.slane %v5208_v63, 7 }
 0x500   : > { %v5137_v24 = vpop.f32.mrf.mxu2  ;;  %v11533_v12 = vld [vmem:[#allocation2 + $0xf8] sm:$0xff] }
 0x501   : > { %v5427_v33 = vsel %vm15171_vm6, %v5424_v43, %v5426_v34  ;;  %v5138_v51 = vadd.f32 %v14023_v41, %v5137_v24  ;;  %6011 = vmatmul.bf16.gmra.mxu3 %v11533_v12  ;;  %v5300_v30 = vsel %vm15174_vm11, %v5297_v32, %v5299_v48  ;;  %v15180_v24 = vld [vmem:[#allocation30_spill] sm:$0xff]  ;;  %vm15187_vm6 = vmmov %vm15155_vm2 }
 0x502   : > { %v5497_v37 = vsel %vm15173_vm7, 0.0, %v5427_v33  ;;  %v14253_v19 = vpop.f32.mrf.mxu1  ;;  %v5369_v36 = vsel %vm15176_vm3, 0.0, %v5300_v30  ;;  %vm15181_vm14 = vnez %v15180_v24  ;;  %v11658_v33 = vld [vmem:[%s14874_s3 + $0x3d0] sm:$0xff]  ;;  %v15183_v30 = vld [vmem:[#allocation31_spill] sm:$0xff]  ;;  %vm15190_vm7 = vmmov %vm15185_vm5 }
 0x503   : > { %v12399_v2 = vpack.c.bf16 %v5497_v37, %v5425_v45  ;;  %v5177_v39 = vmax.f32 %v5138_v51, 0.0  ;;  %7714 = vmatpush.bf16.msra.mxu1 %v11658_v33  ;;  %v11657_v37 = vld [vmem:[%s14874_s3 + $0x3c8] sm:$0xff]  ;;  %vm15184_vm4 = vnez %v15183_v30  ;;  %vm15192_vm11 = vmmov %vm15185_vm5 }
 0x504   : > { %v14247_v3 = vpop.f32.mrf.mxu3  ;;  %vm15193_vm3 = vmmov %vm15185_vm5 }
 0x505   : > { %12761 = vst [vmem:[#allocation2 + $0x188] sm:$0xff] %v12399_v2   ;;  %v5209_v27 = vmin.f32 %v5177_v39, 6.0 }
 0x507   : > { %v5301_v55 = vrot.slane %v5209_v27, 7  ;;  %v12324_v44 = vpack.c.bf16 %v5209_v27, %v5208_v63  ;;  %v5428_v26 = vrot.slane %v5209_v27, 1  ;;  %v11711_v27 = vld [vmem:[%s14874_s3 + $0x478] sm:$0xff]  ;;  %7715 = vmatpush.bf16.msra.mxu1 %v11657_v37 }
 0x508   : > { %v5140_v57 = vpop.f32.mrf.mxu2  ;;  %8337 = vmatpush.bf16.msra.mxu3 %v11711_v27 }
 0x509   : > { %v5302_v54 = vsel %vm15177_vm8, %v5299_v48, %v5301_v55  ;;  %12746 = vst [vmem:[#allocation2 + $0x100] sm:$0xff] %v12324_v44   ;;  %v5141_v58 = vadd.f32 %v14023_v41, %v5140_v57  ;;  %v5429_v43 = vsel %vm15179_vm12, %v5426_v34, %v5428_v26  ;;  %v11687_v34 = vld [vmem:[%s14874_s3 + $0x438] sm:$0xff]  ;;  %v12825_v44 = vld [vmem:[%s14873_s2 + $0x1] ss:$0 sm:$0xff]  ;;  %vm15194_vm8 = vmmov %vm15187_vm6 }
 0x50a   : > { %v12244_v25 = vpack.c.bf16 %v5302_v54, %v5369_v36  ;;  %v14270_v1 = vpop.f32.mrf.mxu1  ;;  %8023 = vmatpush.bf16.msra.mxu2 %v11687_v34  ;;  %v11656_v54 = vld [vmem:[%s14874_s3 + $0x3c0] sm:$0xff] }
 0x50b   : > { %v5178_v32 = vmax.f32 %v5141_v58, 0.0  ;;  %7716 = vmatpush.bf16.msra.mxu1 %v11656_v54 }
 0x50c   : > { %12730 = vst [vmem:[#allocation2 + $0x70] sm:$0xff] %v12244_v25   ;;  %v11557_v13 = vld [vmem:[#allocation2 + $0x188] sm:$0xff]  ;;  %v14265_v46 = vpop.f32.mrf.mxu3 }
 0x50d   : > { %v5210_v4 = vmin.f32 %v5178_v32, 6.0  ;;  %6526 = vmatmul.bf16.gmra.mxu1 %v11557_v13 }
 0x50f   : > { %v5430_v15 = vrot.slane %v5210_v4, 1  ;;  %v5303_v22 = vrot.slane %v5210_v4, 7 }
 0x510   : > { %v5142_v31 = vpop.f32.mrf.mxu2  ;;  %v11534_v23 = vld [vmem:[#allocation2 + $0x100] sm:$0xff] }
 0x511   : > { %v5431_v61 = vsel %vm15178_vm9, %v5428_v26, %v5430_v15  ;;  %v5143_v63 = vadd.f32 %v14023_v41, %v5142_v31  ;;  %6016 = vmatmul.bf16.gmra.mxu3 %v11534_v23  ;;  %v5304_v41 = vsel %vm15182_vm10, %v5301_v55, %v5303_v22  ;;  %vm15195_vm9 = vmmov %vm15187_vm6 }
 0x512   : > { %v5499_v12 = vsel %vm15181_vm14, 0.0, %v5431_v61  ;;  %v5371_v50 = vsel %vm15184_vm4, 0.0, %v5304_v41  ;;  %v14301_v36 = vpop.f32.mrf.mxu1 }
 0x513   : > { %v12404_v51 = vpack.c.bf16 %v5499_v12, %v5429_v43  ;;  %v5179_v45 = vmax.f32 %v5143_v63, 0.0  ;;  %v15188_v43 = vld [vmem:[#allocation32_spill] sm:$0xff] }
 0x514   : > { %v14280_v52 = vpop.f32.mrf.mxu3  ;;  %vm15189_vm2 = vnez %v15188_v43  ;;  %v11498_v43 = vld [vmem:[#allocation2 + $0x10] sm:$0xff] }
 0x515   : > { %12762 = vst [vmem:[#allocation2 + $0x190] sm:$0xff] %v12404_v51   ;;  %v5211_v48 = vmin.f32 %v5179_v45, 6.0 }
 0x517   : > { %v5305_v2 = vrot.slane %v5211_v48, 7  ;;  %v12329_v39 = vpack.c.bf16 %v5211_v48, %v5210_v4  ;;  %v5432_v13 = vrot.slane %v5211_v48, 1 }
 0x518   : > { %v5145_v21 = vpop.f32.mrf.mxu2 }
 0x519   : > { %v5306_v55 = vsel %vm15185_vm5, %v5303_v22, %v5305_v2  ;;  %12747 = vst [vmem:[#allocation2 + $0x108] sm:$0xff] %v12329_v39   ;;  %v5146_v57 = vadd.f32 %v12825_v44, %v5145_v21  ;;  %v5433_v63 = vsel %vm15187_vm6, %v5430_v15, %v5432_v13 }
 0x51a   : > { %v12249_v0 = vpack.c.bf16 %v5306_v55, %v5371_v50  ;;  %v14312_v33 = vpop.f32.mrf.mxu1  ;;  %v11595_v55 = vld [vmem:[#allocation2 + $0xb0] sm:$0xff] }
 0x51b   : > { %v5180_v58 = vmax.f32 %v5146_v57, 0.0 }
 0x51c   : > { %12731 = vst [vmem:[#allocation2 + $0x78] sm:$0xff] %v12249_v0   ;;  %v11558_v25 = vld [vmem:[#allocation2 + $0x190] sm:$0xff]  ;;  %v14306_v32 = vpop.f32.mrf.mxu3 }
 0x51d   : > { %v5212_v9 = vmin.f32 %v5180_v58, 6.0  ;;  %6531 = vmatmul.bf16.gmra.mxu1 %v11558_v25 }
 0x51f   : > { %v5434_v4 = vrot.slane %v5212_v9, 1  ;;  %v5307_v31 = vrot.slane %v5212_v9, 7 }
 0x520   : > { %v5147_v26 = vpop.f32.mrf.mxu2  ;;  %v11535_v11 = vld [vmem:[#allocation2 + $0x108] sm:$0xff] }
 0x521   : > { %v5435_v23 = vsel %vm15186_vm15, %v5432_v13, %v5434_v4  ;;  %v5148_v61 = vadd.f32 %v12825_v44, %v5147_v26  ;;  %6021 = vmatmul.bf16.gmra.mxu3 %v11535_v11  ;;  %v5308_v51 = vsel %vm15190_vm7, %v5305_v2, %v5307_v31  ;;  %v11710_v26 = vld [vmem:[%s14874_s3 + $0x470] sm:$0xff] }
 0x522   : > { %v5501_v22 = vsel %vm15189_vm2, 0.0, %v5435_v23  ;;  %v5373_v15 = vsel %vm13496_vm1, 0.0, %v5308_v51  ;;  %v14334_v14 = vpop.f32.mrf.mxu1  ;;  %8338 = vmatpush.bf16.msra.mxu3 %v11710_v26  ;;  %v11641_v51 = vld [vmem:[#allocation2 + $0x18] sm:$0xff] }
 0x523   : > { %v12409_v24 = vpack.c.bf16 %v5501_v22, %v5433_v63  ;;  %v5181_v12 = vmax.f32 %v5148_v61, 0.0  ;;  %v11593_v61 = vld [vmem:[#allocation2 + $0xa0] sm:$0xff]  ;;  %v11569_v22 = vld [vmem:[#allocation2 + $0x10] sm:$0xff] }
 0x524   : > { %v14315_v48 = vpop.f32.mrf.mxu3 }
 0x525   : > { %12763 = vst [vmem:[#allocation2 + $0x198] sm:$0xff] %v12409_v24   ;;  %v5213_v45 = vmin.f32 %v5181_v12, 6.0 }
 0x527   : > { %v5215_v41 = vrot.slane %v5213_v45, 7  ;;  %v5436_v34 = vrot.slane %v5213_v45, 1  ;;  %v12334_v37 = vpack.c.bf16 %v5213_v45, %v5212_v9 }
 0x529   : > { %v5309_v39 = vsel %vm15192_vm11, %v5307_v31, %v5215_v41  ;;  %v5342_v27 = vsel %vm15193_vm3, %v5215_v41, %v5248_v28  ;;  %v5437_v21 = vsel %vm15194_vm8, %v5434_v4, %v5436_v34  ;;  %v5471_v2 = vsel %vm15195_vm9, %v5436_v34, %v5375_v7  ;;  %12748 = vst [vmem:[#allocation2 + $0x110] sm:$0xff] %v12334_v37   ;;  %v11592_v7 = vld [vmem:[#allocation2 + $0x98] sm:$0xff]  ;;  %v11638_v4 = vld [vmem:[%s14874_s3 + $0x3b0] sm:$0xff]  ;;  %v11594_v41 = vld [vmem:[#allocation2 + $0xa8] sm:$0xff] }
 0x52a   : > { %v5343_v50 = vsel %vm13501_vm0, 0.0, %v5342_v27  ;;  %v5503_v44 = vsel %vm13508_vm13, 0.0, %v5471_v2  ;;  %v12254_v57 = vpack.c.bf16 %v5309_v39, %v5373_v15  ;;  %v14347_v11 = vpop.f32.mrf.mxu1  ;;  %7396 = vmatpush.bf16.msra.mxu0 %v11638_v4  ;;  %v11640_v31 = vld [vmem:[#allocation2 + $0x10] sm:$0xff]  ;;  %v11499_v34 = vld [vmem:[#allocation2 + $0x18] sm:$0xff]  ;;  %v11685_v39 = vld [vmem:[%s14874_s3 + $0x428] sm:$0xff] }
 0x52b   : > { %v12179_v0 = vpack.c.bf16 %v14035_v62, %v5343_v50  ;;  %v12414_v54 = vpack.c.bf16 %v5503_v44, %v5437_v21  ;;  %v11686_v62 = vld [vmem:[%s14874_s3 + $0x430] sm:$0xff]  ;;  %v11570_v37 = vld [vmem:[#allocation2 + $0x18] sm:$0xff]  ;;  %v11637_v27 = vld [vmem:[%s14874_s3 + $0x3a8] sm:$0xff] }
 0x52c   : > { %12732 = vst [vmem:[#allocation2 + $0x80] sm:$0xff] %v12254_v57   ;;  %v11559_v58 = vld [vmem:[#allocation2 + $0x198] sm:$0xff]  ;;  %v14332_v28 = vpop.f32.mrf.mxu3  ;;  %8024 = vmatpush.bf16.msra.mxu2 %v11686_v62  ;;  %v11709_v21 = vld [vmem:[%s14874_s3 + $0x468] sm:$0xff]  ;;  %v11642_v2 = vld [vmem:[#allocation2 + $0x20] sm:$0xff] }
 0x52d   : > { %12717 = vst [vmem:[#allocation2 + $0x8] sm:$0xff] %v12179_v0   ;;  %6536 = vmatmul.bf16.gmra.mxu1 %v11559_v58  ;;  %8339 = vmatpush.bf16.msra.mxu3 %v11709_v21  ;;  %v11500_v44 = vld [vmem:[#allocation2 + $0x20] sm:$0xff]  ;;  %v11643_v58 = vld [vmem:[#allocation2 + $0x28] sm:$0xff] }
 0x52e   : > { %12764 = vst [vmem:[#allocation2 + $0x1a0] sm:$0xff] %v12414_v54   ;;  %7397 = vmatpush.bf16.msra.mxu0 %v11637_v27  ;;  %v11571_v57 = vld [vmem:[#allocation2 + $0x20] sm:$0xff]  ;;  %v11501_v62 = vld [vmem:[#allocation2 + $0x28] sm:$0xff] }
 0x52f   : > { %v11572_v4 = vld [vmem:[#allocation2 + $0x28] sm:$0xff] }
 0x530   : > { %8025 = vmatpush.bf16.msra.mxu2 %v11685_v39  ;;  %v11573_v39 = vld [vmem:[#allocation2 + $0x30] sm:$0xff] }
 0x531   : > { %7089 = vmatmul.bf16.vlgmr.msrb.gmra.mxu3 %v11592_v7 }
 0x532   : > { %v14351_v63 = vpop.f32.mrf.mxu1 }
 0x534   : > { %v11497_v25 = vld [vmem:[#allocation2 + $0x8] sm:$0xff]  ;;  %v14336_v13 = vpop.f32.mrf.mxu3 }
 0x535   : > { %v11568_v9 = vld [vmem:[#allocation2 + $0x8] sm:$0xff]  ;;  %6184 = vmatmul.bf16.gmra.mxu0 %v11497_v25  ;;  %v11596_v25 = vld [vmem:[#allocation2 + $0xb8] sm:$0xff] }
 0x536   : > { %6775 = vmatmul.bf16.vlgmr.msrb.gmra.mxu2 %v11568_v9 }
 0x53a   : > { %v14355_v12 = vpop.f32.mrf.mxu1 }
 0x53c   : > { %v14349_v23 = vpop.f32.mrf.mxu3 }
 0x53d   : > { %7717 = vmatmul.bf16.vlgmr.msra.gmra.mxu1 %v11640_v31  ;;  %v11684_v31 = vld [vmem:[%s14874_s3 + $0x420] sm:$0xff] }
 0x53e   : > { %8026 = vmatpush.bf16.msra.mxu2 %v11684_v31  ;;  %v11635_v31 = vld [vmem:[%s14874_s3 + $0x398] sm:$0xff] }
 0x541   : > { %7094 = vmatmul.bf16.gmra.mxu3 %v11593_v61  ;;  %v11636_v61 = vld [vmem:[%s14874_s3 + $0x3a0] sm:$0xff] }
 0x542   : > { %v14361_v15 = vpop.f32.mrf.mxu1  ;;  %7398 = vmatpush.bf16.msra.mxu0 %v11636_v61  ;;  %v11707_v61 = vld [vmem:[%s14874_s3 + $0x458] sm:$0xff] }
 0x544   : > { %v14353_v24 = vpop.f32.mrf.mxu3 }
 0x545   : > { %6189 = vmatmul.bf16.gmra.mxu0 %v11498_v43  ;;  %v11708_v43 = vld [vmem:[%s14874_s3 + $0x460] sm:$0xff] }
 0x546   : > { %6780 = vmatmul.bf16.gmra.mxu2 %v11569_v22  ;;  %8340 = vmatpush.bf16.msra.mxu3 %v11708_v43  ;;  %v11644_v22 = vld [vmem:[#allocation2 + $0x30] sm:$0xff] }
 0x547   : > { %7399 = vmatpush.bf16.msra.mxu0 %v11635_v31 }
 0x54a   : > { %v14374_v50 = vpop.f32.mrf.mxu1  ;;  %8341 = vmatpush.bf16.msra.mxu3 %v11707_v61 }
 0x54c   : > { %v14357_v45 = vpop.f32.mrf.mxu3 }
 0x54d   : > { %7722 = vmatmul.bf16.gmra.mxu1 %v11641_v51 }
 0x551   : > { %7099 = vmatmul.bf16.gmra.mxu3 %v11594_v41 }
 0x552   : > { %v14378_v54 = vpop.f32.mrf.mxu1 }
 0x554   : > { %v14359_v42 = vpop.f32.mrf.mxu3 }
 0x555   : > { %6194 = vmatmul.bf16.gmra.mxu0 %v11499_v34  ;;  %v11597_v34 = vld [vmem:[#allocation2 + $0xc0] sm:$0xff] }
 0x556   : > { %6785 = vmatmul.bf16.gmra.mxu2 %v11570_v37  ;;  %v11502_v37 = vld [vmem:[#allocation2 + $0x30] sm:$0xff] }
 0x55a   : > { %v14382_v9 = vpop.f32.mrf.mxu1 }
 0x55c   : > { %v14372_v30 = vpop.f32.mrf.mxu3 }
 0x55d   : > { %7727 = vmatmul.bf16.gmra.mxu1 %v11642_v2  ;;  %v11645_v2 = vld [vmem:[#allocation2 + $0x38] sm:$0xff] }
 0x561   : > { %7104 = vmatmul.bf16.gmra.mxu3 %v11595_v55 }
 0x562   : > { %v14397_v41 = vpop.f32.mrf.mxu1 }
 0x564   : > { %v14376_v0 = vpop.f32.mrf.mxu3 }
 0x565   : > { %6199 = vmatmul.bf16.gmra.mxu0 %v11500_v44  ;;  %v11598_v44 = vld [vmem:[#allocation2 + $0xc8] sm:$0xff] }
 0x566   : > { %6790 = vmatmul.bf16.gmra.mxu2 %v11571_v57 }
 0x56a   : > { %v14401_v21 = vpop.f32.mrf.mxu1 }
 0x56c   : > { %v14380_v7 = vpop.f32.mrf.mxu3 }
 0x56d   : > { %7732 = vmatmul.bf16.gmra.mxu1 %v11643_v58  ;;  %v11503_v58 = vld [vmem:[#allocation2 + $0x38] sm:$0xff] }
 0x571   : > { %7109 = vmatmul.bf16.gmra.mxu3 %v11596_v25  ;;  %v11574_v25 = vld [vmem:[#allocation2 + $0x38] sm:$0xff] }
 0x572   : > { %v14405_v57 = vpop.f32.mrf.mxu1 }
 0x573   : > { %15202 = vst [vmem:[#allocation45_spill] sm:$0xff] %v14405_v57 }
 0x574   : > { %v14384_v26 = vpop.f32.mrf.mxu3 }
 0x575   : > { %15198 = vst [vmem:[#allocation41_spill] sm:$0xff] %v14384_v26  ;;  %6204 = vmatmul.bf16.gmra.mxu0 %v11501_v62 }
 0x576   : > { %6795 = vmatmul.bf16.gmra.mxu2 %v11572_v4  ;;  %v11683_v4 = vld [vmem:[%s14874_s3 + $0x418] sm:$0xff] }
 0x577   : > { %8027 = vmatpush.bf16.msra.mxu2 %v11683_v4  ;;  %v11647_v4 = vld [vmem:[#allocation2 + $0x48] sm:$0xff] }
 0x57a   : > { %v14418_v43 = vpop.f32.mrf.mxu1 }
 0x57b   : > { %15204 = vst [vmem:[#allocation39_spill] sm:$0xff] %v14418_v43  ;;  %v11601_v43 = vld [vmem:[#allocation2 + $0xe0] sm:$0xff] }
 0x57c   : > { %v14395_v51 = vpop.f32.mrf.mxu3 }
 0x57d   : > { %15199 = vst [vmem:[#allocation36_spill] sm:$0xff] %v14395_v51  ;;  %7737 = vmatmul.bf16.gmra.mxu1 %v11644_v22  ;;  %v11646_v22 = vld [vmem:[#allocation2 + $0x40] sm:$0xff] }
 0x581   : > { %7114 = vmatmul.bf16.gmra.mxu3 %v11597_v34 }
 0x584   : > { %v14399_v27 = vpop.f32.mrf.mxu3 }
 0x585   : > { %15200 = vst [vmem:[#allocation43_spill] sm:$0xff] %v14399_v27  ;;  %6209 = vmatmul.bf16.gmra.mxu0 %v11502_v37  ;;  %v11599_v37 = vld [vmem:[#allocation2 + $0xd0] sm:$0xff] }
 0x586   : > { %6800 = vmatmul.bf16.gmra.mxu2 %v11573_v39  ;;  %v11504_v39 = vld [vmem:[#allocation2 + $0x40] sm:$0xff] }
 0x58c   : > { %v14403_v55 = vpop.f32.mrf.mxu3 }
 0x58d   : > { %15201 = vst [vmem:[#allocation37_spill] sm:$0xff] %v14403_v55  ;;  %7742 = vmatmul.bf16.gmra.mxu1 %v11645_v2  ;;  %v11575_v2 = vld [vmem:[#allocation2 + $0x40] sm:$0xff] }
 0x591   : > { %7119 = vmatmul.bf16.gmra.mxu3 %v11598_v44 }
 0x594   : > { %v14407_v62 = vpop.f32.mrf.mxu3 }
 0x595   : > { %15203 = vst [vmem:[#allocation38_spill] sm:$0xff] %v14407_v62  ;;  %6214 = vmatmul.bf16.gmra.mxu0 %v11503_v58  ;;  %v14424_v58 = vpop.f32.mrf.mxu1  ;;  %v11600_v62 = vld [vmem:[#allocation2 + $0xd8] sm:$0xff] }
 0x596   : > { %6805 = vmatmul.bf16.gmra.mxu2 %v11574_v25  ;;  %15207 = vst [vmem:[#allocation44_spill] sm:$0xff] %v14424_v58  ;;  %v6182_v25 = vpop.f32.mrf.mxu0 }
 0x59c   : > { %v14420_v34 = vpop.f32.mrf.mxu3 }
 0x59d   : > { %15205 = vst [vmem:[#allocation40_spill] sm:$0xff] %v14420_v34  ;;  %7747 = vmatmul.bf16.gmra.mxu1 %v11646_v22  ;;  %v14428_v61 = vpop.f32.mrf.mxu1  ;;  %v11505_v34 = vld [vmem:[#allocation2 + $0x48] sm:$0xff] }
 0x59e   : > { %15209 = vst [vmem:[#allocation5_spill] sm:$0xff] %v14428_v61  ;;  %v11648_v61 = vld [vmem:[#allocation2 + $0x50] sm:$0xff] }
 0x5a1   : > { %7124 = vmatmul.bf16.gmra.mxu3 %v11599_v37  ;;  %v11576_v37 = vld [vmem:[#allocation2 + $0x48] sm:$0xff] }
 0x5a4   : > { %v14422_v44 = vpop.f32.mrf.mxu3 }
 0x5a5   : > { %15206 = vst [vmem:[#allocation42_spill] sm:$0xff] %v14422_v44  ;;  %6219 = vmatmul.bf16.gmra.mxu0 %v11504_v39  ;;  %v11682_v39 = vld [vmem:[%s14874_s3 + $0x410] sm:$0xff]  ;;  %v6183_v44 = vadd.f32 %v6182_v25, %v14150_v16 }
 0x5a6   : > { %6810 = vmatmul.bf16.gmra.mxu2 %v11575_v2  ;;  %v11634_v2 = vld [vmem:[%s14874_s3 + $0x390] sm:$0xff] }
 0x5a7   : > { %8028 = vmatpush.bf16.msra.mxu2 %v11682_v39  ;;  %7400 = vmatpush.bf16.msra.mxu0 %v11634_v2  ;;  %v6543_v51 = vadd.f32 %v14157_v20, %v6183_v44 }
 0x5ac   : > { %v14426_v31 = vpop.f32.mrf.mxu3 }
 0x5ad   : > { %15208 = vst [vmem:[#allocation4_spill] sm:$0xff] %v14426_v31  ;;  %7752 = vmatmul.bf16.gmra.mxu1 %v11647_v4  ;;  %v11706_v4 = vld [vmem:[%s14874_s3 + $0x450] sm:$0xff]  ;;  %v14439_v31 = vpop.f32.mrf.mxu1 }
 0x5ae   : > { %8342 = vmatpush.bf16.msra.mxu3 %v11706_v4  ;;  %15210 = vst [vmem:[#allocation6_spill] sm:$0xff] %v14439_v31 }
 0x5b1   : > { %7129 = vmatmul.bf16.gmra.mxu3 %v11600_v62 }
 0x5b2   : > { %v6185_v22 = vpop.f32.mrf.mxu0 }
 0x5b3   : > { %v6186_v31 = vadd.f32 %v6185_v22, %v14159_v60 }
 0x5b4   : > { %v7090_v55 = vpop.f32.mrf.mxu3 }
 0x5b5   : > { %6224 = vmatmul.bf16.gmra.mxu0 %v11505_v34  ;;  %v14446_v4 = vpop.f32.mrf.mxu1 }
 0x5b6   : > { %6815 = vmatmul.bf16.gmra.mxu2 %v11576_v37 }
 0x5b9   : > { %v6776_v62 = vpop.f32.mrf.mxu2 }
 0x5ba   : > { %v6856_v34 = vadd.f32 %v6776_v62, %v14122_v38  ;;  %v6187_v37 = vpop.f32.mrf.mxu0  ;;  %v11506_v38 = vld [vmem:[#allocation2 + $0x50] sm:$0xff] }
 0x5bb   : > { %v11577_v62 = vld [vmem:[#allocation2 + $0x50] sm:$0xff] }
 0x5bc   : > { %v14443_v27 = vadd.f32 %v7090_v55, %v6856_v34  ;;  %v7092_v58 = vpop.f32.mrf.mxu3  ;;  %v6544_v55 = vadd.f32 %v14169_v10, %v6186_v31  ;;  %v11507_v31 = vld [vmem:[#allocation2 + $0x58] sm:$0xff] }
 0x5bd   : > { %7757 = vmatmul.bf16.gmra.mxu1 %v11648_v61  ;;  %v14455_v34 = vpop.f32.mrf.mxu1 }
 0x5c1   : > { %v6778_v26 = vpop.f32.mrf.mxu2  ;;  %7134 = vmatmul.bf16.gmra.mxu3 %v11601_v43 }
 0x5c2   : > { %v6857_v39 = vadd.f32 %v6778_v26, %v6543_v51  ;;  %v6190_v2 = vpop.f32.mrf.mxu0  ;;  %v6188_v26 = vadd.f32 %v6187_v37, %v14171_v17  ;;  %v11649_v51 = vld [vmem:[#allocation2 + $0x58] sm:$0xff]  ;;  %v11681_v37 = vld [vmem:[%s14874_s3 + $0x408] sm:$0xff] }
 0x5c3   : > { %v6191_v10 = vadd.f32 %v6190_v2, %v14180_v40  ;;  %8029 = vmatpush.bf16.msra.mxu2 %v11681_v37 }
 0x5c4   : > { %v14449_v57 = vadd.f32 %v7092_v58, %v6857_v39  ;;  %v7095_v16 = vpop.f32.mrf.mxu3  ;;  %v6545_v60 = vadd.f32 %v14178_v8, %v6188_v26  ;;  %v11602_v58 = vld [vmem:[#allocation2 + $0xe8] sm:$0xff] }
 0x5c5   : > { %6229 = vmatmul.bf16.gmra.mxu0 %v11506_v38  ;;  %v11633_v8 = vld [vmem:[%s14874_s3 + $0x388] sm:$0xff]  ;;  %v14470_v40 = vpop.f32.mrf.mxu1  ;;  %v6546_v2 = vadd.f32 %v14187_v6, %v6191_v10 }
 0x5c6   : > { %6820 = vmatmul.bf16.gmra.mxu2 %v11577_v62  ;;  %v11578_v62 = vld [vmem:[#allocation2 + $0x58] sm:$0xff]  ;;  %7401 = vmatpush.bf16.msra.mxu0 %v11633_v8  ;;  %v11508_v8 = vld [vmem:[#allocation2 + $0x60] sm:$0xff] }
 0x5c9   : > { %v6781_v25 = vpop.f32.mrf.mxu2 }
 0x5ca   : > { %v6858_v20 = vadd.f32 %v6781_v25, %v6544_v55  ;;  %v6192_v44 = vpop.f32.mrf.mxu0 }
 0x5cc   : > { %v14453_v43 = vadd.f32 %v7095_v16, %v6858_v20  ;;  %v7097_v61 = vpop.f32.mrf.mxu3  ;;  %v11705_v16 = vld [vmem:[%s14874_s3 + $0x448] sm:$0xff] }
 0x5cd   : > { %7762 = vmatmul.bf16.gmra.mxu1 %v11649_v51  ;;  %8343 = vmatpush.bf16.msra.mxu3 %v11705_v16  ;;  %v6193_v51 = vadd.f32 %v6192_v44, %v14192_v5  ;;  %v11579_v16 = vld [vmem:[#allocation2 + $0x60] sm:$0xff] }
 0x5d1   : > { %v6783_v22 = vpop.f32.mrf.mxu2  ;;  %7139 = vmatmul.bf16.gmra.mxu3 %v11602_v58 }
 0x5d2   : > { %v6859_v39 = vadd.f32 %v6783_v22, %v6545_v60  ;;  %v6195_v38 = vpop.f32.mrf.mxu0  ;;  %v6547_v22 = vadd.f32 %v14199_v59, %v6193_v51 }
 0x5d3   : > { %v6196_v37 = vadd.f32 %v6195_v38, %v14201_v35 }
 0x5d4   : > { %v14459_v55 = vadd.f32 %v7097_v61, %v6859_v39  ;;  %v7100_v17 = vpop.f32.mrf.mxu3  ;;  %v11650_v61 = vld [vmem:[#allocation2 + $0x60] sm:$0xff]  ;;  %v11603_v39 = vld [vmem:[#allocation2 + $0xf0] sm:$0xff] }
 0x5d5   : > { %6234 = vmatmul.bf16.gmra.mxu0 %v11507_v31  ;;  %v6548_v44 = vadd.f32 %v14211_v49, %v6196_v37  ;;  %v11509_v37 = vld [vmem:[#allocation2 + $0x68] sm:$0xff] }
 0x5d6   : > { %6825 = vmatmul.bf16.gmra.mxu2 %v11578_v62  ;;  %v14477_v62 = vpop.f32.mrf.mxu1 }
 0x5d9   : > { %v6786_v25 = vpop.f32.mrf.mxu2 }
 0x5da   : > { %v6860_v20 = vadd.f32 %v6786_v25, %v6546_v2  ;;  %v6197_v26 = vpop.f32.mrf.mxu0 }
 0x5db   : > { %v6198_v51 = vadd.f32 %v6197_v26, %v14213_v18  ;;  %v11632_v26 = vld [vmem:[%s14874_s3 + $0x380] sm:$0xff] }
 0x5dc   : > { %v14474_v60 = vadd.f32 %v7100_v17, %v6860_v20  ;;  %v7102_v58 = vpop.f32.mrf.mxu3  ;;  %7402 = vmatpush.bf16.msra.mxu0 %v11632_v26  ;;  %v11581_v26 = vld [vmem:[#allocation2 + $0x70] sm:$0xff] }
 0x5dd   : > { %7767 = vmatmul.bf16.gmra.mxu1 %v11650_v61  ;;  %v11651_v61 = vld [vmem:[#allocation2 + $0x68] sm:$0xff]  ;;  %v6549_v38 = vadd.f32 %v14220_v29, %v6198_v51  ;;  %v11680_v29 = vld [vmem:[%s14874_s3 + $0x400] sm:$0xff] }
 0x5de   : > { %v14483_v20 = vpop.f32.mrf.mxu1  ;;  %8030 = vmatpush.bf16.msra.mxu2 %v11680_v29  ;;  %v11510_v29 = vld [vmem:[#allocation2 + $0x70] sm:$0xff] }
 0x5e1   : > { %v6788_v31 = vpop.f32.mrf.mxu2  ;;  %7144 = vmatmul.bf16.gmra.mxu3 %v11603_v39 }
 0x5e2   : > { %v6861_v6 = vadd.f32 %v6788_v31, %v6547_v22  ;;  %v6200_v10 = vpop.f32.mrf.mxu0 }
 0x5e3   : > { %v6201_v49 = vadd.f32 %v6200_v10, %v14222_v47  ;;  %v11704_v47 = vld [vmem:[%s14874_s3 + $0x440] sm:$0xff] }
 0x5e4   : > { %v14480_v2 = vadd.f32 %v7102_v58, %v6861_v6  ;;  %v7105_v5 = vpop.f32.mrf.mxu3  ;;  %v11604_v58 = vld [vmem:[#allocation2 + $0xf8] sm:$0xff]  ;;  %8344 = vmatpush.bf16.msra.mxu3 %v11704_v47 }
 0x5e5   : > { %6239 = vmatmul.bf16.gmra.mxu0 %v11508_v8  ;;  %v11580_v8 = vld [vmem:[#allocation2 + $0x68] sm:$0xff]  ;;  %v6550_v10 = vadd.f32 %v14229_v53, %v6201_v49 }
 0x5e6   : > { %6830 = vmatmul.bf16.gmra.mxu2 %v11579_v16  ;;  %v14492_v18 = vpop.f32.mrf.mxu1 }
 0x5e9   : > { %v6791_v17 = vpop.f32.mrf.mxu2 }
 0x5ea   : > { %v6862_v59 = vadd.f32 %v6791_v17, %v6548_v44  ;;  %v6202_v25 = vpop.f32.mrf.mxu0 }
 0x5eb   : > { %v6203_v51 = vadd.f32 %v6202_v25, %v14234_v56 }
 0x5ec   : > { %v14486_v22 = vadd.f32 %v7105_v5, %v6862_v59  ;;  %v7107_v35 = vpop.f32.mrf.mxu3 }
 0x5ed   : > { %7772 = vmatmul.bf16.gmra.mxu1 %v11651_v61  ;;  %v11652_v61 = vld [vmem:[#allocation2 + $0x70] sm:$0xff] }
 0x5f1   : > { %v6793_v39 = vpop.f32.mrf.mxu2  ;;  %7149 = vmatmul.bf16.gmra.mxu3 %v11604_v58  ;;  %v14507_v58 = vpop.f32.mrf.mxu1 }
 0x5f2   : > { %v6863_v31 = vadd.f32 %v6793_v39, %v6549_v38  ;;  %v6205_v6 = vpop.f32.mrf.mxu0  ;;  %v6551_v39 = vadd.f32 %v14253_v19, %v6203_v51  ;;  %v11653_v51 = vld [vmem:[#allocation2 + $0x78] sm:$0xff] }
 0x5f4   : > { %v14490_v16 = vadd.f32 %v7107_v35, %v6863_v31  ;;  %v7110_v44 = vpop.f32.mrf.mxu3  ;;  %v11605_v31 = vld [vmem:[#allocation2 + $0x100] sm:$0xff] }
 0x5f5   : > { %6244 = vmatmul.bf16.gmra.mxu0 %v11509_v37 }
 0x5f6   : > { %6835 = vmatmul.bf16.gmra.mxu2 %v11580_v8  ;;  %v6206_v8 = vadd.f32 %v6205_v6, %v14247_v3 }
 0x5f8   : > { %v6552_v25 = vadd.f32 %v14270_v1, %v6206_v8  ;;  %v11511_v8 = vld [vmem:[#allocation2 + $0x78] sm:$0xff] }
 0x5f9   : > { %v6796_v5 = vpop.f32.mrf.mxu2 }
 0x5fa   : > { %v6864_v17 = vadd.f32 %v6796_v5, %v6550_v10  ;;  %v6207_v59 = vpop.f32.mrf.mxu0  ;;  %v14514_v10 = vpop.f32.mrf.mxu1 }
 0x5fc   : > { %v14505_v35 = vadd.f32 %v7110_v44, %v6864_v17  ;;  %v7112_v38 = vpop.f32.mrf.mxu3  ;;  %v6208_v17 = vadd.f32 %v6207_v59, %v14265_v46 }
 0x5fd   : > { %7777 = vmatmul.bf16.gmra.mxu1 %v11652_v61 }
 0x5fe   : > { %v6553_v6 = vadd.f32 %v14301_v36, %v6208_v17 }
 0x601   : > { %v6798_v37 = vpop.f32.mrf.mxu2  ;;  %7154 = vmatmul.bf16.gmra.mxu3 %v11605_v31 }
 0x602   : > { %v6865_v53 = vadd.f32 %v6798_v37, %v6551_v39  ;;  %v6210_v49 = vpop.f32.mrf.mxu0  ;;  %v14520_v1 = vpop.f32.mrf.mxu1 }
 0x604   : > { %v14511_v47 = vadd.f32 %v7112_v38, %v6865_v53  ;;  %v7115_v56 = vpop.f32.mrf.mxu3  ;;  %v11606_v38 = vld [vmem:[#allocation2 + $0x108] sm:$0xff]  ;;  %v6211_v53 = vadd.f32 %v6210_v49, %v14280_v52  ;;  %v11607_v49 = vld [vmem:[#allocation2 + $0x110] sm:$0xff] }
 0x605   : > { %6249 = vmatmul.bf16.gmra.mxu0 %v11510_v29  ;;  %v11582_v29 = vld [vmem:[#allocation2 + $0x78] sm:$0xff] }
 0x606   : > { %6840 = vmatmul.bf16.gmra.mxu2 %v11581_v26  ;;  %v6554_v59 = vadd.f32 %v14312_v33, %v6211_v53  ;;  %v11616_v53 = vld [vmem:[#allocation2 + $0x128] sm:$0xff] }
 0x609   : > { %v6801_v44 = vpop.f32.mrf.mxu2 }
 0x60a   : > { %v6866_v19 = vadd.f32 %v6801_v44, %v6552_v25  ;;  %v6212_v5 = vpop.f32.mrf.mxu0 }
 0x60b   : > { %v6213_v44 = vadd.f32 %v6212_v5, %v14306_v32 }
 0x60c   : > { %v14517_v61 = vadd.f32 %v7115_v56, %v6866_v19  ;;  %v7117_v3 = vpop.f32.mrf.mxu3  ;;  %v11654_v19 = vld [vmem:[#allocation2 + $0x80] sm:$0xff] }
 0x60d   : > { %7782 = vmatmul.bf16.gmra.mxu1 %v11653_v51  ;;  %v6555_v52 = vadd.f32 %v14334_v14, %v6213_v44 }
 0x611   : > { %v6803_v39 = vpop.f32.mrf.mxu2  ;;  %7159 = vmatmul.bf16.gmra.mxu3 %v11606_v38 }
 0x612   : > { %v6867_v31 = vadd.f32 %v6803_v39, %v6553_v6  ;;  %v6215_v37 = vpop.f32.mrf.mxu0  ;;  %v14529_v6 = vpop.f32.mrf.mxu1 }
 0x613   : > { %v6216_v33 = vadd.f32 %v6215_v37, %v14315_v48  ;;  %v11688_v48 = vld [vmem:[#allocation2 + $0x130] sm:$0xff] }
 0x614   : > { %v14523_v26 = vadd.f32 %v7117_v3, %v6867_v31  ;;  %v7120_v46 = vpop.f32.mrf.mxu3  ;;  %v11583_v31 = vld [vmem:[#allocation2 + $0x80] sm:$0xff] }
 0x615   : > { %6254 = vmatmul.bf16.gmra.mxu0 %v11511_v8  ;;  %v6556_v5 = vadd.f32 %v14347_v11, %v6216_v33 }
 0x616   : > { %6845 = vmatmul.bf16.gmra.mxu2 %v11582_v29 }
 0x619   : > { %v6806_v56 = vpop.f32.mrf.mxu2 }
 0x61a   : > { %v6868_v36 = vadd.f32 %v6806_v56, %v6554_v59  ;;  %v6217_v25 = vpop.f32.mrf.mxu0 }
 0x61b   : > { %v6218_v14 = vadd.f32 %v6217_v25, %v14332_v28 }
 0x61c   : > { %v14527_v17 = vadd.f32 %v7120_v46, %v6868_v36  ;;  %v7122_v51 = vpop.f32.mrf.mxu3 }
 0x61d   : > { %7787 = vmatmul.bf16.gmra.mxu1 %v11654_v19  ;;  %v6557_v44 = vadd.f32 %v14351_v63, %v6218_v14 }
 0x621   : > { %v6808_v3 = vpop.f32.mrf.mxu2  ;;  %7164 = vmatmul.bf16.gmra.mxu3 %v11607_v49  ;;  %v11617_v49 = vld [vmem:[#allocation2 + $0x130] sm:$0xff] }
 0x622   : > { %v6869_v38 = vadd.f32 %v6808_v3, %v6555_v52  ;;  %v6220_v39 = vpop.f32.mrf.mxu0  ;;  %v11664_v3 = vld [vmem:[#allocation2 + $0xa0] sm:$0xff] }
 0x623   : > { %v6221_v52 = vadd.f32 %v6220_v39, %v14336_v13  ;;  %v11689_v13 = vld [vmem:[#allocation2 + $0x138] sm:$0xff] }
 0x624   : > { %v14533_v8 = vadd.f32 %v7122_v51, %v6869_v38  ;;  %v7125_v32 = vpop.f32.mrf.mxu3 }
 0x625   : > { %7403 = vmatmul.bf16.vlgmr.msra.gmra.mxu0 %v11616_v53  ;;  %v6558_v28 = vadd.f32 %v14355_v12, %v6221_v52 }
 0x626   : > { %6850 = vmatmul.bf16.gmra.mxu2 %v11583_v31 }
 0x629   : > { %v6811_v29 = vpop.f32.mrf.mxu2 }
 0x62a   : > { %v6870_v46 = vadd.f32 %v6811_v29, %v6556_v5  ;;  %v6222_v59 = vpop.f32.mrf.mxu0 }
 0x62b   : > { %v6223_v63 = vadd.f32 %v6222_v59, %v14349_v23 }
 0x62c   : > { %v14537_v56 = vadd.f32 %v7125_v32, %v6870_v46  ;;  %v7127_v36 = vpop.f32.mrf.mxu3 }
 0x62d   : > { %v6559_v5 = vadd.f32 %v14361_v15, %v6223_v63  ;;  %v11666_v63 = vld [vmem:[#allocation2 + $0xb0] sm:$0xff] }
 0x631   : > { %v6813_v37 = vpop.f32.mrf.mxu2  ;;  %8345 = vmatmul.bf16.vlgmr.msra.gmra.mxu3 %v11688_v48 }
 0x632   : > { %v6871_v19 = vadd.f32 %v6813_v37, %v6557_v44  ;;  %v6225_v51 = vpop.f32.mrf.mxu0  ;;  %v11665_v44 = vld [vmem:[#allocation2 + $0xa8] sm:$0xff] }
 0x633   : > { %v6226_v14 = vadd.f32 %v6225_v51, %v14353_v24  ;;  %v11690_v24 = vld [vmem:[#allocation2 + $0x140] sm:$0xff] }
 0x634   : > { %v14541_v11 = vadd.f32 %v7127_v36, %v6871_v19  ;;  %v7130_v38 = vpop.f32.mrf.mxu3  ;;  %v11618_v36 = vld [vmem:[#allocation2 + $0x138] sm:$0xff] }
 0x635   : > { %7408 = vmatmul.bf16.gmra.mxu0 %v11617_v49  ;;  %v6560_v23 = vadd.f32 %v14374_v50, %v6226_v14 }
 0x636   : > { %8031 = vmatmul.bf16.vlgmr.msra.gmra.mxu2 %v11664_v3 }
 0x639   : > { %v6816_v25 = vpop.f32.mrf.mxu2 }
 0x63a   : > { %v6872_v33 = vadd.f32 %v6816_v25, %v6558_v28  ;;  %v6227_v31 = vpop.f32.mrf.mxu0 }
 0x63b   : > { %v6228_v15 = vadd.f32 %v6227_v31, %v14357_v45 }
 0x63c   : > { %v14545_v53 = vadd.f32 %v7130_v38, %v6872_v33  ;;  %v7132_v32 = vpop.f32.mrf.mxu3  ;;  %v11619_v33 = vld [vmem:[#allocation2 + $0x140] sm:$0xff] }
 0x63d   : > { %v6561_v3 = vadd.f32 %v14378_v54, %v6228_v15 }
 0x641   : > { %v6818_v39 = vpop.f32.mrf.mxu2  ;;  %8350 = vmatmul.bf16.gmra.mxu3 %v11689_v13 }
 0x642   : > { %v6873_v29 = vadd.f32 %v6818_v39, %v6559_v5  ;;  %v6230_v46 = vpop.f32.mrf.mxu0 }
 0x643   : > { %v6231_v25 = vadd.f32 %v6230_v46, %v14359_v42  ;;  %v11691_v42 = vld [vmem:[#allocation2 + $0x148] sm:$0xff] }
 0x644   : > { %v14549_v12 = vadd.f32 %v7132_v32, %v6873_v29  ;;  %v7135_v48 = vpop.f32.mrf.mxu3 }
 0x645   : > { %7413 = vmatmul.bf16.gmra.mxu0 %v11618_v36  ;;  %v6562_v45 = vadd.f32 %v14382_v9, %v6231_v25 }
 0x646   : > { %8036 = vmatmul.bf16.gmra.mxu2 %v11665_v44 }
 0x649   : > { %v6821_v59 = vpop.f32.mrf.mxu2 }
 0x64a   : > { %v6874_v37 = vadd.f32 %v6821_v59, %v6560_v23  ;;  %v6232_v19 = vpop.f32.mrf.mxu0  ;;  %v11620_v23 = vld [vmem:[#allocation2 + $0x148] sm:$0xff]  ;;  %v11667_v59 = vld [vmem:[#allocation2 + $0xb8] sm:$0xff] }
 0x64b   : > { %v6233_v54 = vadd.f32 %v6232_v19, %v14372_v30 }
 0x64c   : > { %v14553_v52 = vadd.f32 %v7135_v48, %v6874_v37  ;;  %v7137_v49 = vpop.f32.mrf.mxu3 }
 0x64d   : > { %v6563_v14 = vadd.f32 %v14397_v41, %v6233_v54 }
 0x651   : > { %v6823_v51 = vpop.f32.mrf.mxu2  ;;  %8355 = vmatmul.bf16.gmra.mxu3 %v11690_v24 }
 0x652   : > { %v6875_v38 = vadd.f32 %v6823_v51, %v6561_v3  ;;  %v6235_v28 = vpop.f32.mrf.mxu0  ;;  %v15211_v51 = vld [vmem:[#allocation45_spill] sm:$0xff] }
 0x653   : > { %v6236_v48 = vadd.f32 %v6235_v28, %v14376_v0  ;;  %v11692_v0 = vld [vmem:[#allocation2 + $0x150] sm:$0xff] }
 0x654   : > { %v14557_v50 = vadd.f32 %v7137_v49, %v6875_v38  ;;  %v7140_v32 = vpop.f32.mrf.mxu3 }
 0x655   : > { %7418 = vmatmul.bf16.gmra.mxu0 %v11619_v33  ;;  %v6564_v30 = vadd.f32 %v14401_v21, %v6236_v48 }
 0x656   : > { %8041 = vmatmul.bf16.gmra.mxu2 %v11666_v63  ;;  %v15212_v63 = vld [vmem:[#allocation41_spill] sm:$0xff] }
 0x659   : > { %v6826_v31 = vpop.f32.mrf.mxu2 }
 0x65a   : > { %v6876_v5 = vadd.f32 %v6826_v31, %v6562_v45  ;;  %v6237_v13 = vpop.f32.mrf.mxu0  ;;  %v11621_v45 = vld [vmem:[#allocation2 + $0x150] sm:$0xff]  ;;  %v11668_v31 = vld [vmem:[#allocation2 + $0xc0] sm:$0xff] }
 0x65b   : > { %v6238_v41 = vadd.f32 %v6237_v13, %v14380_v7  ;;  %v15213_v7 = vld [vmem:[#allocation39_spill] sm:$0xff] }
 0x65c   : > { %v14561_v39 = vadd.f32 %v7140_v32, %v6876_v5  ;;  %v7142_v29 = vpop.f32.mrf.mxu3 }
 0x65d   : > { %v6565_v38 = vadd.f32 %v15211_v51, %v6238_v41  ;;  %v11669_v51 = vld [vmem:[#allocation2 + $0xc8] sm:$0xff] }
 0x661   : > { %v6828_v46 = vpop.f32.mrf.mxu2  ;;  %8360 = vmatmul.bf16.gmra.mxu3 %v11691_v42  ;;  %v15214_v42 = vld [vmem:[#allocation36_spill] sm:$0xff] }
 0x662   : > { %v6877_v36 = vadd.f32 %v6828_v46, %v6563_v14  ;;  %v6240_v44 = vpop.f32.mrf.mxu0 }
 0x663   : > { %v6241_v32 = vadd.f32 %v6240_v44, %v15212_v63  ;;  %v11693_v44 = vld [vmem:[#allocation2 + $0x158] sm:$0xff] }
 0x664   : > { %v14565_v9 = vadd.f32 %v7142_v29, %v6877_v36  ;;  %v7145_v37 = vpop.f32.mrf.mxu3 }
 0x665   : > { %7423 = vmatmul.bf16.gmra.mxu0 %v11620_v23  ;;  %v6566_v13 = vadd.f32 %v15213_v7, %v6241_v32  ;;  %v15215_v23 = vld [vmem:[#allocation44_spill] sm:$0xff] }
 0x666   : > { %8046 = vmatmul.bf16.gmra.mxu2 %v11667_v59 }
 0x669   : > { %v6831_v19 = vpop.f32.mrf.mxu2 }
 0x66a   : > { %v6878_v15 = vadd.f32 %v6831_v19, %v6564_v30  ;;  %v6242_v49 = vpop.f32.mrf.mxu0 }
 0x66b   : > { %v6243_v46 = vadd.f32 %v6242_v49, %v15214_v42  ;;  %v15217_v49 = vld [vmem:[#allocation5_spill] sm:$0xff] }
 0x66c   : > { %v14569_v3 = vadd.f32 %v7145_v37, %v6878_v15  ;;  %v7147_v24 = vpop.f32.mrf.mxu3  ;;  %v15216_v15 = vld [vmem:[#allocation43_spill] sm:$0xff] }
 0x66d   : > { %v6567_v59 = vadd.f32 %v15215_v23, %v6243_v46 }
 0x671   : > { %v6833_v28 = vpop.f32.mrf.mxu2  ;;  %8365 = vmatmul.bf16.gmra.mxu3 %v11692_v0 }
 0x672   : > { %v6879_v25 = vadd.f32 %v6833_v28, %v6565_v38  ;;  %v6245_v33 = vpop.f32.mrf.mxu0 }
 0x673   : > { %v6246_v41 = vadd.f32 %v6245_v33, %v15216_v15  ;;  %v11694_v33 = vld [vmem:[#allocation2 + $0x160] sm:$0xff] }
 0x674   : > { %v14573_v21 = vadd.f32 %v7147_v24, %v6879_v25  ;;  %v7150_v5 = vpop.f32.mrf.mxu3  ;;  %v11622_v24 = vld [vmem:[#allocation2 + $0x158] sm:$0xff] }
 0x675   : > { %7428 = vmatmul.bf16.gmra.mxu0 %v11621_v45  ;;  %v6568_v28 = vadd.f32 %v15217_v49, %v6246_v41  ;;  %v15218_v45 = vld [vmem:[#allocation37_spill] sm:$0xff] }
 0x676   : > { %8051 = vmatmul.bf16.gmra.mxu2 %v11668_v31 }
 0x679   : > { %v6836_v54 = vpop.f32.mrf.mxu2 }
 0x67a   : > { %v6880_v29 = vadd.f32 %v6836_v54, %v6566_v13  ;;  %v6247_v14 = vpop.f32.mrf.mxu0  ;;  %v15219_v13 = vld [vmem:[#allocation6_spill] sm:$0xff] }
 0x67b   : > { %v6248_v31 = vadd.f32 %v6247_v14, %v15218_v45 }
 0x67c   : > { %v14577_v36 = vadd.f32 %v7150_v5, %v6880_v29  ;;  %v7152_v48 = vpop.f32.mrf.mxu3 }
 0x67d   : > { %v6569_v54 = vadd.f32 %v15219_v13, %v6248_v31 }
 0x681   : > { %v6838_v37 = vpop.f32.mrf.mxu2  ;;  %8370 = vmatmul.bf16.gmra.mxu3 %v11693_v44  ;;  %v11670_v44 = vld [vmem:[#allocation2 + $0xd0] sm:$0xff] }
 0x682   : > { %v6881_v30 = vadd.f32 %v6838_v37, %v6567_v59  ;;  %v6250_v19 = vpop.f32.mrf.mxu0  ;;  %v11623_v59 = vld [vmem:[#allocation2 + $0x160] sm:$0xff] }
 0x684   : > { %v14581_v38 = vadd.f32 %v7152_v48, %v6881_v30  ;;  %v7155_v0 = vpop.f32.mrf.mxu3  ;;  %v15220_v48 = vld [vmem:[#allocation38_spill] sm:$0xff] }
 0x685   : > { %7433 = vmatmul.bf16.gmra.mxu0 %v11622_v24  ;;  %v6251_v23 = vadd.f32 %v6250_v19, %v15220_v48  ;;  %v11695_v19 = vld [vmem:[#allocation2 + $0x168] sm:$0xff] }
 0x686   : > { %8056 = vmatmul.bf16.gmra.mxu2 %v11669_v51  ;;  %v15221_v51 = vld [vmem:[#allocation40_spill] sm:$0xff] }
 0x687   : > { %v6570_v14 = vadd.f32 %v14446_v4, %v6251_v23 }
 0x689   : > { %v6841_v25 = vpop.f32.mrf.mxu2 }
 0x68a   : > { %v6882_v63 = vadd.f32 %v6841_v25, %v6568_v28  ;;  %v6252_v32 = vpop.f32.mrf.mxu0 }
 0x68c   : > { %v14585_v5 = vadd.f32 %v7155_v0, %v6882_v63  ;;  %v7157_v7 = vpop.f32.mrf.mxu3  ;;  %v6253_v0 = vadd.f32 %v6252_v32, %v15221_v51 }
 0x68e   : > { %v6571_v25 = vadd.f32 %v14455_v34, %v6253_v0  ;;  %v15223_v34 = vld [vmem:[#allocation4_spill] sm:$0xff] }
 0x691   : > { %v6843_v29 = vpop.f32.mrf.mxu2  ;;  %8375 = vmatmul.bf16.gmra.mxu3 %v11694_v33  ;;  %v11671_v33 = vld [vmem:[#allocation2 + $0xd8] sm:$0xff] }
 0x692   : > { %v6883_v42 = vadd.f32 %v6843_v29, %v6569_v54  ;;  %v6255_v46 = vpop.f32.mrf.mxu0  ;;  %v11624_v54 = vld [vmem:[#allocation2 + $0x168] sm:$0xff] }
 0x694   : > { %v14589_v37 = vadd.f32 %v7157_v7, %v6883_v42  ;;  %v7160_v30 = vpop.f32.mrf.mxu3  ;;  %v15222_v7 = vld [vmem:[#allocation42_spill] sm:$0xff] }
 0x695   : > { %7438 = vmatmul.bf16.gmra.mxu0 %v11623_v59  ;;  %v6256_v13 = vadd.f32 %v6255_v46, %v15222_v7  ;;  %v11696_v46 = vld [vmem:[#allocation2 + $0x170] sm:$0xff]  ;;  %v14613_v7 = vld [vmem:[%s14875_s4 + $0x1] ss:$0 sm:$0xff] }
 0x696   : > { %8061 = vmatmul.bf16.gmra.mxu2 %v11670_v44 }
 0x697   : > { %v6572_v32 = vadd.f32 %v14470_v40, %v6256_v13  ;;  %v14605_v40 = vpop.f32.mrf.mxu1 }
 0x699   : > { %v6846_v15 = vpop.f32.mrf.mxu2 }
 0x69a   : > { %v6884_v41 = vadd.f32 %v6846_v15, %v6570_v14  ;;  %v6257_v24 = vpop.f32.mrf.mxu0 }
 0x69b   : > { %v6258_v59 = vadd.f32 %v6257_v24, %v15223_v34 }
 0x69c   : > { %v14593_v49 = vadd.f32 %v7160_v30, %v6884_v41  ;;  %v7162_v28 = vpop.f32.mrf.mxu3 }
 0x69d   : > { %v6573_v14 = vadd.f32 %v14477_v62, %v6258_v59 }
 0x6a1   : > { %v6848_v63 = vpop.f32.mrf.mxu2  ;;  %8380 = vmatmul.bf16.gmra.mxu3 %v11695_v19 }
 0x6a2   : > { %v6885_v45 = vadd.f32 %v6848_v63, %v6571_v25  ;;  %v7404_v31 = vpop.f32.mrf.mxu0  ;;  %v11672_v25 = vld [vmem:[#allocation2 + $0xe0] sm:$0xff] }
 0x6a3   : > { %v7484_v0 = vadd.f32 %v7404_v31, %v14443_v27 }
 0x6a4   : > { %v14597_v4 = vadd.f32 %v7162_v28, %v6885_v45  ;;  %v7165_v29 = vpop.f32.mrf.mxu3  ;;  %v11625_v28 = vld [vmem:[#allocation2 + $0x170] sm:$0xff] }
 0x6a5   : > { %7443 = vmatmul.bf16.gmra.mxu0 %v11624_v54  ;;  %v7798_v24 = vadd.f32 %v14483_v20, %v7484_v0  ;;  %v11697_v20 = vld [vmem:[#allocation2 + $0x178] sm:$0xff]  ;;  %v15224_v0 = vlaneseq }
 0x6a6   : > { %8066 = vmatmul.bf16.gmra.mxu2 %v11671_v33 }
 0x6a9   : > { %v6851_v42 = vpop.f32.mrf.mxu2 }
 0x6aa   : > { %v6886_v48 = vadd.f32 %v6851_v42, %v6572_v32  ;;  %v7406_v23 = vpop.f32.mrf.mxu0 }
 0x6ab   : > { %v7485_v27 = vadd.f32 %v7406_v23, %v14449_v57  ;;  %v11673_v57 = vld [vmem:[#allocation2 + $0xe8] sm:$0xff] }
 0x6ac   : > { %v14601_v44 = vadd.f32 %v7165_v29, %v6886_v48  ;;  %v7167_v30 = vpop.f32.mrf.mxu3  ;;  %v14617_v29 = vpop.f32.mrf.mxu1 }
 0x6ad   : > { %v7799_v42 = vadd.f32 %v14492_v18, %v7485_v27 }
 0x6b1   : > { %v6853_v15 = vpop.f32.mrf.mxu2  ;;  %8385 = vmatmul.bf16.gmra.mxu3 %v11696_v46 }
 0x6b2   : > { %v6887_v41 = vadd.f32 %v6853_v15, %v6573_v14  ;;  %v7409_v51 = vpop.f32.mrf.mxu0  ;;  %v11626_v15 = vld [vmem:[#allocation2 + $0x178] sm:$0xff] }
 0x6b4   : > { %v8346_v19 = vpop.f32.mrf.mxu3  ;;  %v14607_v63 = vadd.f32 %v7167_v30, %v6887_v41  ;;  %v7486_v30 = vadd.f32 %v7409_v51, %v14453_v43  ;;  %v12417_v51 = vld [vmem:[#allocation3 + $0x30] sm:$0xff]  }
 0x6b5   : > { %7448 = vmatmul.bf16.gmra.mxu0 %v11625_v28  ;;  %v8784_v28 = vand.u32 127, %v15224_v0 }
 0x6b6   : > { %8071 = vmatmul.bf16.gmra.mxu2 %v11672_v25 }
 0x6b7   : > { %vm8785_vm1 = vcmp.ge.s32.totalorder %v8784_v28, 2  ;;  %vm8786_vm13 = vcmp.lt.s32.totalorder %v8784_v28, 6  ;;  %vm8788_vm0 = vcmp.ge.s32.totalorder %v8784_v28, 8  ;;  %vm8789_vm12 = vcmp.lt.s32.totalorder %v8784_v28, 12  ;;  %v8856_v28 = vld [vmem:[%s12891_s29] sm:$0xff] }
 0x6b8   : > { %vm8787_vm14 = vmand %vm8785_vm1, %vm8786_vm13 }
 0x6b9   : > { %v8032_v45 = vpop.f32.mrf.mxu2  ;;  %vm8790_vm10 = vmand %vm8788_vm0, %vm8789_vm12 }
 0x6ba   : > { %v8112_v62 = vadd.f32 %v8032_v45, %v7798_v24  ;;  %v7411_v13 = vpop.f32.mrf.mxu0  ;;  %v14624_v24 = vpop.f32.mrf.mxu1  ;;  %vm14631_vm4 = vmor %vm8787_vm14, %vm8790_vm10 }
 0x6bc   : > { %v8426_v31 = vadd.f32 %v8346_v19, %v8112_v62  ;;  %v8348_v54 = vpop.f32.mrf.mxu3  ;;  %v7800_v19 = vadd.f32 %v14507_v58, %v7486_v30 }
 0x6be   : > { %v8463_v33 = vadd.f32 %v14613_v7, %v8426_v31 }
 0x6c0   : > { %v8495_v32 = vmax.f32 %v8463_v33, 0.0 }
 0x6c1   : > { %v8034_v48 = vpop.f32.mrf.mxu2  ;;  %8390 = vmatmul.bf16.gmra.mxu3 %v11697_v20  ;;  %v12418_v20 = vunpack.c.l.bf16 %v12417_v51 }
 0x6c2   : > { %v8113_v34 = vadd.f32 %v8034_v48, %v7799_v42  ;;  %v7414_v59 = vpop.f32.mrf.mxu0  ;;  %v8527_v14 = vmin.f32 %v8495_v32, 6.0  ;;  %v12419_v48 = vunpack.c.h.bf16 %v12417_v51  ;;  %v11627_v51 = vld [vmem:[#allocation2 + $0x180] sm:$0xff] }
 0x6c4   : > { %v8427_v46 = vadd.f32 %v8348_v54, %v8113_v34  ;;  %v8351_v23 = vpop.f32.mrf.mxu3  ;;  %v8591_v25 = vpack.c.bf16 %v8527_v14, %v8527_v14  ;;  %v7487_v54 = vadd.f32 %v7411_v13, %v14459_v55  ;;  %v11698_v13 = vld [vmem:[#allocation2 + $0x180] sm:$0xff] }
 0x6c5   : > { %7453 = vmatmul.bf16.gmra.mxu0 %v11626_v15 }
 0x6c6   : > { %v8464_v41 = vadd.f32 %v14613_v7, %v8427_v46  ;;  %8076 = vmatmul.bf16.gmra.mxu2 %v11673_v57  ;;  %v8655_v31 = vunpack.c.l.bf16 %v8591_v25  ;;  %v7801_v55 = vadd.f32 %v14514_v10, %v7487_v54  ;;  %v8857_v25 = vld [vmem:[%s12891_s29 + $0x8] sm:$0xff] }
 0x6c8   : > { %v8496_v18 = vmax.f32 %v8464_v41, 0.0  ;;  %v8687_v30 = vadd.f32 %v12418_v20, %v8655_v31  ;;  %v14629_v41 = vpop.f32.mrf.mxu1  ;;  %v11674_v31 = vld [vmem:[#allocation2 + $0xf0] sm:$0xff] }
 0x6c9   : > { %v8037_v45 = vpop.f32.mrf.mxu2 }
 0x6ca   : > { %v8528_v62 = vmin.f32 %v8496_v18, 6.0  ;;  %v8114_v43 = vadd.f32 %v8037_v45, %v7800_v19  ;;  %v7416_v27 = vpop.f32.mrf.mxu0  ;;  %v7488_v18 = vadd.f32 %v7414_v59, %v14474_v60 }
 0x6cc   : > { %v8592_v33 = vpack.c.bf16 %v8528_v62, %v8528_v62  ;;  %v8428_v32 = vadd.f32 %v8351_v23, %v8114_v43  ;;  %v8353_v42 = vpop.f32.mrf.mxu3 }
 0x6ce   : > { %v8656_v58 = vunpack.c.l.bf16 %v8592_v33  ;;  %v8465_v34 = vadd.f32 %v14613_v7, %v8428_v32 }
 0x6d0   : > { %v8688_v14 = vadd.f32 %v12419_v48, %v8656_v58  ;;  %v8497_v46 = vmax.f32 %v8465_v34, 0.0  ;;  %v7802_v48 = vadd.f32 %v14520_v1, %v7488_v18 }
 0x6d1   : > { %v8039_v15 = vpop.f32.mrf.mxu2  ;;  %8395 = vmatmul.bf16.gmra.mxu3 %v11698_v13 }
 0x6d2   : > { %v12483_v57 = vpack.c.bf16 %v8688_v14, %v8687_v30  ;;  %v8115_v23 = vadd.f32 %v8039_v15, %v7801_v55  ;;  %v7419_v19 = vpop.f32.mrf.mxu0  ;;  %v8529_v62 = vmin.f32 %v8497_v46, 6.0  ;;  %v12765_v30 = vld [vmem:[#allocation3] sm:$0xff]   ;;  %v7489_v55 = vadd.f32 %v7416_v27, %v14480_v2 }
 0x6d4   : > { %12484 = vst [vmem:[#allocation3 + $0x30] sm:$0xff] %v12483_v57   ;;  %v12562_v10 = vunpack.c.l.bf16 %v12483_v57  ;;  %v12563_v45 = vunpack.c.h.bf16 %v12483_v57  ;;  %v8429_v43 = vadd.f32 %v8353_v42, %v8115_v23  ;;  %v8356_v54 = vpop.f32.mrf.mxu3  ;;  %v8593_v32 = vpack.c.bf16 %v8529_v62, %v8529_v62  ;;  %v14654_v57 = vpop.f32.mrf.mxu1 }
 0x6d5   : > { %7458 = vmatmul.bf16.gmra.mxu0 %v11627_v51  ;;  %v11699_v51 = vld [vmem:[#allocation2 + $0x188] sm:$0xff] }
 0x6d6   : > { %v8890_v60 = vsel %vm14631_vm4, %v12562_v10, %v8856_v28  ;;  %v8891_v59 = vsel %vm14631_vm4, %v12563_v45, %v8857_v25  ;;  %v8466_v33 = vadd.f32 %v14613_v7, %v8429_v43  ;;  %8081 = vmatmul.bf16.gmra.mxu2 %v11674_v31  ;;  %v8657_v46 = vunpack.c.l.bf16 %v8593_v32 }
 0x6d7   : > { %8922 = vst [vmem:[%s14643_s22] sm:$0xff] %v8890_v60  ;;  %v12422_v28 = vunpack.c.l.bf16 %v12765_v30  ;;  %v12423_v25 = vunpack.c.h.bf16 %v12765_v30  ;;  %v7803_v43 = vadd.f32 %v14529_v6, %v7489_v55  ;;  %v8859_v60 = vld [vmem:[%s12891_s29 + $0x18] sm:$0xff] }
 0x6d8   : > { %8923 = vst [vmem:[%s14643_s22 + $0x8] sm:$0xff] %v8891_v59  ;;  %v8498_v20 = vmax.f32 %v8466_v33, 0.0  ;;  %v7490_v59 = vadd.f32 %v7419_v19, %v14486_v22 }
 0x6d9   : > { %v8042_v42 = vpop.f32.mrf.mxu2  ;;  %v8689_v18 = vadd.f32 %v12422_v28, %v8657_v46 }
 0x6da   : > { %v8530_v58 = vmin.f32 %v8498_v20, 6.0  ;;  %v8116_v34 = vadd.f32 %v8042_v42, %v7802_v48  ;;  %v7421_v14 = vpop.f32.mrf.mxu0 }
 0x6dc   : > { %v8594_v13 = vpack.c.bf16 %v8530_v58, %v8530_v58  ;;  %v8430_v15 = vadd.f32 %v8356_v54, %v8116_v34  ;;  %v8358_v23 = vpop.f32.mrf.mxu3  ;;  %v8858_v54 = vld [vmem:[%s12891_s29 + $0x10] sm:$0xff]  ;;  %v11628_v58 = vld [vmem:[#allocation2 + $0x188] sm:$0xff]  ;;  %v11675_v34 = vld [vmem:[#allocation2 + $0xf8] sm:$0xff]  ;;  %v14666_v22 = vpop.f32.mrf.mxu1 }
 0x6de   : > { %v8658_v10 = vunpack.c.l.bf16 %v8594_v13  ;;  %v8467_v1 = vadd.f32 %v14613_v7, %v8430_v15  ;;  %v7804_v15 = vadd.f32 %v14605_v40, %v7490_v59 }
 0x6e0   : > { %v8690_v45 = vadd.f32 %v12423_v25, %v8658_v10  ;;  %v8499_v62 = vmax.f32 %v8467_v1, 0.0  ;;  %v12766_v10 = vld [vmem:[#allocation3 + $0x58] sm:$0xff]  }
 0x6e1   : > { %v8044_v31 = vpop.f32.mrf.mxu2  ;;  %8400 = vmatmul.bf16.gmra.mxu3 %v11699_v51 }
 0x6e2   : > { %v12488_v2 = vpack.c.bf16 %v8690_v45, %v8689_v18  ;;  %v8117_v27 = vadd.f32 %v8044_v31, %v7803_v43  ;;  %v7424_v33 = vpop.f32.mrf.mxu0  ;;  %v8531_v48 = vmin.f32 %v8499_v62, 6.0  ;;  %v7491_v45 = vadd.f32 %v7421_v14, %v14490_v16 }
 0x6e3   : > { %v12426_v31 = vunpack.c.l.bf16 %v12766_v10 }
 0x6e4   : > { %12780 = vst [vmem:[#allocation3] sm:$0xff] %v12488_v2   ;;  %v12566_v32 = vunpack.c.l.bf16 %v12488_v2  ;;  %v12567_v20 = vunpack.c.h.bf16 %v12488_v2  ;;  %v8431_v42 = vadd.f32 %v8358_v23, %v8117_v27  ;;  %v8361_v6 = vpop.f32.mrf.mxu3  ;;  %v8595_v19 = vpack.c.bf16 %v8531_v48, %v8531_v48  ;;  %v14674_v48 = vpop.f32.mrf.mxu1 }
 0x6e5   : > { %7463 = vmatmul.bf16.gmra.mxu0 %v11628_v58  ;;  %v12427_v2 = vunpack.c.h.bf16 %v12766_v10  ;;  %v8860_v58 = vld [vmem:[%s12891_s29 + $0x20] sm:$0xff] }
 0x6e6   : > { %v8892_v30 = vsel %vm14631_vm4, %v12566_v32, %v8858_v54  ;;  %v8893_v46 = vsel %vm14631_vm4, %v12567_v20, %v8859_v60  ;;  %v8468_v55 = vadd.f32 %v14613_v7, %v8431_v42  ;;  %8086 = vmatmul.bf16.gmra.mxu2 %v11675_v34  ;;  %v8659_v18 = vunpack.c.l.bf16 %v8595_v19  ;;  %v11700_v20 = vld [vmem:[#allocation2 + $0x190] sm:$0xff]  ;;  %v8861_v34 = vld [vmem:[%s12891_s29 + $0x28] sm:$0xff] }
 0x6e7   : > { %8924 = vst [vmem:[%s14643_s22 + $0x10] sm:$0xff] %v8892_v30  ;;  %v7805_v32 = vadd.f32 %v14617_v29, %v7491_v45  ;;  %v11629_v29 = vld [vmem:[#allocation2 + $0x190] sm:$0xff] }
 0x6e8   : > { %8925 = vst [vmem:[%s14643_s22 + $0x18] sm:$0xff] %v8893_v46  ;;  %v8500_v13 = vmax.f32 %v8468_v55, 0.0  ;;  %v8691_v60 = vadd.f32 %v12426_v31, %v8659_v18 }
 0x6e9   : > { %v8047_v23 = vpop.f32.mrf.mxu2 }
 0x6ea   : > { %v8532_v28 = vmin.f32 %v8500_v13, 6.0  ;;  %v8118_v25 = vadd.f32 %v8047_v23, %v7804_v15  ;;  %v7426_v1 = vpop.f32.mrf.mxu0  ;;  %v11676_v15 = vld [vmem:[#allocation2 + $0x100] sm:$0xff] }
 0x6ec   : > { %v8596_v62 = vpack.c.bf16 %v8532_v28, %v8532_v28  ;;  %v8432_v43 = vadd.f32 %v8361_v6, %v8118_v25  ;;  %v8363_v51 = vpop.f32.mrf.mxu3  ;;  %v7492_v6 = vadd.f32 %v7424_v33, %v14505_v35  ;;  %v11655_v35 = vld [vmem:[#allocation2 + $0x88] sm:$0xff]  ;;  %v14687_v31 = vpop.f32.mrf.mxu1 }
 0x6ed   : > { %7792 = vmatmul.bf16.gmra.mxu1 %v11655_v35  ;;  %v11630_v35 = vld [vmem:[#allocation2 + $0x198] sm:$0xff] }
 0x6ee   : > { %v8660_v27 = vunpack.c.l.bf16 %v8596_v62  ;;  %v8469_v54 = vadd.f32 %v14613_v7, %v8432_v43  ;;  %v7806_v45 = vadd.f32 %v14624_v24, %v7492_v6 }
 0x6f0   : > { %v8692_v40 = vadd.f32 %v12427_v2, %v8660_v27  ;;  %v8501_v59 = vmax.f32 %v8469_v54, 0.0  ;;  %v12767_v2 = vld [vmem:[#allocation3 + $0x18] sm:$0xff]  }
 0x6f1   : > { %v8049_v42 = vpop.f32.mrf.mxu2  ;;  %8405 = vmatmul.bf16.gmra.mxu3 %v11700_v20  ;;  %v12430_v20 = vunpack.c.l.bf16 %v12767_v2 }
 0x6f2   : > { %v12493_v16 = vpack.c.bf16 %v8692_v40, %v8691_v60  ;;  %v8119_v14 = vadd.f32 %v8049_v42, %v7805_v32  ;;  %v7429_v30 = vpop.f32.mrf.mxu0  ;;  %v8533_v19 = vmin.f32 %v8501_v59, 6.0  ;;  %v7493_v60 = vadd.f32 %v7426_v1, %v14511_v47  ;;  %v8862_v47 = vld [vmem:[%s12891_s29 + $0x30] sm:$0xff]  ;;  %v8863_v1 = vld [vmem:[%s12891_s29 + $0x38] sm:$0xff] }
 0x6f3   : > { %v12431_v42 = vunpack.c.h.bf16 %v12767_v2 }
 0x6f4   : > { %12781 = vst [vmem:[#allocation3 + $0x58] sm:$0xff] %v12493_v16   ;;  %v12570_v46 = vunpack.c.l.bf16 %v12493_v16  ;;  %v12571_v55 = vunpack.c.h.bf16 %v12493_v16  ;;  %v8433_v13 = vadd.f32 %v8363_v51, %v8119_v14  ;;  %v8366_v23 = vpop.f32.mrf.mxu3  ;;  %v8597_v33 = vpack.c.bf16 %v8533_v19, %v8533_v19 }
 0x6f5   : > { %7468 = vmatmul.bf16.gmra.mxu0 %v11629_v29  ;;  %v7807_v6 = vadd.f32 %v14629_v41, %v7493_v60  ;;  %v7494_v29 = vadd.f32 %v7429_v30, %v14517_v61  ;;  %v14695_v41 = vpop.f32.mrf.mxu1 }
 0x6f6   : > { %v8894_v28 = vsel %vm14631_vm4, %v12570_v46, %v8860_v58  ;;  %v8895_v25 = vsel %vm14631_vm4, %v12571_v55, %v8861_v34  ;;  %v8470_v10 = vadd.f32 %v14613_v7, %v8433_v13  ;;  %8091 = vmatmul.bf16.gmra.mxu2 %v11676_v15  ;;  %v8661_v54 = vunpack.c.l.bf16 %v8597_v33  ;;  %v11701_v46 = vld [vmem:[#allocation2 + $0x198] sm:$0xff]  ;;  %v11677_v33 = vld [vmem:[#allocation2 + $0x108] sm:$0xff] }
 0x6f7   : > { %8926 = vst [vmem:[%s14643_s22 + $0x20] sm:$0xff] %v8894_v28 }
 0x6f8   : > { %8927 = vst [vmem:[%s14643_s22 + $0x28] sm:$0xff] %v8895_v25  ;;  %v8502_v18 = vmax.f32 %v8470_v10, 0.0  ;;  %v8693_v14 = vadd.f32 %v12430_v20, %v8661_v54 }
 0x6f9   : > { %v8052_v62 = vpop.f32.mrf.mxu2 }
 0x6fa   : > { %v8534_v43 = vmin.f32 %v8502_v18, 6.0  ;;  %v8120_v51 = vadd.f32 %v8052_v62, %v7806_v45  ;;  %v7431_v27 = vpop.f32.mrf.mxu0 }
 0x6fb   : > { %v7495_v20 = vadd.f32 %v7431_v27, %v14523_v26 }
 0x6fc   : > { %v8598_v40 = vpack.c.bf16 %v8534_v43, %v8534_v43  ;;  %v8434_v59 = vadd.f32 %v8366_v23, %v8120_v51  ;;  %v8368_v32 = vpop.f32.mrf.mxu3  ;;  %v7808_v51 = vadd.f32 %v14654_v57, %v7494_v29  ;;  %v8864_v29 = vld [vmem:[%s12891_s29 + $0x40] sm:$0xff] }
 0x6fe   : > { %v8662_v16 = vunpack.c.l.bf16 %v8598_v40  ;;  %v8471_v24 = vadd.f32 %v14613_v7, %v8434_v59  ;;  %v12768_v40 = vld [vmem:[#allocation3 + $0x50] sm:$0xff]  }
 0x700   : > { %v8694_v58 = vadd.f32 %v12431_v42, %v8662_v16  ;;  %v8503_v34 = vmax.f32 %v8471_v24, 0.0 }
 0x701   : > { %v8054_v55 = vpop.f32.mrf.mxu2  ;;  %8410 = vmatmul.bf16.gmra.mxu3 %v11701_v46  ;;  %v14707_v46 = vpop.f32.mrf.mxu1 }
 0x702   : > { %v12498_v19 = vpack.c.bf16 %v8694_v58, %v8693_v14  ;;  %v8121_v13 = vadd.f32 %v8054_v55, %v7807_v6  ;;  %v7434_v15 = vpop.f32.mrf.mxu0  ;;  %v8535_v25 = vmin.f32 %v8503_v34, 6.0  ;;  %v12434_v14 = vunpack.c.l.bf16 %v12768_v40 }
 0x703   : > { %v12435_v58 = vunpack.c.h.bf16 %v12768_v40 }
 0x704   : > { %12782 = vst [vmem:[#allocation3 + $0x18] sm:$0xff] %v12498_v19   ;;  %v12574_v23 = vunpack.c.l.bf16 %v12498_v19  ;;  %v12575_v28 = vunpack.c.h.bf16 %v12498_v19  ;;  %v8435_v10 = vadd.f32 %v8368_v32, %v8121_v13  ;;  %v8371_v18 = vpop.f32.mrf.mxu3  ;;  %v8599_v30 = vpack.c.bf16 %v8535_v25, %v8535_v25 }
 0x705   : > { %7473 = vmatmul.bf16.gmra.mxu0 %v11630_v35  ;;  %v7809_v13 = vadd.f32 %v14666_v22, %v7495_v20 }
 0x706   : > { %v8896_v45 = vsel %vm14631_vm4, %v12574_v23, %v8862_v47  ;;  %v8897_v62 = vsel %vm14631_vm4, %v12575_v28, %v8863_v1  ;;  %v8472_v61 = vadd.f32 %v14613_v7, %v8435_v10  ;;  %8096 = vmatmul.bf16.gmra.mxu2 %v11677_v33  ;;  %v8663_v32 = vunpack.c.l.bf16 %v8599_v30  ;;  %v11702_v47 = vld [vmem:[#allocation2 + $0x1a0] sm:$0xff]  ;;  %v8865_v23 = vld [vmem:[%s12891_s29 + $0x48] sm:$0xff] }
 0x707   : > { %8928 = vst [vmem:[%s14643_s22 + $0x30] sm:$0xff] %v8896_v45  ;;  %v7496_v28 = vadd.f32 %v7434_v15, %v14527_v17  ;;  %v11631_v45 = vld [vmem:[#allocation2 + $0x1a0] sm:$0xff] }
 0x708   : > { %8929 = vst [vmem:[%s14643_s22 + $0x38] sm:$0xff] %v8897_v62  ;;  %v8504_v43 = vmax.f32 %v8472_v61, 0.0  ;;  %v8695_v57 = vadd.f32 %v12434_v14, %v8663_v32  ;;  %v11678_v62 = vld [vmem:[#allocation2 + $0x110] sm:$0xff]  ;;  %v12769_v32 = vld [vmem:[#allocation3 + $0x68] sm:$0xff]  }
 0x709   : > { %v8057_v2 = vpop.f32.mrf.mxu2 }
 0x70a   : > { %v8536_v54 = vmin.f32 %v8504_v43, 6.0  ;;  %v8122_v60 = vadd.f32 %v8057_v2, %v7808_v51  ;;  %v7436_v59 = vpop.f32.mrf.mxu0  ;;  %v7810_v51 = vadd.f32 %v14674_v48, %v7496_v28  ;;  %v14721_v2 = vpop.f32.mrf.mxu1  ;;  %v8867_v28 = vld [vmem:[%s12891_s29 + $0x58] sm:$0xff] }
 0x70c   : > { %v8600_v42 = vpack.c.bf16 %v8536_v54, %v8536_v54  ;;  %v8436_v16 = vadd.f32 %v8371_v18, %v8122_v60  ;;  %v8373_v24 = vpop.f32.mrf.mxu3 }
 0x70e   : > { %v8664_v34 = vunpack.c.l.bf16 %v8600_v42  ;;  %v8473_v6 = vadd.f32 %v14613_v7, %v8436_v16  ;;  %v7497_v16 = vadd.f32 %v7436_v59, %v14533_v8  ;;  %v11679_v8 = vld [vmem:[#allocation2 + $0x118] sm:$0xff] }
 0x710   : > { %v8696_v55 = vadd.f32 %v12435_v58, %v8664_v34  ;;  %v8505_v19 = vmax.f32 %v8473_v6, 0.0  ;;  %v12438_v34 = vunpack.c.l.bf16 %v12769_v32  ;;  %v12439_v6 = vunpack.c.h.bf16 %v12769_v32 }
 0x711   : > { %v8059_v1 = vpop.f32.mrf.mxu2  ;;  %8415 = vmatmul.bf16.gmra.mxu3 %v11702_v47 }
 0x712   : > { %v12503_v26 = vpack.c.bf16 %v8696_v55, %v8695_v57  ;;  %v8123_v27 = vadd.f32 %v8059_v1, %v7809_v13  ;;  %v7439_v25 = vpop.f32.mrf.mxu0  ;;  %v8537_v33 = vmin.f32 %v8505_v19, 6.0  ;;  %v11703_v55 = vld [vmem:[#allocation2 + $0x1a8] sm:$0xff]  ;;  %v7811_v1 = vadd.f32 %v14687_v31, %v7497_v16  ;;  %v14726_v59 = vpop.f32.mrf.mxu1 }
 0x714   : > { %12783 = vst [vmem:[#allocation3 + $0x50] sm:$0xff] %v12503_v26   ;;  %v12578_v10 = vunpack.c.l.bf16 %v12503_v26  ;;  %v12579_v35 = vunpack.c.h.bf16 %v12503_v26  ;;  %v8437_v18 = vadd.f32 %v8373_v24, %v8123_v27  ;;  %v8376_v22 = vpop.f32.mrf.mxu3  ;;  %v8601_v17 = vpack.c.bf16 %v8537_v33, %v8537_v33 }
 0x715   : > { %7478 = vmatmul.bf16.gmra.mxu0 %v11631_v45 }
 0x716   : > { %v8898_v61 = vsel %vm14631_vm4, %v12578_v10, %v8864_v29  ;;  %v8899_v30 = vsel %vm14631_vm4, %v12579_v35, %v8865_v23  ;;  %v8474_v43 = vadd.f32 %v14613_v7, %v8437_v18  ;;  %8101 = vmatmul.bf16.gmra.mxu2 %v11678_v62  ;;  %v8665_v42 = vunpack.c.l.bf16 %v8601_v17  ;;  %v8866_v23 = vld [vmem:[%s12891_s29 + $0x50] sm:$0xff] }
 0x717   : > { %8930 = vst [vmem:[%s14643_s22 + $0x40] sm:$0xff] %v8898_v61  ;;  %v7498_v10 = vadd.f32 %v7439_v25, %v14537_v56 }
 0x718   : > { %8931 = vst [vmem:[%s14643_s22 + $0x48] sm:$0xff] %v8899_v30  ;;  %v8506_v15 = vmax.f32 %v8474_v43, 0.0  ;;  %v8697_v19 = vadd.f32 %v12438_v34, %v8665_v42 }
 0x719   : > { %v8062_v54 = vpop.f32.mrf.mxu2  ;;  %v7812_v25 = vadd.f32 %v14695_v41, %v7498_v10 }
 0x71a   : > { %v8538_v60 = vmin.f32 %v8506_v15, 6.0  ;;  %v8124_v40 = vadd.f32 %v8062_v54, %v7810_v51  ;;  %v7441_v20 = vpop.f32.mrf.mxu0  ;;  %v12770_v54 = vld [vmem:[#allocation3 + $0x8] sm:$0xff]  }
 0x71b   : > { %v7499_v32 = vadd.f32 %v7441_v20, %v14541_v11  ;;  %v12443_v34 = vunpack.c.h.bf16 %v12770_v54  ;;  %v8868_v20 = vld [vmem:[%s12891_s29 + $0x60] sm:$0xff] }
 0x71c   : > { %v8602_v24 = vpack.c.bf16 %v8538_v60, %v8538_v60  ;;  %v8438_v14 = vadd.f32 %v8376_v22, %v8124_v40  ;;  %v8378_v58 = vpop.f32.mrf.mxu3 }
 0x71e   : > { %v8666_v57 = vunpack.c.l.bf16 %v8602_v24  ;;  %v8475_v48 = vadd.f32 %v14613_v7, %v8438_v14  ;;  %v14740_v24 = vpop.f32.mrf.mxu1 }
 0x720   : > { %v8698_v13 = vadd.f32 %v12439_v6, %v8666_v57  ;;  %v8507_v47 = vmax.f32 %v8475_v48, 0.0 }
 0x721   : > { %v8064_v26 = vpop.f32.mrf.mxu2  ;;  %8420 = vmatmul.bf16.gmra.mxu3 %v11703_v55 }
 0x722   : > { %v12508_v27 = vpack.c.bf16 %v8698_v13, %v8697_v19  ;;  %v8125_v29 = vadd.f32 %v8064_v26, %v7811_v1  ;;  %v7444_v35 = vpop.f32.mrf.mxu0  ;;  %v8539_v45 = vmin.f32 %v8507_v47, 6.0  ;;  %v7813_v19 = vadd.f32 %v14707_v46, %v7499_v32  ;;  %v8869_v1 = vld [vmem:[%s12891_s29 + $0x68] sm:$0xff] }
 0x723   : > { %v7500_v26 = vadd.f32 %v7444_v35, %v14545_v53 }
 0x724   : > { %12784 = vst [vmem:[#allocation3 + $0x68] sm:$0xff] %v12508_v27   ;;  %v12582_v33 = vunpack.c.l.bf16 %v12508_v27  ;;  %v12583_v18 = vunpack.c.h.bf16 %v12508_v27  ;;  %v8439_v62 = vadd.f32 %v8378_v58, %v8125_v29  ;;  %v8381_v31 = vpop.f32.mrf.mxu3  ;;  %v8603_v43 = vpack.c.bf16 %v8539_v45, %v8539_v45 }
 0x725   : > { %v12442_v58 = vunpack.c.l.bf16 %v12770_v54 }
 0x726   : > { %v8900_v22 = vsel %vm14631_vm4, %v12582_v33, %v8866_v23  ;;  %v8901_v61 = vsel %vm14631_vm4, %v12583_v18, %v8867_v28  ;;  %v8476_v30 = vadd.f32 %v14613_v7, %v8439_v62  ;;  %8106 = vmatmul.bf16.gmra.mxu2 %v11679_v8  ;;  %v8667_v40 = vunpack.c.l.bf16 %v8603_v43  ;;  %v14752_v45 = vpop.f32.mrf.mxu1 }
 0x727   : > { %8932 = vst [vmem:[%s14643_s22 + $0x50] sm:$0xff] %v8900_v22  ;;  %v7814_v62 = vadd.f32 %v14721_v2, %v7500_v26 }
 0x728   : > { %8933 = vst [vmem:[%s14643_s22 + $0x58] sm:$0xff] %v8901_v61  ;;  %v8508_v56 = vmax.f32 %v8476_v30, 0.0  ;;  %v8699_v57 = vadd.f32 %v12442_v58, %v8667_v40  ;;  %v12771_v30 = vld [vmem:[#allocation3 + $0x48] sm:$0xff]  }
 0x729   : > { %v8067_v17 = vpop.f32.mrf.mxu2  ;;  %v12446_v54 = vunpack.c.l.bf16 %v12771_v30  ;;  %v12447_v40 = vunpack.c.h.bf16 %v12771_v30 }
 0x72a   : > { %v8540_v15 = vmin.f32 %v8508_v56, 6.0  ;;  %v8126_v51 = vadd.f32 %v8067_v17, %v7812_v25  ;;  %v7446_v60 = vpop.f32.mrf.mxu0 }
 0x72b   : > { %v7501_v25 = vadd.f32 %v7446_v60, %v14549_v12  ;;  %v8870_v60 = vld [vmem:[%s12891_s29 + $0x70] sm:$0xff] }
 0x72c   : > { %v8604_v42 = vpack.c.bf16 %v8540_v15, %v8540_v15  ;;  %v8440_v16 = vadd.f32 %v8381_v31, %v8126_v51  ;;  %v8383_v14 = vpop.f32.mrf.mxu3 }
 0x72d   : > { %v7815_v58 = vadd.f32 %v14726_v59, %v7501_v25 }
 0x72e   : > { %v8668_v6 = vunpack.c.l.bf16 %v8604_v42  ;;  %v8477_v41 = vadd.f32 %v14613_v7, %v8440_v16 }
 0x730   : > { %v8700_v48 = vadd.f32 %v12443_v34, %v8668_v6  ;;  %v8509_v55 = vmax.f32 %v8477_v41, 0.0  ;;  %v7768_v34 = vpop.f32.mrf.mxu1 }
 0x731   : > { %v8069_v13 = vpop.f32.mrf.mxu2 }
 0x732   : > { %v12513_v47 = vpack.c.bf16 %v8700_v48, %v8699_v57  ;;  %v8127_v11 = vadd.f32 %v8069_v13, %v7813_v19  ;;  %v7449_v27 = vpop.f32.mrf.mxu0  ;;  %v8541_v23 = vmin.f32 %v8509_v55, 6.0  ;;  %v8871_v57 = vld [vmem:[%s12891_s29 + $0x78] sm:$0xff] }
 0x733   : > { %v7502_v48 = vadd.f32 %v7449_v27, %v14553_v52 }
 0x734   : > { %12785 = vst [vmem:[#allocation3 + $0x8] sm:$0xff] %v12513_v47   ;;  %v12586_v29 = vunpack.c.l.bf16 %v12513_v47  ;;  %v12587_v8 = vunpack.c.h.bf16 %v12513_v47  ;;  %v8441_v28 = vadd.f32 %v8383_v14, %v8127_v11  ;;  %v8386_v10 = vpop.f32.mrf.mxu3  ;;  %v8605_v53 = vpack.c.bf16 %v8541_v23, %v8541_v23 }
 0x735   : > { %v7816_v52 = vadd.f32 %v14740_v24, %v7502_v48 }
 0x736   : > { %v8902_v33 = vsel %vm14631_vm4, %v12586_v29, %v8868_v20  ;;  %v8903_v46 = vsel %vm14631_vm4, %v12587_v8, %v8869_v1  ;;  %v8478_v18 = vadd.f32 %v14613_v7, %v8441_v28  ;;  %v8669_v56 = vunpack.c.l.bf16 %v8605_v53 }
 0x737   : > { %8934 = vst [vmem:[%s14643_s22 + $0x60] sm:$0xff] %v8902_v33  ;;  %v12772_v33 = vld [vmem:[#allocation3 + $0x40] sm:$0xff]  }
 0x738   : > { %8935 = vst [vmem:[%s14643_s22 + $0x68] sm:$0xff] %v8903_v46  ;;  %v8510_v35 = vmax.f32 %v8478_v18, 0.0  ;;  %v8701_v16 = vadd.f32 %v12446_v54, %v8669_v56 }
 0x739   : > { %v8072_v31 = vpop.f32.mrf.mxu2 }
 0x73a   : > { %v8542_v22 = vmin.f32 %v8510_v35, 6.0  ;;  %v8128_v61 = vadd.f32 %v8072_v31, %v7814_v62  ;;  %v7451_v43 = vpop.f32.mrf.mxu0 }
 0x73b   : > { %v7503_v53 = vadd.f32 %v7451_v43, %v14557_v50  ;;  %v8872_v50 = vld [vmem:[%s12891_s29 + $0x80] sm:$0xff]  ;;  %v8873_v43 = vld [vmem:[%s12891_s29 + $0x88] sm:$0xff] }
 0x73c   : > { %v8606_v17 = vpack.c.bf16 %v8542_v22, %v8542_v22  ;;  %v8442_v15 = vadd.f32 %v8386_v10, %v8128_v61  ;;  %v8388_v51 = vpop.f32.mrf.mxu3  ;;  %v7770_v10 = vpop.f32.mrf.mxu1  ;;  %v12450_v22 = vunpack.c.l.bf16 %v12772_v33  ;;  %v12451_v61 = vunpack.c.h.bf16 %v12772_v33 }
 0x73e   : > { %v8670_v32 = vunpack.c.l.bf16 %v8606_v17  ;;  %v8479_v42 = vadd.f32 %v14613_v7, %v8442_v15  ;;  %v7817_v15 = vadd.f32 %v14752_v45, %v7503_v53 }
 0x740   : > { %v8702_v2 = vadd.f32 %v12447_v40, %v8670_v32  ;;  %v8511_v14 = vmax.f32 %v8479_v42, 0.0 }
 0x741   : > { %v8074_v6 = vpop.f32.mrf.mxu2 }
 0x742   : > { %v12518_v41 = vpack.c.bf16 %v8702_v2, %v8701_v16  ;;  %v8129_v12 = vadd.f32 %v8074_v6, %v7815_v58  ;;  %v7454_v55 = vpop.f32.mrf.mxu0  ;;  %v8543_v47 = vmin.f32 %v8511_v14, 6.0 }
 0x743   : > { %v7504_v32 = vadd.f32 %v7454_v55, %v14561_v39 }
 0x744   : > { %12786 = vst [vmem:[#allocation3 + $0x48] sm:$0xff] %v12518_v41   ;;  %v12590_v19 = vunpack.c.l.bf16 %v12518_v41  ;;  %v12591_v13 = vunpack.c.h.bf16 %v12518_v41  ;;  %v8443_v11 = vadd.f32 %v8388_v51, %v8129_v12  ;;  %v8391_v20 = vpop.f32.mrf.mxu3  ;;  %v8607_v29 = vpack.c.bf16 %v8543_v47, %v8543_v47  ;;  %v7773_v6 = vpop.f32.mrf.mxu1  ;;  %v12773_v47 = vld [vmem:[#allocation3 + $0x20] sm:$0xff]  }
 0x745   : > { %v7818_v48 = vadd.f32 %v7768_v34, %v7504_v32 }
 0x746   : > { %v8904_v59 = vsel %vm14631_vm4, %v12590_v19, %v8870_v60  ;;  %v8905_v1 = vsel %vm14631_vm4, %v12591_v13, %v8871_v57  ;;  %v8480_v26 = vadd.f32 %v14613_v7, %v8443_v11  ;;  %v8671_v18 = vunpack.c.l.bf16 %v8607_v29 }
 0x747   : > { %8936 = vst [vmem:[%s14643_s22 + $0x70] sm:$0xff] %v8904_v59 }
 0x748   : > { %8937 = vst [vmem:[%s14643_s22 + $0x78] sm:$0xff] %v8905_v1  ;;  %v8512_v8 = vmax.f32 %v8480_v26, 0.0  ;;  %v8703_v24 = vadd.f32 %v12450_v22, %v8671_v18 }
 0x749   : > { %v8077_v27 = vpop.f32.mrf.mxu2 }
 0x74a   : > { %v8544_v23 = vmin.f32 %v8512_v8, 6.0  ;;  %v8130_v28 = vadd.f32 %v8077_v27, %v7816_v52  ;;  %v7456_v46 = vpop.f32.mrf.mxu0  ;;  %v12454_v8 = vunpack.c.l.bf16 %v12773_v47  ;;  %v12455_v52 = vunpack.c.h.bf16 %v12773_v47 }
 0x74b   : > { %v7505_v59 = vadd.f32 %v7456_v46, %v14565_v9  ;;  %v8874_v46 = vld [vmem:[%s12891_s29 + $0x90] sm:$0xff] }
 0x74c   : > { %v8608_v35 = vpack.c.bf16 %v8544_v23, %v8544_v23  ;;  %v8444_v62 = vadd.f32 %v8391_v20, %v8130_v28  ;;  %v8393_v31 = vpop.f32.mrf.mxu3  ;;  %v7775_v28 = vpop.f32.mrf.mxu1 }
 0x74d   : > { %v7819_v53 = vadd.f32 %v7770_v10, %v7505_v59 }
 0x74e   : > { %v8672_v30 = vunpack.c.l.bf16 %v8608_v35  ;;  %v8481_v56 = vadd.f32 %v14613_v7, %v8444_v62 }
 0x750   : > { %v8704_v25 = vadd.f32 %v12451_v61, %v8672_v30  ;;  %v8513_v17 = vmax.f32 %v8481_v56, 0.0 }
 0x751   : > { %v8079_v51 = vpop.f32.mrf.mxu2 }
 0x752   : > { %v12523_v54 = vpack.c.bf16 %v8704_v25, %v8703_v24  ;;  %v8131_v40 = vadd.f32 %v8079_v51, %v7817_v15  ;;  %v7459_v42 = vpop.f32.mrf.mxu0  ;;  %v8545_v14 = vmin.f32 %v8513_v17, 6.0 }
 0x753   : > { %v7506_v22 = vadd.f32 %v7459_v42, %v14569_v3 }
 0x754   : > { %12787 = vst [vmem:[#allocation3 + $0x40] sm:$0xff] %v12523_v54   ;;  %v12594_v16 = vunpack.c.l.bf16 %v12523_v54  ;;  %v12595_v2 = vunpack.c.h.bf16 %v12523_v54  ;;  %v8445_v58 = vadd.f32 %v8393_v31, %v8131_v40  ;;  %v8396_v41 = vpop.f32.mrf.mxu3  ;;  %v8609_v57 = vpack.c.bf16 %v8545_v14, %v8545_v14  ;;  %v8875_v31 = vld [vmem:[%s12891_s29 + $0x98] sm:$0xff] }
 0x755   : > { %v7820_v3 = vadd.f32 %v7773_v6, %v7506_v22 }
 0x756   : > { %v8906_v45 = vsel %vm14631_vm4, %v12594_v16, %v8872_v50  ;;  %v8907_v12 = vsel %vm14631_vm4, %v12595_v2, %v8873_v43  ;;  %v8482_v60 = vadd.f32 %v14613_v7, %v8445_v58  ;;  %v8673_v20 = vunpack.c.l.bf16 %v8609_v57  ;;  %v7778_v50 = vpop.f32.mrf.mxu1  ;;  %v12774_v16 = vld [vmem:[#allocation3 + $0x10] sm:$0xff]  }
 0x757   : > { %8938 = vst [vmem:[%s14643_s22 + $0x80] sm:$0xff] %v8906_v45  ;;  %v12459_v57 = vunpack.c.h.bf16 %v12774_v16 }
 0x758   : > { %8939 = vst [vmem:[%s14643_s22 + $0x88] sm:$0xff] %v8907_v12  ;;  %v8514_v39 = vmax.f32 %v8482_v60, 0.0  ;;  %v8705_v34 = vadd.f32 %v12454_v8, %v8673_v20  ;;  %v12458_v60 = vunpack.c.l.bf16 %v12774_v16  ;;  %v8878_v16 = vld [vmem:[%s12891_s29 + $0xb0] sm:$0xff] }
 0x759   : > { %v8082_v55 = vpop.f32.mrf.mxu2 }
 0x75a   : > { %v8546_v19 = vmin.f32 %v8514_v39, 6.0  ;;  %v8132_v13 = vadd.f32 %v8082_v55, %v7818_v48  ;;  %v7461_v11 = vpop.f32.mrf.mxu0 }
 0x75b   : > { %v7507_v14 = vadd.f32 %v7461_v11, %v14573_v21  ;;  %v8876_v11 = vld [vmem:[%s12891_s29 + $0xa0] sm:$0xff] }
 0x75c   : > { %v8610_v1 = vpack.c.bf16 %v8546_v19, %v8546_v19  ;;  %v8446_v26 = vadd.f32 %v8396_v41, %v8132_v13  ;;  %v8398_v29 = vpop.f32.mrf.mxu3 }
 0x75d   : > { %v7821_v13 = vadd.f32 %v7775_v28, %v7507_v14 }
 0x75e   : > { %v8674_v27 = vunpack.c.l.bf16 %v8610_v1  ;;  %v8483_v23 = vadd.f32 %v14613_v7, %v8446_v26  ;;  %v7780_v21 = vpop.f32.mrf.mxu1  ;;  %v8877_v1 = vld [vmem:[%s12891_s29 + $0xa8] sm:$0xff] }
 0x760   : > { %v8706_v33 = vadd.f32 %v12455_v52, %v8674_v27  ;;  %v8515_v18 = vmax.f32 %v8483_v23, 0.0 }
 0x761   : > { %v8084_v35 = vpop.f32.mrf.mxu2 }
 0x762   : > { %v12528_v62 = vpack.c.bf16 %v8706_v33, %v8705_v34  ;;  %v8133_v9 = vadd.f32 %v8084_v35, %v7819_v53  ;;  %v7464_v61 = vpop.f32.mrf.mxu0  ;;  %v8547_v24 = vmin.f32 %v8515_v18, 6.0 }
 0x763   : > { %v7508_v26 = vadd.f32 %v7464_v61, %v14577_v36 }
 0x764   : > { %12788 = vst [vmem:[#allocation3 + $0x20] sm:$0xff] %v12528_v62   ;;  %v12598_v30 = vunpack.c.l.bf16 %v12528_v62  ;;  %v12599_v56 = vunpack.c.h.bf16 %v12528_v62  ;;  %v8447_v25 = vadd.f32 %v8398_v29, %v8133_v9  ;;  %v8401_v17 = vpop.f32.mrf.mxu3  ;;  %v8611_v54 = vpack.c.bf16 %v8547_v24, %v8547_v24 }
 0x765   : > { %v7822_v36 = vadd.f32 %v7778_v50, %v7508_v26 }
 0x766   : > { %v8908_v15 = vsel %vm14631_vm4, %v12598_v30, %v8874_v46  ;;  %v8909_v10 = vsel %vm14631_vm4, %v12599_v56, %v8875_v31  ;;  %v8484_v51 = vadd.f32 %v14613_v7, %v8447_v25  ;;  %v8675_v2 = vunpack.c.l.bf16 %v8611_v54  ;;  %v12775_v31 = vld [vmem:[#allocation3 + $0x38] sm:$0xff]   ;;  %v7783_v24 = vpop.f32.mrf.mxu1 }
 0x767   : > { %8940 = vst [vmem:[%s14643_s22 + $0x90] sm:$0xff] %v8908_v15 }
 0x768   : > { %8941 = vst [vmem:[%s14643_s22 + $0x98] sm:$0xff] %v8909_v10  ;;  %v8516_v40 = vmax.f32 %v8484_v51, 0.0  ;;  %v8707_v6 = vadd.f32 %v12458_v60, %v8675_v2  ;;  %v14812_v10 = vld [vmem:[%s14875_s4 + $0x1] ss:$0 sm:$0xff]  ;;  %v8879_v2 = vld [vmem:[%s12891_s29 + $0xb8] sm:$0xff] }
 0x769   : > { %v8087_v43 = vpop.f32.mrf.mxu2 }
 0x76a   : > { %v8548_v32 = vmin.f32 %v8516_v40, 6.0  ;;  %v8134_v42 = vadd.f32 %v8087_v43, %v7820_v3  ;;  %v7466_v45 = vpop.f32.mrf.mxu0 }
 0x76b   : > { %v7509_v61 = vadd.f32 %v7466_v45, %v14581_v38 }
 0x76c   : > { %v8612_v58 = vpack.c.bf16 %v8548_v32, %v8548_v32  ;;  %v8448_v41 = vadd.f32 %v8401_v17, %v8134_v42  ;;  %v8403_v12 = vpop.f32.mrf.mxu3  ;;  %v12463_v17 = vunpack.c.h.bf16 %v12775_v31 }
 0x76d   : > { %v7823_v50 = vadd.f32 %v7780_v21, %v7509_v61  ;;  %v12776_v21 = vld [vmem:[#allocation3 + $0x60] sm:$0xff]  }
 0x76e   : > { %v8676_v39 = vunpack.c.l.bf16 %v8612_v58  ;;  %v8485_v48 = vadd.f32 %v14613_v7, %v8448_v41 }
 0x770   : > { %v8708_v55 = vadd.f32 %v12459_v57, %v8676_v39  ;;  %v8517_v19 = vmax.f32 %v8485_v48, 0.0 }
 0x771   : > { %v8089_v47 = vpop.f32.mrf.mxu2 }
 0x772   : > { %v12533_v20 = vpack.c.bf16 %v8708_v55, %v8707_v6  ;;  %v8135_v59 = vadd.f32 %v8089_v47, %v7821_v13  ;;  %v8549_v52 = vmin.f32 %v8517_v19, 6.0  ;;  %v7469_v18 = vpop.f32.mrf.mxu0  ;;  %v7785_v6 = vpop.f32.mrf.mxu1 }
 0x773   : > { %v7510_v14 = vadd.f32 %v7469_v18, %v14585_v5 }
 0x774   : > { %12789 = vst [vmem:[#allocation3 + $0x10] sm:$0xff] %v12533_v20   ;;  %v12602_v29 = vunpack.c.l.bf16 %v12533_v20  ;;  %v12603_v8 = vunpack.c.h.bf16 %v12533_v20  ;;  %v8449_v27 = vadd.f32 %v8403_v12, %v8135_v59  ;;  %v8406_v23 = vpop.f32.mrf.mxu3  ;;  %v8613_v53 = vpack.c.bf16 %v8549_v52, %v8549_v52 }
 0x775   : > { %v7824_v5 = vadd.f32 %v7783_v24, %v7510_v14  ;;  %v12466_v52 = vunpack.c.l.bf16 %v12776_v21 }
 0x776   : > { %v8910_v34 = vsel %vm14631_vm4, %v12602_v29, %v8876_v11  ;;  %v8911_v28 = vsel %vm14631_vm4, %v12603_v8, %v8877_v1  ;;  %v8486_v33 = vadd.f32 %v14613_v7, %v8449_v27  ;;  %v8677_v22 = vunpack.c.l.bf16 %v8613_v53 }
 0x777   : > { %8942 = vst [vmem:[%s14643_s22 + $0xa0] sm:$0xff] %v8910_v34  ;;  %v12462_v7 = vunpack.c.l.bf16 %v12775_v31  ;;  %v12467_v27 = vunpack.c.h.bf16 %v12776_v21 }
 0x778   : > { %8943 = vst [vmem:[%s14643_s22 + $0xa8] sm:$0xff] %v8911_v28  ;;  %v8518_v35 = vmax.f32 %v8486_v33, 0.0 }
 0x779   : > { %v8092_v62 = vpop.f32.mrf.mxu2  ;;  %v8709_v54 = vadd.f32 %v12462_v7, %v8677_v22 }
 0x77a   : > { %v8550_v9 = vmin.f32 %v8518_v35, 6.0  ;;  %v8136_v46 = vadd.f32 %v8092_v62, %v7822_v36  ;;  %v7471_v38 = vpop.f32.mrf.mxu0  ;;  %v7788_v35 = vpop.f32.mrf.mxu1 }
 0x77b   : > { %v7511_v1 = vadd.f32 %v7471_v38, %v14589_v37 }
 0x77c   : > { %v8614_v30 = vpack.c.bf16 %v8550_v9, %v8550_v9  ;;  %v8450_v56 = vadd.f32 %v8406_v23, %v8136_v46  ;;  %v8408_v25 = vpop.f32.mrf.mxu3  ;;  %v8880_v9 = vld [vmem:[%s12891_s29 + $0xc0] sm:$0xff]  ;;  %v8881_v46 = vld [vmem:[%s12891_s29 + $0xc8] sm:$0xff] }
 0x77d   : > { %v7825_v53 = vadd.f32 %v7785_v6, %v7511_v1 }
 0x77e   : > { %v8678_v15 = vunpack.c.l.bf16 %v8614_v30  ;;  %v8487_v51 = vadd.f32 %v14812_v10, %v8450_v56 }
 0x780   : > { %v8710_v40 = vadd.f32 %v12463_v17, %v8678_v15  ;;  %v8519_v3 = vmax.f32 %v8487_v51, 0.0 }
 0x781   : > { %v8094_v43 = vpop.f32.mrf.mxu2 }
 0x782   : > { %v12538_v32 = vpack.c.bf16 %v8710_v40, %v8709_v54  ;;  %v8137_v42 = vadd.f32 %v8094_v43, %v7823_v50  ;;  %v8551_v45 = vmin.f32 %v8519_v3, 6.0  ;;  %v7474_v20 = vpop.f32.mrf.mxu0  ;;  %v7790_v50 = vpop.f32.mrf.mxu1  ;;  %v12777_v43 = vld [vmem:[#allocation3 + $0x70] sm:$0xff]  }
 0x783   : > { %v7512_v31 = vadd.f32 %v7474_v20, %v14593_v49  ;;  %v12470_v14 = vunpack.c.l.bf16 %v12777_v43 }
 0x784   : > { %12790 = vst [vmem:[#allocation3 + $0x38] sm:$0xff] %v12538_v32   ;;  %v12606_v58 = vunpack.c.l.bf16 %v12538_v32  ;;  %v12607_v41 = vunpack.c.h.bf16 %v12538_v32  ;;  %v8451_v12 = vadd.f32 %v8408_v25, %v8137_v42  ;;  %v8411_v60 = vpop.f32.mrf.mxu3  ;;  %v8615_v55 = vpack.c.bf16 %v8551_v45, %v8551_v45 }
 0x785   : > { %v7826_v49 = vadd.f32 %v7788_v35, %v7512_v31 }
 0x786   : > { %v8912_v57 = vsel %vm14631_vm4, %v12606_v58, %v8878_v16  ;;  %v8913_v39 = vsel %vm14631_vm4, %v12607_v41, %v8879_v2  ;;  %v8488_v48 = vadd.f32 %v14812_v10, %v8451_v12  ;;  %v8679_v11 = vunpack.c.l.bf16 %v8615_v55 }
 0x787   : > { %8944 = vst [vmem:[%s14643_s22 + $0xb0] sm:$0xff] %v8912_v57  ;;  %v12471_v58 = vunpack.c.h.bf16 %v12777_v43 }
 0x788   : > { %8945 = vst [vmem:[%s14643_s22 + $0xb8] sm:$0xff] %v8913_v39  ;;  %v8520_v19 = vmax.f32 %v8488_v48, 0.0  ;;  %v8711_v28 = vadd.f32 %v12466_v52, %v8679_v11 }
 0x789   : > { %v8097_v13 = vpop.f32.mrf.mxu2 }
 0x78a   : > { %v8552_v47 = vmin.f32 %v8520_v19, 6.0  ;;  %v8138_v59 = vadd.f32 %v8097_v13, %v7824_v5  ;;  %v7476_v56 = vpop.f32.mrf.mxu0  ;;  %v8882_v5 = vld [vmem:[%s12891_s29 + $0xd0] sm:$0xff]  ;;  %v8883_v13 = vld [vmem:[%s12891_s29 + $0xd8] sm:$0xff]  ;;  %v7793_v20 = vpop.f32.mrf.mxu1 }
 0x78b   : > { %v7513_v42 = vadd.f32 %v7476_v56, %v14597_v4 }
 0x78c   : > { %v8616_v26 = vpack.c.bf16 %v8552_v47, %v8552_v47  ;;  %v8452_v29 = vadd.f32 %v8411_v60, %v8138_v59  ;;  %v8413_v8 = vpop.f32.mrf.mxu3 }
 0x78d   : > { %v7827_v6 = vadd.f32 %v7790_v50, %v7513_v42 }
 0x78e   : > { %v8680_v23 = vunpack.c.l.bf16 %v8616_v26  ;;  %v8489_v34 = vadd.f32 %v14812_v10, %v8452_v29 }
 0x790   : > { %v8712_v33 = vadd.f32 %v12467_v27, %v8680_v23  ;;  %v8521_v18 = vmax.f32 %v8489_v34, 0.0 }
 0x791   : > { %v8099_v36 = vpop.f32.mrf.mxu2 }
 0x792   : > { %v12543_v62 = vpack.c.bf16 %v8712_v33, %v8711_v28  ;;  %v8139_v37 = vadd.f32 %v8099_v36, %v7825_v53  ;;  %v8553_v30 = vmin.f32 %v8521_v18, 6.0  ;;  %v7479_v45 = vpop.f32.mrf.mxu0  ;;  %v12778_v53 = vld [vmem:[#allocation3 + $0x78] sm:$0xff]  }
 0x793   : > { %v7514_v47 = vadd.f32 %v7479_v45, %v14601_v44  ;;  %v12475_v31 = vunpack.c.h.bf16 %v12778_v53 }
 0x794   : > { %12791 = vst [vmem:[#allocation3 + $0x60] sm:$0xff] %v12543_v62   ;;  %v12610_v22 = vunpack.c.l.bf16 %v12543_v62  ;;  %v12611_v61 = vunpack.c.h.bf16 %v12543_v62  ;;  %v8453_v24 = vadd.f32 %v8413_v8, %v8139_v37  ;;  %v8416_v25 = vpop.f32.mrf.mxu3  ;;  %v8617_v51 = vpack.c.bf16 %v8553_v30, %v8553_v30 }
 0x795   : > { %v7828_v52 = vadd.f32 %v7793_v20, %v7514_v47 }
 0x796   : > { %v8914_v7 = vsel %vm14631_vm4, %v12610_v22, %v8880_v9  ;;  %v8915_v17 = vsel %vm14631_vm4, %v12611_v61, %v8881_v46  ;;  %v8490_v15 = vadd.f32 %v14812_v10, %v8453_v24  ;;  %v8681_v32 = vunpack.c.l.bf16 %v8617_v51  ;;  %v7795_v9 = vpop.f32.mrf.mxu1  ;;  %v8884_v51 = vld [vmem:[%s12891_s29 + $0xe0] sm:$0xff] }
 0x797   : > { %8946 = vst [vmem:[%s14643_s22 + $0xc0] sm:$0xff] %v8914_v7  ;;  %v12474_v46 = vunpack.c.l.bf16 %v12778_v53 }
 0x798   : > { %8947 = vst [vmem:[%s14643_s22 + $0xc8] sm:$0xff] %v8915_v17  ;;  %v8522_v54 = vmax.f32 %v8490_v15, 0.0  ;;  %v8713_v57 = vadd.f32 %v12470_v14, %v8681_v32  ;;  %v12779_v14 = vld [vmem:[#allocation3 + $0x28] sm:$0xff]  }
 0x799   : > { %v8102_v40 = vpop.f32.mrf.mxu2  ;;  %v12478_v45 = vunpack.c.l.bf16 %v12779_v14 }
 0x79a   : > { %v8554_v3 = vmin.f32 %v8522_v54, 6.0  ;;  %v8140_v38 = vadd.f32 %v8102_v40, %v7826_v49  ;;  %v7481_v23 = vpop.f32.mrf.mxu0 }
 0x79b   : > { %v7515_v36 = vadd.f32 %v7481_v23, %v14607_v63  ;;  %v8885_v63 = vld [vmem:[%s12891_s29 + $0xe8] sm:$0xff] }
 0x79c   : > { %v8618_v16 = vpack.c.bf16 %v8554_v3, %v8554_v3  ;;  %v8454_v2 = vadd.f32 %v8416_v25, %v8140_v38  ;;  %v8418_v60 = vpop.f32.mrf.mxu3 }
 0x79d   : > { %v7829_v56 = vadd.f32 %v7795_v9, %v7515_v36 }
 0x79e   : > { %v8682_v41 = vunpack.c.l.bf16 %v8618_v16  ;;  %v8491_v12 = vadd.f32 %v14812_v10, %v8454_v2 }
 0x7a0   : > { %v8714_v39 = vadd.f32 %v12471_v58, %v8682_v41  ;;  %v8523_v48 = vmax.f32 %v8491_v12, 0.0  ;;  %v12479_v12 = vunpack.c.h.bf16 %v12779_v14 }
 0x7a1   : > { %v8104_v55 = vpop.f32.mrf.mxu2 }
 0x7a2   : > { %v12548_v19 = vpack.c.bf16 %v8714_v39, %v8713_v57  ;;  %v8141_v4 = vadd.f32 %v8104_v55, %v7827_v6  ;;  %v8555_v11 = vmin.f32 %v8523_v48, 6.0  ;;  %v8886_v6 = vld [vmem:[%s12891_s29 + $0xf0] sm:$0xff]  ;;  %v8887_v55 = vld [vmem:[%s12891_s29 + $0xf8] sm:$0xff] }
 0x7a4   : > { %12792 = vst [vmem:[#allocation3 + $0x70] sm:$0xff] %v12548_v19   ;;  %v12614_v59 = vunpack.c.l.bf16 %v12548_v19  ;;  %v12615_v21 = vunpack.c.h.bf16 %v12548_v19  ;;  %v8455_v1 = vadd.f32 %v8418_v60, %v8141_v4  ;;  %v8619_v27 = vpack.c.bf16 %v8555_v11, %v8555_v11  ;;  %v8421_v34 = vpop.f32.mrf.mxu3 }
 0x7a6   : > { %v8916_v26 = vsel %vm14631_vm4, %v12614_v59, %v8882_v5  ;;  %v8917_v29 = vsel %vm14631_vm4, %v12615_v21, %v8883_v13  ;;  %v8492_v8 = vadd.f32 %v14812_v10, %v8455_v1  ;;  %v8683_v35 = vunpack.c.l.bf16 %v8619_v27 }
 0x7a7   : > { %8948 = vst [vmem:[%s14643_s22 + $0xd0] sm:$0xff] %v8916_v26 }
 0x7a8   : > { %8949 = vst [vmem:[%s14643_s22 + $0xd8] sm:$0xff] %v8917_v29  ;;  %v8524_v44 = vmax.f32 %v8492_v8, 0.0  ;;  %v8715_v30 = vadd.f32 %v12474_v46, %v8683_v35 }
 0x7a9   : > { %v8107_v28 = vpop.f32.mrf.mxu2 }
 0x7aa   : > { %v8556_v33 = vmin.f32 %v8524_v44, 6.0  ;;  %v8142_v18 = vadd.f32 %v8107_v28, %v7828_v52 }
 0x7ac   : > { %v8620_v62 = vpack.c.bf16 %v8556_v33, %v8556_v33  ;;  %v8456_v37 = vadd.f32 %v8421_v34, %v8142_v18  ;;  %v8423_v54 = vpop.f32.mrf.mxu3 }
 0x7ae   : > { %v8684_v22 = vunpack.c.l.bf16 %v8620_v62  ;;  %v8493_v61 = vadd.f32 %v14812_v10, %v8456_v37 }
 0x7b0   : > { %v8716_v24 = vadd.f32 %v12475_v31, %v8684_v22  ;;  %v8525_v25 = vmax.f32 %v8493_v61, 0.0 }
 0x7b1   : > { %v8109_v7 = vpop.f32.mrf.mxu2 }
 0x7b2   : > { %v12553_v17 = vpack.c.bf16 %v8716_v24, %v8715_v30  ;;  %v8143_v15 = vadd.f32 %v8109_v7, %v7829_v56  ;;  %v8557_v3 = vmin.f32 %v8525_v25, 6.0 }
 0x7b4   : > { %12793 = vst [vmem:[#allocation3 + $0x78] sm:$0xff] %v12553_v17   ;;  %v12618_v49 = vunpack.c.l.bf16 %v12553_v17  ;;  %v12619_v40 = vunpack.c.h.bf16 %v12553_v17  ;;  %v8457_v38 = vadd.f32 %v8423_v54, %v8143_v15  ;;  %v8621_v42 = vpack.c.bf16 %v8557_v3, %v8557_v3 }
 0x7b6   : > { %v8918_v50 = vsel %vm14631_vm4, %v12618_v49, %v8884_v51  ;;  %v8919_v43 = vsel %vm14631_vm4, %v12619_v40, %v8885_v63  ;;  %v8494_v32 = vadd.f32 %v14812_v10, %v8457_v38  ;;  %v8685_v58 = vunpack.c.l.bf16 %v8621_v42 }
 0x7b7   : > { %8950 = vst [vmem:[%s14643_s22 + $0xe0] sm:$0xff] %v8918_v50 }
 0x7b8   : > { %8951 = vst [vmem:[%s14643_s22 + $0xe8] sm:$0xff] %v8919_v43  ;;  %v8526_v16 = vmax.f32 %v8494_v32, 0.0  ;;  %v8717_v57 = vadd.f32 %v12478_v45, %v8685_v58 }
 0x7ba   : > { %v8558_v2 = vmin.f32 %v8526_v16, 6.0 }
 0x7bc   : > { %v8622_v41 = vpack.c.bf16 %v8558_v2, %v8558_v2 }
 0x7be   : > { %v8686_v60 = vunpack.c.l.bf16 %v8622_v41 }
 0x7c0   : > { %v8718_v39 = vadd.f32 %v12479_v12, %v8686_v60 }
 0x7c2   : > { %v12558_v48 = vpack.c.bf16 %v8718_v39, %v8717_v57 }
 0x7c4   : > { %12794 = vst [vmem:[#allocation3 + $0x28] sm:$0xff] %v12558_v48   ;;  %v12622_v10 = vunpack.c.l.bf16 %v12558_v48  ;;  %v12623_v19 = vunpack.c.h.bf16 %v12558_v48 }
 0x7c6   : > { %v8920_v4 = vsel %vm14631_vm4, %v12622_v10, %v8886_v6  ;;  %v8921_v5 = vsel %vm14631_vm4, %v12623_v19, %v8887_v55 }
 0x7c7   : > { %8952 = vst [vmem:[%s14643_s22 + $0xf0] sm:$0xff] %v8920_v4 }
 0x7c8   : > { %8953 = vst [vmem:[%s14643_s22 + $0xf8] sm:$0xff] %v8921_v5 }
 0x7c9 PF: > { %s15_s18 = sadd.s32 1, %s12833_s18  }
 0x7ca   : > { %p12_p4 = scmp.ge.s32.totalorder %s15_s18, 4  }
 0x7cc   :  { %14 = sbr.rel (!%p12_p4) target bundleno = 1 (0x1), region = 92 }

</bundles_post_ra>
